<compile_context>
chip_gen: v7x
topology: tpu7x:2x2x1
jax: 0.10.0
libtpu: 0.0.40
codegen_flags: <defaults>
</compile_context>

<pallas_src>
import functools

import jax
import jax.numpy as jnp
from jax import lax
from jax.experimental import pallas as pl
from jax.experimental.pallas import tpu as pltpu

SOS_token = 1
NEG_INF = -1e30
VMEM_LIMIT_BYTES = 64 * 1024 * 1024   # <= physical VMEM on v5e/v6e/v7x


def _round_up(x, m):
    return (x + m - 1) // m * m


def _vmem():
    return pl.BlockSpec(memory_space=pltpu.MemorySpace.VMEM)


def _smem():
    return pl.BlockSpec(memory_space=pltpu.MemorySpace.SMEM)


# ------------------------- parameter preparation (host/wrapper) -------------------------
def prepare_params(p):
    """PyTorch-layout params -> fused-gate, transposed, padded, bf16-weight layout."""
    V, H = p["embedding"].shape
    Hp = _round_up(H, 128)
    Vp = _round_up(V, 128)
    Vr = _round_up(V, 8)

    def pad2(a, rows, cols, value=0.0, dtype=jnp.float32):
        r, c = a.shape
        out = jnp.pad(a, ((0, rows - r), (0, cols - c)), constant_values=value)
        return out.astype(dtype)

    def fuse_w(w):   # (3, Hout, Hin), gate order (r, z, n) -> (Hp, 3*Hp) bf16 for x @ W
        return jnp.concatenate(
            [pad2(w[g].T, Hp, Hp, dtype=jnp.bfloat16) for g in range(3)], axis=1)

    def fuse_b(b):   # (3, 1, H) -> (1, 3*Hp) f32
        return jnp.concatenate([pad2(b[g], 1, Hp) for g in range(3)], axis=1)

    # merged concat weight: rows [0:Hp) act on h_new, rows [Hp:2Hp) act on context
    wc = jnp.concatenate(
        [pad2(p["w_concat"][:, :H].T, Hp, Hp, dtype=jnp.bfloat16),
         pad2(p["w_concat"][:, H:].T, Hp, Hp, dtype=jnp.bfloat16)], axis=0)   # (2Hp, Hp)

    return {
        # embedding stays f32: dynamic single-row gather source (see header TODO)
        "emb": pad2(p["embedding"], Vr, Hp),
        "enc_wih_f": fuse_w(p["enc_wih_f"]), "enc_whh_f": fuse_w(p["enc_whh_f"]),
        "enc_bih_f": fuse_b(p["enc_bih_f"]), "enc_bhh_f": fuse_b(p["enc_bhh_f"]),
        "enc_wih_b": fuse_w(p["enc_wih_b"]), "enc_whh_b": fuse_w(p["enc_whh_b"]),
        "enc_bih_b": fuse_b(p["enc_bih_b"]), "enc_bhh_b": fuse_b(p["enc_bhh_b"]),
        "dec_wih": fuse_w(p["dec_wih"]), "dec_whh": fuse_w(p["dec_whh"]),
        "dec_bih": fuse_b(p["dec_bih"]), "dec_bhh": fuse_b(p["dec_bhh"]),
        "wc": wc,
        "bc": pad2(p["b_concat"], 1, Hp),
        "wo": pad2(p["w_out"].T, Hp, Vp, dtype=jnp.bfloat16),
        "bo": pad2(p["b_out"], 1, Vp, value=NEG_INF),  # padded vocab can never win
    }


# ------------------------- encoder kernel -------------------------
def encoder_kernel(seq_ref, emb_ref, wihf_ref, whhf_ref, bihf_ref, bhhf_ref,
                   wihb_ref, whhb_ref, bihb_ref, bhhb_ref,
                   out_ref, hfin_ref, x_scr, xpf_scr, xpb_scr, bwd_scr):
    S, Hp = out_ref.shape

    # in-kernel embedding gather (input_seq lives in SMEM, table in VMEM, f32)
    for t in range(S):
        x_scr[pl.ds(t, 1), :] = emb_ref[pl.ds(seq_ref[t], 1), :]

    # hoisted input-side projections for the whole sequence (one bf16 matmul per direction)
    xb = x_scr[...].astype(jnp.bfloat16)
    xpf_scr[...] = jnp.dot(xb, wihf_ref[...],
                           preferred_element_type=jnp.float32) + bihf_ref[...]
    xpb_scr[...] = jnp.dot(xb, wihb_ref[...],
                           preferred_element_type=jnp.float32) + bihb_ref[...]

    h0 = jnp.zeros((1, Hp), jnp.float32)

    def step(t, carry):
        hf, hb = carry

        # forward direction, time t
        hpf = jnp.dot(hf.astype(jnp.bfloat16), whhf_ref[...],
                      preferred_element_type=jnp.float32) + bhhf_ref[...]
        xpf = xpf_scr[pl.ds(t, 1), :]
        rf = jax.nn.sigmoid(xpf[:, :Hp] + hpf[:, :Hp])
        zf = jax.nn.sigmoid(xpf[:, Hp:2 * Hp] + hpf[:, Hp:2 * Hp])
        nf = jnp.tanh(xpf[:, 2 * Hp:] + rf * hpf[:, 2 * Hp:])
        hf_new = (1.0 - zf) * nf + zf * hf
        out_ref[pl.ds(t, 1), :] = hf_new

        # backward direction, time S-1-t (independent of fwd -> overlaps on the MXU)
        tb = S - 1 - t
        hpb = jnp.dot(hb.astype(jnp.bfloat16), whhb_ref[...],
                      preferred_element_type=jnp.float32) + bhhb_ref[...]
        xpb = xpb_scr[pl.ds(tb, 1), :]
        rb = jax.nn.sigmoid(xpb[:, :Hp] + hpb[:, :Hp])
        zb = jax.nn.sigmoid(xpb[:, Hp:2 * Hp] + hpb[:, Hp:2 * Hp])
        nb = jnp.tanh(xpb[:, 2 * Hp:] + rb * hpb[:, 2 * Hp:])
        hb_new = (1.0 - zb) * nb + zb * hb
        bwd_scr[pl.ds(tb, 1), :] = hb_new

        return hf_new, hb_new

    hf_fin, _ = lax.fori_loop(0, S, step, (h0, h0), unroll=True)
    hfin_ref[...] = hf_fin                       # encoder_hidden[:n_layers], n_layers=1
    out_ref[...] = out_ref[...] + bwd_scr[...]   # bidirectional sum (fwd + bwd)


def run_encoder(input_seq, dp):
    S = input_seq.shape[0]
    Hp = dp["enc_whh_f"].shape[0]
    G = dp["enc_wih_f"].shape[1]   # 3*Hp
    args = (input_seq, dp["emb"],
            dp["enc_wih_f"], dp["enc_whh_f"], dp["enc_bih_f"], dp["enc_bhh_f"],
            dp["enc_wih_b"], dp["enc_whh_b"], dp["enc_bih_b"], dp["enc_bhh_b"])
    fn = pl.pallas_call(
        encoder_kernel,
        out_shape=(jax.ShapeDtypeStruct((S, Hp), jnp.float32),
                   jax.ShapeDtypeStruct((1, Hp), jnp.float32)),
        in_specs=[_smem()] + [_vmem() for _ in range(len(args) - 1)],
        out_specs=(_vmem(), _vmem()),
        scratch_shapes=[pltpu.VMEM((S, Hp), jnp.float32),   # gathered embeddings
                        pltpu.VMEM((S, G), jnp.float32),    # fwd input projection
                        pltpu.VMEM((S, G), jnp.float32),    # bwd input projection
                        pltpu.VMEM((S, Hp), jnp.float32)],  # bwd outputs
        compiler_params=pltpu.CompilerParams(vmem_limit_bytes=VMEM_LIMIT_BYTES),
    )
    return fn(*args)


# ------------------------- fused greedy-decode kernel -------------------------
def decode_kernel(emb_ref, h0_ref, enc_ref, enct_ref, wih_ref, whh_ref,
                  bih_ref, bhh_ref, wc_ref, bc_ref, wo_ref, bo_ref,
                  tok_ref, score_ref, hc_scr):
    Hp = h0_ref.shape[1]
    Vp = wo_ref.shape[1]
    max_len = tok_ref.shape[0]

    # vocab chunking (<=512 lanes per chunk; Vp is a multiple of 128)
    vc = Vp
    for cand in (512, 384, 256, 128):
        if Vp % cand == 0:
            vc = cand
            break
    n_chunks = Vp // vc

    # hoisted once: per-chunk lane index iota (JAX does not CSE broadcast_in_dim)
    iota_c = lax.broadcasted_iota(jnp.int32, (1, vc), 1)

    def step(t, carry):
        h, tok = carry

        # in-kernel embedding gather of the previously emitted token (f32 row -> bf16)
        x = emb_ref[pl.ds(tok, 1), :].astype(jnp.bfloat16)                   # (1, Hp)

        # fused-gate GRU cell: bf16 matmuls, f32 accumulation + gate math
        xp = jnp.dot(x, wih_ref[...], preferred_element_type=jnp.float32) + bih_ref[...]
        hp = jnp.dot(h.astype(jnp.bfloat16), whh_ref[...],
                     preferred_element_type=jnp.float32) + bhh_ref[...]
        r = jax.nn.sigmoid(xp[:, :Hp] + hp[:, :Hp])
        z = jax.nn.sigmoid(xp[:, Hp:2 * Hp] + hp[:, Hp:2 * Hp])
        n = jnp.tanh(xp[:, 2 * Hp:] + r * hp[:, 2 * Hp:])
        h_new = (1.0 - z) * n + z * h

        # Luong "dot" attention with pre-transposed (Hp,S) encoder outputs
        energies = jnp.dot(h_new.astype(jnp.bfloat16), enct_ref[...],
                           preferred_element_type=jnp.float32)               # (1, S)
        energies = energies - jnp.max(energies, axis=1, keepdims=True)
        e = jnp.exp(energies)
        attn = e * pl.reciprocal(jnp.sum(e, axis=1, keepdims=True), approx=True)
        context = jnp.dot(attn, enc_ref[...],
                          preferred_element_type=jnp.float32)                # (1, Hp)

        # concat -> tanh(Linear): 128-aligned lane halves + one K=2Hp matmul
        hc_scr[:, :Hp] = h_new
        hc_scr[:, Hp:] = context
        concat_out = jnp.tanh(
            jnp.dot(hc_scr[...].astype(jnp.bfloat16), wc_ref[...],
                    preferred_element_type=jnp.float32) + bc_ref[...])
        co = concat_out.astype(jnp.bfloat16)

        # chunked output projection + online (max, first-argmax, rescaled exp-sum)
        best_m = jnp.full((1, 1), -jnp.inf, jnp.float32)
        best_i = jnp.zeros((1, 1), jnp.int32)
        denom = jnp.zeros((1, 1), jnp.float32)
        for c in range(n_chunks):
            off = c * vc
            lc = jnp.dot(co, wo_ref[:, off:off + vc],
                         preferred_element_type=jnp.float32) + bo_ref[:, off:off + vc]
            m_c = jnp.max(lc, axis=1, keepdims=True)                         # (1, 1)
            i_c = jnp.min(jnp.where(lc == m_c, iota_c + off, Vp),
                          axis=1, keepdims=True)                             # first max in chunk
            m_new = jnp.maximum(best_m, m_c)
            denom = denom * jnp.exp(best_m - m_new) \
                + jnp.sum(jnp.exp(lc - m_new), axis=1, keepdims=True)
            best_i = jnp.where(m_c > best_m, i_c, best_i)                    # first max across chunks
            best_m = m_new

        # argmax(softmax(logits)) == argmax(logits); score = 1 / sum(exp(logits - max))
        tok_new = jnp.max(best_i)
        tok_ref[t] = tok_new
        score_ref[t] = jnp.max(1.0 / denom)    # exact divide (one scalar per step)
        return h_new, tok_new

    lax.fori_loop(0, max_len, step,
                  (h0_ref[...], jnp.array(SOS_token, jnp.int32)),
                  unroll=True)


def run_decode(h0, enc_out, dp, max_length):
    S, Hp = enc_out.shape
    Vp = dp["wo"].shape[1]
    enc_t = enc_out.T.astype(jnp.bfloat16)       # transposed once, not per decode step

    args = (dp["emb"], h0, enc_out, enc_t,
            dp["dec_wih"], dp["dec_whh"], dp["dec_bih"], dp["dec_bhh"],
            dp["wc"], dp["bc"], dp["wo"], dp["bo"])

    flops_per_step = (2 * Hp * 3 * Hp) * 2 + (2 * Hp * S) * 2 + 2 * (2 * Hp) * Hp + 2 * Hp * Vp
    trans_per_step = 3 * Hp + S + Vp
    bytes_accessed = sum(int(a.size) * a.dtype.itemsize for a in args) + max_length * 8
    cost = pl.CostEstimate(flops=int(max_length * flops_per_step),
                           transcendentals=int(max_length * trans_per_step),
                           bytes_accessed=int(bytes_accessed))

    fn = pl.pallas_call(
        decode_kernel,
        out_shape=(jax.ShapeDtypeStruct((max_length,), jnp.int32),
                   jax.ShapeDtypeStruct((max_length,), jnp.float32)),
        in_specs=[_vmem() for _ in range(len(args))],
        out_specs=(_smem(), _smem()),
        scratch_shapes=[pltpu.VMEM((1, 2 * Hp), jnp.float32)],   # [h_new | context]
        compiler_params=pltpu.CompilerParams(vmem_limit_bytes=VMEM_LIMIT_BYTES),
        cost_estimate=cost,
    )
    return fn(*args)


# ------------------------- GreedySearchDecoder.forward -------------------------
@functools.partial(jax.jit, static_argnums=(1, 2))
def greedy_search_decode(input_seq, input_length, max_length, dev_params):
    # TODO(synk): nn.utils.rnn.pack_padded_sequence / variable input_length not
    # modeled; assumes a single full-length (batch=1) sequence.
    del input_length
    encoder_outputs, encoder_hidden_fwd = run_encoder(input_seq, dev_params)
    all_tokens, all_scores = run_decode(encoder_hidden_fwd, encoder_outputs,
                                        dev_params, max_length)
    return all_tokens, all_scores


if __name__ == "__main__":
    S, H, V = 8, 32, 64          # seq len, hidden size, vocab size
    MAX_LENGTH = 6

    key = jax.random.PRNGKey(0)
    ks = jax.random.split(key, 18)

    def init(k, shape, scale=0.1):
        return (scale * jax.random.normal(k, shape)).astype(jnp.float32)

    params = {
        "embedding": init(ks[0], (V, H)),          # shared encoder/decoder embedding
        "enc_wih_f": init(ks[1], (3, H, H)), "enc_whh_f": init(ks[2], (3, H, H)),
        "enc_bih_f": init(ks[3], (3, 1, H)), "enc_bhh_f": init(ks[4], (3, 1, H)),
        "enc_wih_b": init(ks[5], (3, H, H)), "enc_whh_b": init(ks[6], (3, H, H)),
        "enc_bih_b": init(ks[7], (3, 1, H)), "enc_bhh_b": init(ks[8], (3, 1, H)),
        "dec_wih": init(ks[9], (3, H, H)),  "dec_whh": init(ks[10], (3, H, H)),
        "dec_bih": init(ks[11], (3, 1, H)), "dec_bhh": init(ks[12], (3, 1, H)),
        "w_concat": init(ks[13], (H, 2 * H)), "b_concat": init(ks[14], (1, H)),
        "w_out": init(ks[15], (V, H)),        "b_out": init(ks[16], (1, V)),
    }

    dev_params = prepare_params(params)            # one-time layout/pad/fuse/bf16 prep

    input_seq = jax.random.randint(ks[17], (S,), 0, V, dtype=jnp.int32)
    input_length = S

    all_tokens, all_scores = greedy_search_decode(input_seq, input_length,
                                                  MAX_LENGTH, dev_params)
    jax.block_until_ready((all_tokens, all_scores))
    assert all_tokens.shape == (MAX_LENGTH,) and all_scores.shape == (MAX_LENGTH,)
    assert bool(jnp.all(all_tokens >= 0)) and bool(jnp.all(all_tokens < V))
    assert bool(jnp.all(all_scores > 0.0)) and bool(jnp.all(all_scores <= 1.0))
    print("KERNEL_OK")
</pallas_src>

<mosaic_0001>
module attributes {stable_mosaic.version = 11 : i64} {
  func.func @encoder_kernel(%arg0: memref<8xi32, #tpu.memory_space<smem>>, %arg1: memref<64x128xf32, #tpu.memory_space<vmem>>, %arg2: memref<128x384xbf16, #tpu.memory_space<vmem>>, %arg3: memref<128x384xbf16, #tpu.memory_space<vmem>>, %arg4: memref<1x384xf32, #tpu.memory_space<vmem>>, %arg5: memref<1x384xf32, #tpu.memory_space<vmem>>, %arg6: memref<128x384xbf16, #tpu.memory_space<vmem>>, %arg7: memref<128x384xbf16, #tpu.memory_space<vmem>>, %arg8: memref<1x384xf32, #tpu.memory_space<vmem>>, %arg9: memref<1x384xf32, #tpu.memory_space<vmem>>, %arg10: memref<8x128xf32, #tpu.memory_space<vmem>>, %arg11: memref<1x128xf32, #tpu.memory_space<vmem>>, %arg12: memref<8x128xf32, #tpu.memory_space<vmem>>, %arg13: memref<8x384xf32, #tpu.memory_space<vmem>>, %arg14: memref<8x384xf32, #tpu.memory_space<vmem>>, %arg15: memref<8x128xf32, #tpu.memory_space<vmem>>) attributes {dimension_semantics = [], scalar_prefetch = 0 : i64, scratch_operands = 4 : i64, tpu.core_type = #tpu.core_type<tc>} {
    %c0 = arith.constant 0 : index
    %0 = memref.load %arg0[%c0] : memref<8xi32, #tpu.memory_space<smem>>
    %1 = arith.index_cast %0 : i32 to index
    %c0_0 = arith.constant 0 : index
    %2 = vector.load %arg1[%1, %c0_0] : memref<64x128xf32, #tpu.memory_space<vmem>>, vector<1x128xf32>
    %c0_1 = arith.constant 0 : index
    %c0_2 = arith.constant 0 : index
    %3 = vector.load %arg12[%c0_1, %c0_2] : memref<8x128xf32, #tpu.memory_space<vmem>>, vector<1x128xf32>
    tpu.vector_store %arg12[%c0_1, %c0_2], %2 {strides = array<i32>} : memref<8x128xf32, #tpu.memory_space<vmem>>, vector<1x128xf32>,
    %c1 = arith.constant 1 : index
    %4 = memref.load %arg0[%c1] : memref<8xi32, #tpu.memory_space<smem>>
    %5 = arith.index_cast %4 : i32 to index
    %c0_3 = arith.constant 0 : index
    %6 = vector.load %arg1[%5, %c0_3] : memref<64x128xf32, #tpu.memory_space<vmem>>, vector<1x128xf32>
    %c1_4 = arith.constant 1 : index
    %c0_5 = arith.constant 0 : index
    %7 = vector.load %arg12[%c1_4, %c0_5] : memref<8x128xf32, #tpu.memory_space<vmem>>, vector<1x128xf32>
    tpu.vector_store %arg12[%c1_4, %c0_5], %6 {strides = array<i32>} : memref<8x128xf32, #tpu.memory_space<vmem>>, vector<1x128xf32>,
    %c2 = arith.constant 2 : index
    %8 = memref.load %arg0[%c2] : memref<8xi32, #tpu.memory_space<smem>>
    %9 = arith.index_cast %8 : i32 to index
    %c0_6 = arith.constant 0 : index
    %10 = vector.load %arg1[%9, %c0_6] : memref<64x128xf32, #tpu.memory_space<vmem>>, vector<1x128xf32>
    %c2_7 = arith.constant 2 : index
    %c0_8 = arith.constant 0 : index
    %11 = vector.load %arg12[%c2_7, %c0_8] : memref<8x128xf32, #tpu.memory_space<vmem>>, vector<1x128xf32>
    tpu.vector_store %arg12[%c2_7, %c0_8], %10 {strides = array<i32>} : memref<8x128xf32, #tpu.memory_space<vmem>>, vector<1x128xf32>,
    %c3 = arith.constant 3 : index
    %12 = memref.load %arg0[%c3] : memref<8xi32, #tpu.memory_space<smem>>
    %13 = arith.index_cast %12 : i32 to index
    %c0_9 = arith.constant 0 : index
    %14 = vector.load %arg1[%13, %c0_9] : memref<64x128xf32, #tpu.memory_space<vmem>>, vector<1x128xf32>
    %c3_10 = arith.constant 3 : index
    %c0_11 = arith.constant 0 : index
    %15 = vector.load %arg12[%c3_10, %c0_11] : memref<8x128xf32, #tpu.memory_space<vmem>>, vector<1x128xf32>
    tpu.vector_store %arg12[%c3_10, %c0_11], %14 {strides = array<i32>} : memref<8x128xf32, #tpu.memory_space<vmem>>, vector<1x128xf32>,
    %c4 = arith.constant 4 : index
    %16 = memref.load %arg0[%c4] : memref<8xi32, #tpu.memory_space<smem>>
    %17 = arith.index_cast %16 : i32 to index
    %c0_12 = arith.constant 0 : index
    %18 = vector.load %arg1[%17, %c0_12] : memref<64x128xf32, #tpu.memory_space<vmem>>, vector<1x128xf32>
    %c4_13 = arith.constant 4 : index
    %c0_14 = arith.constant 0 : index
    %19 = vector.load %arg12[%c4_13, %c0_14] : memref<8x128xf32, #tpu.memory_space<vmem>>, vector<1x128xf32>
    tpu.vector_store %arg12[%c4_13, %c0_14], %18 {strides = array<i32>} : memref<8x128xf32, #tpu.memory_space<vmem>>, vector<1x128xf32>,
    %c5 = arith.constant 5 : index
    %20 = memref.load %arg0[%c5] : memref<8xi32, #tpu.memory_space<smem>>
    %21 = arith.index_cast %20 : i32 to index
    %c0_15 = arith.constant 0 : index
    %22 = vector.load %arg1[%21, %c0_15] : memref<64x128xf32, #tpu.memory_space<vmem>>, vector<1x128xf32>
    %c5_16 = arith.constant 5 : index
    %c0_17 = arith.constant 0 : index
    %23 = vector.load %arg12[%c5_16, %c0_17] : memref<8x128xf32, #tpu.memory_space<vmem>>, vector<1x128xf32>
    tpu.vector_store %arg12[%c5_16, %c0_17], %22 {strides = array<i32>} : memref<8x128xf32, #tpu.memory_space<vmem>>, vector<1x128xf32>,
    %c6 = arith.constant 6 : index
    %24 = memref.load %arg0[%c6] : memref<8xi32, #tpu.memory_space<smem>>
    %25 = arith.index_cast %24 : i32 to index
    %c0_18 = arith.constant 0 : index
    %26 = vector.load %arg1[%25, %c0_18] : memref<64x128xf32, #tpu.memory_space<vmem>>, vector<1x128xf32>
    %c6_19 = arith.constant 6 : index
    %c0_20 = arith.constant 0 : index
    %27 = vector.load %arg12[%c6_19, %c0_20] : memref<8x128xf32, #tpu.memory_space<vmem>>, vector<1x128xf32>
    tpu.vector_store %arg12[%c6_19, %c0_20], %26 {strides = array<i32>} : memref<8x128xf32, #tpu.memory_space<vmem>>, vector<1x128xf32>,
    %c7 = arith.constant 7 : index
    %28 = memref.load %arg0[%c7] : memref<8xi32, #tpu.memory_space<smem>>
    %29 = arith.index_cast %28 : i32 to index
    %c0_21 = arith.constant 0 : index
    %30 = vector.load %arg1[%29, %c0_21] : memref<64x128xf32, #tpu.memory_space<vmem>>, vector<1x128xf32>
    %c7_22 = arith.constant 7 : index
    %c0_23 = arith.constant 0 : index
    %31 = vector.load %arg12[%c7_22, %c0_23] : memref<8x128xf32, #tpu.memory_space<vmem>>, vector<1x128xf32>
    tpu.vector_store %arg12[%c7_22, %c0_23], %30 {strides = array<i32>} : memref<8x128xf32, #tpu.memory_space<vmem>>, vector<1x128xf32>,
    %c0_24 = arith.constant 0 : index
    %c0_25 = arith.constant 0 : index
    %32 = vector.load %arg12[%c0_24, %c0_25] : memref<8x128xf32, #tpu.memory_space<vmem>>, vector<8x128xf32>
    %33 = arith.truncf %32 : vector<8x128xf32> to vector<8x128xbf16>
    %c0_26 = arith.constant 0 : index
    %c0_27 = arith.constant 0 : index
    %34 = vector.load %arg2[%c0_26, %c0_27] : memref<128x384xbf16, #tpu.memory_space<vmem>>, vector<128x384xbf16>
    %cst = arith.constant dense<0.000000e+00> : vector<8x384xf32>
    %35 = tpu.matmul %33, %34, %cst {dimension_numbers = #tpu.dot_dimension_numbers<[1], [0], [0], [1], [0, 0, 1, 1], [], []>} : vector<8x128xbf16>, vector<128x384xbf16>, vector<8x384xf32> -> vector<8x384xf32>
    %c0_28 = arith.constant 0 : index
    %c0_29 = arith.constant 0 : index
    %36 = vector.load %arg4[%c0_28, %c0_29] : memref<1x384xf32, #tpu.memory_space<vmem>>, vector<1x384xf32>
    %37 = vector.broadcast %36 : vector<1x384xf32> to vector<8x384xf32>
    %38 = arith.addf %35, %37 : vector<8x384xf32>
    %c0_30 = arith.constant 0 : index
    %c0_31 = arith.constant 0 : index
    %39 = vector.load %arg13[%c0_30, %c0_31] : memref<8x384xf32, #tpu.memory_space<vmem>>, vector<8x384xf32>
    tpu.vector_store %arg13[%c0_30, %c0_31], %38 {strides = array<i32>} : memref<8x384xf32, #tpu.memory_space<vmem>>, vector<8x384xf32>,
    %c0_32 = arith.constant 0 : index
    %c0_33 = arith.constant 0 : index
    %40 = vector.load %arg6[%c0_32, %c0_33] : memref<128x384xbf16, #tpu.memory_space<vmem>>, vector<128x384xbf16>
    %cst_34 = arith.constant dense<0.000000e+00> : vector<8x384xf32>
    %41 = tpu.matmul %33, %40, %cst_34 {dimension_numbers = #tpu.dot_dimension_numbers<[1], [0], [0], [1], [0, 0, 1, 1], [], []>} : vector<8x128xbf16>, vector<128x384xbf16>, vector<8x384xf32> -> vector<8x384xf32>
    %c0_35 = arith.constant 0 : index
    %c0_36 = arith.constant 0 : index
    %42 = vector.load %arg8[%c0_35, %c0_36] : memref<1x384xf32, #tpu.memory_space<vmem>>, vector<1x384xf32>
    %43 = vector.broadcast %42 : vector<1x384xf32> to vector<8x384xf32>
    %44 = arith.addf %41, %43 : vector<8x384xf32>
    %c0_37 = arith.constant 0 : index
    %c0_38 = arith.constant 0 : index
    %45 = vector.load %arg14[%c0_37, %c0_38] : memref<8x384xf32, #tpu.memory_space<vmem>>, vector<8x384xf32>
    tpu.vector_store %arg14[%c0_37, %c0_38], %44 {strides = array<i32>} : memref<8x384xf32, #tpu.memory_space<vmem>>, vector<8x384xf32>,
    %cst_39 = arith.constant 0.000000e+00 : f32
    %46 = vector.broadcast %cst_39 : f32 to vector<1x128xf32>
    %c0_i32 = arith.constant 0 : i32
    %47 = arith.truncf %46 : vector<1x128xf32> to vector<1x128xbf16>
    %c0_40 = arith.constant 0 : index
    %c0_41 = arith.constant 0 : index
    %48 = vector.load %arg3[%c0_40, %c0_41] : memref<128x384xbf16, #tpu.memory_space<vmem>>, vector<128x384xbf16>
    %cst_42 = arith.constant dense<0.000000e+00> : vector<1x384xf32>
    %49 = tpu.matmul %47, %48, %cst_42 {dimension_numbers = #tpu.dot_dimension_numbers<[1], [0], [0], [1], [0, 0, 1, 1], [], []>} : vector<1x128xbf16>, vector<128x384xbf16>, vector<1x384xf32> -> vector<1x384xf32>
    %c0_43 = arith.constant 0 : index
    %c0_44 = arith.constant 0 : index
    %50 = vector.load %arg5[%c0_43, %c0_44] : memref<1x384xf32, #tpu.memory_space<vmem>>, vector<1x384xf32>
    %51 = arith.addf %49, %50 : vector<1x384xf32>
    %52 = arith.index_cast %c0_i32 : i32 to index
    %c0_45 = arith.constant 0 : index
    %53 = vector.load %arg13[%52, %c0_45] : memref<8x384xf32, #tpu.memory_space<vmem>>, vector<1x384xf32>
    %54 = vector.extract_strided_slice %53 {offsets = [0, 0], sizes = [1, 128], strides = [1, 1]} : vector<1x384xf32> to vector<1x128xf32>
    %55 = vector.extract_strided_slice %51 {offsets = [0, 0], sizes = [1, 128], strides = [1, 1]} : vector<1x384xf32> to vector<1x128xf32>
    %56 = arith.addf %54, %55 : vector<1x128xf32>
    %57 = arith.negf %56 : vector<1x128xf32>
    %58 = math.exp %57 : vector<1x128xf32>
    %cst_46 = arith.constant 1.000000e+00 : f32
    %59 = vector.broadcast %cst_46 : f32 to vector<1x128xf32>
    %60 = arith.addf %59, %58 : vector<1x128xf32>
    %61 = arith.divf %59, %60 : vector<1x128xf32>
    %62 = vector.extract_strided_slice %53 {offsets = [0, 128], sizes = [1, 128], strides = [1, 1]} : vector<1x384xf32> to vector<1x128xf32>
    %63 = vector.extract_strided_slice %51 {offsets = [0, 128], sizes = [1, 128], strides = [1, 1]} : vector<1x384xf32> to vector<1x128xf32>
    %64 = arith.addf %62, %63 : vector<1x128xf32>
    %65 = arith.negf %64 : vector<1x128xf32>
    %66 = math.exp %65 : vector<1x128xf32>
    %cst_47 = arith.constant 1.000000e+00 : f32
    %67 = vector.broadcast %cst_47 : f32 to vector<1x128xf32>
    %68 = arith.addf %67, %66 : vector<1x128xf32>
    %69 = arith.divf %67, %68 : vector<1x128xf32>
    %70 = vector.extract_strided_slice %53 {offsets = [0, 256], sizes = [1, 128], strides = [1, 1]} : vector<1x384xf32> to vector<1x128xf32>
    %71 = vector.extract_strided_slice %51 {offsets = [0, 256], sizes = [1, 128], strides = [1, 1]} : vector<1x384xf32> to vector<1x128xf32>
    %72 = arith.mulf %61, %71 : vector<1x128xf32>
    %73 = arith.addf %70, %72 : vector<1x128xf32>
    %74 = math.tanh %73 : vector<1x128xf32>
    %cst_48 = arith.constant 1.000000e+00 : f32
    %75 = vector.broadcast %cst_48 : f32 to vector<1x128xf32>
    %76 = arith.subf %75, %69 : vector<1x128xf32>
    %77 = arith.mulf %76, %74 : vector<1x128xf32>
    %78 = arith.mulf %69, %46 : vector<1x128xf32>
    %79 = arith.addf %77, %78 : vector<1x128xf32>
    %80 = arith.index_cast %c0_i32 : i32 to index
    %c0_49 = arith.constant 0 : index
    %81 = vector.load %arg10[%80, %c0_49] : memref<8x128xf32, #tpu.memory_space<vmem>>, vector<1x128xf32>
    tpu.vector_store %arg10[%80, %c0_49], %79 {strides = array<i32>} : memref<8x128xf32, #tpu.memory_space<vmem>>, vector<1x128xf32>,
    %c7_i32 = arith.constant 7 : i32
    %82 = arith.subi %c7_i32, %c0_i32 : i32
    %83 = arith.truncf %46 : vector<1x128xf32> to vector<1x128xbf16>
    %c0_50 = arith.constant 0 : index
    %c0_51 = arith.constant 0 : index
    %84 = vector.load %arg7[%c0_50, %c0_51] : memref<128x384xbf16, #tpu.memory_space<vmem>>, vector<128x384xbf16>
    %cst_52 = arith.constant dense<0.000000e+00> : vector<1x384xf32>
    %85 = tpu.matmul %83, %84, %cst_52 {dimension_numbers = #tpu.dot_dimension_numbers<[1], [0], [0], [1], [0, 0, 1, 1], [], []>} : vector<1x128xbf16>, vector<128x384xbf16>, vector<1x384xf32> -> vector<1x384xf32>
    %c0_53 = arith.constant 0 : index
    %c0_54 = arith.constant 0 : index
    %86 = vector.load %arg9[%c0_53, %c0_54] : memref<1x384xf32, #tpu.memory_space<vmem>>, vector<1x384xf32>
    %87 = arith.addf %85, %86 : vector<1x384xf32>
    %88 = arith.index_cast %82 : i32 to index
    %c0_55 = arith.constant 0 : index
    %89 = vector.load %arg14[%88, %c0_55] : memref<8x384xf32, #tpu.memory_space<vmem>>, vector<1x384xf32>
    %90 = vector.extract_strided_slice %89 {offsets = [0, 0], sizes = [1, 128], strides = [1, 1]} : vector<1x384xf32> to vector<1x128xf32>
    %91 = vector.extract_strided_slice %87 {offsets = [0, 0], sizes = [1, 128], strides = [1, 1]} : vector<1x384xf32> to vector<1x128xf32>
    %92 = arith.addf %90, %91 : vector<1x128xf32>
    %93 = arith.negf %92 : vector<1x128xf32>
    %94 = math.exp %93 : vector<1x128xf32>
    %cst_56 = arith.constant 1.000000e+00 : f32
    %95 = vector.broadcast %cst_56 : f32 to vector<1x128xf32>
    %96 = arith.addf %95, %94 : vector<1x128xf32>
    %97 = arith.divf %95, %96 : vector<1x128xf32>
    %98 = vector.extract_strided_slice %89 {offsets = [0, 128], sizes = [1, 128], strides = [1, 1]} : vector<1x384xf32> to vector<1x128xf32>
    %99 = vector.extract_strided_slice %87 {offsets = [0, 128], sizes = [1, 128], strides = [1, 1]} : vector<1x384xf32> to vector<1x128xf32>
    %100 = arith.addf %98, %99 : vector<1x128xf32>
    %101 = arith.negf %100 : vector<1x128xf32>
    %102 = math.exp %101 : vector<1x128xf32>
    %cst_57 = arith.constant 1.000000e+00 : f32
    %103 = vector.broadcast %cst_57 : f32 to vector<1x128xf32>
    %104 = arith.addf %103, %102 : vector<1x128xf32>
    %105 = arith.divf %103, %104 : vector<1x128xf32>
    %106 = vector.extract_strided_slice %89 {offsets = [0, 256], sizes = [1, 128], strides = [1, 1]} : vector<1x384xf32> to vector<1x128xf32>
    %107 = vector.extract_strided_slice %87 {offsets = [0, 256], sizes = [1, 128], strides = [1, 1]} : vector<1x384xf32> to vector<1x128xf32>
    %108 = arith.mulf %97, %107 : vector<1x128xf32>
    %109 = arith.addf %106, %108 : vector<1x128xf32>
    %110 = math.tanh %109 : vector<1x128xf32>
    %cst_58 = arith.constant 1.000000e+00 : f32
    %111 = vector.broadcast %cst_58 : f32 to vector<1x128xf32>
    %112 = arith.subf %111, %105 : vector<1x128xf32>
    %113 = arith.mulf %112, %110 : vector<1x128xf32>
    %114 = arith.mulf %105, %46 : vector<1x128xf32>
    %115 = arith.addf %113, %114 : vector<1x128xf32>
    %116 = arith.index_cast %82 : i32 to index
    %c0_59 = arith.constant 0 : index
    %117 = vector.load %arg15[%116, %c0_59] : memref<8x128xf32, #tpu.memory_space<vmem>>, vector<1x128xf32>
    tpu.vector_store %arg15[%116, %c0_59], %115 {strides = array<i32>} : memref<8x128xf32, #tpu.memory_space<vmem>>, vector<1x128xf32>,
    %c1_i32 = arith.constant 1 : i32
    %118 = arith.truncf %79 : vector<1x128xf32> to vector<1x128xbf16>
    %c0_60 = arith.constant 0 : index
    %c0_61 = arith.constant 0 : index
    %119 = vector.load %arg3[%c0_60, %c0_61] : memref<128x384xbf16, #tpu.memory_space<vmem>>, vector<128x384xbf16>
    %cst_62 = arith.constant dense<0.000000e+00> : vector<1x384xf32>
    %120 = tpu.matmul %118, %119, %cst_62 {dimension_numbers = #tpu.dot_dimension_numbers<[1], [0], [0], [1], [0, 0, 1, 1], [], []>} : vector<1x128xbf16>, vector<128x384xbf16>, vector<1x384xf32> -> vector<1x384xf32>
    %c0_63 = arith.constant 0 : index
    %c0_64 = arith.constant 0 : index
    %121 = vector.load %arg5[%c0_63, %c0_64] : memref<1x384xf32, #tpu.memory_space<vmem>>, vector<1x384xf32>
    %122 = arith.addf %120, %121 : vector<1x384xf32>
    %123 = arith.index_cast %c1_i32 : i32 to index
    %c0_65 = arith.constant 0 : index
    %124 = vector.load %arg13[%123, %c0_65] : memref<8x384xf32, #tpu.memory_space<vmem>>, vector<1x384xf32>
    %125 = vector.extract_strided_slice %124 {offsets = [0, 0], sizes = [1, 128], strides = [1, 1]} : vector<1x384xf32> to vector<1x128xf32>
    %126 = vector.extract_strided_slice %122 {offsets = [0, 0], sizes = [1, 128], strides = [1, 1]} : vector<1x384xf32> to vector<1x128xf32>
    %127 = arith.addf %125, %126 : vector<1x128xf32>
    %128 = arith.negf %127 : vector<1x128xf32>
    %129 = math.exp %128 : vector<1x128xf32>
    %cst_66 = arith.constant 1.000000e+00 : f32
    %130 = vector.broadcast %cst_66 : f32 to vector<1x128xf32>
    %131 = arith.addf %130, %129 : vector<1x128xf32>
    %132 = arith.divf %130, %131 : vector<1x128xf32>
    %133 = vector.extract_strided_slice %124 {offsets = [0, 128], sizes = [1, 128], strides = [1, 1]} : vector<1x384xf32> to vector<1x128xf32>
    %134 = vector.extract_strided_slice %122 {offsets = [0, 128], sizes = [1, 128], strides = [1, 1]} : vector<1x384xf32> to vector<1x128xf32>
    %135 = arith.addf %133, %134 : vector<1x128xf32>
    %136 = arith.negf %135 : vector<1x128xf32>
    %137 = math.exp %136 : vector<1x128xf32>
    %cst_67 = arith.constant 1.000000e+00 : f32
    %138 = vector.broadcast %cst_67 : f32 to vector<1x128xf32>
    %139 = arith.addf %138, %137 : vector<1x128xf32>
    %140 = arith.divf %138, %139 : vector<1x128xf32>
    %141 = vector.extract_strided_slice %124 {offsets = [0, 256], sizes = [1, 128], strides = [1, 1]} : vector<1x384xf32> to vector<1x128xf32>
    %142 = vector.extract_strided_slice %122 {offsets = [0, 256], sizes = [1, 128], strides = [1, 1]} : vector<1x384xf32> to vector<1x128xf32>
    %143 = arith.mulf %132, %142 : vector<1x128xf32>
    %144 = arith.addf %141, %143 : vector<1x128xf32>
    %145 = math.tanh %144 : vector<1x128xf32>
    %cst_68 = arith.constant 1.000000e+00 : f32
    %146 = vector.broadcast %cst_68 : f32 to vector<1x128xf32>
    %147 = arith.subf %146, %140 : vector<1x128xf32>
    %148 = arith.mulf %147, %145 : vector<1x128xf32>
    %149 = arith.mulf %140, %79 : vector<1x128xf32>
    %150 = arith.addf %148, %149 : vector<1x128xf32>
    %151 = arith.index_cast %c1_i32 : i32 to index
    %c0_69 = arith.constant 0 : index
    %152 = vector.load %arg10[%151, %c0_69] : memref<8x128xf32, #tpu.memory_space<vmem>>, vector<1x128xf32>
    tpu.vector_store %arg10[%151, %c0_69], %150 {strides = array<i32>} : memref<8x128xf32, #tpu.memory_space<vmem>>, vector<1x128xf32>,
    %c7_i32_70 = arith.constant 7 : i32
    %153 = arith.subi %c7_i32_70, %c1_i32 : i32
    %154 = arith.truncf %115 : vector<1x128xf32> to vector<1x128xbf16>
    %c0_71 = arith.constant 0 : index
    %c0_72 = arith.constant 0 : index
    %155 = vector.load %arg7[%c0_71, %c0_72] : memref<128x384xbf16, #tpu.memory_space<vmem>>, vector<128x384xbf16>
    %cst_73 = arith.constant dense<0.000000e+00> : vector<1x384xf32>
    %156 = tpu.matmul %154, %155, %cst_73 {dimension_numbers = #tpu.dot_dimension_numbers<[1], [0], [0], [1], [0, 0, 1, 1], [], []>} : vector<1x128xbf16>, vector<128x384xbf16>, vector<1x384xf32> -> vector<1x384xf32>
    %c0_74 = arith.constant 0 : index
    %c0_75 = arith.constant 0 : index
    %157 = vector.load %arg9[%c0_74, %c0_75] : memref<1x384xf32, #tpu.memory_space<vmem>>, vector<1x384xf32>
    %158 = arith.addf %156, %157 : vector<1x384xf32>
    %159 = arith.index_cast %153 : i32 to index
    %c0_76 = arith.constant 0 : index
    %160 = vector.load %arg14[%159, %c0_76] : memref<8x384xf32, #tpu.memory_space<vmem>>, vector<1x384xf32>
    %161 = vector.extract_strided_slice %160 {offsets = [0, 0], sizes = [1, 128], strides = [1, 1]} : vector<1x384xf32> to vector<1x128xf32>
    %162 = vector.extract_strided_slice %158 {offsets = [0, 0], sizes = [1, 128], strides = [1, 1]} : vector<1x384xf32> to vector<1x128xf32>
    %163 = arith.addf %161, %162 : vector<1x128xf32>
    %164 = arith.negf %163 : vector<1x128xf32>
    %165 = math.exp %164 : vector<1x128xf32>
    %cst_77 = arith.constant 1.000000e+00 : f32
    %166 = vector.broadcast %cst_77 : f32 to vector<1x128xf32>
    %167 = arith.addf %166, %165 : vector<1x128xf32>
    %168 = arith.divf %166, %167 : vector<1x128xf32>
    %169 = vector.extract_strided_slice %160 {offsets = [0, 128], sizes = [1, 128], strides = [1, 1]} : vector<1x384xf32> to vector<1x128xf32>
    %170 = vector.extract_strided_slice %158 {offsets = [0, 128], sizes = [1, 128], strides = [1, 1]} : vector<1x384xf32> to vector<1x128xf32>
    %171 = arith.addf %169, %170 : vector<1x128xf32>
    %172 = arith.negf %171 : vector<1x128xf32>
    %173 = math.exp %172 : vector<1x128xf32>
    %cst_78 = arith.constant 1.000000e+00 : f32
    %174 = vector.broadcast %cst_78 : f32 to vector<1x128xf32>
    %175 = arith.addf %174, %173 : vector<1x128xf32>
    %176 = arith.divf %174, %175 : vector<1x128xf32>
    %177 = vector.extract_strided_slice %160 {offsets = [0, 256], sizes = [1, 128], strides = [1, 1]} : vector<1x384xf32> to vector<1x128xf32>
    %178 = vector.extract_strided_slice %158 {offsets = [0, 256], sizes = [1, 128], strides = [1, 1]} : vector<1x384xf32> to vector<1x128xf32>
    %179 = arith.mulf %168, %178 : vector<1x128xf32>
    %180 = arith.addf %177, %179 : vector<1x128xf32>
    %181 = math.tanh %180 : vector<1x128xf32>
    %cst_79 = arith.constant 1.000000e+00 : f32
    %182 = vector.broadcast %cst_79 : f32 to vector<1x128xf32>
    %183 = arith.subf %182, %176 : vector<1x128xf32>
    %184 = arith.mulf %183, %181 : vector<1x128xf32>
    %185 = arith.mulf %176, %115 : vector<1x128xf32>
    %186 = arith.addf %184, %185 : vector<1x128xf32>
    %187 = arith.index_cast %153 : i32 to index
    %c0_80 = arith.constant 0 : index
    %188 = vector.load %arg15[%187, %c0_80] : memref<8x128xf32, #tpu.memory_space<vmem>>, vector<1x128xf32>
    tpu.vector_store %arg15[%187, %c0_80], %186 {strides = array<i32>} : memref<8x128xf32, #tpu.memory_space<vmem>>, vector<1x128xf32>,
    %c2_i32 = arith.constant 2 : i32
    %189 = arith.truncf %150 : vector<1x128xf32> to vector<1x128xbf16>
    %c0_81 = arith.constant 0 : index
    %c0_82 = arith.constant 0 : index
    %190 = vector.load %arg3[%c0_81, %c0_82] : memref<128x384xbf16, #tpu.memory_space<vmem>>, vector<128x384xbf16>
    %cst_83 = arith.constant dense<0.000000e+00> : vector<1x384xf32>
    %191 = tpu.matmul %189, %190, %cst_83 {dimension_numbers = #tpu.dot_dimension_numbers<[1], [0], [0], [1], [0, 0, 1, 1], [], []>} : vector<1x128xbf16>, vector<128x384xbf16>, vector<1x384xf32> -> vector<1x384xf32>
    %c0_84 = arith.constant 0 : index
    %c0_85 = arith.constant 0 : index
    %192 = vector.load %arg5[%c0_84, %c0_85] : memref<1x384xf32, #tpu.memory_space<vmem>>, vector<1x384xf32>
    %193 = arith.addf %191, %192 : vector<1x384xf32>
    %194 = arith.index_cast %c2_i32 : i32 to index
    %c0_86 = arith.constant 0 : index
    %195 = vector.load %arg13[%194, %c0_86] : memref<8x384xf32, #tpu.memory_space<vmem>>, vector<1x384xf32>
    %196 = vector.extract_strided_slice %195 {offsets = [0, 0], sizes = [1, 128], strides = [1, 1]} : vector<1x384xf32> to vector<1x128xf32>
    %197 = vector.extract_strided_slice %193 {offsets = [0, 0], sizes = [1, 128], strides = [1, 1]} : vector<1x384xf32> to vector<1x128xf32>
    %198 = arith.addf %196, %197 : vector<1x128xf32>
    %199 = arith.negf %198 : vector<1x128xf32>
    %200 = math.exp %199 : vector<1x128xf32>
    %cst_87 = arith.constant 1.000000e+00 : f32
    %201 = vector.broadcast %cst_87 : f32 to vector<1x128xf32>
    %202 = arith.addf %201, %200 : vector<1x128xf32>
    %203 = arith.divf %201, %202 : vector<1x128xf32>
    %204 = vector.extract_strided_slice %195 {offsets = [0, 128], sizes = [1, 128], strides = [1, 1]} : vector<1x384xf32> to vector<1x128xf32>
    %205 = vector.extract_strided_slice %193 {offsets = [0, 128], sizes = [1, 128], strides = [1, 1]} : vector<1x384xf32> to vector<1x128xf32>
    %206 = arith.addf %204, %205 : vector<1x128xf32>
    %207 = arith.negf %206 : vector<1x128xf32>
    %208 = math.exp %207 : vector<1x128xf32>
    %cst_88 = arith.constant 1.000000e+00 : f32
    %209 = vector.broadcast %cst_88 : f32 to vector<1x128xf32>
    %210 = arith.addf %209, %208 : vector<1x128xf32>
    %211 = arith.divf %209, %210 : vector<1x128xf32>
    %212 = vector.extract_strided_slice %195 {offsets = [0, 256], sizes = [1, 128], strides = [1, 1]} : vector<1x384xf32> to vector<1x128xf32>
    %213 = vector.extract_strided_slice %193 {offsets = [0, 256], sizes = [1, 128], strides = [1, 1]} : vector<1x384xf32> to vector<1x128xf32>
    %214 = arith.mulf %203, %213 : vector<1x128xf32>
    %215 = arith.addf %212, %214 : vector<1x128xf32>
    %216 = math.tanh %215 : vector<1x128xf32>
    %cst_89 = arith.constant 1.000000e+00 : f32
    %217 = vector.broadcast %cst_89 : f32 to vector<1x128xf32>
    %218 = arith.subf %217, %211 : vector<1x128xf32>
    %219 = arith.mulf %218, %216 : vector<1x128xf32>
    %220 = arith.mulf %211, %150 : vector<1x128xf32>
    %221 = arith.addf %219, %220 : vector<1x128xf32>
    %222 = arith.index_cast %c2_i32 : i32 to index
    %c0_90 = arith.constant 0 : index
    %223 = vector.load %arg10[%222, %c0_90] : memref<8x128xf32, #tpu.memory_space<vmem>>, vector<1x128xf32>
    tpu.vector_store %arg10[%222, %c0_90], %221 {strides = array<i32>} : memref<8x128xf32, #tpu.memory_space<vmem>>, vector<1x128xf32>,
    %c7_i32_91 = arith.constant 7 : i32
    %224 = arith.subi %c7_i32_91, %c2_i32 : i32
    %225 = arith.truncf %186 : vector<1x128xf32> to vector<1x128xbf16>
    %c0_92 = arith.constant 0 : index
    %c0_93 = arith.constant 0 : index
    %226 = vector.load %arg7[%c0_92, %c0_93] : memref<128x384xbf16, #tpu.memory_space<vmem>>, vector<128x384xbf16>
    %cst_94 = arith.constant dense<0.000000e+00> : vector<1x384xf32>
    %227 = tpu.matmul %225, %226, %cst_94 {dimension_numbers = #tpu.dot_dimension_numbers<[1], [0], [0], [1], [0, 0, 1, 1], [], []>} : vector<1x128xbf16>, vector<128x384xbf16>, vector<1x384xf32> -> vector<1x384xf32>
    %c0_95 = arith.constant 0 : index
    %c0_96 = arith.constant 0 : index
    %228 = vector.load %arg9[%c0_95, %c0_96] : memref<1x384xf32, #tpu.memory_space<vmem>>, vector<1x384xf32>
    %229 = arith.addf %227, %228 : vector<1x384xf32>
    %230 = arith.index_cast %224 : i32 to index
    %c0_97 = arith.constant 0 : index
    %231 = vector.load %arg14[%230, %c0_97] : memref<8x384xf32, #tpu.memory_space<vmem>>, vector<1x384xf32>
    %232 = vector.extract_strided_slice %231 {offsets = [0, 0], sizes = [1, 128], strides = [1, 1]} : vector<1x384xf32> to vector<1x128xf32>
    %233 = vector.extract_strided_slice %229 {offsets = [0, 0], sizes = [1, 128], strides = [1, 1]} : vector<1x384xf32> to vector<1x128xf32>
    %234 = arith.addf %232, %233 : vector<1x128xf32>
    %235 = arith.negf %234 : vector<1x128xf32>
    %236 = math.exp %235 : vector<1x128xf32>
    %cst_98 = arith.constant 1.000000e+00 : f32
    %237 = vector.broadcast %cst_98 : f32 to vector<1x128xf32>
    %238 = arith.addf %237, %236 : vector<1x128xf32>
    %239 = arith.divf %237, %238 : vector<1x128xf32>
    %240 = vector.extract_strided_slice %231 {offsets = [0, 128], sizes = [1, 128], strides = [1, 1]} : vector<1x384xf32> to vector<1x128xf32>
    %241 = vector.extract_strided_slice %229 {offsets = [0, 128], sizes = [1, 128], strides = [1, 1]} : vector<1x384xf32> to vector<1x128xf32>
    %242 = arith.addf %240, %241 : vector<1x128xf32>
    %243 = arith.negf %242 : vector<1x128xf32>
    %244 = math.exp %243 : vector<1x128xf32>
    %cst_99 = arith.constant 1.000000e+00 : f32
    %245 = vector.broadcast %cst_99 : f32 to vector<1x128xf32>
    %246 = arith.addf %245, %244 : vector<1x128xf32>
    %247 = arith.divf %245, %246 : vector<1x128xf32>
    %248 = vector.extract_strided_slice %231 {offsets = [0, 256], sizes = [1, 128], strides = [1, 1]} : vector<1x384xf32> to vector<1x128xf32>
    %249 = vector.extract_strided_slice %229 {offsets = [0, 256], sizes = [1, 128], strides = [1, 1]} : vector<1x384xf32> to vector<1x128xf32>
    %250 = arith.mulf %239, %249 : vector<1x128xf32>
    %251 = arith.addf %248, %250 : vector<1x128xf32>
    %252 = math.tanh %251 : vector<1x128xf32>
    %cst_100 = arith.constant 1.000000e+00 : f32
    %253 = vector.broadcast %cst_100 : f32 to vector<1x128xf32>
    %254 = arith.subf %253, %247 : vector<1x128xf32>
    %255 = arith.mulf %254, %252 : vector<1x128xf32>
    %256 = arith.mulf %247, %186 : vector<1x128xf32>
    %257 = arith.addf %255, %256 : vector<1x128xf32>
    %258 = arith.index_cast %224 : i32 to index
    %c0_101 = arith.constant 0 : index
    %259 = vector.load %arg15[%258, %c0_101] : memref<8x128xf32, #tpu.memory_space<vmem>>, vector<1x128xf32>
    tpu.vector_store %arg15[%258, %c0_101], %257 {strides = array<i32>} : memref<8x128xf32, #tpu.memory_space<vmem>>, vector<1x128xf32>,
    %c3_i32 = arith.constant 3 : i32
    %260 = arith.truncf %221 : vector<1x128xf32> to vector<1x128xbf16>
    %c0_102 = arith.constant 0 : index
    %c0_103 = arith.constant 0 : index
    %261 = vector.load %arg3[%c0_102, %c0_103] : memref<128x384xbf16, #tpu.memory_space<vmem>>, vector<128x384xbf16>
    %cst_104 = arith.constant dense<0.000000e+00> : vector<1x384xf32>
    %262 = tpu.matmul %260, %261, %cst_104 {dimension_numbers = #tpu.dot_dimension_numbers<[1], [0], [0], [1], [0, 0, 1, 1], [], []>} : vector<1x128xbf16>, vector<128x384xbf16>, vector<1x384xf32> -> vector<1x384xf32>
    %c0_105 = arith.constant 0 : index
    %c0_106 = arith.constant 0 : index
    %263 = vector.load %arg5[%c0_105, %c0_106] : memref<1x384xf32, #tpu.memory_space<vmem>>, vector<1x384xf32>
    %264 = arith.addf %262, %263 : vector<1x384xf32>
    %265 = arith.index_cast %c3_i32 : i32 to index
    %c0_107 = arith.constant 0 : index
    %266 = vector.load %arg13[%265, %c0_107] : memref<8x384xf32, #tpu.memory_space<vmem>>, vector<1x384xf32>
    %267 = vector.extract_strided_slice %266 {offsets = [0, 0], sizes = [1, 128], strides = [1, 1]} : vector<1x384xf32> to vector<1x128xf32>
    %268 = vector.extract_strided_slice %264 {offsets = [0, 0], sizes = [1, 128], strides = [1, 1]} : vector<1x384xf32> to vector<1x128xf32>
    %269 = arith.addf %267, %268 : vector<1x128xf32>
    %270 = arith.negf %269 : vector<1x128xf32>
    %271 = math.exp %270 : vector<1x128xf32>
    %cst_108 = arith.constant 1.000000e+00 : f32
    %272 = vector.broadcast %cst_108 : f32 to vector<1x128xf32>
    %273 = arith.addf %272, %271 : vector<1x128xf32>
    %274 = arith.divf %272, %273 : vector<1x128xf32>
    %275 = vector.extract_strided_slice %266 {offsets = [0, 128], sizes = [1, 128], strides = [1, 1]} : vector<1x384xf32> to vector<1x128xf32>
    %276 = vector.extract_strided_slice %264 {offsets = [0, 128], sizes = [1, 128], strides = [1, 1]} : vector<1x384xf32> to vector<1x128xf32>
    %277 = arith.addf %275, %276 : vector<1x128xf32>
    %278 = arith.negf %277 : vector<1x128xf32>
    %279 = math.exp %278 : vector<1x128xf32>
    %cst_109 = arith.constant 1.000000e+00 : f32
    %280 = vector.broadcast %cst_109 : f32 to vector<1x128xf32>
    %281 = arith.addf %280, %279 : vector<1x128xf32>
    %282 = arith.divf %280, %281 : vector<1x128xf32>
    %283 = vector.extract_strided_slice %266 {offsets = [0, 256], sizes = [1, 128], strides = [1, 1]} : vector<1x384xf32> to vector<1x128xf32>
    %284 = vector.extract_strided_slice %264 {offsets = [0, 256], sizes = [1, 128], strides = [1, 1]} : vector<1x384xf32> to vector<1x128xf32>
    %285 = arith.mulf %274, %284 : vector<1x128xf32>
    %286 = arith.addf %283, %285 : vector<1x128xf32>
    %287 = math.tanh %286 : vector<1x128xf32>
    %cst_110 = arith.constant 1.000000e+00 : f32
    %288 = vector.broadcast %cst_110 : f32 to vector<1x128xf32>
    %289 = arith.subf %288, %282 : vector<1x128xf32>
    %290 = arith.mulf %289, %287 : vector<1x128xf32>
    %291 = arith.mulf %282, %221 : vector<1x128xf32>
    %292 = arith.addf %290, %291 : vector<1x128xf32>
    %293 = arith.index_cast %c3_i32 : i32 to index
    %c0_111 = arith.constant 0 : index
    %294 = vector.load %arg10[%293, %c0_111] : memref<8x128xf32, #tpu.memory_space<vmem>>, vector<1x128xf32>
    tpu.vector_store %arg10[%293, %c0_111], %292 {strides = array<i32>} : memref<8x128xf32, #tpu.memory_space<vmem>>, vector<1x128xf32>,
    %c7_i32_112 = arith.constant 7 : i32
    %295 = arith.subi %c7_i32_112, %c3_i32 : i32
    %296 = arith.truncf %257 : vector<1x128xf32> to vector<1x128xbf16>
    %c0_113 = arith.constant 0 : index
    %c0_114 = arith.constant 0 : index
    %297 = vector.load %arg7[%c0_113, %c0_114] : memref<128x384xbf16, #tpu.memory_space<vmem>>, vector<128x384xbf16>
    %cst_115 = arith.constant dense<0.000000e+00> : vector<1x384xf32>
    %298 = tpu.matmul %296, %297, %cst_115 {dimension_numbers = #tpu.dot_dimension_numbers<[1], [0], [0], [1], [0, 0, 1, 1], [], []>} : vector<1x128xbf16>, vector<128x384xbf16>, vector<1x384xf32> -> vector<1x384xf32>
    %c0_116 = arith.constant 0 : index
    %c0_117 = arith.constant 0 : index
    %299 = vector.load %arg9[%c0_116, %c0_117] : memref<1x384xf32, #tpu.memory_space<vmem>>, vector<1x384xf32>
    %300 = arith.addf %298, %299 : vector<1x384xf32>
    %301 = arith.index_cast %295 : i32 to index
    %c0_118 = arith.constant 0 : index
    %302 = vector.load %arg14[%301, %c0_118] : memref<8x384xf32, #tpu.memory_space<vmem>>, vector<1x384xf32>
    %303 = vector.extract_strided_slice %302 {offsets = [0, 0], sizes = [1, 128], strides = [1, 1]} : vector<1x384xf32> to vector<1x128xf32>
    %304 = vector.extract_strided_slice %300 {offsets = [0, 0], sizes = [1, 128], strides = [1, 1]} : vector<1x384xf32> to vector<1x128xf32>
    %305 = arith.addf %303, %304 : vector<1x128xf32>
    %306 = arith.negf %305 : vector<1x128xf32>
    %307 = math.exp %306 : vector<1x128xf32>
    %cst_119 = arith.constant 1.000000e+00 : f32
    %308 = vector.broadcast %cst_119 : f32 to vector<1x128xf32>
    %309 = arith.addf %308, %307 : vector<1x128xf32>
    %310 = arith.divf %308, %309 : vector<1x128xf32>
    %311 = vector.extract_strided_slice %302 {offsets = [0, 128], sizes = [1, 128], strides = [1, 1]} : vector<1x384xf32> to vector<1x128xf32>
    %312 = vector.extract_strided_slice %300 {offsets = [0, 128], sizes = [1, 128], strides = [1, 1]} : vector<1x384xf32> to vector<1x128xf32>
    %313 = arith.addf %311, %312 : vector<1x128xf32>
    %314 = arith.negf %313 : vector<1x128xf32>
    %315 = math.exp %314 : vector<1x128xf32>
    %cst_120 = arith.constant 1.000000e+00 : f32
    %316 = vector.broadcast %cst_120 : f32 to vector<1x128xf32>
    %317 = arith.addf %316, %315 : vector<1x128xf32>
    %318 = arith.divf %316, %317 : vector<1x128xf32>
    %319 = vector.extract_strided_slice %302 {offsets = [0, 256], sizes = [1, 128], strides = [1, 1]} : vector<1x384xf32> to vector<1x128xf32>
    %320 = vector.extract_strided_slice %300 {offsets = [0, 256], sizes = [1, 128], strides = [1, 1]} : vector<1x384xf32> to vector<1x128xf32>
    %321 = arith.mulf %310, %320 : vector<1x128xf32>
    %322 = arith.addf %319, %321 : vector<1x128xf32>
    %323 = math.tanh %322 : vector<1x128xf32>
    %cst_121 = arith.constant 1.000000e+00 : f32
    %324 = vector.broadcast %cst_121 : f32 to vector<1x128xf32>
    %325 = arith.subf %324, %318 : vector<1x128xf32>
    %326 = arith.mulf %325, %323 : vector<1x128xf32>
    %327 = arith.mulf %318, %257 : vector<1x128xf32>
    %328 = arith.addf %326, %327 : vector<1x128xf32>
    %329 = arith.index_cast %295 : i32 to index
    %c0_122 = arith.constant 0 : index
    %330 = vector.load %arg15[%329, %c0_122] : memref<8x128xf32, #tpu.memory_space<vmem>>, vector<1x128xf32>
    tpu.vector_store %arg15[%329, %c0_122], %328 {strides = array<i32>} : memref<8x128xf32, #tpu.memory_space<vmem>>, vector<1x128xf32>,
    %c4_i32 = arith.constant 4 : i32
    %331 = arith.truncf %292 : vector<1x128xf32> to vector<1x128xbf16>
    %c0_123 = arith.constant 0 : index
    %c0_124 = arith.constant 0 : index
    %332 = vector.load %arg3[%c0_123, %c0_124] : memref<128x384xbf16, #tpu.memory_space<vmem>>, vector<128x384xbf16>
    %cst_125 = arith.constant dense<0.000000e+00> : vector<1x384xf32>
    %333 = tpu.matmul %331, %332, %cst_125 {dimension_numbers = #tpu.dot_dimension_numbers<[1], [0], [0], [1], [0, 0, 1, 1], [], []>} : vector<1x128xbf16>, vector<128x384xbf16>, vector<1x384xf32> -> vector<1x384xf32>
    %c0_126 = arith.constant 0 : index
    %c0_127 = arith.constant 0 : index
    %334 = vector.load %arg5[%c0_126, %c0_127] : memref<1x384xf32, #tpu.memory_space<vmem>>, vector<1x384xf32>
    %335 = arith.addf %333, %334 : vector<1x384xf32>
    %336 = arith.index_cast %c4_i32 : i32 to index
    %c0_128 = arith.constant 0 : index
    %337 = vector.load %arg13[%336, %c0_128] : memref<8x384xf32, #tpu.memory_space<vmem>>, vector<1x384xf32>
    %338 = vector.extract_strided_slice %337 {offsets = [0, 0], sizes = [1, 128], strides = [1, 1]} : vector<1x384xf32> to vector<1x128xf32>
    %339 = vector.extract_strided_slice %335 {offsets = [0, 0], sizes = [1, 128], strides = [1, 1]} : vector<1x384xf32> to vector<1x128xf32>
    %340 = arith.addf %338, %339 : vector<1x128xf32>
    %341 = arith.negf %340 : vector<1x128xf32>
    %342 = math.exp %341 : vector<1x128xf32>
    %cst_129 = arith.constant 1.000000e+00 : f32
    %343 = vector.broadcast %cst_129 : f32 to vector<1x128xf32>
    %344 = arith.addf %343, %342 : vector<1x128xf32>
    %345 = arith.divf %343, %344 : vector<1x128xf32>
    %346 = vector.extract_strided_slice %337 {offsets = [0, 128], sizes = [1, 128], strides = [1, 1]} : vector<1x384xf32> to vector<1x128xf32>
    %347 = vector.extract_strided_slice %335 {offsets = [0, 128], sizes = [1, 128], strides = [1, 1]} : vector<1x384xf32> to vector<1x128xf32>
    %348 = arith.addf %346, %347 : vector<1x128xf32>
    %349 = arith.negf %348 : vector<1x128xf32>
    %350 = math.exp %349 : vector<1x128xf32>
    %cst_130 = arith.constant 1.000000e+00 : f32
    %351 = vector.broadcast %cst_130 : f32 to vector<1x128xf32>
    %352 = arith.addf %351, %350 : vector<1x128xf32>
    %353 = arith.divf %351, %352 : vector<1x128xf32>
    %354 = vector.extract_strided_slice %337 {offsets = [0, 256], sizes = [1, 128], strides = [1, 1]} : vector<1x384xf32> to vector<1x128xf32>
    %355 = vector.extract_strided_slice %335 {offsets = [0, 256], sizes = [1, 128], strides = [1, 1]} : vector<1x384xf32> to vector<1x128xf32>
    %356 = arith.mulf %345, %355 : vector<1x128xf32>
    %357 = arith.addf %354, %356 : vector<1x128xf32>
    %358 = math.tanh %357 : vector<1x128xf32>
    %cst_131 = arith.constant 1.000000e+00 : f32
    %359 = vector.broadcast %cst_131 : f32 to vector<1x128xf32>
    %360 = arith.subf %359, %353 : vector<1x128xf32>
    %361 = arith.mulf %360, %358 : vector<1x128xf32>
    %362 = arith.mulf %353, %292 : vector<1x128xf32>
    %363 = arith.addf %361, %362 : vector<1x128xf32>
    %364 = arith.index_cast %c4_i32 : i32 to index
    %c0_132 = arith.constant 0 : index
    %365 = vector.load %arg10[%364, %c0_132] : memref<8x128xf32, #tpu.memory_space<vmem>>, vector<1x128xf32>
    tpu.vector_store %arg10[%364, %c0_132], %363 {strides = array<i32>} : memref<8x128xf32, #tpu.memory_space<vmem>>, vector<1x128xf32>,
    %c7_i32_133 = arith.constant 7 : i32
    %366 = arith.subi %c7_i32_133, %c4_i32 : i32
    %367 = arith.truncf %328 : vector<1x128xf32> to vector<1x128xbf16>
    %c0_134 = arith.constant 0 : index
    %c0_135 = arith.constant 0 : index
    %368 = vector.load %arg7[%c0_134, %c0_135] : memref<128x384xbf16, #tpu.memory_space<vmem>>, vector<128x384xbf16>
    %cst_136 = arith.constant dense<0.000000e+00> : vector<1x384xf32>
    %369 = tpu.matmul %367, %368, %cst_136 {dimension_numbers = #tpu.dot_dimension_numbers<[1], [0], [0], [1], [0, 0, 1, 1], [], []>} : vector<1x128xbf16>, vector<128x384xbf16>, vector<1x384xf32> -> vector<1x384xf32>
    %c0_137 = arith.constant 0 : index
    %c0_138 = arith.constant 0 : index
    %370 = vector.load %arg9[%c0_137, %c0_138] : memref<1x384xf32, #tpu.memory_space<vmem>>, vector<1x384xf32>
    %371 = arith.addf %369, %370 : vector<1x384xf32>
    %372 = arith.index_cast %366 : i32 to index
    %c0_139 = arith.constant 0 : index
    %373 = vector.load %arg14[%372, %c0_139] : memref<8x384xf32, #tpu.memory_space<vmem>>, vector<1x384xf32>
    %374 = vector.extract_strided_slice %373 {offsets = [0, 0], sizes = [1, 128], strides = [1, 1]} : vector<1x384xf32> to vector<1x128xf32>
    %375 = vector.extract_strided_slice %371 {offsets = [0, 0], sizes = [1, 128], strides = [1, 1]} : vector<1x384xf32> to vector<1x128xf32>
    %376 = arith.addf %374, %375 : vector<1x128xf32>
    %377 = arith.negf %376 : vector<1x128xf32>
    %378 = math.exp %377 : vector<1x128xf32>
    %cst_140 = arith.constant 1.000000e+00 : f32
    %379 = vector.broadcast %cst_140 : f32 to vector<1x128xf32>
    %380 = arith.addf %379, %378 : vector<1x128xf32>
    %381 = arith.divf %379, %380 : vector<1x128xf32>
    %382 = vector.extract_strided_slice %373 {offsets = [0, 128], sizes = [1, 128], strides = [1, 1]} : vector<1x384xf32> to vector<1x128xf32>
    %383 = vector.extract_strided_slice %371 {offsets = [0, 128], sizes = [1, 128], strides = [1, 1]} : vector<1x384xf32> to vector<1x128xf32>
    %384 = arith.addf %382, %383 : vector<1x128xf32>
    %385 = arith.negf %384 : vector<1x128xf32>
    %386 = math.exp %385 : vector<1x128xf32>
    %cst_141 = arith.constant 1.000000e+00 : f32
    %387 = vector.broadcast %cst_141 : f32 to vector<1x128xf32>
    %388 = arith.addf %387, %386 : vector<1x128xf32>
    %389 = arith.divf %387, %388 : vector<1x128xf32>
    %390 = vector.extract_strided_slice %373 {offsets = [0, 256], sizes = [1, 128], strides = [1, 1]} : vector<1x384xf32> to vector<1x128xf32>
    %391 = vector.extract_strided_slice %371 {offsets = [0, 256], sizes = [1, 128], strides = [1, 1]} : vector<1x384xf32> to vector<1x128xf32>
    %392 = arith.mulf %381, %391 : vector<1x128xf32>
    %393 = arith.addf %390, %392 : vector<1x128xf32>
    %394 = math.tanh %393 : vector<1x128xf32>
    %cst_142 = arith.constant 1.000000e+00 : f32
    %395 = vector.broadcast %cst_142 : f32 to vector<1x128xf32>
    %396 = arith.subf %395, %389 : vector<1x128xf32>
    %397 = arith.mulf %396, %394 : vector<1x128xf32>
    %398 = arith.mulf %389, %328 : vector<1x128xf32>
    %399 = arith.addf %397, %398 : vector<1x128xf32>
    %400 = arith.index_cast %366 : i32 to index
    %c0_143 = arith.constant 0 : index
    %401 = vector.load %arg15[%400, %c0_143] : memref<8x128xf32, #tpu.memory_space<vmem>>, vector<1x128xf32>
    tpu.vector_store %arg15[%400, %c0_143], %399 {strides = array<i32>} : memref<8x128xf32, #tpu.memory_space<vmem>>, vector<1x128xf32>,
    %c5_i32 = arith.constant 5 : i32
    %402 = arith.truncf %363 : vector<1x128xf32> to vector<1x128xbf16>
    %c0_144 = arith.constant 0 : index
    %c0_145 = arith.constant 0 : index
    %403 = vector.load %arg3[%c0_144, %c0_145] : memref<128x384xbf16, #tpu.memory_space<vmem>>, vector<128x384xbf16>
    %cst_146 = arith.constant dense<0.000000e+00> : vector<1x384xf32>
    %404 = tpu.matmul %402, %403, %cst_146 {dimension_numbers = #tpu.dot_dimension_numbers<[1], [0], [0], [1], [0, 0, 1, 1], [], []>} : vector<1x128xbf16>, vector<128x384xbf16>, vector<1x384xf32> -> vector<1x384xf32>
    %c0_147 = arith.constant 0 : index
    %c0_148 = arith.constant 0 : index
    %405 = vector.load %arg5[%c0_147, %c0_148] : memref<1x384xf32, #tpu.memory_space<vmem>>, vector<1x384xf32>
    %406 = arith.addf %404, %405 : vector<1x384xf32>
    %407 = arith.index_cast %c5_i32 : i32 to index
    %c0_149 = arith.constant 0 : index
    %408 = vector.load %arg13[%407, %c0_149] : memref<8x384xf32, #tpu.memory_space<vmem>>, vector<1x384xf32>
    %409 = vector.extract_strided_slice %408 {offsets = [0, 0], sizes = [1, 128], strides = [1, 1]} : vector<1x384xf32> to vector<1x128xf32>
    %410 = vector.extract_strided_slice %406 {offsets = [0, 0], sizes = [1, 128], strides = [1, 1]} : vector<1x384xf32> to vector<1x128xf32>
    %411 = arith.addf %409, %410 : vector<1x128xf32>
    %412 = arith.negf %411 : vector<1x128xf32>
    %413 = math.exp %412 : vector<1x128xf32>
    %cst_150 = arith.constant 1.000000e+00 : f32
    %414 = vector.broadcast %cst_150 : f32 to vector<1x128xf32>
    %415 = arith.addf %414, %413 : vector<1x128xf32>
    %416 = arith.divf %414, %415 : vector<1x128xf32>
    %417 = vector.extract_strided_slice %408 {offsets = [0, 128], sizes = [1, 128], strides = [1, 1]} : vector<1x384xf32> to vector<1x128xf32>
    %418 = vector.extract_strided_slice %406 {offsets = [0, 128], sizes = [1, 128], strides = [1, 1]} : vector<1x384xf32> to vector<1x128xf32>
    %419 = arith.addf %417, %418 : vector<1x128xf32>
    %420 = arith.negf %419 : vector<1x128xf32>
    %421 = math.exp %420 : vector<1x128xf32>
    %cst_151 = arith.constant 1.000000e+00 : f32
    %422 = vector.broadcast %cst_151 : f32 to vector<1x128xf32>
    %423 = arith.addf %422, %421 : vector<1x128xf32>
    %424 = arith.divf %422, %423 : vector<1x128xf32>
    %425 = vector.extract_strided_slice %408 {offsets = [0, 256], sizes = [1, 128], strides = [1, 1]} : vector<1x384xf32> to vector<1x128xf32>
    %426 = vector.extract_strided_slice %406 {offsets = [0, 256], sizes = [1, 128], strides = [1, 1]} : vector<1x384xf32> to vector<1x128xf32>
    %427 = arith.mulf %416, %426 : vector<1x128xf32>
    %428 = arith.addf %425, %427 : vector<1x128xf32>
    %429 = math.tanh %428 : vector<1x128xf32>
    %cst_152 = arith.constant 1.000000e+00 : f32
    %430 = vector.broadcast %cst_152 : f32 to vector<1x128xf32>
    %431 = arith.subf %430, %424 : vector<1x128xf32>
    %432 = arith.mulf %431, %429 : vector<1x128xf32>
    %433 = arith.mulf %424, %363 : vector<1x128xf32>
    %434 = arith.addf %432, %433 : vector<1x128xf32>
    %435 = arith.index_cast %c5_i32 : i32 to index
    %c0_153 = arith.constant 0 : index
    %436 = vector.load %arg10[%435, %c0_153] : memref<8x128xf32, #tpu.memory_space<vmem>>, vector<1x128xf32>
    tpu.vector_store %arg10[%435, %c0_153], %434 {strides = array<i32>} : memref<8x128xf32, #tpu.memory_space<vmem>>, vector<1x128xf32>,
    %c7_i32_154 = arith.constant 7 : i32
    %437 = arith.subi %c7_i32_154, %c5_i32 : i32
    %438 = arith.truncf %399 : vector<1x128xf32> to vector<1x128xbf16>
    %c0_155 = arith.constant 0 : index
    %c0_156 = arith.constant 0 : index
    %439 = vector.load %arg7[%c0_155, %c0_156] : memref<128x384xbf16, #tpu.memory_space<vmem>>, vector<128x384xbf16>
    %cst_157 = arith.constant dense<0.000000e+00> : vector<1x384xf32>
    %440 = tpu.matmul %438, %439, %cst_157 {dimension_numbers = #tpu.dot_dimension_numbers<[1], [0], [0], [1], [0, 0, 1, 1], [], []>} : vector<1x128xbf16>, vector<128x384xbf16>, vector<1x384xf32> -> vector<1x384xf32>
    %c0_158 = arith.constant 0 : index
    %c0_159 = arith.constant 0 : index
    %441 = vector.load %arg9[%c0_158, %c0_159] : memref<1x384xf32, #tpu.memory_space<vmem>>, vector<1x384xf32>
    %442 = arith.addf %440, %441 : vector<1x384xf32>
    %443 = arith.index_cast %437 : i32 to index
    %c0_160 = arith.constant 0 : index
    %444 = vector.load %arg14[%443, %c0_160] : memref<8x384xf32, #tpu.memory_space<vmem>>, vector<1x384xf32>
    %445 = vector.extract_strided_slice %444 {offsets = [0, 0], sizes = [1, 128], strides = [1, 1]} : vector<1x384xf32> to vector<1x128xf32>
    %446 = vector.extract_strided_slice %442 {offsets = [0, 0], sizes = [1, 128], strides = [1, 1]} : vector<1x384xf32> to vector<1x128xf32>
    %447 = arith.addf %445, %446 : vector<1x128xf32>
    %448 = arith.negf %447 : vector<1x128xf32>
    %449 = math.exp %448 : vector<1x128xf32>
    %cst_161 = arith.constant 1.000000e+00 : f32
    %450 = vector.broadcast %cst_161 : f32 to vector<1x128xf32>
    %451 = arith.addf %450, %449 : vector<1x128xf32>
    %452 = arith.divf %450, %451 : vector<1x128xf32>
    %453 = vector.extract_strided_slice %444 {offsets = [0, 128], sizes = [1, 128], strides = [1, 1]} : vector<1x384xf32> to vector<1x128xf32>
    %454 = vector.extract_strided_slice %442 {offsets = [0, 128], sizes = [1, 128], strides = [1, 1]} : vector<1x384xf32> to vector<1x128xf32>
    %455 = arith.addf %453, %454 : vector<1x128xf32>
    %456 = arith.negf %455 : vector<1x128xf32>
    %457 = math.exp %456 : vector<1x128xf32>
    %cst_162 = arith.constant 1.000000e+00 : f32
    %458 = vector.broadcast %cst_162 : f32 to vector<1x128xf32>
    %459 = arith.addf %458, %457 : vector<1x128xf32>
    %460 = arith.divf %458, %459 : vector<1x128xf32>
    %461 = vector.extract_strided_slice %444 {offsets = [0, 256], sizes = [1, 128], strides = [1, 1]} : vector<1x384xf32> to vector<1x128xf32>
    %462 = vector.extract_strided_slice %442 {offsets = [0, 256], sizes = [1, 128], strides = [1, 1]} : vector<1x384xf32> to vector<1x128xf32>
    %463 = arith.mulf %452, %462 : vector<1x128xf32>
    %464 = arith.addf %461, %463 : vector<1x128xf32>
    %465 = math.tanh %464 : vector<1x128xf32>
    %cst_163 = arith.constant 1.000000e+00 : f32
    %466 = vector.broadcast %cst_163 : f32 to vector<1x128xf32>
    %467 = arith.subf %466, %460 : vector<1x128xf32>
    %468 = arith.mulf %467, %465 : vector<1x128xf32>
    %469 = arith.mulf %460, %399 : vector<1x128xf32>
    %470 = arith.addf %468, %469 : vector<1x128xf32>
    %471 = arith.index_cast %437 : i32 to index
    %c0_164 = arith.constant 0 : index
    %472 = vector.load %arg15[%471, %c0_164] : memref<8x128xf32, #tpu.memory_space<vmem>>, vector<1x128xf32>
    tpu.vector_store %arg15[%471, %c0_164], %470 {strides = array<i32>} : memref<8x128xf32, #tpu.memory_space<vmem>>, vector<1x128xf32>,
    %c6_i32 = arith.constant 6 : i32
    %473 = arith.truncf %434 : vector<1x128xf32> to vector<1x128xbf16>
    %c0_165 = arith.constant 0 : index
    %c0_166 = arith.constant 0 : index
    %474 = vector.load %arg3[%c0_165, %c0_166] : memref<128x384xbf16, #tpu.memory_space<vmem>>, vector<128x384xbf16>
    %cst_167 = arith.constant dense<0.000000e+00> : vector<1x384xf32>
    %475 = tpu.matmul %473, %474, %cst_167 {dimension_numbers = #tpu.dot_dimension_numbers<[1], [0], [0], [1], [0, 0, 1, 1], [], []>} : vector<1x128xbf16>, vector<128x384xbf16>, vector<1x384xf32> -> vector<1x384xf32>
    %c0_168 = arith.constant 0 : index
    %c0_169 = arith.constant 0 : index
    %476 = vector.load %arg5[%c0_168, %c0_169] : memref<1x384xf32, #tpu.memory_space<vmem>>, vector<1x384xf32>
    %477 = arith.addf %475, %476 : vector<1x384xf32>
    %478 = arith.index_cast %c6_i32 : i32 to index
    %c0_170 = arith.constant 0 : index
    %479 = vector.load %arg13[%478, %c0_170] : memref<8x384xf32, #tpu.memory_space<vmem>>, vector<1x384xf32>
    %480 = vector.extract_strided_slice %479 {offsets = [0, 0], sizes = [1, 128], strides = [1, 1]} : vector<1x384xf32> to vector<1x128xf32>
    %481 = vector.extract_strided_slice %477 {offsets = [0, 0], sizes = [1, 128], strides = [1, 1]} : vector<1x384xf32> to vector<1x128xf32>
    %482 = arith.addf %480, %481 : vector<1x128xf32>
    %483 = arith.negf %482 : vector<1x128xf32>
    %484 = math.exp %483 : vector<1x128xf32>
    %cst_171 = arith.constant 1.000000e+00 : f32
    %485 = vector.broadcast %cst_171 : f32 to vector<1x128xf32>
    %486 = arith.addf %485, %484 : vector<1x128xf32>
    %487 = arith.divf %485, %486 : vector<1x128xf32>
    %488 = vector.extract_strided_slice %479 {offsets = [0, 128], sizes = [1, 128], strides = [1, 1]} : vector<1x384xf32> to vector<1x128xf32>
    %489 = vector.extract_strided_slice %477 {offsets = [0, 128], sizes = [1, 128], strides = [1, 1]} : vector<1x384xf32> to vector<1x128xf32>
    %490 = arith.addf %488, %489 : vector<1x128xf32>
    %491 = arith.negf %490 : vector<1x128xf32>
    %492 = math.exp %491 : vector<1x128xf32>
    %cst_172 = arith.constant 1.000000e+00 : f32
    %493 = vector.broadcast %cst_172 : f32 to vector<1x128xf32>
    %494 = arith.addf %493, %492 : vector<1x128xf32>
    %495 = arith.divf %493, %494 : vector<1x128xf32>
    %496 = vector.extract_strided_slice %479 {offsets = [0, 256], sizes = [1, 128], strides = [1, 1]} : vector<1x384xf32> to vector<1x128xf32>
    %497 = vector.extract_strided_slice %477 {offsets = [0, 256], sizes = [1, 128], strides = [1, 1]} : vector<1x384xf32> to vector<1x128xf32>
    %498 = arith.mulf %487, %497 : vector<1x128xf32>
    %499 = arith.addf %496, %498 : vector<1x128xf32>
    %500 = math.tanh %499 : vector<1x128xf32>
    %cst_173 = arith.constant 1.000000e+00 : f32
    %501 = vector.broadcast %cst_173 : f32 to vector<1x128xf32>
    %502 = arith.subf %501, %495 : vector<1x128xf32>
    %503 = arith.mulf %502, %500 : vector<1x128xf32>
    %504 = arith.mulf %495, %434 : vector<1x128xf32>
    %505 = arith.addf %503, %504 : vector<1x128xf32>
    %506 = arith.index_cast %c6_i32 : i32 to index
    %c0_174 = arith.constant 0 : index
    %507 = vector.load %arg10[%506, %c0_174] : memref<8x128xf32, #tpu.memory_space<vmem>>, vector<1x128xf32>
    tpu.vector_store %arg10[%506, %c0_174], %505 {strides = array<i32>} : memref<8x128xf32, #tpu.memory_space<vmem>>, vector<1x128xf32>,
    %c7_i32_175 = arith.constant 7 : i32
    %508 = arith.subi %c7_i32_175, %c6_i32 : i32
    %509 = arith.truncf %470 : vector<1x128xf32> to vector<1x128xbf16>
    %c0_176 = arith.constant 0 : index
    %c0_177 = arith.constant 0 : index
    %510 = vector.load %arg7[%c0_176, %c0_177] : memref<128x384xbf16, #tpu.memory_space<vmem>>, vector<128x384xbf16>
    %cst_178 = arith.constant dense<0.000000e+00> : vector<1x384xf32>
    %511 = tpu.matmul %509, %510, %cst_178 {dimension_numbers = #tpu.dot_dimension_numbers<[1], [0], [0], [1], [0, 0, 1, 1], [], []>} : vector<1x128xbf16>, vector<128x384xbf16>, vector<1x384xf32> -> vector<1x384xf32>
    %c0_179 = arith.constant 0 : index
    %c0_180 = arith.constant 0 : index
    %512 = vector.load %arg9[%c0_179, %c0_180] : memref<1x384xf32, #tpu.memory_space<vmem>>, vector<1x384xf32>
    %513 = arith.addf %511, %512 : vector<1x384xf32>
    %514 = arith.index_cast %508 : i32 to index
    %c0_181 = arith.constant 0 : index
    %515 = vector.load %arg14[%514, %c0_181] : memref<8x384xf32, #tpu.memory_space<vmem>>, vector<1x384xf32>
    %516 = vector.extract_strided_slice %515 {offsets = [0, 0], sizes = [1, 128], strides = [1, 1]} : vector<1x384xf32> to vector<1x128xf32>
    %517 = vector.extract_strided_slice %513 {offsets = [0, 0], sizes = [1, 128], strides = [1, 1]} : vector<1x384xf32> to vector<1x128xf32>
    %518 = arith.addf %516, %517 : vector<1x128xf32>
    %519 = arith.negf %518 : vector<1x128xf32>
    %520 = math.exp %519 : vector<1x128xf32>
    %cst_182 = arith.constant 1.000000e+00 : f32
    %521 = vector.broadcast %cst_182 : f32 to vector<1x128xf32>
    %522 = arith.addf %521, %520 : vector<1x128xf32>
    %523 = arith.divf %521, %522 : vector<1x128xf32>
    %524 = vector.extract_strided_slice %515 {offsets = [0, 128], sizes = [1, 128], strides = [1, 1]} : vector<1x384xf32> to vector<1x128xf32>
    %525 = vector.extract_strided_slice %513 {offsets = [0, 128], sizes = [1, 128], strides = [1, 1]} : vector<1x384xf32> to vector<1x128xf32>
    %526 = arith.addf %524, %525 : vector<1x128xf32>
    %527 = arith.negf %526 : vector<1x128xf32>
    %528 = math.exp %527 : vector<1x128xf32>
    %cst_183 = arith.constant 1.000000e+00 : f32
    %529 = vector.broadcast %cst_183 : f32 to vector<1x128xf32>
    %530 = arith.addf %529, %528 : vector<1x128xf32>
    %531 = arith.divf %529, %530 : vector<1x128xf32>
    %532 = vector.extract_strided_slice %515 {offsets = [0, 256], sizes = [1, 128], strides = [1, 1]} : vector<1x384xf32> to vector<1x128xf32>
    %533 = vector.extract_strided_slice %513 {offsets = [0, 256], sizes = [1, 128], strides = [1, 1]} : vector<1x384xf32> to vector<1x128xf32>
    %534 = arith.mulf %523, %533 : vector<1x128xf32>
    %535 = arith.addf %532, %534 : vector<1x128xf32>
    %536 = math.tanh %535 : vector<1x128xf32>
    %cst_184 = arith.constant 1.000000e+00 : f32
    %537 = vector.broadcast %cst_184 : f32 to vector<1x128xf32>
    %538 = arith.subf %537, %531 : vector<1x128xf32>
    %539 = arith.mulf %538, %536 : vector<1x128xf32>
    %540 = arith.mulf %531, %470 : vector<1x128xf32>
    %541 = arith.addf %539, %540 : vector<1x128xf32>
    %542 = arith.index_cast %508 : i32 to index
    %c0_185 = arith.constant 0 : index
    %543 = vector.load %arg15[%542, %c0_185] : memref<8x128xf32, #tpu.memory_space<vmem>>, vector<1x128xf32>
    tpu.vector_store %arg15[%542, %c0_185], %541 {strides = array<i32>} : memref<8x128xf32, #tpu.memory_space<vmem>>, vector<1x128xf32>,
    %c7_i32_186 = arith.constant 7 : i32
    %544 = arith.truncf %505 : vector<1x128xf32> to vector<1x128xbf16>
    %c0_187 = arith.constant 0 : index
    %c0_188 = arith.constant 0 : index
    %545 = vector.load %arg3[%c0_187, %c0_188] : memref<128x384xbf16, #tpu.memory_space<vmem>>, vector<128x384xbf16>
    %cst_189 = arith.constant dense<0.000000e+00> : vector<1x384xf32>
    %546 = tpu.matmul %544, %545, %cst_189 {dimension_numbers = #tpu.dot_dimension_numbers<[1], [0], [0], [1], [0, 0, 1, 1], [], []>} : vector<1x128xbf16>, vector<128x384xbf16>, vector<1x384xf32> -> vector<1x384xf32>
    %c0_190 = arith.constant 0 : index
    %c0_191 = arith.constant 0 : index
    %547 = vector.load %arg5[%c0_190, %c0_191] : memref<1x384xf32, #tpu.memory_space<vmem>>, vector<1x384xf32>
    %548 = arith.addf %546, %547 : vector<1x384xf32>
    %549 = arith.index_cast %c7_i32_186 : i32 to index
    %c0_192 = arith.constant 0 : index
    %550 = vector.load %arg13[%549, %c0_192] : memref<8x384xf32, #tpu.memory_space<vmem>>, vector<1x384xf32>
    %551 = vector.extract_strided_slice %550 {offsets = [0, 0], sizes = [1, 128], strides = [1, 1]} : vector<1x384xf32> to vector<1x128xf32>
    %552 = vector.extract_strided_slice %548 {offsets = [0, 0], sizes = [1, 128], strides = [1, 1]} : vector<1x384xf32> to vector<1x128xf32>
    %553 = arith.addf %551, %552 : vector<1x128xf32>
    %554 = arith.negf %553 : vector<1x128xf32>
    %555 = math.exp %554 : vector<1x128xf32>
    %cst_193 = arith.constant 1.000000e+00 : f32
    %556 = vector.broadcast %cst_193 : f32 to vector<1x128xf32>
    %557 = arith.addf %556, %555 : vector<1x128xf32>
    %558 = arith.divf %556, %557 : vector<1x128xf32>
    %559 = vector.extract_strided_slice %550 {offsets = [0, 128], sizes = [1, 128], strides = [1, 1]} : vector<1x384xf32> to vector<1x128xf32>
    %560 = vector.extract_strided_slice %548 {offsets = [0, 128], sizes = [1, 128], strides = [1, 1]} : vector<1x384xf32> to vector<1x128xf32>
    %561 = arith.addf %559, %560 : vector<1x128xf32>
    %562 = arith.negf %561 : vector<1x128xf32>
    %563 = math.exp %562 : vector<1x128xf32>
    %cst_194 = arith.constant 1.000000e+00 : f32
    %564 = vector.broadcast %cst_194 : f32 to vector<1x128xf32>
    %565 = arith.addf %564, %563 : vector<1x128xf32>
    %566 = arith.divf %564, %565 : vector<1x128xf32>
    %567 = vector.extract_strided_slice %550 {offsets = [0, 256], sizes = [1, 128], strides = [1, 1]} : vector<1x384xf32> to vector<1x128xf32>
    %568 = vector.extract_strided_slice %548 {offsets = [0, 256], sizes = [1, 128], strides = [1, 1]} : vector<1x384xf32> to vector<1x128xf32>
    %569 = arith.mulf %558, %568 : vector<1x128xf32>
    %570 = arith.addf %567, %569 : vector<1x128xf32>
    %571 = math.tanh %570 : vector<1x128xf32>
    %cst_195 = arith.constant 1.000000e+00 : f32
    %572 = vector.broadcast %cst_195 : f32 to vector<1x128xf32>
    %573 = arith.subf %572, %566 : vector<1x128xf32>
    %574 = arith.mulf %573, %571 : vector<1x128xf32>
    %575 = arith.mulf %566, %505 : vector<1x128xf32>
    %576 = arith.addf %574, %575 : vector<1x128xf32>
    %577 = arith.index_cast %c7_i32_186 : i32 to index
    %c0_196 = arith.constant 0 : index
    %578 = vector.load %arg10[%577, %c0_196] : memref<8x128xf32, #tpu.memory_space<vmem>>, vector<1x128xf32>
    tpu.vector_store %arg10[%577, %c0_196], %576 {strides = array<i32>} : memref<8x128xf32, #tpu.memory_space<vmem>>, vector<1x128xf32>,
    %c7_i32_197 = arith.constant 7 : i32
    %579 = arith.subi %c7_i32_197, %c7_i32_186 : i32
    %580 = arith.truncf %541 : vector<1x128xf32> to vector<1x128xbf16>
    %c0_198 = arith.constant 0 : index
    %c0_199 = arith.constant 0 : index
    %581 = vector.load %arg7[%c0_198, %c0_199] : memref<128x384xbf16, #tpu.memory_space<vmem>>, vector<128x384xbf16>
    %cst_200 = arith.constant dense<0.000000e+00> : vector<1x384xf32>
    %582 = tpu.matmul %580, %581, %cst_200 {dimension_numbers = #tpu.dot_dimension_numbers<[1], [0], [0], [1], [0, 0, 1, 1], [], []>} : vector<1x128xbf16>, vector<128x384xbf16>, vector<1x384xf32> -> vector<1x384xf32>
    %c0_201 = arith.constant 0 : index
    %c0_202 = arith.constant 0 : index
    %583 = vector.load %arg9[%c0_201, %c0_202] : memref<1x384xf32, #tpu.memory_space<vmem>>, vector<1x384xf32>
    %584 = arith.addf %582, %583 : vector<1x384xf32>
    %585 = arith.index_cast %579 : i32 to index
    %c0_203 = arith.constant 0 : index
    %586 = vector.load %arg14[%585, %c0_203] : memref<8x384xf32, #tpu.memory_space<vmem>>, vector<1x384xf32>
    %587 = vector.extract_strided_slice %586 {offsets = [0, 0], sizes = [1, 128], strides = [1, 1]} : vector<1x384xf32> to vector<1x128xf32>
    %588 = vector.extract_strided_slice %584 {offsets = [0, 0], sizes = [1, 128], strides = [1, 1]} : vector<1x384xf32> to vector<1x128xf32>
    %589 = arith.addf %587, %588 : vector<1x128xf32>
    %590 = arith.negf %589 : vector<1x128xf32>
    %591 = math.exp %590 : vector<1x128xf32>
    %cst_204 = arith.constant 1.000000e+00 : f32
    %592 = vector.broadcast %cst_204 : f32 to vector<1x128xf32>
    %593 = arith.addf %592, %591 : vector<1x128xf32>
    %594 = arith.divf %592, %593 : vector<1x128xf32>
    %595 = vector.extract_strided_slice %586 {offsets = [0, 128], sizes = [1, 128], strides = [1, 1]} : vector<1x384xf32> to vector<1x128xf32>
    %596 = vector.extract_strided_slice %584 {offsets = [0, 128], sizes = [1, 128], strides = [1, 1]} : vector<1x384xf32> to vector<1x128xf32>
    %597 = arith.addf %595, %596 : vector<1x128xf32>
    %598 = arith.negf %597 : vector<1x128xf32>
    %599 = math.exp %598 : vector<1x128xf32>
    %cst_205 = arith.constant 1.000000e+00 : f32
    %600 = vector.broadcast %cst_205 : f32 to vector<1x128xf32>
    %601 = arith.addf %600, %599 : vector<1x128xf32>
    %602 = arith.divf %600, %601 : vector<1x128xf32>
    %603 = vector.extract_strided_slice %586 {offsets = [0, 256], sizes = [1, 128], strides = [1, 1]} : vector<1x384xf32> to vector<1x128xf32>
    %604 = vector.extract_strided_slice %584 {offsets = [0, 256], sizes = [1, 128], strides = [1, 1]} : vector<1x384xf32> to vector<1x128xf32>
    %605 = arith.mulf %594, %604 : vector<1x128xf32>
    %606 = arith.addf %603, %605 : vector<1x128xf32>
    %607 = math.tanh %606 : vector<1x128xf32>
    %cst_206 = arith.constant 1.000000e+00 : f32
    %608 = vector.broadcast %cst_206 : f32 to vector<1x128xf32>
    %609 = arith.subf %608, %602 : vector<1x128xf32>
    %610 = arith.mulf %609, %607 : vector<1x128xf32>
    %611 = arith.mulf %602, %541 : vector<1x128xf32>
    %612 = arith.addf %610, %611 : vector<1x128xf32>
    %613 = arith.index_cast %579 : i32 to index
    %c0_207 = arith.constant 0 : index
    %614 = vector.load %arg15[%613, %c0_207] : memref<8x128xf32, #tpu.memory_space<vmem>>, vector<1x128xf32>
    tpu.vector_store %arg15[%613, %c0_207], %612 {strides = array<i32>} : memref<8x128xf32, #tpu.memory_space<vmem>>, vector<1x128xf32>,
    %c8_i32 = arith.constant 8 : i32
    %c0_208 = arith.constant 0 : index
    %c0_209 = arith.constant 0 : index
    %615 = vector.load %arg11[%c0_208, %c0_209] : memref<1x128xf32, #tpu.memory_space<vmem>>, vector<1x128xf32>
    tpu.vector_store %arg11[%c0_208, %c0_209], %576 {strides = array<i32>} : memref<1x128xf32, #tpu.memory_space<vmem>>, vector<1x128xf32>,
    %c0_210 = arith.constant 0 : index
    %c0_211 = arith.constant 0 : index
    %616 = vector.load %arg10[%c0_210, %c0_211] : memref<8x128xf32, #tpu.memory_space<vmem>>, vector<8x128xf32>
    %c0_212 = arith.constant 0 : index
    %c0_213 = arith.constant 0 : index
    %617 = vector.load %arg15[%c0_212, %c0_213] : memref<8x128xf32, #tpu.memory_space<vmem>>, vector<8x128xf32>
    %618 = arith.addf %616, %617 : vector<8x128xf32>
    %c0_214 = arith.constant 0 : index
    %c0_215 = arith.constant 0 : index
    %619 = vector.load %arg10[%c0_214, %c0_215] : memref<8x128xf32, #tpu.memory_space<vmem>>, vector<8x128xf32>
    tpu.vector_store %arg10[%c0_214, %c0_215], %618 {strides = array<i32>} : memref<8x128xf32, #tpu.memory_space<vmem>>, vector<8x128xf32>,
    return
  }
}

module attributes {stable_mosaic.version = 11 : i64} {
  func.func @decode_kernel(%arg0: memref<64x128xf32, #tpu.memory_space<vmem>>, %arg1: memref<1x128xf32, #tpu.memory_space<vmem>>, %arg2: memref<8x128xf32, #tpu.memory_space<vmem>>, %arg3: memref<128x8xbf16, #tpu.memory_space<vmem>>, %arg4: memref<128x384xbf16, #tpu.memory_space<vmem>>, %arg5: memref<128x384xbf16, #tpu.memory_space<vmem>>, %arg6: memref<1x384xf32, #tpu.memory_space<vmem>>, %arg7: memref<1x384xf32, #tpu.memory_space<vmem>>, %arg8: memref<256x128xbf16, #tpu.memory_space<vmem>>, %arg9: memref<1x128xf32, #tpu.memory_space<vmem>>, %arg10: memref<128x128xbf16, #tpu.memory_space<vmem>>, %arg11: memref<1x128xf32, #tpu.memory_space<vmem>>, %arg12: memref<6xi32, #tpu.memory_space<smem>>, %arg13: memref<6xf32, #tpu.memory_space<smem>>, %arg14: memref<1x256xf32, #tpu.memory_space<vmem>>) attributes {dimension_semantics = [], scalar_prefetch = 0 : i64, scratch_operands = 1 : i64, tpu.core_type = #tpu.core_type<tc>} {
    %0 = tpu.iota {dimensions = array<i32: 1>} : vector<1x128xi32>
    %c0 = arith.constant 0 : index
    %c0_0 = arith.constant 0 : index
    %1 = vector.load %arg1[%c0, %c0_0] : memref<1x128xf32, #tpu.memory_space<vmem>>, vector<1x128xf32>
    %c1_i32 = arith.constant 1 : i32
    %c0_i32 = arith.constant 0 : i32
    %2 = arith.index_cast %c1_i32 : i32 to index
    %c0_1 = arith.constant 0 : index
    %3 = vector.load %arg0[%2, %c0_1] : memref<64x128xf32, #tpu.memory_space<vmem>>, vector<1x128xf32>
    %4 = arith.truncf %3 : vector<1x128xf32> to vector<1x128xbf16>
    %c0_2 = arith.constant 0 : index
    %c0_3 = arith.constant 0 : index
    %5 = vector.load %arg4[%c0_2, %c0_3] : memref<128x384xbf16, #tpu.memory_space<vmem>>, vector<128x384xbf16>
    %cst = arith.constant dense<0.000000e+00> : vector<1x384xf32>
    %6 = tpu.matmul %4, %5, %cst {dimension_numbers = #tpu.dot_dimension_numbers<[1], [0], [0], [1], [0, 0, 1, 1], [], []>} : vector<1x128xbf16>, vector<128x384xbf16>, vector<1x384xf32> -> vector<1x384xf32>
    %c0_4 = arith.constant 0 : index
    %c0_5 = arith.constant 0 : index
    %7 = vector.load %arg6[%c0_4, %c0_5] : memref<1x384xf32, #tpu.memory_space<vmem>>, vector<1x384xf32>
    %8 = arith.addf %6, %7 : vector<1x384xf32>
    %9 = arith.truncf %1 : vector<1x128xf32> to vector<1x128xbf16>
    %c0_6 = arith.constant 0 : index
    %c0_7 = arith.constant 0 : index
    %10 = vector.load %arg5[%c0_6, %c0_7] : memref<128x384xbf16, #tpu.memory_space<vmem>>, vector<128x384xbf16>
    %cst_8 = arith.constant dense<0.000000e+00> : vector<1x384xf32>
    %11 = tpu.matmul %9, %10, %cst_8 {dimension_numbers = #tpu.dot_dimension_numbers<[1], [0], [0], [1], [0, 0, 1, 1], [], []>} : vector<1x128xbf16>, vector<128x384xbf16>, vector<1x384xf32> -> vector<1x384xf32>
    %c0_9 = arith.constant 0 : index
    %c0_10 = arith.constant 0 : index
    %12 = vector.load %arg7[%c0_9, %c0_10] : memref<1x384xf32, #tpu.memory_space<vmem>>, vector<1x384xf32>
    %13 = arith.addf %11, %12 : vector<1x384xf32>
    %14 = vector.extract_strided_slice %8 {offsets = [0, 0], sizes = [1, 128], strides = [1, 1]} : vector<1x384xf32> to vector<1x128xf32>
    %15 = vector.extract_strided_slice %13 {offsets = [0, 0], sizes = [1, 128], strides = [1, 1]} : vector<1x384xf32> to vector<1x128xf32>
    %16 = arith.addf %14, %15 : vector<1x128xf32>
    %17 = arith.negf %16 : vector<1x128xf32>
    %18 = math.exp %17 : vector<1x128xf32>
    %cst_11 = arith.constant 1.000000e+00 : f32
    %19 = vector.broadcast %cst_11 : f32 to vector<1x128xf32>
    %20 = arith.addf %19, %18 : vector<1x128xf32>
    %21 = arith.divf %19, %20 : vector<1x128xf32>
    %22 = vector.extract_strided_slice %8 {offsets = [0, 128], sizes = [1, 128], strides = [1, 1]} : vector<1x384xf32> to vector<1x128xf32>
    %23 = vector.extract_strided_slice %13 {offsets = [0, 128], sizes = [1, 128], strides = [1, 1]} : vector<1x384xf32> to vector<1x128xf32>
    %24 = arith.addf %22, %23 : vector<1x128xf32>
    %25 = arith.negf %24 : vector<1x128xf32>
    %26 = math.exp %25 : vector<1x128xf32>
    %cst_12 = arith.constant 1.000000e+00 : f32
    %27 = vector.broadcast %cst_12 : f32 to vector<1x128xf32>
    %28 = arith.addf %27, %26 : vector<1x128xf32>
    %29 = arith.divf %27, %28 : vector<1x128xf32>
    %30 = vector.extract_strided_slice %8 {offsets = [0, 256], sizes = [1, 128], strides = [1, 1]} : vector<1x384xf32> to vector<1x128xf32>
    %31 = vector.extract_strided_slice %13 {offsets = [0, 256], sizes = [1, 128], strides = [1, 1]} : vector<1x384xf32> to vector<1x128xf32>
    %32 = arith.mulf %21, %31 : vector<1x128xf32>
    %33 = arith.addf %30, %32 : vector<1x128xf32>
    %34 = math.tanh %33 : vector<1x128xf32>
    %cst_13 = arith.constant 1.000000e+00 : f32
    %35 = vector.broadcast %cst_13 : f32 to vector<1x128xf32>
    %36 = arith.subf %35, %29 : vector<1x128xf32>
    %37 = arith.mulf %36, %34 : vector<1x128xf32>
    %38 = arith.mulf %29, %1 : vector<1x128xf32>
    %39 = arith.addf %37, %38 : vector<1x128xf32>
    %40 = arith.truncf %39 : vector<1x128xf32> to vector<1x128xbf16>
    %c0_14 = arith.constant 0 : index
    %c0_15 = arith.constant 0 : index
    %41 = vector.load %arg3[%c0_14, %c0_15] : memref<128x8xbf16, #tpu.memory_space<vmem>>, vector<128x8xbf16>
    %cst_16 = arith.constant dense<0.000000e+00> : vector<1x8xf32>
    %42 = tpu.matmul %40, %41, %cst_16 {dimension_numbers = #tpu.dot_dimension_numbers<[1], [0], [0], [1], [0, 0, 1, 1], [], []>} : vector<1x128xbf16>, vector<128x8xbf16>, vector<1x8xf32> -> vector<1x8xf32>
    %cst_17 = arith.constant dense<0xFF800000> : vector<1xf32>
    %43 = vector.multi_reduction <maximumf>, %42, %cst_17 [1] : vector<1x8xf32> to vector<1xf32>
    %44 = vector.shape_cast %43 : vector<1xf32> to vector<1x1xf32>
    %45 = vector.broadcast %44 : vector<1x1xf32> to vector<1x8xf32>
    %46 = arith.subf %42, %45 : vector<1x8xf32>
    %47 = math.exp %46 : vector<1x8xf32>
    %cst_18 = arith.constant dense<0.000000e+00> : vector<1xf32>
    %48 = vector.multi_reduction <add>, %47, %cst_18 [1] : vector<1x8xf32> to vector<1xf32>
    %49 = vector.shape_cast %48 : vector<1xf32> to vector<1x1xf32>
    %50 = tpu.reciprocal %49 {approx = true} : vector<1x1xf32> -> vector<1x1xf32>
    %51 = vector.broadcast %50 : vector<1x1xf32> to vector<1x8xf32>
    %52 = arith.mulf %47, %51 : vector<1x8xf32>
    %c0_19 = arith.constant 0 : index
    %c0_20 = arith.constant 0 : index
    %53 = vector.load %arg2[%c0_19, %c0_20] : memref<8x128xf32, #tpu.memory_space<vmem>>, vector<8x128xf32>
    %cst_21 = arith.constant dense<0.000000e+00> : vector<1x128xf32>
    %54 = tpu.matmul %52, %53, %cst_21 {dimension_numbers = #tpu.dot_dimension_numbers<[1], [0], [0], [1], [0, 0, 1, 1], [], []>} : vector<1x8xf32>, vector<8x128xf32>, vector<1x128xf32> -> vector<1x128xf32>
    %c0_22 = arith.constant 0 : index
    %c0_23 = arith.constant 0 : index
    %55 = vector.load %arg14[%c0_22, %c0_23] : memref<1x256xf32, #tpu.memory_space<vmem>>, vector<1x128xf32>
    tpu.vector_store %arg14[%c0_22, %c0_23], %39 {strides = array<i32>} : memref<1x256xf32, #tpu.memory_space<vmem>>, vector<1x128xf32>,
    %c0_24 = arith.constant 0 : index
    %c128 = arith.constant 128 : index
    %56 = vector.load %arg14[%c0_24, %c128] : memref<1x256xf32, #tpu.memory_space<vmem>>, vector<1x128xf32>
    tpu.vector_store %arg14[%c0_24, %c128], %54 {strides = array<i32>} : memref<1x256xf32, #tpu.memory_space<vmem>>, vector<1x128xf32>,
    %c0_25 = arith.constant 0 : index
    %c0_26 = arith.constant 0 : index
    %57 = vector.load %arg14[%c0_25, %c0_26] : memref<1x256xf32, #tpu.memory_space<vmem>>, vector<1x256xf32>
    %58 = arith.truncf %57 : vector<1x256xf32> to vector<1x256xbf16>
    %c0_27 = arith.constant 0 : index
    %c0_28 = arith.constant 0 : index
    %59 = vector.load %arg8[%c0_27, %c0_28] : memref<256x128xbf16, #tpu.memory_space<vmem>>, vector<256x128xbf16>
    %cst_29 = arith.constant dense<0.000000e+00> : vector<1x128xf32>
    %60 = tpu.matmul %58, %59, %cst_29 {dimension_numbers = #tpu.dot_dimension_numbers<[1], [0], [0], [1], [0, 0, 1, 1], [], []>} : vector<1x256xbf16>, vector<256x128xbf16>, vector<1x128xf32> -> vector<1x128xf32>
    %c0_30 = arith.constant 0 : index
    %c0_31 = arith.constant 0 : index
    %61 = vector.load %arg9[%c0_30, %c0_31] : memref<1x128xf32, #tpu.memory_space<vmem>>, vector<1x128xf32>
    %62 = arith.addf %60, %61 : vector<1x128xf32>
    %63 = math.tanh %62 : vector<1x128xf32>
    %64 = arith.truncf %63 : vector<1x128xf32> to vector<1x128xbf16>
    %cst_32 = arith.constant 0xFF800000 : f32
    %65 = vector.broadcast %cst_32 : f32 to vector<1x1xf32>
    %c0_i32_33 = arith.constant 0 : i32
    %66 = vector.broadcast %c0_i32_33 : i32 to vector<1x1xi32>
    %cst_34 = arith.constant 0.000000e+00 : f32
    %67 = vector.broadcast %cst_34 : f32 to vector<1x1xf32>
    %c0_35 = arith.constant 0 : index
    %c0_36 = arith.constant 0 : index
    %68 = vector.load %arg10[%c0_35, %c0_36] : memref<128x128xbf16, #tpu.memory_space<vmem>>, vector<128x128xbf16>
    %cst_37 = arith.constant dense<0.000000e+00> : vector<1x128xf32>
    %69 = tpu.matmul %64, %68, %cst_37 {dimension_numbers = #tpu.dot_dimension_numbers<[1], [0], [0], [1], [0, 0, 1, 1], [], []>} : vector<1x128xbf16>, vector<128x128xbf16>, vector<1x128xf32> -> vector<1x128xf32>
    %c0_38 = arith.constant 0 : index
    %c0_39 = arith.constant 0 : index
    %70 = vector.load %arg11[%c0_38, %c0_39] : memref<1x128xf32, #tpu.memory_space<vmem>>, vector<1x128xf32>
    %71 = arith.addf %69, %70 : vector<1x128xf32>
    %cst_40 = arith.constant dense<0xFF800000> : vector<1xf32>
    %72 = vector.multi_reduction <maximumf>, %71, %cst_40 [1] : vector<1x128xf32> to vector<1xf32>
    %73 = vector.shape_cast %72 : vector<1xf32> to vector<1x1xf32>
    %74 = vector.broadcast %73 : vector<1x1xf32> to vector<1x128xf32>
    %75 = arith.cmpf oeq, %71, %74 : vector<1x128xf32>
    %c0_i32_41 = arith.constant 0 : i32
    %76 = vector.broadcast %c0_i32_41 : i32 to vector<1x128xi32>
    %77 = arith.addi %0, %76 : vector<1x128xi32>
    %c128_i32 = arith.constant 128 : i32
    %78 = vector.broadcast %c128_i32 : i32 to vector<1x128xi32>
    %79 = arith.select %75, %77, %78 : vector<1x128xi1>, vector<1x128xi32>
    %cst_42 = arith.constant dense<2147483647> : vector<1xi32>
    %80 = vector.multi_reduction <minsi>, %79, %cst_42 [1] : vector<1x128xi32> to vector<1xi32>
    %81 = vector.shape_cast %80 : vector<1xi32> to vector<1x1xi32>
    %82 = arith.maximumf %65, %73 : vector<1x1xf32>
    %83 = arith.subf %65, %82 : vector<1x1xf32>
    %84 = math.exp %83 : vector<1x1xf32>
    %85 = arith.mulf %67, %84 : vector<1x1xf32>
    %86 = vector.broadcast %82 : vector<1x1xf32> to vector<1x128xf32>
    %87 = arith.subf %71, %86 : vector<1x128xf32>
    %88 = math.exp %87 : vector<1x128xf32>
    %cst_43 = arith.constant dense<0.000000e+00> : vector<1xf32>
    %89 = vector.multi_reduction <add>, %88, %cst_43 [1] : vector<1x128xf32> to vector<1xf32>
    %90 = vector.shape_cast %89 : vector<1xf32> to vector<1x1xf32>
    %91 = arith.addf %85, %90 : vector<1x1xf32>
    %92 = arith.cmpf ogt, %73, %65 : vector<1x1xf32>
    %93 = arith.select %92, %81, %66 : vector<1x1xi1>, vector<1x1xi32>
    %94 = vector.shape_cast %93 : vector<1x1xi32> to vector<1x1x1xi32>
    %cst_44 = arith.constant dense<-2147483648> : vector<1xi32>
    %95 = vector.multi_reduction <maxsi>, %94, %cst_44 [1, 2] : vector<1x1x1xi32> to vector<1xi32>
    %96 = vector.shape_cast %95 : vector<1xi32> to vector<1x1x1xi32>
    %97 = vector.extract %96[0, 0, 0] : i32 from vector<1x1x1xi32>
    %98 = arith.index_cast %c0_i32 : i32 to index
    %99 = memref.load %arg12[%98] : memref<6xi32, #tpu.memory_space<smem>>
    memref.store %97, %arg12[%98] : memref<6xi32, #tpu.memory_space<smem>>
    %cst_45 = arith.constant 1.000000e+00 : f32
    %100 = vector.broadcast %cst_45 : f32 to vector<1x1xf32>
    %101 = arith.divf %100, %91 : vector<1x1xf32>
    %102 = vector.shape_cast %101 : vector<1x1xf32> to vector<1x1x1xf32>
    %cst_46 = arith.constant dense<0xFF800000> : vector<1xf32>
    %103 = vector.multi_reduction <maximumf>, %102, %cst_46 [1, 2] : vector<1x1x1xf32> to vector<1xf32>
    %104 = vector.shape_cast %103 : vector<1xf32> to vector<1x1x1xf32>
    %105 = vector.extract %104[0, 0, 0] : f32 from vector<1x1x1xf32>
    %106 = arith.index_cast %c0_i32 : i32 to index
    %107 = memref.load %arg13[%106] : memref<6xf32, #tpu.memory_space<smem>>
    memref.store %105, %arg13[%106] : memref<6xf32, #tpu.memory_space<smem>>
    %c1_i32_47 = arith.constant 1 : i32
    %108 = arith.index_cast %97 : i32 to index
    %c0_48 = arith.constant 0 : index
    %109 = vector.load %arg0[%108, %c0_48] : memref<64x128xf32, #tpu.memory_space<vmem>>, vector<1x128xf32>
    %110 = arith.truncf %109 : vector<1x128xf32> to vector<1x128xbf16>
    %c0_49 = arith.constant 0 : index
    %c0_50 = arith.constant 0 : index
    %111 = vector.load %arg4[%c0_49, %c0_50] : memref<128x384xbf16, #tpu.memory_space<vmem>>, vector<128x384xbf16>
    %cst_51 = arith.constant dense<0.000000e+00> : vector<1x384xf32>
    %112 = tpu.matmul %110, %111, %cst_51 {dimension_numbers = #tpu.dot_dimension_numbers<[1], [0], [0], [1], [0, 0, 1, 1], [], []>} : vector<1x128xbf16>, vector<128x384xbf16>, vector<1x384xf32> -> vector<1x384xf32>
    %c0_52 = arith.constant 0 : index
    %c0_53 = arith.constant 0 : index
    %113 = vector.load %arg6[%c0_52, %c0_53] : memref<1x384xf32, #tpu.memory_space<vmem>>, vector<1x384xf32>
    %114 = arith.addf %112, %113 : vector<1x384xf32>
    %115 = arith.truncf %39 : vector<1x128xf32> to vector<1x128xbf16>
    %c0_54 = arith.constant 0 : index
    %c0_55 = arith.constant 0 : index
    %116 = vector.load %arg5[%c0_54, %c0_55] : memref<128x384xbf16, #tpu.memory_space<vmem>>, vector<128x384xbf16>
    %cst_56 = arith.constant dense<0.000000e+00> : vector<1x384xf32>
    %117 = tpu.matmul %115, %116, %cst_56 {dimension_numbers = #tpu.dot_dimension_numbers<[1], [0], [0], [1], [0, 0, 1, 1], [], []>} : vector<1x128xbf16>, vector<128x384xbf16>, vector<1x384xf32> -> vector<1x384xf32>
    %c0_57 = arith.constant 0 : index
    %c0_58 = arith.constant 0 : index
    %118 = vector.load %arg7[%c0_57, %c0_58] : memref<1x384xf32, #tpu.memory_space<vmem>>, vector<1x384xf32>
    %119 = arith.addf %117, %118 : vector<1x384xf32>
    %120 = vector.extract_strided_slice %114 {offsets = [0, 0], sizes = [1, 128], strides = [1, 1]} : vector<1x384xf32> to vector<1x128xf32>
    %121 = vector.extract_strided_slice %119 {offsets = [0, 0], sizes = [1, 128], strides = [1, 1]} : vector<1x384xf32> to vector<1x128xf32>
    %122 = arith.addf %120, %121 : vector<1x128xf32>
    %123 = arith.negf %122 : vector<1x128xf32>
    %124 = math.exp %123 : vector<1x128xf32>
    %cst_59 = arith.constant 1.000000e+00 : f32
    %125 = vector.broadcast %cst_59 : f32 to vector<1x128xf32>
    %126 = arith.addf %125, %124 : vector<1x128xf32>
    %127 = arith.divf %125, %126 : vector<1x128xf32>
    %128 = vector.extract_strided_slice %114 {offsets = [0, 128], sizes = [1, 128], strides = [1, 1]} : vector<1x384xf32> to vector<1x128xf32>
    %129 = vector.extract_strided_slice %119 {offsets = [0, 128], sizes = [1, 128], strides = [1, 1]} : vector<1x384xf32> to vector<1x128xf32>
    %130 = arith.addf %128, %129 : vector<1x128xf32>
    %131 = arith.negf %130 : vector<1x128xf32>
    %132 = math.exp %131 : vector<1x128xf32>
    %cst_60 = arith.constant 1.000000e+00 : f32
    %133 = vector.broadcast %cst_60 : f32 to vector<1x128xf32>
    %134 = arith.addf %133, %132 : vector<1x128xf32>
    %135 = arith.divf %133, %134 : vector<1x128xf32>
    %136 = vector.extract_strided_slice %114 {offsets = [0, 256], sizes = [1, 128], strides = [1, 1]} : vector<1x384xf32> to vector<1x128xf32>
    %137 = vector.extract_strided_slice %119 {offsets = [0, 256], sizes = [1, 128], strides = [1, 1]} : vector<1x384xf32> to vector<1x128xf32>
    %138 = arith.mulf %127, %137 : vector<1x128xf32>
    %139 = arith.addf %136, %138 : vector<1x128xf32>
    %140 = math.tanh %139 : vector<1x128xf32>
    %cst_61 = arith.constant 1.000000e+00 : f32
    %141 = vector.broadcast %cst_61 : f32 to vector<1x128xf32>
    %142 = arith.subf %141, %135 : vector<1x128xf32>
    %143 = arith.mulf %142, %140 : vector<1x128xf32>
    %144 = arith.mulf %135, %39 : vector<1x128xf32>
    %145 = arith.addf %143, %144 : vector<1x128xf32>
    %146 = arith.truncf %145 : vector<1x128xf32> to vector<1x128xbf16>
    %c0_62 = arith.constant 0 : index
    %c0_63 = arith.constant 0 : index
    %147 = vector.load %arg3[%c0_62, %c0_63] : memref<128x8xbf16, #tpu.memory_space<vmem>>, vector<128x8xbf16>
    %cst_64 = arith.constant dense<0.000000e+00> : vector<1x8xf32>
    %148 = tpu.matmul %146, %147, %cst_64 {dimension_numbers = #tpu.dot_dimension_numbers<[1], [0], [0], [1], [0, 0, 1, 1], [], []>} : vector<1x128xbf16>, vector<128x8xbf16>, vector<1x8xf32> -> vector<1x8xf32>
    %cst_65 = arith.constant dense<0xFF800000> : vector<1xf32>
    %149 = vector.multi_reduction <maximumf>, %148, %cst_65 [1] : vector<1x8xf32> to vector<1xf32>
    %150 = vector.shape_cast %149 : vector<1xf32> to vector<1x1xf32>
    %151 = vector.broadcast %150 : vector<1x1xf32> to vector<1x8xf32>
    %152 = arith.subf %148, %151 : vector<1x8xf32>
    %153 = math.exp %152 : vector<1x8xf32>
    %cst_66 = arith.constant dense<0.000000e+00> : vector<1xf32>
    %154 = vector.multi_reduction <add>, %153, %cst_66 [1] : vector<1x8xf32> to vector<1xf32>
    %155 = vector.shape_cast %154 : vector<1xf32> to vector<1x1xf32>
    %156 = tpu.reciprocal %155 {approx = true} : vector<1x1xf32> -> vector<1x1xf32>
    %157 = vector.broadcast %156 : vector<1x1xf32> to vector<1x8xf32>
    %158 = arith.mulf %153, %157 : vector<1x8xf32>
    %c0_67 = arith.constant 0 : index
    %c0_68 = arith.constant 0 : index
    %159 = vector.load %arg2[%c0_67, %c0_68] : memref<8x128xf32, #tpu.memory_space<vmem>>, vector<8x128xf32>
    %cst_69 = arith.constant dense<0.000000e+00> : vector<1x128xf32>
    %160 = tpu.matmul %158, %159, %cst_69 {dimension_numbers = #tpu.dot_dimension_numbers<[1], [0], [0], [1], [0, 0, 1, 1], [], []>} : vector<1x8xf32>, vector<8x128xf32>, vector<1x128xf32> -> vector<1x128xf32>
    %c0_70 = arith.constant 0 : index
    %c0_71 = arith.constant 0 : index
    %161 = vector.load %arg14[%c0_70, %c0_71] : memref<1x256xf32, #tpu.memory_space<vmem>>, vector<1x128xf32>
    tpu.vector_store %arg14[%c0_70, %c0_71], %145 {strides = array<i32>} : memref<1x256xf32, #tpu.memory_space<vmem>>, vector<1x128xf32>,
    %c0_72 = arith.constant 0 : index
    %c128_73 = arith.constant 128 : index
    %162 = vector.load %arg14[%c0_72, %c128_73] : memref<1x256xf32, #tpu.memory_space<vmem>>, vector<1x128xf32>
    tpu.vector_store %arg14[%c0_72, %c128_73], %160 {strides = array<i32>} : memref<1x256xf32, #tpu.memory_space<vmem>>, vector<1x128xf32>,
    %c0_74 = arith.constant 0 : index
    %c0_75 = arith.constant 0 : index
    %163 = vector.load %arg14[%c0_74, %c0_75] : memref<1x256xf32, #tpu.memory_space<vmem>>, vector<1x256xf32>
    %164 = arith.truncf %163 : vector<1x256xf32> to vector<1x256xbf16>
    %c0_76 = arith.constant 0 : index
    %c0_77 = arith.constant 0 : index
    %165 = vector.load %arg8[%c0_76, %c0_77] : memref<256x128xbf16, #tpu.memory_space<vmem>>, vector<256x128xbf16>
    %cst_78 = arith.constant dense<0.000000e+00> : vector<1x128xf32>
    %166 = tpu.matmul %164, %165, %cst_78 {dimension_numbers = #tpu.dot_dimension_numbers<[1], [0], [0], [1], [0, 0, 1, 1], [], []>} : vector<1x256xbf16>, vector<256x128xbf16>, vector<1x128xf32> -> vector<1x128xf32>
    %c0_79 = arith.constant 0 : index
    %c0_80 = arith.constant 0 : index
    %167 = vector.load %arg9[%c0_79, %c0_80] : memref<1x128xf32, #tpu.memory_space<vmem>>, vector<1x128xf32>
    %168 = arith.addf %166, %167 : vector<1x128xf32>
    %169 = math.tanh %168 : vector<1x128xf32>
    %170 = arith.truncf %169 : vector<1x128xf32> to vector<1x128xbf16>
    %cst_81 = arith.constant 0xFF800000 : f32
    %171 = vector.broadcast %cst_81 : f32 to vector<1x1xf32>
    %c0_i32_82 = arith.constant 0 : i32
    %172 = vector.broadcast %c0_i32_82 : i32 to vector<1x1xi32>
    %cst_83 = arith.constant 0.000000e+00 : f32
    %173 = vector.broadcast %cst_83 : f32 to vector<1x1xf32>
    %c0_84 = arith.constant 0 : index
    %c0_85 = arith.constant 0 : index
    %174 = vector.load %arg10[%c0_84, %c0_85] : memref<128x128xbf16, #tpu.memory_space<vmem>>, vector<128x128xbf16>
    %cst_86 = arith.constant dense<0.000000e+00> : vector<1x128xf32>
    %175 = tpu.matmul %170, %174, %cst_86 {dimension_numbers = #tpu.dot_dimension_numbers<[1], [0], [0], [1], [0, 0, 1, 1], [], []>} : vector<1x128xbf16>, vector<128x128xbf16>, vector<1x128xf32> -> vector<1x128xf32>
    %c0_87 = arith.constant 0 : index
    %c0_88 = arith.constant 0 : index
    %176 = vector.load %arg11[%c0_87, %c0_88] : memref<1x128xf32, #tpu.memory_space<vmem>>, vector<1x128xf32>
    %177 = arith.addf %175, %176 : vector<1x128xf32>
    %cst_89 = arith.constant dense<0xFF800000> : vector<1xf32>
    %178 = vector.multi_reduction <maximumf>, %177, %cst_89 [1] : vector<1x128xf32> to vector<1xf32>
    %179 = vector.shape_cast %178 : vector<1xf32> to vector<1x1xf32>
    %180 = vector.broadcast %179 : vector<1x1xf32> to vector<1x128xf32>
    %181 = arith.cmpf oeq, %177, %180 : vector<1x128xf32>
    %c0_i32_90 = arith.constant 0 : i32
    %182 = vector.broadcast %c0_i32_90 : i32 to vector<1x128xi32>
    %183 = arith.addi %0, %182 : vector<1x128xi32>
    %c128_i32_91 = arith.constant 128 : i32
    %184 = vector.broadcast %c128_i32_91 : i32 to vector<1x128xi32>
    %185 = arith.select %181, %183, %184 : vector<1x128xi1>, vector<1x128xi32>
    %cst_92 = arith.constant dense<2147483647> : vector<1xi32>
    %186 = vector.multi_reduction <minsi>, %185, %cst_92 [1] : vector<1x128xi32> to vector<1xi32>
    %187 = vector.shape_cast %186 : vector<1xi32> to vector<1x1xi32>
    %188 = arith.maximumf %171, %179 : vector<1x1xf32>
    %189 = arith.subf %171, %188 : vector<1x1xf32>
    %190 = math.exp %189 : vector<1x1xf32>
    %191 = arith.mulf %173, %190 : vector<1x1xf32>
    %192 = vector.broadcast %188 : vector<1x1xf32> to vector<1x128xf32>
    %193 = arith.subf %177, %192 : vector<1x128xf32>
    %194 = math.exp %193 : vector<1x128xf32>
    %cst_93 = arith.constant dense<0.000000e+00> : vector<1xf32>
    %195 = vector.multi_reduction <add>, %194, %cst_93 [1] : vector<1x128xf32> to vector<1xf32>
    %196 = vector.shape_cast %195 : vector<1xf32> to vector<1x1xf32>
    %197 = arith.addf %191, %196 : vector<1x1xf32>
    %198 = arith.cmpf ogt, %179, %171 : vector<1x1xf32>
    %199 = arith.select %198, %187, %172 : vector<1x1xi1>, vector<1x1xi32>
    %200 = vector.shape_cast %199 : vector<1x1xi32> to vector<1x1x1xi32>
    %cst_94 = arith.constant dense<-2147483648> : vector<1xi32>
    %201 = vector.multi_reduction <maxsi>, %200, %cst_94 [1, 2] : vector<1x1x1xi32> to vector<1xi32>
    %202 = vector.shape_cast %201 : vector<1xi32> to vector<1x1x1xi32>
    %203 = vector.extract %202[0, 0, 0] : i32 from vector<1x1x1xi32>
    %204 = arith.index_cast %c1_i32_47 : i32 to index
    %205 = memref.load %arg12[%204] : memref<6xi32, #tpu.memory_space<smem>>
    memref.store %203, %arg12[%204] : memref<6xi32, #tpu.memory_space<smem>>
    %cst_95 = arith.constant 1.000000e+00 : f32
    %206 = vector.broadcast %cst_95 : f32 to vector<1x1xf32>
    %207 = arith.divf %206, %197 : vector<1x1xf32>
    %208 = vector.shape_cast %207 : vector<1x1xf32> to vector<1x1x1xf32>
    %cst_96 = arith.constant dense<0xFF800000> : vector<1xf32>
    %209 = vector.multi_reduction <maximumf>, %208, %cst_96 [1, 2] : vector<1x1x1xf32> to vector<1xf32>
    %210 = vector.shape_cast %209 : vector<1xf32> to vector<1x1x1xf32>
    %211 = vector.extract %210[0, 0, 0] : f32 from vector<1x1x1xf32>
    %212 = arith.index_cast %c1_i32_47 : i32 to index
    %213 = memref.load %arg13[%212] : memref<6xf32, #tpu.memory_space<smem>>
    memref.store %211, %arg13[%212] : memref<6xf32, #tpu.memory_space<smem>>
    %c2_i32 = arith.constant 2 : i32
    %214 = arith.index_cast %203 : i32 to index
    %c0_97 = arith.constant 0 : index
    %215 = vector.load %arg0[%214, %c0_97] : memref<64x128xf32, #tpu.memory_space<vmem>>, vector<1x128xf32>
    %216 = arith.truncf %215 : vector<1x128xf32> to vector<1x128xbf16>
    %c0_98 = arith.constant 0 : index
    %c0_99 = arith.constant 0 : index
    %217 = vector.load %arg4[%c0_98, %c0_99] : memref<128x384xbf16, #tpu.memory_space<vmem>>, vector<128x384xbf16>
    %cst_100 = arith.constant dense<0.000000e+00> : vector<1x384xf32>
    %218 = tpu.matmul %216, %217, %cst_100 {dimension_numbers = #tpu.dot_dimension_numbers<[1], [0], [0], [1], [0, 0, 1, 1], [], []>} : vector<1x128xbf16>, vector<128x384xbf16>, vector<1x384xf32> -> vector<1x384xf32>
    %c0_101 = arith.constant 0 : index
    %c0_102 = arith.constant 0 : index
    %219 = vector.load %arg6[%c0_101, %c0_102] : memref<1x384xf32, #tpu.memory_space<vmem>>, vector<1x384xf32>
    %220 = arith.addf %218, %219 : vector<1x384xf32>
    %221 = arith.truncf %145 : vector<1x128xf32> to vector<1x128xbf16>
    %c0_103 = arith.constant 0 : index
    %c0_104 = arith.constant 0 : index
    %222 = vector.load %arg5[%c0_103, %c0_104] : memref<128x384xbf16, #tpu.memory_space<vmem>>, vector<128x384xbf16>
    %cst_105 = arith.constant dense<0.000000e+00> : vector<1x384xf32>
    %223 = tpu.matmul %221, %222, %cst_105 {dimension_numbers = #tpu.dot_dimension_numbers<[1], [0], [0], [1], [0, 0, 1, 1], [], []>} : vector<1x128xbf16>, vector<128x384xbf16>, vector<1x384xf32> -> vector<1x384xf32>
    %c0_106 = arith.constant 0 : index
    %c0_107 = arith.constant 0 : index
    %224 = vector.load %arg7[%c0_106, %c0_107] : memref<1x384xf32, #tpu.memory_space<vmem>>, vector<1x384xf32>
    %225 = arith.addf %223, %224 : vector<1x384xf32>
    %226 = vector.extract_strided_slice %220 {offsets = [0, 0], sizes = [1, 128], strides = [1, 1]} : vector<1x384xf32> to vector<1x128xf32>
    %227 = vector.extract_strided_slice %225 {offsets = [0, 0], sizes = [1, 128], strides = [1, 1]} : vector<1x384xf32> to vector<1x128xf32>
    %228 = arith.addf %226, %227 : vector<1x128xf32>
    %229 = arith.negf %228 : vector<1x128xf32>
    %230 = math.exp %229 : vector<1x128xf32>
    %cst_108 = arith.constant 1.000000e+00 : f32
    %231 = vector.broadcast %cst_108 : f32 to vector<1x128xf32>
    %232 = arith.addf %231, %230 : vector<1x128xf32>
    %233 = arith.divf %231, %232 : vector<1x128xf32>
    %234 = vector.extract_strided_slice %220 {offsets = [0, 128], sizes = [1, 128], strides = [1, 1]} : vector<1x384xf32> to vector<1x128xf32>
    %235 = vector.extract_strided_slice %225 {offsets = [0, 128], sizes = [1, 128], strides = [1, 1]} : vector<1x384xf32> to vector<1x128xf32>
    %236 = arith.addf %234, %235 : vector<1x128xf32>
    %237 = arith.negf %236 : vector<1x128xf32>
    %238 = math.exp %237 : vector<1x128xf32>
    %cst_109 = arith.constant 1.000000e+00 : f32
    %239 = vector.broadcast %cst_109 : f32 to vector<1x128xf32>
    %240 = arith.addf %239, %238 : vector<1x128xf32>
    %241 = arith.divf %239, %240 : vector<1x128xf32>
    %242 = vector.extract_strided_slice %220 {offsets = [0, 256], sizes = [1, 128], strides = [1, 1]} : vector<1x384xf32> to vector<1x128xf32>
    %243 = vector.extract_strided_slice %225 {offsets = [0, 256], sizes = [1, 128], strides = [1, 1]} : vector<1x384xf32> to vector<1x128xf32>
    %244 = arith.mulf %233, %243 : vector<1x128xf32>
    %245 = arith.addf %242, %244 : vector<1x128xf32>
    %246 = math.tanh %245 : vector<1x128xf32>
    %cst_110 = arith.constant 1.000000e+00 : f32
    %247 = vector.broadcast %cst_110 : f32 to vector<1x128xf32>
    %248 = arith.subf %247, %241 : vector<1x128xf32>
    %249 = arith.mulf %248, %246 : vector<1x128xf32>
    %250 = arith.mulf %241, %145 : vector<1x128xf32>
    %251 = arith.addf %249, %250 : vector<1x128xf32>
    %252 = arith.truncf %251 : vector<1x128xf32> to vector<1x128xbf16>
    %c0_111 = arith.constant 0 : index
    %c0_112 = arith.constant 0 : index
    %253 = vector.load %arg3[%c0_111, %c0_112] : memref<128x8xbf16, #tpu.memory_space<vmem>>, vector<128x8xbf16>
    %cst_113 = arith.constant dense<0.000000e+00> : vector<1x8xf32>
    %254 = tpu.matmul %252, %253, %cst_113 {dimension_numbers = #tpu.dot_dimension_numbers<[1], [0], [0], [1], [0, 0, 1, 1], [], []>} : vector<1x128xbf16>, vector<128x8xbf16>, vector<1x8xf32> -> vector<1x8xf32>
    %cst_114 = arith.constant dense<0xFF800000> : vector<1xf32>
    %255 = vector.multi_reduction <maximumf>, %254, %cst_114 [1] : vector<1x8xf32> to vector<1xf32>
    %256 = vector.shape_cast %255 : vector<1xf32> to vector<1x1xf32>
    %257 = vector.broadcast %256 : vector<1x1xf32> to vector<1x8xf32>
    %258 = arith.subf %254, %257 : vector<1x8xf32>
    %259 = math.exp %258 : vector<1x8xf32>
    %cst_115 = arith.constant dense<0.000000e+00> : vector<1xf32>
    %260 = vector.multi_reduction <add>, %259, %cst_115 [1] : vector<1x8xf32> to vector<1xf32>
    %261 = vector.shape_cast %260 : vector<1xf32> to vector<1x1xf32>
    %262 = tpu.reciprocal %261 {approx = true} : vector<1x1xf32> -> vector<1x1xf32>
    %263 = vector.broadcast %262 : vector<1x1xf32> to vector<1x8xf32>
    %264 = arith.mulf %259, %263 : vector<1x8xf32>
    %c0_116 = arith.constant 0 : index
    %c0_117 = arith.constant 0 : index
    %265 = vector.load %arg2[%c0_116, %c0_117] : memref<8x128xf32, #tpu.memory_space<vmem>>, vector<8x128xf32>
    %cst_118 = arith.constant dense<0.000000e+00> : vector<1x128xf32>
    %266 = tpu.matmul %264, %265, %cst_118 {dimension_numbers = #tpu.dot_dimension_numbers<[1], [0], [0], [1], [0, 0, 1, 1], [], []>} : vector<1x8xf32>, vector<8x128xf32>, vector<1x128xf32> -> vector<1x128xf32>
    %c0_119 = arith.constant 0 : index
    %c0_120 = arith.constant 0 : index
    %267 = vector.load %arg14[%c0_119, %c0_120] : memref<1x256xf32, #tpu.memory_space<vmem>>, vector<1x128xf32>
    tpu.vector_store %arg14[%c0_119, %c0_120], %251 {strides = array<i32>} : memref<1x256xf32, #tpu.memory_space<vmem>>, vector<1x128xf32>,
    %c0_121 = arith.constant 0 : index
    %c128_122 = arith.constant 128 : index
    %268 = vector.load %arg14[%c0_121, %c128_122] : memref<1x256xf32, #tpu.memory_space<vmem>>, vector<1x128xf32>
    tpu.vector_store %arg14[%c0_121, %c128_122], %266 {strides = array<i32>} : memref<1x256xf32, #tpu.memory_space<vmem>>, vector<1x128xf32>,
    %c0_123 = arith.constant 0 : index
    %c0_124 = arith.constant 0 : index
    %269 = vector.load %arg14[%c0_123, %c0_124] : memref<1x256xf32, #tpu.memory_space<vmem>>, vector<1x256xf32>
    %270 = arith.truncf %269 : vector<1x256xf32> to vector<1x256xbf16>
    %c0_125 = arith.constant 0 : index
    %c0_126 = arith.constant 0 : index
    %271 = vector.load %arg8[%c0_125, %c0_126] : memref<256x128xbf16, #tpu.memory_space<vmem>>, vector<256x128xbf16>
    %cst_127 = arith.constant dense<0.000000e+00> : vector<1x128xf32>
    %272 = tpu.matmul %270, %271, %cst_127 {dimension_numbers = #tpu.dot_dimension_numbers<[1], [0], [0], [1], [0, 0, 1, 1], [], []>} : vector<1x256xbf16>, vector<256x128xbf16>, vector<1x128xf32> -> vector<1x128xf32>
    %c0_128 = arith.constant 0 : index
    %c0_129 = arith.constant 0 : index
    %273 = vector.load %arg9[%c0_128, %c0_129] : memref<1x128xf32, #tpu.memory_space<vmem>>, vector<1x128xf32>
    %274 = arith.addf %272, %273 : vector<1x128xf32>
    %275 = math.tanh %274 : vector<1x128xf32>
    %276 = arith.truncf %275 : vector<1x128xf32> to vector<1x128xbf16>
    %cst_130 = arith.constant 0xFF800000 : f32
    %277 = vector.broadcast %cst_130 : f32 to vector<1x1xf32>
    %c0_i32_131 = arith.constant 0 : i32
    %278 = vector.broadcast %c0_i32_131 : i32 to vector<1x1xi32>
    %cst_132 = arith.constant 0.000000e+00 : f32
    %279 = vector.broadcast %cst_132 : f32 to vector<1x1xf32>
    %c0_133 = arith.constant 0 : index
    %c0_134 = arith.constant 0 : index
    %280 = vector.load %arg10[%c0_133, %c0_134] : memref<128x128xbf16, #tpu.memory_space<vmem>>, vector<128x128xbf16>
    %cst_135 = arith.constant dense<0.000000e+00> : vector<1x128xf32>
    %281 = tpu.matmul %276, %280, %cst_135 {dimension_numbers = #tpu.dot_dimension_numbers<[1], [0], [0], [1], [0, 0, 1, 1], [], []>} : vector<1x128xbf16>, vector<128x128xbf16>, vector<1x128xf32> -> vector<1x128xf32>
    %c0_136 = arith.constant 0 : index
    %c0_137 = arith.constant 0 : index
    %282 = vector.load %arg11[%c0_136, %c0_137] : memref<1x128xf32, #tpu.memory_space<vmem>>, vector<1x128xf32>
    %283 = arith.addf %281, %282 : vector<1x128xf32>
    %cst_138 = arith.constant dense<0xFF800000> : vector<1xf32>
    %284 = vector.multi_reduction <maximumf>, %283, %cst_138 [1] : vector<1x128xf32> to vector<1xf32>
    %285 = vector.shape_cast %284 : vector<1xf32> to vector<1x1xf32>
    %286 = vector.broadcast %285 : vector<1x1xf32> to vector<1x128xf32>
    %287 = arith.cmpf oeq, %283, %286 : vector<1x128xf32>
    %c0_i32_139 = arith.constant 0 : i32
    %288 = vector.broadcast %c0_i32_139 : i32 to vector<1x128xi32>
    %289 = arith.addi %0, %288 : vector<1x128xi32>
    %c128_i32_140 = arith.constant 128 : i32
    %290 = vector.broadcast %c128_i32_140 : i32 to vector<1x128xi32>
    %291 = arith.select %287, %289, %290 : vector<1x128xi1>, vector<1x128xi32>
    %cst_141 = arith.constant dense<2147483647> : vector<1xi32>
    %292 = vector.multi_reduction <minsi>, %291, %cst_141 [1] : vector<1x128xi32> to vector<1xi32>
    %293 = vector.shape_cast %292 : vector<1xi32> to vector<1x1xi32>
    %294 = arith.maximumf %277, %285 : vector<1x1xf32>
    %295 = arith.subf %277, %294 : vector<1x1xf32>
    %296 = math.exp %295 : vector<1x1xf32>
    %297 = arith.mulf %279, %296 : vector<1x1xf32>
    %298 = vector.broadcast %294 : vector<1x1xf32> to vector<1x128xf32>
    %299 = arith.subf %283, %298 : vector<1x128xf32>
    %300 = math.exp %299 : vector<1x128xf32>
    %cst_142 = arith.constant dense<0.000000e+00> : vector<1xf32>
    %301 = vector.multi_reduction <add>, %300, %cst_142 [1] : vector<1x128xf32> to vector<1xf32>
    %302 = vector.shape_cast %301 : vector<1xf32> to vector<1x1xf32>
    %303 = arith.addf %297, %302 : vector<1x1xf32>
    %304 = arith.cmpf ogt, %285, %277 : vector<1x1xf32>
    %305 = arith.select %304, %293, %278 : vector<1x1xi1>, vector<1x1xi32>
    %306 = vector.shape_cast %305 : vector<1x1xi32> to vector<1x1x1xi32>
    %cst_143 = arith.constant dense<-2147483648> : vector<1xi32>
    %307 = vector.multi_reduction <maxsi>, %306, %cst_143 [1, 2] : vector<1x1x1xi32> to vector<1xi32>
    %308 = vector.shape_cast %307 : vector<1xi32> to vector<1x1x1xi32>
    %309 = vector.extract %308[0, 0, 0] : i32 from vector<1x1x1xi32>
    %310 = arith.index_cast %c2_i32 : i32 to index
    %311 = memref.load %arg12[%310] : memref<6xi32, #tpu.memory_space<smem>>
    memref.store %309, %arg12[%310] : memref<6xi32, #tpu.memory_space<smem>>
    %cst_144 = arith.constant 1.000000e+00 : f32
    %312 = vector.broadcast %cst_144 : f32 to vector<1x1xf32>
    %313 = arith.divf %312, %303 : vector<1x1xf32>
    %314 = vector.shape_cast %313 : vector<1x1xf32> to vector<1x1x1xf32>
    %cst_145 = arith.constant dense<0xFF800000> : vector<1xf32>
    %315 = vector.multi_reduction <maximumf>, %314, %cst_145 [1, 2] : vector<1x1x1xf32> to vector<1xf32>
    %316 = vector.shape_cast %315 : vector<1xf32> to vector<1x1x1xf32>
    %317 = vector.extract %316[0, 0, 0] : f32 from vector<1x1x1xf32>
    %318 = arith.index_cast %c2_i32 : i32 to index
    %319 = memref.load %arg13[%318] : memref<6xf32, #tpu.memory_space<smem>>
    memref.store %317, %arg13[%318] : memref<6xf32, #tpu.memory_space<smem>>
    %c3_i32 = arith.constant 3 : i32
    %320 = arith.index_cast %309 : i32 to index
    %c0_146 = arith.constant 0 : index
    %321 = vector.load %arg0[%320, %c0_146] : memref<64x128xf32, #tpu.memory_space<vmem>>, vector<1x128xf32>
    %322 = arith.truncf %321 : vector<1x128xf32> to vector<1x128xbf16>
    %c0_147 = arith.constant 0 : index
    %c0_148 = arith.constant 0 : index
    %323 = vector.load %arg4[%c0_147, %c0_148] : memref<128x384xbf16, #tpu.memory_space<vmem>>, vector<128x384xbf16>
    %cst_149 = arith.constant dense<0.000000e+00> : vector<1x384xf32>
    %324 = tpu.matmul %322, %323, %cst_149 {dimension_numbers = #tpu.dot_dimension_numbers<[1], [0], [0], [1], [0, 0, 1, 1], [], []>} : vector<1x128xbf16>, vector<128x384xbf16>, vector<1x384xf32> -> vector<1x384xf32>
    %c0_150 = arith.constant 0 : index
    %c0_151 = arith.constant 0 : index
    %325 = vector.load %arg6[%c0_150, %c0_151] : memref<1x384xf32, #tpu.memory_space<vmem>>, vector<1x384xf32>
    %326 = arith.addf %324, %325 : vector<1x384xf32>
    %327 = arith.truncf %251 : vector<1x128xf32> to vector<1x128xbf16>
    %c0_152 = arith.constant 0 : index
    %c0_153 = arith.constant 0 : index
    %328 = vector.load %arg5[%c0_152, %c0_153] : memref<128x384xbf16, #tpu.memory_space<vmem>>, vector<128x384xbf16>
    %cst_154 = arith.constant dense<0.000000e+00> : vector<1x384xf32>
    %329 = tpu.matmul %327, %328, %cst_154 {dimension_numbers = #tpu.dot_dimension_numbers<[1], [0], [0], [1], [0, 0, 1, 1], [], []>} : vector<1x128xbf16>, vector<128x384xbf16>, vector<1x384xf32> -> vector<1x384xf32>
    %c0_155 = arith.constant 0 : index
    %c0_156 = arith.constant 0 : index
    %330 = vector.load %arg7[%c0_155, %c0_156] : memref<1x384xf32, #tpu.memory_space<vmem>>, vector<1x384xf32>
    %331 = arith.addf %329, %330 : vector<1x384xf32>
    %332 = vector.extract_strided_slice %326 {offsets = [0, 0], sizes = [1, 128], strides = [1, 1]} : vector<1x384xf32> to vector<1x128xf32>
    %333 = vector.extract_strided_slice %331 {offsets = [0, 0], sizes = [1, 128], strides = [1, 1]} : vector<1x384xf32> to vector<1x128xf32>
    %334 = arith.addf %332, %333 : vector<1x128xf32>
    %335 = arith.negf %334 : vector<1x128xf32>
    %336 = math.exp %335 : vector<1x128xf32>
    %cst_157 = arith.constant 1.000000e+00 : f32
    %337 = vector.broadcast %cst_157 : f32 to vector<1x128xf32>
    %338 = arith.addf %337, %336 : vector<1x128xf32>
    %339 = arith.divf %337, %338 : vector<1x128xf32>
    %340 = vector.extract_strided_slice %326 {offsets = [0, 128], sizes = [1, 128], strides = [1, 1]} : vector<1x384xf32> to vector<1x128xf32>
    %341 = vector.extract_strided_slice %331 {offsets = [0, 128], sizes = [1, 128], strides = [1, 1]} : vector<1x384xf32> to vector<1x128xf32>
    %342 = arith.addf %340, %341 : vector<1x128xf32>
    %343 = arith.negf %342 : vector<1x128xf32>
    %344 = math.exp %343 : vector<1x128xf32>
    %cst_158 = arith.constant 1.000000e+00 : f32
    %345 = vector.broadcast %cst_158 : f32 to vector<1x128xf32>
    %346 = arith.addf %345, %344 : vector<1x128xf32>
    %347 = arith.divf %345, %346 : vector<1x128xf32>
    %348 = vector.extract_strided_slice %326 {offsets = [0, 256], sizes = [1, 128], strides = [1, 1]} : vector<1x384xf32> to vector<1x128xf32>
    %349 = vector.extract_strided_slice %331 {offsets = [0, 256], sizes = [1, 128], strides = [1, 1]} : vector<1x384xf32> to vector<1x128xf32>
    %350 = arith.mulf %339, %349 : vector<1x128xf32>
    %351 = arith.addf %348, %350 : vector<1x128xf32>
    %352 = math.tanh %351 : vector<1x128xf32>
    %cst_159 = arith.constant 1.000000e+00 : f32
    %353 = vector.broadcast %cst_159 : f32 to vector<1x128xf32>
    %354 = arith.subf %353, %347 : vector<1x128xf32>
    %355 = arith.mulf %354, %352 : vector<1x128xf32>
    %356 = arith.mulf %347, %251 : vector<1x128xf32>
    %357 = arith.addf %355, %356 : vector<1x128xf32>
    %358 = arith.truncf %357 : vector<1x128xf32> to vector<1x128xbf16>
    %c0_160 = arith.constant 0 : index
    %c0_161 = arith.constant 0 : index
    %359 = vector.load %arg3[%c0_160, %c0_161] : memref<128x8xbf16, #tpu.memory_space<vmem>>, vector<128x8xbf16>
    %cst_162 = arith.constant dense<0.000000e+00> : vector<1x8xf32>
    %360 = tpu.matmul %358, %359, %cst_162 {dimension_numbers = #tpu.dot_dimension_numbers<[1], [0], [0], [1], [0, 0, 1, 1], [], []>} : vector<1x128xbf16>, vector<128x8xbf16>, vector<1x8xf32> -> vector<1x8xf32>
    %cst_163 = arith.constant dense<0xFF800000> : vector<1xf32>
    %361 = vector.multi_reduction <maximumf>, %360, %cst_163 [1] : vector<1x8xf32> to vector<1xf32>
    %362 = vector.shape_cast %361 : vector<1xf32> to vector<1x1xf32>
    %363 = vector.broadcast %362 : vector<1x1xf32> to vector<1x8xf32>
    %364 = arith.subf %360, %363 : vector<1x8xf32>
    %365 = math.exp %364 : vector<1x8xf32>
    %cst_164 = arith.constant dense<0.000000e+00> : vector<1xf32>
    %366 = vector.multi_reduction <add>, %365, %cst_164 [1] : vector<1x8xf32> to vector<1xf32>
    %367 = vector.shape_cast %366 : vector<1xf32> to vector<1x1xf32>
    %368 = tpu.reciprocal %367 {approx = true} : vector<1x1xf32> -> vector<1x1xf32>
    %369 = vector.broadcast %368 : vector<1x1xf32> to vector<1x8xf32>
    %370 = arith.mulf %365, %369 : vector<1x8xf32>
    %c0_165 = arith.constant 0 : index
    %c0_166 = arith.constant 0 : index
    %371 = vector.load %arg2[%c0_165, %c0_166] : memref<8x128xf32, #tpu.memory_space<vmem>>, vector<8x128xf32>
    %cst_167 = arith.constant dense<0.000000e+00> : vector<1x128xf32>
    %372 = tpu.matmul %370, %371, %cst_167 {dimension_numbers = #tpu.dot_dimension_numbers<[1], [0], [0], [1], [0, 0, 1, 1], [], []>} : vector<1x8xf32>, vector<8x128xf32>, vector<1x128xf32> -> vector<1x128xf32>
    %c0_168 = arith.constant 0 : index
    %c0_169 = arith.constant 0 : index
    %373 = vector.load %arg14[%c0_168, %c0_169] : memref<1x256xf32, #tpu.memory_space<vmem>>, vector<1x128xf32>
    tpu.vector_store %arg14[%c0_168, %c0_169], %357 {strides = array<i32>} : memref<1x256xf32, #tpu.memory_space<vmem>>, vector<1x128xf32>,
    %c0_170 = arith.constant 0 : index
    %c128_171 = arith.constant 128 : index
    %374 = vector.load %arg14[%c0_170, %c128_171] : memref<1x256xf32, #tpu.memory_space<vmem>>, vector<1x128xf32>
    tpu.vector_store %arg14[%c0_170, %c128_171], %372 {strides = array<i32>} : memref<1x256xf32, #tpu.memory_space<vmem>>, vector<1x128xf32>,
    %c0_172 = arith.constant 0 : index
    %c0_173 = arith.constant 0 : index
    %375 = vector.load %arg14[%c0_172, %c0_173] : memref<1x256xf32, #tpu.memory_space<vmem>>, vector<1x256xf32>
    %376 = arith.truncf %375 : vector<1x256xf32> to vector<1x256xbf16>
    %c0_174 = arith.constant 0 : index
    %c0_175 = arith.constant 0 : index
    %377 = vector.load %arg8[%c0_174, %c0_175] : memref<256x128xbf16, #tpu.memory_space<vmem>>, vector<256x128xbf16>
    %cst_176 = arith.constant dense<0.000000e+00> : vector<1x128xf32>
    %378 = tpu.matmul %376, %377, %cst_176 {dimension_numbers = #tpu.dot_dimension_numbers<[1], [0], [0], [1], [0, 0, 1, 1], [], []>} : vector<1x256xbf16>, vector<256x128xbf16>, vector<1x128xf32> -> vector<1x128xf32>
    %c0_177 = arith.constant 0 : index
    %c0_178 = arith.constant 0 : index
    %379 = vector.load %arg9[%c0_177, %c0_178] : memref<1x128xf32, #tpu.memory_space<vmem>>, vector<1x128xf32>
    %380 = arith.addf %378, %379 : vector<1x128xf32>
    %381 = math.tanh %380 : vector<1x128xf32>
    %382 = arith.truncf %381 : vector<1x128xf32> to vector<1x128xbf16>
    %cst_179 = arith.constant 0xFF800000 : f32
    %383 = vector.broadcast %cst_179 : f32 to vector<1x1xf32>
    %c0_i32_180 = arith.constant 0 : i32
    %384 = vector.broadcast %c0_i32_180 : i32 to vector<1x1xi32>
    %cst_181 = arith.constant 0.000000e+00 : f32
    %385 = vector.broadcast %cst_181 : f32 to vector<1x1xf32>
    %c0_182 = arith.constant 0 : index
    %c0_183 = arith.constant 0 : index
    %386 = vector.load %arg10[%c0_182, %c0_183] : memref<128x128xbf16, #tpu.memory_space<vmem>>, vector<128x128xbf16>
    %cst_184 = arith.constant dense<0.000000e+00> : vector<1x128xf32>
    %387 = tpu.matmul %382, %386, %cst_184 {dimension_numbers = #tpu.dot_dimension_numbers<[1], [0], [0], [1], [0, 0, 1, 1], [], []>} : vector<1x128xbf16>, vector<128x128xbf16>, vector<1x128xf32> -> vector<1x128xf32>
    %c0_185 = arith.constant 0 : index
    %c0_186 = arith.constant 0 : index
    %388 = vector.load %arg11[%c0_185, %c0_186] : memref<1x128xf32, #tpu.memory_space<vmem>>, vector<1x128xf32>
    %389 = arith.addf %387, %388 : vector<1x128xf32>
    %cst_187 = arith.constant dense<0xFF800000> : vector<1xf32>
    %390 = vector.multi_reduction <maximumf>, %389, %cst_187 [1] : vector<1x128xf32> to vector<1xf32>
    %391 = vector.shape_cast %390 : vector<1xf32> to vector<1x1xf32>
    %392 = vector.broadcast %391 : vector<1x1xf32> to vector<1x128xf32>
    %393 = arith.cmpf oeq, %389, %392 : vector<1x128xf32>
    %c0_i32_188 = arith.constant 0 : i32
    %394 = vector.broadcast %c0_i32_188 : i32 to vector<1x128xi32>
    %395 = arith.addi %0, %394 : vector<1x128xi32>
    %c128_i32_189 = arith.constant 128 : i32
    %396 = vector.broadcast %c128_i32_189 : i32 to vector<1x128xi32>
    %397 = arith.select %393, %395, %396 : vector<1x128xi1>, vector<1x128xi32>
    %cst_190 = arith.constant dense<2147483647> : vector<1xi32>
    %398 = vector.multi_reduction <minsi>, %397, %cst_190 [1] : vector<1x128xi32> to vector<1xi32>
    %399 = vector.shape_cast %398 : vector<1xi32> to vector<1x1xi32>
    %400 = arith.maximumf %383, %391 : vector<1x1xf32>
    %401 = arith.subf %383, %400 : vector<1x1xf32>
    %402 = math.exp %401 : vector<1x1xf32>
    %403 = arith.mulf %385, %402 : vector<1x1xf32>
    %404 = vector.broadcast %400 : vector<1x1xf32> to vector<1x128xf32>
    %405 = arith.subf %389, %404 : vector<1x128xf32>
    %406 = math.exp %405 : vector<1x128xf32>
    %cst_191 = arith.constant dense<0.000000e+00> : vector<1xf32>
    %407 = vector.multi_reduction <add>, %406, %cst_191 [1] : vector<1x128xf32> to vector<1xf32>
    %408 = vector.shape_cast %407 : vector<1xf32> to vector<1x1xf32>
    %409 = arith.addf %403, %408 : vector<1x1xf32>
    %410 = arith.cmpf ogt, %391, %383 : vector<1x1xf32>
    %411 = arith.select %410, %399, %384 : vector<1x1xi1>, vector<1x1xi32>
    %412 = vector.shape_cast %411 : vector<1x1xi32> to vector<1x1x1xi32>
    %cst_192 = arith.constant dense<-2147483648> : vector<1xi32>
    %413 = vector.multi_reduction <maxsi>, %412, %cst_192 [1, 2] : vector<1x1x1xi32> to vector<1xi32>
    %414 = vector.shape_cast %413 : vector<1xi32> to vector<1x1x1xi32>
    %415 = vector.extract %414[0, 0, 0] : i32 from vector<1x1x1xi32>
    %416 = arith.index_cast %c3_i32 : i32 to index
    %417 = memref.load %arg12[%416] : memref<6xi32, #tpu.memory_space<smem>>
    memref.store %415, %arg12[%416] : memref<6xi32, #tpu.memory_space<smem>>
    %cst_193 = arith.constant 1.000000e+00 : f32
    %418 = vector.broadcast %cst_193 : f32 to vector<1x1xf32>
    %419 = arith.divf %418, %409 : vector<1x1xf32>
    %420 = vector.shape_cast %419 : vector<1x1xf32> to vector<1x1x1xf32>
    %cst_194 = arith.constant dense<0xFF800000> : vector<1xf32>
    %421 = vector.multi_reduction <maximumf>, %420, %cst_194 [1, 2] : vector<1x1x1xf32> to vector<1xf32>
    %422 = vector.shape_cast %421 : vector<1xf32> to vector<1x1x1xf32>
    %423 = vector.extract %422[0, 0, 0] : f32 from vector<1x1x1xf32>
    %424 = arith.index_cast %c3_i32 : i32 to index
    %425 = memref.load %arg13[%424] : memref<6xf32, #tpu.memory_space<smem>>
    memref.store %423, %arg13[%424] : memref<6xf32, #tpu.memory_space<smem>>
    %c4_i32 = arith.constant 4 : i32
    %426 = arith.index_cast %415 : i32 to index
    %c0_195 = arith.constant 0 : index
    %427 = vector.load %arg0[%426, %c0_195] : memref<64x128xf32, #tpu.memory_space<vmem>>, vector<1x128xf32>
    %428 = arith.truncf %427 : vector<1x128xf32> to vector<1x128xbf16>
    %c0_196 = arith.constant 0 : index
    %c0_197 = arith.constant 0 : index
    %429 = vector.load %arg4[%c0_196, %c0_197] : memref<128x384xbf16, #tpu.memory_space<vmem>>, vector<128x384xbf16>
    %cst_198 = arith.constant dense<0.000000e+00> : vector<1x384xf32>
    %430 = tpu.matmul %428, %429, %cst_198 {dimension_numbers = #tpu.dot_dimension_numbers<[1], [0], [0], [1], [0, 0, 1, 1], [], []>} : vector<1x128xbf16>, vector<128x384xbf16>, vector<1x384xf32> -> vector<1x384xf32>
    %c0_199 = arith.constant 0 : index
    %c0_200 = arith.constant 0 : index
    %431 = vector.load %arg6[%c0_199, %c0_200] : memref<1x384xf32, #tpu.memory_space<vmem>>, vector<1x384xf32>
    %432 = arith.addf %430, %431 : vector<1x384xf32>
    %433 = arith.truncf %357 : vector<1x128xf32> to vector<1x128xbf16>
    %c0_201 = arith.constant 0 : index
    %c0_202 = arith.constant 0 : index
    %434 = vector.load %arg5[%c0_201, %c0_202] : memref<128x384xbf16, #tpu.memory_space<vmem>>, vector<128x384xbf16>
    %cst_203 = arith.constant dense<0.000000e+00> : vector<1x384xf32>
    %435 = tpu.matmul %433, %434, %cst_203 {dimension_numbers = #tpu.dot_dimension_numbers<[1], [0], [0], [1], [0, 0, 1, 1], [], []>} : vector<1x128xbf16>, vector<128x384xbf16>, vector<1x384xf32> -> vector<1x384xf32>
    %c0_204 = arith.constant 0 : index
    %c0_205 = arith.constant 0 : index
    %436 = vector.load %arg7[%c0_204, %c0_205] : memref<1x384xf32, #tpu.memory_space<vmem>>, vector<1x384xf32>
    %437 = arith.addf %435, %436 : vector<1x384xf32>
    %438 = vector.extract_strided_slice %432 {offsets = [0, 0], sizes = [1, 128], strides = [1, 1]} : vector<1x384xf32> to vector<1x128xf32>
    %439 = vector.extract_strided_slice %437 {offsets = [0, 0], sizes = [1, 128], strides = [1, 1]} : vector<1x384xf32> to vector<1x128xf32>
    %440 = arith.addf %438, %439 : vector<1x128xf32>
    %441 = arith.negf %440 : vector<1x128xf32>
    %442 = math.exp %441 : vector<1x128xf32>
    %cst_206 = arith.constant 1.000000e+00 : f32
    %443 = vector.broadcast %cst_206 : f32 to vector<1x128xf32>
    %444 = arith.addf %443, %442 : vector<1x128xf32>
    %445 = arith.divf %443, %444 : vector<1x128xf32>
    %446 = vector.extract_strided_slice %432 {offsets = [0, 128], sizes = [1, 128], strides = [1, 1]} : vector<1x384xf32> to vector<1x128xf32>
    %447 = vector.extract_strided_slice %437 {offsets = [0, 128], sizes = [1, 128], strides = [1, 1]} : vector<1x384xf32> to vector<1x128xf32>
    %448 = arith.addf %446, %447 : vector<1x128xf32>
    %449 = arith.negf %448 : vector<1x128xf32>
    %450 = math.exp %449 : vector<1x128xf32>
    %cst_207 = arith.constant 1.000000e+00 : f32
    %451 = vector.broadcast %cst_207 : f32 to vector<1x128xf32>
    %452 = arith.addf %451, %450 : vector<1x128xf32>
    %453 = arith.divf %451, %452 : vector<1x128xf32>
    %454 = vector.extract_strided_slice %432 {offsets = [0, 256], sizes = [1, 128], strides = [1, 1]} : vector<1x384xf32> to vector<1x128xf32>
    %455 = vector.extract_strided_slice %437 {offsets = [0, 256], sizes = [1, 128], strides = [1, 1]} : vector<1x384xf32> to vector<1x128xf32>
    %456 = arith.mulf %445, %455 : vector<1x128xf32>
    %457 = arith.addf %454, %456 : vector<1x128xf32>
    %458 = math.tanh %457 : vector<1x128xf32>
    %cst_208 = arith.constant 1.000000e+00 : f32
    %459 = vector.broadcast %cst_208 : f32 to vector<1x128xf32>
    %460 = arith.subf %459, %453 : vector<1x128xf32>
    %461 = arith.mulf %460, %458 : vector<1x128xf32>
    %462 = arith.mulf %453, %357 : vector<1x128xf32>
    %463 = arith.addf %461, %462 : vector<1x128xf32>
    %464 = arith.truncf %463 : vector<1x128xf32> to vector<1x128xbf16>
    %c0_209 = arith.constant 0 : index
    %c0_210 = arith.constant 0 : index
    %465 = vector.load %arg3[%c0_209, %c0_210] : memref<128x8xbf16, #tpu.memory_space<vmem>>, vector<128x8xbf16>
    %cst_211 = arith.constant dense<0.000000e+00> : vector<1x8xf32>
    %466 = tpu.matmul %464, %465, %cst_211 {dimension_numbers = #tpu.dot_dimension_numbers<[1], [0], [0], [1], [0, 0, 1, 1], [], []>} : vector<1x128xbf16>, vector<128x8xbf16>, vector<1x8xf32> -> vector<1x8xf32>
    %cst_212 = arith.constant dense<0xFF800000> : vector<1xf32>
    %467 = vector.multi_reduction <maximumf>, %466, %cst_212 [1] : vector<1x8xf32> to vector<1xf32>
    %468 = vector.shape_cast %467 : vector<1xf32> to vector<1x1xf32>
    %469 = vector.broadcast %468 : vector<1x1xf32> to vector<1x8xf32>
    %470 = arith.subf %466, %469 : vector<1x8xf32>
    %471 = math.exp %470 : vector<1x8xf32>
    %cst_213 = arith.constant dense<0.000000e+00> : vector<1xf32>
    %472 = vector.multi_reduction <add>, %471, %cst_213 [1] : vector<1x8xf32> to vector<1xf32>
    %473 = vector.shape_cast %472 : vector<1xf32> to vector<1x1xf32>
    %474 = tpu.reciprocal %473 {approx = true} : vector<1x1xf32> -> vector<1x1xf32>
    %475 = vector.broadcast %474 : vector<1x1xf32> to vector<1x8xf32>
    %476 = arith.mulf %471, %475 : vector<1x8xf32>
    %c0_214 = arith.constant 0 : index
    %c0_215 = arith.constant 0 : index
    %477 = vector.load %arg2[%c0_214, %c0_215] : memref<8x128xf32, #tpu.memory_space<vmem>>, vector<8x128xf32>
    %cst_216 = arith.constant dense<0.000000e+00> : vector<1x128xf32>
    %478 = tpu.matmul %476, %477, %cst_216 {dimension_numbers = #tpu.dot_dimension_numbers<[1], [0], [0], [1], [0, 0, 1, 1], [], []>} : vector<1x8xf32>, vector<8x128xf32>, vector<1x128xf32> -> vector<1x128xf32>
    %c0_217 = arith.constant 0 : index
    %c0_218 = arith.constant 0 : index
    %479 = vector.load %arg14[%c0_217, %c0_218] : memref<1x256xf32, #tpu.memory_space<vmem>>, vector<1x128xf32>
    tpu.vector_store %arg14[%c0_217, %c0_218], %463 {strides = array<i32>} : memref<1x256xf32, #tpu.memory_space<vmem>>, vector<1x128xf32>,
    %c0_219 = arith.constant 0 : index
    %c128_220 = arith.constant 128 : index
    %480 = vector.load %arg14[%c0_219, %c128_220] : memref<1x256xf32, #tpu.memory_space<vmem>>, vector<1x128xf32>
    tpu.vector_store %arg14[%c0_219, %c128_220], %478 {strides = array<i32>} : memref<1x256xf32, #tpu.memory_space<vmem>>, vector<1x128xf32>,
    %c0_221 = arith.constant 0 : index
    %c0_222 = arith.constant 0 : index
    %481 = vector.load %arg14[%c0_221, %c0_222] : memref<1x256xf32, #tpu.memory_space<vmem>>, vector<1x256xf32>
    %482 = arith.truncf %481 : vector<1x256xf32> to vector<1x256xbf16>
    %c0_223 = arith.constant 0 : index
    %c0_224 = arith.constant 0 : index
    %483 = vector.load %arg8[%c0_223, %c0_224] : memref<256x128xbf16, #tpu.memory_space<vmem>>, vector<256x128xbf16>
    %cst_225 = arith.constant dense<0.000000e+00> : vector<1x128xf32>
    %484 = tpu.matmul %482, %483, %cst_225 {dimension_numbers = #tpu.dot_dimension_numbers<[1], [0], [0], [1], [0, 0, 1, 1], [], []>} : vector<1x256xbf16>, vector<256x128xbf16>, vector<1x128xf32> -> vector<1x128xf32>
    %c0_226 = arith.constant 0 : index
    %c0_227 = arith.constant 0 : index
    %485 = vector.load %arg9[%c0_226, %c0_227] : memref<1x128xf32, #tpu.memory_space<vmem>>, vector<1x128xf32>
    %486 = arith.addf %484, %485 : vector<1x128xf32>
    %487 = math.tanh %486 : vector<1x128xf32>
    %488 = arith.truncf %487 : vector<1x128xf32> to vector<1x128xbf16>
    %cst_228 = arith.constant 0xFF800000 : f32
    %489 = vector.broadcast %cst_228 : f32 to vector<1x1xf32>
    %c0_i32_229 = arith.constant 0 : i32
    %490 = vector.broadcast %c0_i32_229 : i32 to vector<1x1xi32>
    %cst_230 = arith.constant 0.000000e+00 : f32
    %491 = vector.broadcast %cst_230 : f32 to vector<1x1xf32>
    %c0_231 = arith.constant 0 : index
    %c0_232 = arith.constant 0 : index
    %492 = vector.load %arg10[%c0_231, %c0_232] : memref<128x128xbf16, #tpu.memory_space<vmem>>, vector<128x128xbf16>
    %cst_233 = arith.constant dense<0.000000e+00> : vector<1x128xf32>
    %493 = tpu.matmul %488, %492, %cst_233 {dimension_numbers = #tpu.dot_dimension_numbers<[1], [0], [0], [1], [0, 0, 1, 1], [], []>} : vector<1x128xbf16>, vector<128x128xbf16>, vector<1x128xf32> -> vector<1x128xf32>
    %c0_234 = arith.constant 0 : index
    %c0_235 = arith.constant 0 : index
    %494 = vector.load %arg11[%c0_234, %c0_235] : memref<1x128xf32, #tpu.memory_space<vmem>>, vector<1x128xf32>
    %495 = arith.addf %493, %494 : vector<1x128xf32>
    %cst_236 = arith.constant dense<0xFF800000> : vector<1xf32>
    %496 = vector.multi_reduction <maximumf>, %495, %cst_236 [1] : vector<1x128xf32> to vector<1xf32>
    %497 = vector.shape_cast %496 : vector<1xf32> to vector<1x1xf32>
    %498 = vector.broadcast %497 : vector<1x1xf32> to vector<1x128xf32>
    %499 = arith.cmpf oeq, %495, %498 : vector<1x128xf32>
    %c0_i32_237 = arith.constant 0 : i32
    %500 = vector.broadcast %c0_i32_237 : i32 to vector<1x128xi32>
    %501 = arith.addi %0, %500 : vector<1x128xi32>
    %c128_i32_238 = arith.constant 128 : i32
    %502 = vector.broadcast %c128_i32_238 : i32 to vector<1x128xi32>
    %503 = arith.select %499, %501, %502 : vector<1x128xi1>, vector<1x128xi32>
    %cst_239 = arith.constant dense<2147483647> : vector<1xi32>
    %504 = vector.multi_reduction <minsi>, %503, %cst_239 [1] : vector<1x128xi32> to vector<1xi32>
    %505 = vector.shape_cast %504 : vector<1xi32> to vector<1x1xi32>
    %506 = arith.maximumf %489, %497 : vector<1x1xf32>
    %507 = arith.subf %489, %506 : vector<1x1xf32>
    %508 = math.exp %507 : vector<1x1xf32>
    %509 = arith.mulf %491, %508 : vector<1x1xf32>
    %510 = vector.broadcast %506 : vector<1x1xf32> to vector<1x128xf32>
    %511 = arith.subf %495, %510 : vector<1x128xf32>
    %512 = math.exp %511 : vector<1x128xf32>
    %cst_240 = arith.constant dense<0.000000e+00> : vector<1xf32>
    %513 = vector.multi_reduction <add>, %512, %cst_240 [1] : vector<1x128xf32> to vector<1xf32>
    %514 = vector.shape_cast %513 : vector<1xf32> to vector<1x1xf32>
    %515 = arith.addf %509, %514 : vector<1x1xf32>
    %516 = arith.cmpf ogt, %497, %489 : vector<1x1xf32>
    %517 = arith.select %516, %505, %490 : vector<1x1xi1>, vector<1x1xi32>
    %518 = vector.shape_cast %517 : vector<1x1xi32> to vector<1x1x1xi32>
    %cst_241 = arith.constant dense<-2147483648> : vector<1xi32>
    %519 = vector.multi_reduction <maxsi>, %518, %cst_241 [1, 2] : vector<1x1x1xi32> to vector<1xi32>
    %520 = vector.shape_cast %519 : vector<1xi32> to vector<1x1x1xi32>
    %521 = vector.extract %520[0, 0, 0] : i32 from vector<1x1x1xi32>
    %522 = arith.index_cast %c4_i32 : i32 to index
    %523 = memref.load %arg12[%522] : memref<6xi32, #tpu.memory_space<smem>>
    memref.store %521, %arg12[%522] : memref<6xi32, #tpu.memory_space<smem>>
    %cst_242 = arith.constant 1.000000e+00 : f32
    %524 = vector.broadcast %cst_242 : f32 to vector<1x1xf32>
    %525 = arith.divf %524, %515 : vector<1x1xf32>
    %526 = vector.shape_cast %525 : vector<1x1xf32> to vector<1x1x1xf32>
    %cst_243 = arith.constant dense<0xFF800000> : vector<1xf32>
    %527 = vector.multi_reduction <maximumf>, %526, %cst_243 [1, 2] : vector<1x1x1xf32> to vector<1xf32>
    %528 = vector.shape_cast %527 : vector<1xf32> to vector<1x1x1xf32>
    %529 = vector.extract %528[0, 0, 0] : f32 from vector<1x1x1xf32>
    %530 = arith.index_cast %c4_i32 : i32 to index
    %531 = memref.load %arg13[%530] : memref<6xf32, #tpu.memory_space<smem>>
    memref.store %529, %arg13[%530] : memref<6xf32, #tpu.memory_space<smem>>
    %c5_i32 = arith.constant 5 : i32
    %532 = arith.index_cast %521 : i32 to index
    %c0_244 = arith.constant 0 : index
    %533 = vector.load %arg0[%532, %c0_244] : memref<64x128xf32, #tpu.memory_space<vmem>>, vector<1x128xf32>
    %534 = arith.truncf %533 : vector<1x128xf32> to vector<1x128xbf16>
    %c0_245 = arith.constant 0 : index
    %c0_246 = arith.constant 0 : index
    %535 = vector.load %arg4[%c0_245, %c0_246] : memref<128x384xbf16, #tpu.memory_space<vmem>>, vector<128x384xbf16>
    %cst_247 = arith.constant dense<0.000000e+00> : vector<1x384xf32>
    %536 = tpu.matmul %534, %535, %cst_247 {dimension_numbers = #tpu.dot_dimension_numbers<[1], [0], [0], [1], [0, 0, 1, 1], [], []>} : vector<1x128xbf16>, vector<128x384xbf16>, vector<1x384xf32> -> vector<1x384xf32>
    %c0_248 = arith.constant 0 : index
    %c0_249 = arith.constant 0 : index
    %537 = vector.load %arg6[%c0_248, %c0_249] : memref<1x384xf32, #tpu.memory_space<vmem>>, vector<1x384xf32>
    %538 = arith.addf %536, %537 : vector<1x384xf32>
    %539 = arith.truncf %463 : vector<1x128xf32> to vector<1x128xbf16>
    %c0_250 = arith.constant 0 : index
    %c0_251 = arith.constant 0 : index
    %540 = vector.load %arg5[%c0_250, %c0_251] : memref<128x384xbf16, #tpu.memory_space<vmem>>, vector<128x384xbf16>
    %cst_252 = arith.constant dense<0.000000e+00> : vector<1x384xf32>
    %541 = tpu.matmul %539, %540, %cst_252 {dimension_numbers = #tpu.dot_dimension_numbers<[1], [0], [0], [1], [0, 0, 1, 1], [], []>} : vector<1x128xbf16>, vector<128x384xbf16>, vector<1x384xf32> -> vector<1x384xf32>
    %c0_253 = arith.constant 0 : index
    %c0_254 = arith.constant 0 : index
    %542 = vector.load %arg7[%c0_253, %c0_254] : memref<1x384xf32, #tpu.memory_space<vmem>>, vector<1x384xf32>
    %543 = arith.addf %541, %542 : vector<1x384xf32>
    %544 = vector.extract_strided_slice %538 {offsets = [0, 0], sizes = [1, 128], strides = [1, 1]} : vector<1x384xf32> to vector<1x128xf32>
    %545 = vector.extract_strided_slice %543 {offsets = [0, 0], sizes = [1, 128], strides = [1, 1]} : vector<1x384xf32> to vector<1x128xf32>
    %546 = arith.addf %544, %545 : vector<1x128xf32>
    %547 = arith.negf %546 : vector<1x128xf32>
    %548 = math.exp %547 : vector<1x128xf32>
    %cst_255 = arith.constant 1.000000e+00 : f32
    %549 = vector.broadcast %cst_255 : f32 to vector<1x128xf32>
    %550 = arith.addf %549, %548 : vector<1x128xf32>
    %551 = arith.divf %549, %550 : vector<1x128xf32>
    %552 = vector.extract_strided_slice %538 {offsets = [0, 128], sizes = [1, 128], strides = [1, 1]} : vector<1x384xf32> to vector<1x128xf32>
    %553 = vector.extract_strided_slice %543 {offsets = [0, 128], sizes = [1, 128], strides = [1, 1]} : vector<1x384xf32> to vector<1x128xf32>
    %554 = arith.addf %552, %553 : vector<1x128xf32>
    %555 = arith.negf %554 : vector<1x128xf32>
    %556 = math.exp %555 : vector<1x128xf32>
    %cst_256 = arith.constant 1.000000e+00 : f32
    %557 = vector.broadcast %cst_256 : f32 to vector<1x128xf32>
    %558 = arith.addf %557, %556 : vector<1x128xf32>
    %559 = arith.divf %557, %558 : vector<1x128xf32>
    %560 = vector.extract_strided_slice %538 {offsets = [0, 256], sizes = [1, 128], strides = [1, 1]} : vector<1x384xf32> to vector<1x128xf32>
    %561 = vector.extract_strided_slice %543 {offsets = [0, 256], sizes = [1, 128], strides = [1, 1]} : vector<1x384xf32> to vector<1x128xf32>
    %562 = arith.mulf %551, %561 : vector<1x128xf32>
    %563 = arith.addf %560, %562 : vector<1x128xf32>
    %564 = math.tanh %563 : vector<1x128xf32>
    %cst_257 = arith.constant 1.000000e+00 : f32
    %565 = vector.broadcast %cst_257 : f32 to vector<1x128xf32>
    %566 = arith.subf %565, %559 : vector<1x128xf32>
    %567 = arith.mulf %566, %564 : vector<1x128xf32>
    %568 = arith.mulf %559, %463 : vector<1x128xf32>
    %569 = arith.addf %567, %568 : vector<1x128xf32>
    %570 = arith.truncf %569 : vector<1x128xf32> to vector<1x128xbf16>
    %c0_258 = arith.constant 0 : index
    %c0_259 = arith.constant 0 : index
    %571 = vector.load %arg3[%c0_258, %c0_259] : memref<128x8xbf16, #tpu.memory_space<vmem>>, vector<128x8xbf16>
    %cst_260 = arith.constant dense<0.000000e+00> : vector<1x8xf32>
    %572 = tpu.matmul %570, %571, %cst_260 {dimension_numbers = #tpu.dot_dimension_numbers<[1], [0], [0], [1], [0, 0, 1, 1], [], []>} : vector<1x128xbf16>, vector<128x8xbf16>, vector<1x8xf32> -> vector<1x8xf32>
    %cst_261 = arith.constant dense<0xFF800000> : vector<1xf32>
    %573 = vector.multi_reduction <maximumf>, %572, %cst_261 [1] : vector<1x8xf32> to vector<1xf32>
    %574 = vector.shape_cast %573 : vector<1xf32> to vector<1x1xf32>
    %575 = vector.broadcast %574 : vector<1x1xf32> to vector<1x8xf32>
    %576 = arith.subf %572, %575 : vector<1x8xf32>
    %577 = math.exp %576 : vector<1x8xf32>
    %cst_262 = arith.constant dense<0.000000e+00> : vector<1xf32>
    %578 = vector.multi_reduction <add>, %577, %cst_262 [1] : vector<1x8xf32> to vector<1xf32>
    %579 = vector.shape_cast %578 : vector<1xf32> to vector<1x1xf32>
    %580 = tpu.reciprocal %579 {approx = true} : vector<1x1xf32> -> vector<1x1xf32>
    %581 = vector.broadcast %580 : vector<1x1xf32> to vector<1x8xf32>
    %582 = arith.mulf %577, %581 : vector<1x8xf32>
    %c0_263 = arith.constant 0 : index
    %c0_264 = arith.constant 0 : index
    %583 = vector.load %arg2[%c0_263, %c0_264] : memref<8x128xf32, #tpu.memory_space<vmem>>, vector<8x128xf32>
    %cst_265 = arith.constant dense<0.000000e+00> : vector<1x128xf32>
    %584 = tpu.matmul %582, %583, %cst_265 {dimension_numbers = #tpu.dot_dimension_numbers<[1], [0], [0], [1], [0, 0, 1, 1], [], []>} : vector<1x8xf32>, vector<8x128xf32>, vector<1x128xf32> -> vector<1x128xf32>
    %c0_266 = arith.constant 0 : index
    %c0_267 = arith.constant 0 : index
    %585 = vector.load %arg14[%c0_266, %c0_267] : memref<1x256xf32, #tpu.memory_space<vmem>>, vector<1x128xf32>
    tpu.vector_store %arg14[%c0_266, %c0_267], %569 {strides = array<i32>} : memref<1x256xf32, #tpu.memory_space<vmem>>, vector<1x128xf32>,
    %c0_268 = arith.constant 0 : index
    %c128_269 = arith.constant 128 : index
    %586 = vector.load %arg14[%c0_268, %c128_269] : memref<1x256xf32, #tpu.memory_space<vmem>>, vector<1x128xf32>
    tpu.vector_store %arg14[%c0_268, %c128_269], %584 {strides = array<i32>} : memref<1x256xf32, #tpu.memory_space<vmem>>, vector<1x128xf32>,
    %c0_270 = arith.constant 0 : index
    %c0_271 = arith.constant 0 : index
    %587 = vector.load %arg14[%c0_270, %c0_271] : memref<1x256xf32, #tpu.memory_space<vmem>>, vector<1x256xf32>
    %588 = arith.truncf %587 : vector<1x256xf32> to vector<1x256xbf16>
    %c0_272 = arith.constant 0 : index
    %c0_273 = arith.constant 0 : index
    %589 = vector.load %arg8[%c0_272, %c0_273] : memref<256x128xbf16, #tpu.memory_space<vmem>>, vector<256x128xbf16>
    %cst_274 = arith.constant dense<0.000000e+00> : vector<1x128xf32>
    %590 = tpu.matmul %588, %589, %cst_274 {dimension_numbers = #tpu.dot_dimension_numbers<[1], [0], [0], [1], [0, 0, 1, 1], [], []>} : vector<1x256xbf16>, vector<256x128xbf16>, vector<1x128xf32> -> vector<1x128xf32>
    %c0_275 = arith.constant 0 : index
    %c0_276 = arith.constant 0 : index
    %591 = vector.load %arg9[%c0_275, %c0_276] : memref<1x128xf32, #tpu.memory_space<vmem>>, vector<1x128xf32>
    %592 = arith.addf %590, %591 : vector<1x128xf32>
    %593 = math.tanh %592 : vector<1x128xf32>
    %594 = arith.truncf %593 : vector<1x128xf32> to vector<1x128xbf16>
    %cst_277 = arith.constant 0xFF800000 : f32
    %595 = vector.broadcast %cst_277 : f32 to vector<1x1xf32>
    %c0_i32_278 = arith.constant 0 : i32
    %596 = vector.broadcast %c0_i32_278 : i32 to vector<1x1xi32>
    %cst_279 = arith.constant 0.000000e+00 : f32
    %597 = vector.broadcast %cst_279 : f32 to vector<1x1xf32>
    %c0_280 = arith.constant 0 : index
    %c0_281 = arith.constant 0 : index
    %598 = vector.load %arg10[%c0_280, %c0_281] : memref<128x128xbf16, #tpu.memory_space<vmem>>, vector<128x128xbf16>
    %cst_282 = arith.constant dense<0.000000e+00> : vector<1x128xf32>
    %599 = tpu.matmul %594, %598, %cst_282 {dimension_numbers = #tpu.dot_dimension_numbers<[1], [0], [0], [1], [0, 0, 1, 1], [], []>} : vector<1x128xbf16>, vector<128x128xbf16>, vector<1x128xf32> -> vector<1x128xf32>
    %c0_283 = arith.constant 0 : index
    %c0_284 = arith.constant 0 : index
    %600 = vector.load %arg11[%c0_283, %c0_284] : memref<1x128xf32, #tpu.memory_space<vmem>>, vector<1x128xf32>
    %601 = arith.addf %599, %600 : vector<1x128xf32>
    %cst_285 = arith.constant dense<0xFF800000> : vector<1xf32>
    %602 = vector.multi_reduction <maximumf>, %601, %cst_285 [1] : vector<1x128xf32> to vector<1xf32>
    %603 = vector.shape_cast %602 : vector<1xf32> to vector<1x1xf32>
    %604 = vector.broadcast %603 : vector<1x1xf32> to vector<1x128xf32>
    %605 = arith.cmpf oeq, %601, %604 : vector<1x128xf32>
    %c0_i32_286 = arith.constant 0 : i32
    %606 = vector.broadcast %c0_i32_286 : i32 to vector<1x128xi32>
    %607 = arith.addi %0, %606 : vector<1x128xi32>
    %c128_i32_287 = arith.constant 128 : i32
    %608 = vector.broadcast %c128_i32_287 : i32 to vector<1x128xi32>
    %609 = arith.select %605, %607, %608 : vector<1x128xi1>, vector<1x128xi32>
    %cst_288 = arith.constant dense<2147483647> : vector<1xi32>
    %610 = vector.multi_reduction <minsi>, %609, %cst_288 [1] : vector<1x128xi32> to vector<1xi32>
    %611 = vector.shape_cast %610 : vector<1xi32> to vector<1x1xi32>
    %612 = arith.maximumf %595, %603 : vector<1x1xf32>
    %613 = arith.subf %595, %612 : vector<1x1xf32>
    %614 = math.exp %613 : vector<1x1xf32>
    %615 = arith.mulf %597, %614 : vector<1x1xf32>
    %616 = vector.broadcast %612 : vector<1x1xf32> to vector<1x128xf32>
    %617 = arith.subf %601, %616 : vector<1x128xf32>
    %618 = math.exp %617 : vector<1x128xf32>
    %cst_289 = arith.constant dense<0.000000e+00> : vector<1xf32>
    %619 = vector.multi_reduction <add>, %618, %cst_289 [1] : vector<1x128xf32> to vector<1xf32>
    %620 = vector.shape_cast %619 : vector<1xf32> to vector<1x1xf32>
    %621 = arith.addf %615, %620 : vector<1x1xf32>
    %622 = arith.cmpf ogt, %603, %595 : vector<1x1xf32>
    %623 = arith.select %622, %611, %596 : vector<1x1xi1>, vector<1x1xi32>
    %624 = vector.shape_cast %623 : vector<1x1xi32> to vector<1x1x1xi32>
    %cst_290 = arith.constant dense<-2147483648> : vector<1xi32>
    %625 = vector.multi_reduction <maxsi>, %624, %cst_290 [1, 2] : vector<1x1x1xi32> to vector<1xi32>
    %626 = vector.shape_cast %625 : vector<1xi32> to vector<1x1x1xi32>
    %627 = vector.extract %626[0, 0, 0] : i32 from vector<1x1x1xi32>
    %628 = arith.index_cast %c5_i32 : i32 to index
    %629 = memref.load %arg12[%628] : memref<6xi32, #tpu.memory_space<smem>>
    memref.store %627, %arg12[%628] : memref<6xi32, #tpu.memory_space<smem>>
    %cst_291 = arith.constant 1.000000e+00 : f32
    %630 = vector.broadcast %cst_291 : f32 to vector<1x1xf32>
    %631 = arith.divf %630, %621 : vector<1x1xf32>
    %632 = vector.shape_cast %631 : vector<1x1xf32> to vector<1x1x1xf32>
    %cst_292 = arith.constant dense<0xFF800000> : vector<1xf32>
    %633 = vector.multi_reduction <maximumf>, %632, %cst_292 [1, 2] : vector<1x1x1xf32> to vector<1xf32>
    %634 = vector.shape_cast %633 : vector<1xf32> to vector<1x1x1xf32>
    %635 = vector.extract %634[0, 0, 0] : f32 from vector<1x1x1xf32>
    %636 = arith.index_cast %c5_i32 : i32 to index
    %637 = memref.load %arg13[%636] : memref<6xf32, #tpu.memory_space<smem>>
    memref.store %635, %arg13[%636] : memref<6xf32, #tpu.memory_space<smem>>
    %c6_i32 = arith.constant 6 : i32
    return
  }
}

</mosaic_0001>

<bundles_post_ra>
// kernel: greedy_search_decode.2
= control target key start
LH: loop header
LB: loop body
LE: loop exit
PB: predicated region body
PF: predicated region fallthrough
CT: control target
= control target key end

     0   :  { %17 = vsyncpa [#allocation9], 0  ;;  %s8325_s0 = inlined_call_operand.hbm [shape: s32[8], index: 0, kind: input, shape index: {}]   ;;  %s8326_s1 = inlined_call_operand.hbm [shape: f32[64,128], index: 1, kind: input, shape index: {}]   ;;  %s8327_s2 = inlined_call_operand.hbm [shape: bf16[128,384], index: 2, kind: input, shape index: {}]   ;;  %s8328_s3 = inlined_call_operand.hbm [shape: bf16[128,384], index: 3, kind: input, shape index: {}]   ;;  %s8329_s4 = inlined_call_operand.hbm [shape: f32[1,384], index: 4, kind: input, shape index: {}]   ;;  %s8330_s5 = inlined_call_operand.hbm [shape: f32[1,384], index: 5, kind: input, shape index: {}]   ;;  %s8331_s6 = inlined_call_operand.hbm [shape: bf16[128,384], index: 6, kind: input, shape index: {}]   ;;  %s8332_s7 = inlined_call_operand.hbm [shape: bf16[128,384], index: 7, kind: input, shape index: {}]   ;;  %s8333_s8 = inlined_call_operand.hbm [shape: f32[1,384], index: 8, kind: input, shape index: {}]   ;;  %s8334_s9 = inlined_call_operand.hbm [shape: f32[1,384], index: 9, kind: input, shape index: {}]   ;;  %s8335_s10 = inlined_call_operand.hbm [shape: f32[8,128], index: 10, kind: output, shape index: {0}]   ;;  %s8336_s11 = inlined_call_operand.hbm [shape: f32[1,128], index: 11, kind: output, shape index: {1}]  }
   0x1   :  { %18 = vsyncpa [#allocation7], 0 }
   0x2   :  { %19 = vsyncpa [#allocation12], 0 }
   0x3   :  { %20 = vsyncpa [#allocation15], 0 }
   0x4   :  { %21 = vsyncpa [#allocation18], 0 }
   0x5   :  { %22 = vsyncpa [#allocation21], 0 }
   0x6   :  { %23 = vsyncpa [#allocation8], 0 }
   0x7   :  { %24 = vsyncpa [#allocation25], 0  ;;  %s7196_s17 = smov [#allocation11]   ;;  %s6928_s21 = scalar_lea.hbm %s8327_s2, 3072 }
   0x8   :  { %s50_s18 = sshll.u32 %s7196_s17, 4  ;;  %p6929_p0 = scmp.ne.s32.totalorder %s8327_s2, %s6928_s21  ;;  %s51_s18 = int_to_ptr.vmem [resolvable:$true] %s50_s18 }
   0x9   :  { %p6932_p1 = scmp.lt.u32.totalorder %s6928_s21, %s8327_s2 }
   0xb   :  { %p6934_p2 = pnand %p6932_p1, %p6929_p0 }
   0xd   :  { %6937 = shalt.err (!%p6934_p2)
}
   0xe   :  { %s6938_s26 = scalar_lea.vmem %s51_s18, 3072  ;;  %p6943_p4 = scmp.lt.s32.totalorder %s51_s18, %s51_s18 }
   0xf   :  { %p6939_p3 = scmp.ne.s32.totalorder %s51_s18, %s6938_s26  ;;  %p6944_p5 = scmp.lt.s32.totalorder %s6938_s26, %s6938_s26 }
  0x11   :  { %p6945_p6 = por %p6944_p5, %p6943_p4 }
  0x13   :  { %p6946_p7 = pnand %p6945_p6, %p6939_p3 }
  0x15   :  { %6949 = shalt.err (!%p6946_p7)
}
  0x16   :  { %s7197_s27 = smov 192   ;;  %s7198_s28 = smov 12  }
  0x17   :  { %56 = dma.hbm_to_vmem [thread:$0]  %s8327_s2, 3072, %s51_s18, [#allocation12], %s7197_s27, %s7197_s27, %s7198_s28  }
  0x18   :  { %s7199_s12 = smov [#allocation14]   ;;  %s7200_s14 = smov [#allocation17]  }
  0x19   :  { %s75_s13 = sshll.u32 %s7199_s12, 4  ;;  %s94_s15 = sshll.u32 %s7200_s14, 4  ;;  %s76_s13 = int_to_ptr.vmem [resolvable:$true] %s75_s13  ;;  %s95_s15 = int_to_ptr.vmem [resolvable:$true] %s94_s15 }
  0x1a   :  { %s6950_s19 = scalar_lea.hbm %s8329_s4, 48 }
  0x1b   :  { %p6951_p8 = scmp.ne.s32.totalorder %s8329_s4, %s6950_s19  ;;  %p6954_p9 = scmp.lt.u32.totalorder %s6950_s19, %s8329_s4 }
  0x1d   :  { %p6956_p10 = pnand %p6954_p9, %p6951_p8 }
  0x1f   :  { %6959 = shalt.err (!%p6956_p10)
}
  0x20   :  { %s6960_s2 = scalar_lea.vmem %s76_s13, 48  ;;  %s6964_s18 = scalar_lea.vmem %s76_s13, 64 }
  0x21   :  { %p6961_p11 = scmp.ne.s32.totalorder %s76_s13, %s6960_s2  ;;  %p6965_p12 = scmp.lt.s32.totalorder %s76_s13, %s76_s13 }
  0x22   :  { %p6966_p13 = scmp.lt.s32.totalorder %s6964_s18, %s6960_s2 }
  0x24   :  { %p6967_p0 = por %p6966_p13, %p6965_p12 }
  0x26   :  { %p6968_p1 = pnand %p6967_p0, %p6961_p11 }
  0x28   :  { %6971 = shalt.err (!%p6968_p1)
}
  0x29   :  { %78 = dma.hbm_to_vmem [thread:$0]  %s8329_s4, 48, %s76_s13, [#allocation15]  }
  0x2a   :  { %s6972_s30 = scalar_lea.hbm %s8331_s6, 3072 }
  0x2b   :  { %p6973_p2 = scmp.ne.s32.totalorder %s8331_s6, %s6972_s30  ;;  %p6976_p3 = scmp.lt.u32.totalorder %s6972_s30, %s8331_s6 }
  0x2d   :  { %p6978_p4 = pnand %p6976_p3, %p6973_p2 }
  0x2f   :  { %6981 = shalt.err (!%p6978_p4)
}
  0x30   :  { %s6982_s19 = scalar_lea.vmem %s95_s15, 3072  ;;  %p6987_p6 = scmp.lt.s32.totalorder %s95_s15, %s95_s15 }
  0x31   :  { %p6983_p5 = scmp.ne.s32.totalorder %s95_s15, %s6982_s19  ;;  %p6988_p7 = scmp.lt.s32.totalorder %s6982_s19, %s6982_s19 }
  0x33   :  { %p6989_p8 = por %p6988_p7, %p6987_p6 }
  0x35   :  { %p6990_p9 = pnand %p6989_p8, %p6983_p5 }
  0x37   :  { %6993 = shalt.err (!%p6990_p9)
}
  0x38   :  { %100 = dma.hbm_to_vmem [thread:$0]  %s8331_s6, 3072, %s95_s15, [#allocation18], %s7197_s27, %s7197_s27, %s7198_s28  }
  0x39   :  { %s7201_s20 = smov [#allocation20]   ;;  %s6994_s2 = scalar_lea.hbm %s8333_s8, 48 }
  0x3a   :  { %s119_s21 = sshll.u32 %s7201_s20, 4  ;;  %p6995_p10 = scmp.ne.s32.totalorder %s8333_s8, %s6994_s2  ;;  %s120_s21 = int_to_ptr.vmem [resolvable:$true] %s119_s21 }
  0x3b   :  { %p6998_p11 = scmp.lt.u32.totalorder %s6994_s2, %s8333_s8 }
  0x3d   :  { %p7000_p12 = pnand %p6998_p11, %p6995_p10 }
  0x3f   :  { %7003 = shalt.err (!%p7000_p12)
}
  0x40   :  { %s7004_s29 = scalar_lea.vmem %s120_s21, 48  ;;  %s7008_s6 = scalar_lea.vmem %s120_s21, 64 }
  0x41   :  { %p7005_p13 = scmp.ne.s32.totalorder %s120_s21, %s7004_s29  ;;  %p7009_p0 = scmp.lt.s32.totalorder %s120_s21, %s120_s21 }
  0x42   :  { %p7010_p1 = scmp.lt.s32.totalorder %s7008_s6, %s7004_s29 }
  0x44   :  { %p7011_p2 = por %p7010_p1, %p7009_p0 }
  0x46   :  { %p7012_p3 = pnand %p7011_p2, %p7005_p13 }
  0x48   :  { %7015 = shalt.err (!%p7012_p3)
}
  0x49   :  { %122 = dma.hbm_to_vmem [thread:$0]  %s8333_s8, 48, %s120_s21, [#allocation21]  }
  0x4a   :  { %s7016_s16 = scalar_lea.hbm %s8325_s0, 16 }
  0x4b   :  { %p7017_p4 = scmp.ne.s32.totalorder %s8325_s0, %s7016_s16  ;;  %p7020_p5 = scmp.lt.u32.totalorder %s7016_s16, %s8325_s0 }
  0x4d   :  { %p7022_p6 = pnand %p7020_p5, %p7017_p4 }
  0x4f   :  { %7025 = shalt.err (!%p7022_p6)
}
  0x50   :  { %s7202_s20 = smov [#allocation6]   ;;  %s7203_s8 = smov [#allocation10]  }
  0x51   :  { %32 = dma.hbm_to_smem %s8325_s0, 16, %s7202_s20, [#allocation9]  }
  0x52   :  { %s38_s21 = sshll.u32 %s7203_s8, 4  ;;  %s7026_s24 = scalar_lea.hbm %s8326_s1, 1024  ;;  %s39_s21 = int_to_ptr.vmem [resolvable:$true] %s38_s21 }
  0x53   :  { %p7027_p7 = scmp.ne.s32.totalorder %s8326_s1, %s7026_s24  ;;  %p7030_p8 = scmp.lt.u32.totalorder %s7026_s24, %s8326_s1 }
  0x55   :  { %p7032_p9 = pnand %p7030_p8, %p7027_p7 }
  0x57   :  { %7035 = shalt.err (!%p7032_p9)
}
  0x58   :  { %s7036_s15 = scalar_lea.vmem %s39_s21, 1024  ;;  %p7041_p11 = scmp.lt.s32.totalorder %s39_s21, %s39_s21 }
  0x59   :  { %p7037_p10 = scmp.ne.s32.totalorder %s39_s21, %s7036_s15  ;;  %p7042_p12 = scmp.lt.s32.totalorder %s7036_s15, %s7036_s15 }
  0x5b   :  { %p7043_p13 = por %p7042_p12, %p7041_p11 }
  0x5d   :  { %p7044_p0 = pnand %p7043_p13, %p7037_p10 }
  0x5f   :  { %7047 = shalt.err (!%p7044_p0)
}
  0x60   :  { %s7204_s0 = smov 128   ;;  %s7205_s30 = smov 8  }
  0x61   :  { %44 = dma.hbm_to_vmem [thread:$0]  %s8326_s1, 1024, %s39_s21, [#allocation7], %s7204_s0, %s7204_s0, %s7205_s30  }
  0x62   :  { %s7206_s16 = smov [#allocation13]   ;;  %s7207_s19 = smov [#allocation16]  }
  0x63   :  { %s62_s17 = sshll.u32 %s7206_s16, 4  ;;  %s85_s4 = sshll.u32 %s7207_s19, 4  ;;  %s63_s17 = int_to_ptr.vmem [resolvable:$true] %s62_s17  ;;  %s86_s4 = int_to_ptr.vmem [resolvable:$true] %s85_s4 }
  0x64   :  { %s7048_s22 = scalar_lea.hbm %s8328_s3, 3072 }
  0x65   :  { %p7049_p1 = scmp.ne.s32.totalorder %s8328_s3, %s7048_s22  ;;  %p7052_p2 = scmp.lt.u32.totalorder %s7048_s22, %s8328_s3 }
  0x67   :  { %p7054_p3 = pnand %p7052_p2, %p7049_p1 }
  0x69   :  { %7057 = shalt.err (!%p7054_p3)
}
  0x6a   :  { %s7058_s1 = scalar_lea.vmem %s63_s17, 3072  ;;  %p7063_p5 = scmp.lt.s32.totalorder %s63_s17, %s63_s17 }
  0x6b   :  { %p7059_p4 = scmp.ne.s32.totalorder %s63_s17, %s7058_s1  ;;  %p7064_p6 = scmp.lt.s32.totalorder %s7058_s1, %s7058_s1 }
  0x6d   :  { %p7065_p7 = por %p7064_p6, %p7063_p5 }
  0x6f   :  { %p7066_p8 = pnand %p7065_p7, %p7059_p4 }
  0x71   :  { %7069 = shalt.err (!%p7066_p8)
}
  0x72   :  { %68 = dma.hbm_to_vmem [thread:$0]  %s8328_s3, 3072, %s63_s17, [#allocation12], %s7197_s27, %s7197_s27, %s7198_s28  }
  0x73   :  { %s7070_s29 = scalar_lea.hbm %s8330_s5, 48 }
  0x74   :  { %p7071_p9 = scmp.ne.s32.totalorder %s8330_s5, %s7070_s29  ;;  %p7074_p10 = scmp.lt.u32.totalorder %s7070_s29, %s8330_s5 }
  0x76   :  { %p7076_p11 = pnand %p7074_p10, %p7071_p9 }
  0x78   :  { %7079 = shalt.err (!%p7076_p11)
}
  0x79   :  { %s7080_s12 = scalar_lea.vmem %s86_s4, 48  ;;  %s7084_s14 = scalar_lea.vmem %s86_s4, 64 }
  0x7a   :  { %p7081_p12 = scmp.ne.s32.totalorder %s86_s4, %s7080_s12  ;;  %p7085_p13 = scmp.lt.s32.totalorder %s86_s4, %s86_s4 }
  0x7b   :  { %p7086_p0 = scmp.lt.s32.totalorder %s7084_s14, %s7080_s12 }
  0x7d   :  { %p7087_p1 = por %p7086_p0, %p7085_p13 }
  0x7f   :  { %p7088_p2 = pnand %p7087_p1, %p7081_p12 }
  0x81   :  { %7091 = shalt.err (!%p7088_p2)
}
  0x82   :  { %88 = dma.hbm_to_vmem [thread:$0]  %s8330_s5, 48, %s86_s4, [#allocation15]  }
  0x83   :  { %s7208_s17 = smov [#allocation19]   ;;  %s7209_s13 = smov [#allocation22]  }
  0x84   :  { %s106_s19 = sshll.u32 %s7208_s17, 4  ;;  %s129_s20 = sshll.u32 %s7209_s13, 4  ;;  %s107_s19 = int_to_ptr.vmem [resolvable:$true] %s106_s19  ;;  %s130_s20 = int_to_ptr.vmem [resolvable:$true] %s129_s20 }
  0x85   :  { %s7092_s8 = scalar_lea.hbm %s8332_s7, 3072 }
  0x86   :  { %p7093_p3 = scmp.ne.s32.totalorder %s8332_s7, %s7092_s8  ;;  %p7096_p4 = scmp.lt.u32.totalorder %s7092_s8, %s8332_s7 }
  0x88   :  { %p7098_p5 = pnand %p7096_p4, %p7093_p3 }
  0x8a   :  { %7101 = shalt.err (!%p7098_p5)
}
  0x8b   :  { %s7102_s5 = scalar_lea.vmem %s107_s19, 3072  ;;  %p7107_p7 = scmp.lt.s32.totalorder %s107_s19, %s107_s19 }
  0x8c   :  { %p7103_p6 = scmp.ne.s32.totalorder %s107_s19, %s7102_s5  ;;  %p7108_p8 = scmp.lt.s32.totalorder %s7102_s5, %s7102_s5 }
  0x8e   :  { %p7109_p9 = por %p7108_p8, %p7107_p7 }
  0x90   :  { %p7110_p10 = pnand %p7109_p9, %p7103_p6 }
  0x92   :  { %7113 = shalt.err (!%p7110_p10)
}
  0x93   :  { %112 = dma.hbm_to_vmem [thread:$0]  %s8332_s7, 3072, %s107_s19, [#allocation18], %s7197_s27, %s7197_s27, %s7198_s28  }
  0x94   :  { %s7114_s29 = scalar_lea.hbm %s8334_s9, 48 }
  0x95   :  { %p7115_p11 = scmp.ne.s32.totalorder %s8334_s9, %s7114_s29  ;;  %p7118_p12 = scmp.lt.u32.totalorder %s7114_s29, %s8334_s9 }
  0x97   :  { %p7120_p13 = pnand %p7118_p12, %p7115_p11 }
  0x99   :  { %7123 = shalt.err (!%p7120_p13)
}
  0x9a   :  { %s7124_s12 = scalar_lea.vmem %s130_s20, 48  ;;  %s7128_s14 = scalar_lea.vmem %s130_s20, 64 }
  0x9b   :  { %p7125_p0 = scmp.ne.s32.totalorder %s130_s20, %s7124_s12  ;;  %p7129_p1 = scmp.lt.s32.totalorder %s130_s20, %s130_s20 }
  0x9c   :  { %p7130_p2 = scmp.lt.s32.totalorder %s7128_s14, %s7124_s12 }
  0x9e   :  { %p7131_p3 = por %p7130_p2, %p7129_p1 }
  0xa0   :  { %p7132_p4 = pnand %p7131_p3, %p7125_p0 }
  0xa2   :  { %7135 = shalt.err (!%p7132_p4)
}
  0xa3   :  { %132 = dma.hbm_to_vmem [thread:$0]  %s8334_s9, 48, %s130_s20, [#allocation21]  }
  0xa4   :  { %7180 = dma.done.wait [#allocation9], 16  }
  0xa5   :  { %7181 = vsyncadd [#allocation9], 4294967280 }
  0xa6   :  { %7182 = dma.done.wait [#allocation7], 1024  }
  0xa7   :  { %7183 = vsyncadd [#allocation7], 4294966272 }
  0xa8   :  { %7184 = dma.done.wait [#allocation12], 6144  }
  0xa9   :  { %7185 = vsyncadd [#allocation12], 4294961152 }
  0xaa   :  { %7186 = dma.done.wait [#allocation15], 96  }
  0xab   :  { %7187 = vsyncadd [#allocation15], 4294967200 }
  0xac   :  { %7188 = dma.done.wait [#allocation18], 6144  }
  0xad   :  { %7189 = vsyncadd [#allocation18], 4294961152 }
  0xae   :  { %7190 = dma.done.wait [#allocation21], 96  }
  0xaf   :  { %7191 = vsyncadd [#allocation21], 4294967200 }
  0xb0   :  { %163 = sfence }
  0xb1   :  { %v6384_v0 = vld [vmem:[#allocation11 + $0x4] ss:$12 sps:$4 sm:$0xff]   ;;  %v6386_v1 = vld [vmem:[#allocation11] ss:$12 sps:$4 sm:$0xff]   ;;  %v7210_v2 = vmov 0.0   ;;  %v7211_v3 = vmov 0  }
  0xb2   :  { %6005 = vmatprep.subr.bf16.mxu1 %v7210_v2  ;;  %408 = vmatprep.mubr.bf16.mxu0 %v7211_v3  ;;  %v6387_v4 = vld [vmem:[#allocation11 + $0x8] ss:$12 sps:$4 sm:$0xff]   ;;  %s7409_s9 = sld [smem:[#allocation6]]  ;;  %v6390_v6 = vld [vmem:[#allocation11 + $0x18] ss:$12 sps:$4 sm:$0xff]   ;;  %vm7212_vm0 = vmmov 0  }
  0xb3   :  { %376 = vmatprep.subr.bf16.mxu0 %v6384_v0  ;;  %v6388_v5 = vld [vmem:[#allocation11 + $0x1c] ss:$12 sps:$4 sm:$0xff]   ;;  %6006 = vmatpush3.bf16.msra.mxu1 %v6387_v4  ;;  %v6391_v7 = vld [vmem:[#allocation11 + $0x20] ss:$12 sps:$4 sm:$0xff]   ;;  %v6395_v10 = vld [vmem:[#allocation11 + $0x38] ss:$12 sps:$4 sm:$0xff]  }
  0xb4   :  { %377 = vmatpush1.bf16.msra.mxu0 %v6386_v1  ;;  %6007 = vmatprep.subr.bf16.mxu1 %v7210_v2  ;;  %v6392_v8 = vld [vmem:[#allocation11 + $0x34] ss:$12 sps:$4 sm:$0xff]   ;;  %v6394_v9 = vld [vmem:[#allocation11 + $0x30] ss:$12 sps:$4 sm:$0xff]   ;;  %v6396_v11 = vld [vmem:[#allocation11 + $0x4c] ss:$12 sps:$4 sm:$0xff]  }
  0xb5   :  { %378 = vmatprep.subr.bf16.mxu0 %v6388_v5  ;;  %6021 = vmatprep.mubr.msk.bf16.mxu1 %vm7212_vm0, %v7210_v2  ;;  %s5372_s28 = sld [smem:[#allocation6 + $0x1]]  ;;  %v6398_v12 = vld [vmem:[#allocation11 + $0x48] ss:$12 sps:$4 sm:$0xff]   ;;  %v6399_v13 = vld [vmem:[#allocation11 + $0x50] ss:$12 sps:$4 sm:$0xff]   ;;  %s5373_s3 = sld [smem:[#allocation6 + $0x2]] }
  0xb6   :  { %v6400_v14 = vld [vmem:[#allocation11 + $0x64] ss:$12 sps:$4 sm:$0xff]   ;;  %v6402_v15 = vld [vmem:[#allocation11 + $0x60] ss:$12 sps:$4 sm:$0xff]   ;;  %v6403_v16 = vld [vmem:[#allocation11 + $0x68] ss:$12 sps:$4 sm:$0xff]  }
  0xb7   :  { %6008 = vmatpush3.bf16.msra.mxu1 %v6391_v7  ;;  %v6404_v17 = vld [vmem:[#allocation11 + $0x7c] ss:$12 sps:$4 sm:$0xff]   ;;  %v6406_v18 = vld [vmem:[#allocation11 + $0x78] ss:$12 sps:$4 sm:$0xff]   ;;  %v6407_v19 = vld [vmem:[#allocation11 + $0x80] ss:$12 sps:$4 sm:$0xff]  }
  0xb8   :  { %379 = vmatpush1.bf16.msra.mxu0 %v6390_v6  ;;  %6009 = vmatprep.subr.bf16.mxu1 %v7210_v2  ;;  %v6408_v20 = vld [vmem:[#allocation11 + $0x94] ss:$12 sps:$4 sm:$0xff]   ;;  %s166_s16 = scalar_lea.vmem [#allocation10], %s7409_s9  ;;  %s5374_s19 = sld [smem:[#allocation6 + $0x3]]  ;;  %v6410_v23 = vld [vmem:[#allocation11 + $0x90] ss:$12 sps:$4 sm:$0xff]  }
  0xb9   :  { %380 = vmatprep.subr.bf16.mxu0 %v6392_v8  ;;  %v167_v21 = vld [vmem:[%s166_s16] sm:$0x1]  ;;  %s5375_s13 = sld [smem:[#allocation6 + $0x4]]  ;;  %s5376_s20 = sld [smem:[#allocation6 + $0x5]]  ;;  %v6411_v25 = vld [vmem:[#allocation11 + $0x98] ss:$12 sps:$4 sm:$0xff]  }
  0xba   :  { %168 = vst [vmem:[#allocation2] sm:$0x1] %v167_v21  ;;  %s5377_s22 = sld [smem:[#allocation6 + $0x6]]  ;;  %s7419_s23 = sld [smem:[#allocation6 + $0x7]]  ;;  %v6412_v26 = vld [vmem:[#allocation11 + $0xac] ss:$12 sps:$4 sm:$0xff]  }
  0xbb   :  { %6010 = vmatpush3.bf16.msra.mxu1 %v6395_v10  ;;  %s170_s17 = scalar_lea.vmem [#allocation10], %s5372_s28  ;;  %s174_s8 = scalar_lea.vmem [#allocation10], %s5373_s3  ;;  %v6414_v27 = vld [vmem:[#allocation11 + $0xa8] ss:$12 sps:$4 sm:$0xff]   ;;  %v6415_v28 = vld [vmem:[#allocation11 + $0xb0] ss:$12 sps:$4 sm:$0xff]  }
  0xbc   :  { %381 = vmatpush1.bf16.msra.mxu0 %v6394_v9  ;;  %6011 = vmatprep.subr.bf16.mxu1 %v7210_v2  ;;  %v171_v22 = vld [vmem:[%s170_s17] sm:$0x1]  ;;  %v6418_v34 = vld [vmem:[#allocation17 + $0x4] ss:$12 sps:$4 sm:$0xff]   ;;  %v6416_v35 = vld [vmem:[#allocation17] ss:$12 sps:$4 sm:$0xff]  }
  0xbd   :  { %382 = vmatprep.subr.bf16.mxu0 %v6396_v11  ;;  %172 = vst [vmem:[#allocation2 + $0x1] sm:$0x1] %v171_v22  ;;  %v175_v24 = vld [vmem:[%s174_s8] sm:$0x1]  ;;  %v6419_v37 = vld [vmem:[#allocation17 + $0x8] ss:$12 sps:$4 sm:$0xff]  }
  0xbe   :  { %176 = vst [vmem:[#allocation2 + $0x2] sm:$0x1] %v175_v24  ;;  %s178_s2 = scalar_lea.vmem [#allocation10], %s5374_s19  ;;  %v6422_v39 = vld [vmem:[#allocation17 + $0x1c] ss:$12 sps:$4 sm:$0xff]   ;;  %s7213_s4 = smov [#allocation24]  }
  0xbf   :  { %6012 = vmatpush3.bf16.msra.mxu1 %v6399_v13  ;;  %v179_v29 = vld [vmem:[%s178_s2] sm:$0x1]  ;;  %s182_s18 = scalar_lea.vmem [#allocation10], %s5375_s13  ;;  %s186_s1 = scalar_lea.vmem [#allocation10], %s5376_s20  ;;  %v6423_v41 = vld [vmem:[#allocation17 + $0x20] ss:$12 sps:$4 sm:$0xff]  }
  0xc0   :  { %383 = vmatpush1.bf16.msra.mxu0 %v6398_v12  ;;  %6013 = vmatprep.subr.bf16.mxu1 %v7210_v2  ;;  %v183_v30 = vld [vmem:[%s182_s18] sm:$0x1]  ;;  %180 = vst [vmem:[#allocation2 + $0x3] sm:$0x1] %v179_v29  ;;  %s190_s21 = scalar_lea.vmem [#allocation10], %s5377_s22  ;;  %s194_s5 = scalar_lea.vmem [#allocation10], %s7419_s23 }
  0xc1   :  { %384 = vmatprep.subr.bf16.mxu0 %v6400_v14  ;;  %184 = vst [vmem:[#allocation2 + $0x4] sm:$0x1] %v183_v30  ;;  %v187_v31 = vld [vmem:[%s186_s1] sm:$0x1]  ;;  %v6426_v42 = vld [vmem:[#allocation17 + $0x34] ss:$12 sps:$4 sm:$0xff]  }
  0xc2   :  { %v191_v32 = vld [vmem:[%s190_s21] sm:$0x1]  ;;  %188 = vst [vmem:[#allocation2 + $0x5] sm:$0x1] %v187_v31  ;;  %v6424_v43 = vld [vmem:[#allocation17 + $0x30] ss:$12 sps:$4 sm:$0xff]  }
  0xc3   :  { %6014 = vmatpush3.bf16.msra.mxu1 %v6403_v16  ;;  %192 = vst [vmem:[#allocation2 + $0x6] sm:$0x1] %v191_v32  ;;  %v195_v33 = vld [vmem:[%s194_s5] sm:$0x1]  ;;  %v6428_v46 = vld [vmem:[#allocation17 + $0x48] ss:$12 sps:$4 sm:$0xff]  }
  0xc4   :  { %385 = vmatpush1.bf16.msra.mxu0 %v6402_v15  ;;  %6015 = vmatprep.subr.bf16.mxu1 %v7210_v2  ;;  %196 = vst [vmem:[#allocation2 + $0x7] sm:$0x1] %v195_v33  ;;  %v6420_v40 = vld [vmem:[#allocation17 + $0x18] ss:$12 sps:$4 sm:$0xff]   ;;  %v6431_v47 = vld [vmem:[#allocation17 + $0x50] ss:$12 sps:$4 sm:$0xff]  }
  0xc5   :  { %386 = vmatprep.subr.bf16.mxu0 %v6404_v17  ;;  %v6427_v44 = vld [vmem:[#allocation17 + $0x38] ss:$12 sps:$4 sm:$0xff]   ;;  %v6432_v49 = vld [vmem:[#allocation17 + $0x60] ss:$12 sps:$4 sm:$0xff]   ;;  %v6435_v50 = vld [vmem:[#allocation17 + $0x68] ss:$12 sps:$4 sm:$0xff]  }
  0xc6   :  { %v6430_v45 = vld [vmem:[#allocation17 + $0x4c] ss:$12 sps:$4 sm:$0xff]   ;;  %v6434_v48 = vld [vmem:[#allocation17 + $0x64] ss:$12 sps:$4 sm:$0xff]   ;;  %v6438_v51 = vld [vmem:[#allocation17 + $0x7c] ss:$12 sps:$4 sm:$0xff]  }
  0xc7   :  { %6016 = vmatpush3.bf16.msra.mxu1 %v6407_v19  ;;  %v6436_v52 = vld [vmem:[#allocation17 + $0x78] ss:$12 sps:$4 sm:$0xff]   ;;  %v6439_v53 = vld [vmem:[#allocation17 + $0x80] ss:$12 sps:$4 sm:$0xff]   ;;  %v6440_v55 = vld [vmem:[#allocation17 + $0x90] ss:$12 sps:$4 sm:$0xff]  }
  0xc8   :  { %387 = vmatpush1.bf16.msra.mxu0 %v6406_v18  ;;  %6017 = vmatprep.subr.bf16.mxu1 %v7210_v2  ;;  %v6442_v54 = vld [vmem:[#allocation17 + $0x94] ss:$12 sps:$4 sm:$0xff]   ;;  %v6443_v56 = vld [vmem:[#allocation17 + $0x98] ss:$12 sps:$4 sm:$0xff]   ;;  %v6447_v59 = vld [vmem:[#allocation17 + $0xb0] ss:$12 sps:$4 sm:$0xff]  }
  0xc9   :  { %388 = vmatprep.subr.bf16.mxu0 %v6408_v20  ;;  %v6446_v57 = vld [vmem:[#allocation17 + $0xac] ss:$12 sps:$4 sm:$0xff]   ;;  %v6444_v58 = vld [vmem:[#allocation17 + $0xa8] ss:$12 sps:$4 sm:$0xff]   ;;  %v7444_v0 = vld [vmem:[#allocation13 + $0x18] ss:$12 sps:$4 sm:$0xff]  }
  0xca   :  { %v7435_v60 = vld [vmem:[#allocation13 + $0x4] ss:$12 sps:$4 sm:$0xff]   ;;  %v7437_v61 = vld [vmem:[#allocation13] ss:$12 sps:$4 sm:$0xff]   ;;  %v6469_v62 = vld [vmem:[#allocation13 + $0x8] ss:$12 sps:$4 sm:$0xff]  }
  0xcb   :  { %6018 = vmatpush3.bf16.msra.mxu1 %v6411_v25  ;;  %v197_v36 = vld [vmem:[#allocation2] sm:$0xff]  ;;  %v7440_v63 = vld [vmem:[#allocation13 + $0x1c] ss:$12 sps:$4 sm:$0xff]   ;;  %v7457_v7 = vld [vmem:[#allocation13 + $0x4c] ss:$12 sps:$4 sm:$0xff]   ;;  %s5346_s24 = sshll.u32 %s7213_s4, 4  ;;  %s5347_s24 = int_to_ptr.vmem [resolvable:$true] %s5346_s24 }
  0xcc   :  { %389 = vmatpush1.bf16.msra.mxu0 %v6410_v23  ;;  %6019 = vmatprep.subr.bf16.mxu1 %v7210_v2  ;;  %v198_v38 = vpack.c.bf16 %v197_v36, %v197_v36  ;;  %v6473_v1 = vld [vmem:[#allocation13 + $0x20] ss:$12 sps:$4 sm:$0xff]   ;;  %v7453_v5 = vld [vmem:[#allocation13 + $0x30] ss:$12 sps:$4 sm:$0xff]   ;;  %v6477_v6 = vld [vmem:[#allocation13 + $0x38] ss:$12 sps:$4 sm:$0xff]   ;;  %p7141_p6 = scmp.lt.s32.totalorder %s5347_s24, %s5347_s24 }
  0xcd   :  { %390 = vmatprep.subr.bf16.mxu0 %v6412_v26  ;;  %v7447_v4 = vld [vmem:[#allocation13 + $0x34] ss:$12 sps:$4 sm:$0xff]   ;;  %v7462_v9 = vld [vmem:[#allocation13 + $0x64] ss:$12 sps:$4 sm:$0xff]   ;;  %v7469_v13 = vld [vmem:[#allocation13 + $0x7c] ss:$12 sps:$4 sm:$0xff]  }
  0xce   :  { %v7460_v8 = vld [vmem:[#allocation13 + $0x48] ss:$12 sps:$4 sm:$0xff]   ;;  %v6481_v10 = vld [vmem:[#allocation13 + $0x50] ss:$12 sps:$4 sm:$0xff]   ;;  %v7467_v11 = vld [vmem:[#allocation13 + $0x60] ss:$12 sps:$4 sm:$0xff]  }
  0xcf   :  { %6020 = vmatpush3.bf16.msra.mxu1 %v6415_v28  ;;  %v6485_v12 = vld [vmem:[#allocation13 + $0x68] ss:$12 sps:$4 sm:$0xff]   ;;  %v7474_v14 = vld [vmem:[#allocation13 + $0x78] ss:$12 sps:$4 sm:$0xff]   ;;  %v6489_v15 = vld [vmem:[#allocation13 + $0x80] ss:$12 sps:$4 sm:$0xff]  }
  0xd0   :  { %391 = vmatpush1.bf16.msra.mxu0 %v6414_v27  ;;  %6025 = vmatprep.subr.bf16.mxu1 %v7210_v2  ;;  %v7476_v16 = vld [vmem:[#allocation13 + $0x94] ss:$12 sps:$4 sm:$0xff]   ;;  %v7481_v17 = vld [vmem:[#allocation13 + $0x90] ss:$12 sps:$4 sm:$0xff]   ;;  %v6493_v18 = vld [vmem:[#allocation13 + $0x98] ss:$12 sps:$4 sm:$0xff]  }
  0xd1   :  { %637 = vmatprep.subr.bf16.mxu0 %v6418_v34  ;;  %v7483_v19 = vld [vmem:[#allocation13 + $0xac] ss:$12 sps:$4 sm:$0xff]   ;;  %v7488_v20 = vld [vmem:[#allocation13 + $0xa8] ss:$12 sps:$4 sm:$0xff]   ;;  %v6497_v21 = vld [vmem:[#allocation13 + $0xb0] ss:$12 sps:$4 sm:$0xff]  }
  0xd2   :  { %6022 = vmatmul.mubr.bf16.vlgmr.msra.gmra.mrb[0].mxu1 %v198_v38  ;;  %v7490_v22 = vld [vmem:[#allocation19 + $0x4] ss:$12 sps:$4 sm:$0xff]   ;;  %v7495_v23 = vld [vmem:[#allocation19] ss:$12 sps:$4 sm:$0xff]   ;;  %v6501_v24 = vld [vmem:[#allocation19 + $0x8] ss:$12 sps:$4 sm:$0xff]  }
  0xd3   :  { %409 = vmatmul.mubr.bf16.vlgmr.msra.gmra.mrb[0].mxu0 %v198_v38  ;;  %6026 = vmatpush3.bf16.msra.mxu1 %v6419_v37  ;;  %v7497_v25 = vld [vmem:[#allocation19 + $0x1c] ss:$12 sps:$4 sm:$0xff]   ;;  %v7502_v26 = vld [vmem:[#allocation19 + $0x18] ss:$12 sps:$4 sm:$0xff]   ;;  %v6505_v27 = vld [vmem:[#allocation19 + $0x20] ss:$12 sps:$4 sm:$0xff]  }
  0xd4   :  { %638 = vmatpush1.bf16.msra.mxu0 %v6416_v35  ;;  %6027 = vmatprep.subr.bf16.mxu1 %v7210_v2  ;;  %v7505_v28 = vld [vmem:[#allocation19 + $0x34] ss:$12 sps:$4 sm:$0xff]   ;;  %v7511_v29 = vld [vmem:[#allocation19 + $0x30] ss:$12 sps:$4 sm:$0xff]   ;;  %v6506_v30 = vld [vmem:[#allocation19 + $0x38] ss:$12 sps:$4 sm:$0xff]  }
  0xd5   :  { %639 = vmatprep.subr.bf16.mxu0 %v6422_v39  ;;  %669 = vmatprep.mubr.bf16.mxu0 %v7211_v3  ;;  %v7516_v31 = vld [vmem:[#allocation19 + $0x4c] ss:$12 sps:$4 sm:$0xff]   ;;  %v7521_v32 = vld [vmem:[#allocation19 + $0x48] ss:$12 sps:$4 sm:$0xff]   ;;  %v6507_v33 = vld [vmem:[#allocation19 + $0x50] ss:$12 sps:$4 sm:$0xff]  }
  0xd6   :  { %6041 = vmatprep.mubr.msk.bf16.mxu1 %vm7212_vm0, %v7210_v2  ;;  %v7523_v34 = vld [vmem:[#allocation19 + $0x64] ss:$12 sps:$4 sm:$0xff]   ;;  %v7528_v35 = vld [vmem:[#allocation19 + $0x60] ss:$12 sps:$4 sm:$0xff]   ;;  %v6508_v36 = vld [vmem:[#allocation19 + $0x68] ss:$12 sps:$4 sm:$0xff]  }
  0xd7   :  { %6028 = vmatpush3.bf16.msra.mxu1 %v6423_v41  ;;  %v7530_v37 = vld [vmem:[#allocation19 + $0x7c] ss:$12 sps:$4 sm:$0xff]   ;;  %v7537_v39 = vld [vmem:[#allocation19 + $0x94] ss:$12 sps:$4 sm:$0xff]   ;;  %s7136_s25 = scalar_lea.vmem %s5347_s24, 16  ;;  %s7140_s26 = scalar_lea.vmem %s5347_s24, 32 }
  0xd8   :  { %640 = vmatpush1.bf16.msra.mxu0 %v6420_v40  ;;  %6029 = vmatprep.subr.bf16.mxu1 %v7210_v2  ;;  %v6509_v40 = vld [vmem:[#allocation19 + $0x80] ss:$12 sps:$4 sm:$0xff]   ;;  %v7542_v41 = vld [vmem:[#allocation19 + $0x90] ss:$12 sps:$4 sm:$0xff]   ;;  %p7137_p5 = scmp.ne.s32.totalorder %s5347_s24, %s7136_s25  ;;  %p7142_p7 = scmp.lt.s32.totalorder %s7140_s26, %s7136_s25 }
  0xd9   :  { %641 = vmatprep.subr.bf16.mxu0 %v6426_v42  ;;  %v6510_v42 = vld [vmem:[#allocation19 + $0x98] ss:$12 sps:$4 sm:$0xff]  }
  0xda   :  { %p7143_p8 = por %p7142_p7, %p7141_p6 }
  0xdb   :  { %6030 = vmatpush3.bf16.msra.mxu1 %v6427_v44  ;;  %v7549_v44 = vld [vmem:[#allocation19 + $0xa8] ss:$12 sps:$4 sm:$0xff]  }
  0xdc   :  { %642 = vmatpush1.bf16.msra.mxu0 %v6424_v43  ;;  %6031 = vmatprep.subr.bf16.mxu1 %v7210_v2  ;;  %v7544_v43 = vld [vmem:[#allocation19 + $0xac] ss:$12 sps:$4 sm:$0xff]   ;;  %p7144_p9 = pnand %p7143_p8, %p7137_p5 }
  0xdd   :  { %643 = vmatprep.subr.bf16.mxu0 %v6430_v45  ;;  %v6511_v45 = vld [vmem:[#allocation19 + $0xb0] ss:$12 sps:$4 sm:$0xff]  }
  0xdf   :  { %6032 = vmatpush3.bf16.msra.mxu1 %v6431_v47  ;;  %v6513_v47 = vld [vmem:[#allocation13 + $0x20] ss:$12 sps:$4 sm:$0xff]  }
  0xe0   :  { %644 = vmatpush1.bf16.msra.mxu0 %v6428_v46  ;;  %6033 = vmatprep.subr.bf16.mxu1 %v7210_v2  ;;  %v6512_v46 = vld [vmem:[#allocation13 + $0x8] ss:$12 sps:$4 sm:$0xff]  }
  0xe1   :  { %645 = vmatprep.subr.bf16.mxu0 %v6434_v48  ;;  %v6514_v48 = vld [vmem:[#allocation13 + $0x38] ss:$12 sps:$4 sm:$0xff]  }
  0xe3   :  { %6034 = vmatpush3.bf16.msra.mxu1 %v6435_v50  ;;  %v6516_v50 = vld [vmem:[#allocation13 + $0x68] ss:$12 sps:$4 sm:$0xff]  }
  0xe4   :  { %646 = vmatpush1.bf16.msra.mxu0 %v6432_v49  ;;  %6035 = vmatprep.subr.bf16.mxu1 %v7210_v2  ;;  %v6515_v49 = vld [vmem:[#allocation13 + $0x50] ss:$12 sps:$4 sm:$0xff]  }
  0xe5   :  { %647 = vmatprep.subr.bf16.mxu0 %v6438_v51  ;;  %v6517_v51 = vld [vmem:[#allocation13 + $0x80] ss:$12 sps:$4 sm:$0xff]  }
  0xe7   :  { %6036 = vmatpush3.bf16.msra.mxu1 %v6439_v53  ;;  %v6519_v53 = vld [vmem:[#allocation13 + $0xb0] ss:$12 sps:$4 sm:$0xff]  }
  0xe8   :  { %648 = vmatpush1.bf16.msra.mxu0 %v6436_v52  ;;  %6037 = vmatprep.subr.bf16.mxu1 %v7210_v2  ;;  %v6518_v52 = vld [vmem:[#allocation13 + $0x98] ss:$12 sps:$4 sm:$0xff]  }
  0xe9   :  { %649 = vmatprep.subr.bf16.mxu0 %v6442_v54  ;;  %v233_v54 = vlaneseq }
  0xeb   :  { %6038 = vmatpush3.bf16.msra.mxu1 %v6443_v56 }
  0xec   :  { %650 = vmatpush1.bf16.msra.mxu0 %v6440_v55  ;;  %6039 = vmatprep.subr.bf16.mxu1 %v7210_v2  ;;  %v234_v55 = vshrl.u32 %v233_v54, 7 }
  0xed   :  { %651 = vmatprep.subr.bf16.mxu0 %v6446_v57 }
  0xee   :  { %v7586_v56 = vsub.s32 0, %v234_v55  ;;  %v7588_v57 = vsub.s32 2, %v234_v55 }
  0xef   :  { %6040 = vmatpush3.bf16.msra.mxu1 %v6447_v59  ;;  %v7590_v59 = vsub.s32 1, %v234_v55 }
  0xf0   :  { %652 = vmatpush1.bf16.msra.mxu0 %v6444_v58  ;;  %6045 = vmatprep.subr.bf16.mxu1 %v7210_v2  ;;  %v231_v58 = vld [vmem:[#allocation14] sm:$0x7] }
  0xf1   :  { %898 = vmatprep.subr.bf16.mxu0 %v7435_v60 }
  0xf2   :  { %6042 = vmatmul.mubr.bf16.vlgmr.msra.gmra.mrb[4].mxu1 %v198_v38 }
  0xf3   :  { %670 = vmatmul.mubr.bf16.vlgmr.msra.gmra.mrb[4].mxu0 %v198_v38  ;;  %6046 = vmatpush3.bf16.msra.mxu1 %v6469_v62  ;;  %v7535_v38 = vld [vmem:[#allocation19 + $0x78] ss:$12 sps:$4 sm:$0xff]   ;;  %v240_v62 = vrot.slane %v231_v58, %v7590_v59 }
  0xf4   :  { %899 = vmatpush1.bf16.msra.mxu0 %v7437_v61  ;;  %6047 = vmatprep.subr.bf16.mxu1 %v7210_v2 }
  0xf5   :  { %900 = vmatprep.subr.bf16.mxu0 %v7440_v63  ;;  %930 = vmatprep.mubr.bf16.mxu0 %v7211_v3 }
  0xf6   :  { %6061 = vmatprep.mubr.msk.bf16.mxu1 %vm7212_vm0, %v7210_v2 }
  0xf7   :  { %6048 = vmatpush3.bf16.msra.mxu1 %v6473_v1 }
  0xf8   :  { %901 = vmatpush1.bf16.msra.mxu0 %v7444_v0  ;;  %6049 = vmatprep.subr.bf16.mxu1 %v7210_v2 }
  0xf9   :  { %902 = vmatprep.subr.bf16.mxu0 %v7447_v4 }
  0xfb   :  { %6050 = vmatpush3.bf16.msra.mxu1 %v6477_v6 }
  0xfc   :  { %903 = vmatpush1.bf16.msra.mxu0 %v7453_v5  ;;  %6051 = vmatprep.subr.bf16.mxu1 %v7210_v2 }
  0xfd   :  { %904 = vmatprep.subr.bf16.mxu0 %v7457_v7 }
  0xff   :  { %6052 = vmatpush3.bf16.msra.mxu1 %v6481_v10 }
 0x100   :  { %905 = vmatpush1.bf16.msra.mxu0 %v7460_v8  ;;  %6053 = vmatprep.subr.bf16.mxu1 %v7210_v2 }
 0x101   :  { %906 = vmatprep.subr.bf16.mxu0 %v7462_v9 }
 0x103   :  { %6054 = vmatpush3.bf16.msra.mxu1 %v6485_v12  ;;  %v492_v12 = vld [vmem:[#allocation20] sm:$0x7] }
 0x104   :  { %907 = vmatpush1.bf16.msra.mxu0 %v7467_v11  ;;  %6055 = vmatprep.subr.bf16.mxu1 %v7210_v2 }
 0x105   :  { %908 = vmatprep.subr.bf16.mxu0 %v7469_v13 }
 0x107   :  { %6056 = vmatpush3.bf16.msra.mxu1 %v6489_v15  ;;  %v501_v15 = vrot.slane %v492_v12, %v7590_v59 }
 0x108   :  { %909 = vmatpush1.bf16.msra.mxu0 %v7474_v14  ;;  %6057 = vmatprep.subr.bf16.mxu1 %v7210_v2 }
 0x109   :  { %910 = vmatprep.subr.bf16.mxu0 %v7476_v16 }
 0x10b   :  { %6058 = vmatpush3.bf16.msra.mxu1 %v6493_v18 }
 0x10c   :  { %911 = vmatpush1.bf16.msra.mxu0 %v7481_v17  ;;  %6059 = vmatprep.subr.bf16.mxu1 %v7210_v2 }
 0x10d   :  { %912 = vmatprep.subr.bf16.mxu0 %v7483_v19 }
 0x10f   :  { %6060 = vmatpush3.bf16.msra.mxu1 %v6497_v21 }
 0x110   :  { %913 = vmatpush1.bf16.msra.mxu0 %v7488_v20  ;;  %6065 = vmatprep.subr.bf16.mxu1 %v7210_v2 }
 0x111   :  { %1184 = vmatprep.subr.bf16.mxu0 %v7490_v22 }
 0x112   :  { %6062 = vmatmul.mubr.bf16.vlgmr.msra.gmra.mrb[8].mxu1 %v7211_v3 }
 0x113   :  { %931 = vmatmul.mubr.bf16.vlgmr.msra.gmra.mrb[8].mxu0 %v7211_v3  ;;  %6066 = vmatpush3.bf16.msra.mxu1 %v6501_v24 }
 0x114   :  { %1185 = vmatpush1.bf16.msra.mxu0 %v7495_v23  ;;  %6067 = vmatprep.subr.bf16.mxu1 %v7210_v2 }
 0x115   :  { %1186 = vmatprep.subr.bf16.mxu0 %v7497_v25  ;;  %1216 = vmatprep.mubr.bf16.mxu0 %v7211_v3 }
 0x116   :  { %6081 = vmatprep.mubr.msk.bf16.mxu1 %vm7212_vm0, %v7210_v2 }
 0x117   :  { %6068 = vmatpush3.bf16.msra.mxu1 %v6505_v27 }
 0x118   :  { %1187 = vmatpush1.bf16.msra.mxu0 %v7502_v26  ;;  %6069 = vmatprep.subr.bf16.mxu1 %v7210_v2 }
 0x119   :  { %1188 = vmatprep.subr.bf16.mxu0 %v7505_v28 }
 0x11b   :  { %6070 = vmatpush3.bf16.msra.mxu1 %v6506_v30 }
 0x11c   :  { %1189 = vmatpush1.bf16.msra.mxu0 %v7511_v29  ;;  %6071 = vmatprep.subr.bf16.mxu1 %v7210_v2 }
 0x11d   :  { %1190 = vmatprep.subr.bf16.mxu0 %v7516_v31 }
 0x11f   :  { %6072 = vmatpush3.bf16.msra.mxu1 %v6507_v33 }
 0x120   :  { %1191 = vmatpush1.bf16.msra.mxu0 %v7521_v32  ;;  %6073 = vmatprep.subr.bf16.mxu1 %v7210_v2 }
 0x121   :  { %1192 = vmatprep.subr.bf16.mxu0 %v7523_v34 }
 0x123   :  { %6074 = vmatpush3.bf16.msra.mxu1 %v6508_v36  ;;  %v753_v36 = vld [vmem:[#allocation16] sm:$0x7] }
 0x124   :  { %1193 = vmatpush1.bf16.msra.mxu0 %v7528_v35  ;;  %6075 = vmatprep.subr.bf16.mxu1 %v7210_v2 }
 0x125   :  { %1194 = vmatprep.subr.bf16.mxu0 %v7530_v37 }
 0x127   :  { %6076 = vmatpush3.bf16.msra.mxu1 %v6509_v40  ;;  %v886_v40 = vrot.slane %v753_v36, %v7586_v56 }
 0x128   :  { %1195 = vmatpush1.bf16.msra.mxu0 %v7535_v38  ;;  %6077 = vmatprep.subr.bf16.mxu1 %v7210_v2 }
 0x129   :  { %1196 = vmatprep.subr.bf16.mxu0 %v7537_v39 }
 0x12b   :  { %6078 = vmatpush3.bf16.msra.mxu1 %v6510_v42  ;;  %v890_v42 = vrot.slane %v753_v36, %v7590_v59 }
 0x12c   :  { %1197 = vmatpush1.bf16.msra.mxu0 %v7542_v41  ;;  %6079 = vmatprep.subr.bf16.mxu1 %v7210_v2 }
 0x12d   :  { %1198 = vmatprep.subr.bf16.mxu0 %v7544_v43 }
 0x12f   :  { %6080 = vmatpush3.bf16.msra.mxu1 %v6511_v45 }
 0x130   :  { %1199 = vmatpush1.bf16.msra.mxu0 %v7549_v44  ;;  %6085 = vmatprep.subr.bf16.mxu1 %v7210_v2 }
 0x131   :  { %1472 = vmatprep.subr.bf16.mxu0 %v7435_v60  ;;  %v236_v60 = vrot.slane %v231_v58, %v7586_v56 }
 0x132   :  { %6082 = vmatmul.mubr.bf16.vlgmr.msra.gmra.mrb[12].mxu1 %v7211_v3 }
 0x133   :  { %1217 = vmatmul.mubr.bf16.vlgmr.msra.gmra.mrb[12].mxu0 %v7211_v3  ;;  %6101 = vmatprep.mubr.msk.bf16.mxu1 %vm7212_vm0, %v7210_v2 }
 0x134   :  { %1473 = vmatpush1.bf16.msra.mxu0 %v7437_v61  ;;  %1504 = vmatprep.mubr.bf16.mxu0 %v7211_v3  ;;  %v244_v61 = vrot.slane %v231_v58, %v7588_v57 }
 0x135   :  { %1474 = vmatprep.subr.bf16.mxu0 %v7440_v63  ;;  %6086 = vmatpush3.bf16.msra.mxu1 %v6512_v46 }
 0x136   :  { %6087 = vmatprep.subr.bf16.mxu1 %v7210_v2 }
 0x138   :  { %1475 = vmatpush1.bf16.msra.mxu0 %v7444_v0 }
 0x139   :  { %1476 = vmatprep.subr.bf16.mxu0 %v7447_v4  ;;  %6088 = vmatpush3.bf16.msra.mxu1 %v6513_v47 }
 0x13a   :  { %6089 = vmatprep.subr.bf16.mxu1 %v7210_v2 }
 0x13c   :  { %1477 = vmatpush1.bf16.msra.mxu0 %v7453_v5 }
 0x13d   :  { %1478 = vmatprep.subr.bf16.mxu0 %v7457_v7  ;;  %6090 = vmatpush3.bf16.msra.mxu1 %v6514_v48 }
 0x13e   :  { %6091 = vmatprep.subr.bf16.mxu1 %v7210_v2 }
 0x140   :  { %1479 = vmatpush1.bf16.msra.mxu0 %v7460_v8 }
 0x141   :  { %1480 = vmatprep.subr.bf16.mxu0 %v7462_v9  ;;  %6092 = vmatpush3.bf16.msra.mxu1 %v6515_v49 }
 0x142   :  { %6093 = vmatprep.subr.bf16.mxu1 %v7210_v2 }
 0x144   :  { %1481 = vmatpush1.bf16.msra.mxu0 %v7467_v11 }
 0x145   :  { %1482 = vmatprep.subr.bf16.mxu0 %v7469_v13  ;;  %6094 = vmatpush3.bf16.msra.mxu1 %v6516_v50  ;;  %v497_v13 = vrot.slane %v492_v12, %v7586_v56 }
 0x146   :  { %6095 = vmatprep.subr.bf16.mxu1 %v7210_v2 }
 0x148   :  { %1483 = vmatpush1.bf16.msra.mxu0 %v7474_v14  ;;  %v505_v14 = vrot.slane %v492_v12, %v7588_v57 }
 0x149   :  { %1484 = vmatprep.subr.bf16.mxu0 %v7476_v16  ;;  %6096 = vmatpush3.bf16.msra.mxu1 %v6517_v51 }
 0x14a   :  { %6097 = vmatprep.subr.bf16.mxu1 %v7210_v2 }
 0x14c   :  { %1485 = vmatpush1.bf16.msra.mxu0 %v7481_v17 }
 0x14d   :  { %1486 = vmatprep.subr.bf16.mxu0 %v7483_v19  ;;  %6098 = vmatpush3.bf16.msra.mxu1 %v6518_v52 }
 0x14e   :  { %6099 = vmatprep.subr.bf16.mxu1 %v7210_v2 }
 0x150   :  { %1487 = vmatpush1.bf16.msra.mxu0 %v7488_v20 }
 0x151   :  { %1760 = vmatprep.subr.bf16.mxu0 %v7490_v22  ;;  %6100 = vmatpush3.bf16.msra.mxu1 %v6519_v53 }
 0x152   :  { %6105 = vmatprep.subr.bf16.mxu1 %v7210_v2 }
 0x1a5   :  { %v451_v0 = vpop.f32.mrb[0].mxu1 }
 0x1a6   :  { %v410_v63 = vpop.f32.mrb[0].mxu0  ;;  %v452_v5 = vadd.f32 %v451_v0, %v244_v61  ;;  %v6023_v6 = vpop.f32.mrb[1].mxu1 }
 0x1a7   :  { %v411_v1 = vadd.f32 %v410_v63, %v236_v60  ;;  %v412_v4 = vpop.f32.mrb[1].mxu0  ;;  %v454_v9 = vpop.f32.mrb[2].mxu1  ;;  %v1039_v6 = vld [vmem:[#allocation22] sm:$0x7] }
 0x1a8   :  { %v413_v7 = vadd.f32 %v412_v4, %v240_v62  ;;  %v414_v8 = vpop.f32.mrb[2].mxu0  ;;  %459 = vst [vmem:[#allocation3 + $0x10] sm:$0xff] %v452_v5  ;;  %v6024_v11 = vpop.f32.mrb[3].mxu1  ;;  %v894_v4 = vrot.slane %v753_v36, %v7588_v57  ;;  %v1172_v9 = vrot.slane %v1039_v6, %v7586_v56 }
 0x1a9   :  { %457 = vst [vmem:[#allocation3] sm:$0xff] %v411_v1  ;;  %v415_v10 = vpop.f32.mrb[3].mxu0  ;;  %v1176_v11 = vrot.slane %v1039_v6, %v7590_v59 }
 0x1aa   :  { %458 = vst [vmem:[#allocation3 + $0x8] sm:$0xff] %v413_v7 }
 0x1b1   :  { %v979_v48 = vld [vmem:[#allocation3] ss:$8 sm:$0x7] }
 0x1b2   :  { %v988_v60 = vrot.slane %v979_v48, 1 }
 0x1c5   :  { %v712_v17 = vpop.f32.mrb[4].mxu1 }
 0x1c6   :  { %v671_v16 = vpop.f32.mrb[4].mxu0  ;;  %v713_v20 = vadd.f32 %v712_v17, %v505_v14  ;;  %v6043_v21 = vpop.f32.mrb[5].mxu1 }
 0x1c7   :  { %v672_v18 = vadd.f32 %v671_v16, %v497_v13  ;;  %v673_v19 = vpop.f32.mrb[5].mxu0  ;;  %v715_v27 = vpop.f32.mrb[6].mxu1  ;;  %v998_v13 = vrot.slane %v979_v48, 2 }
 0x1c8   :  { %v674_v22 = vadd.f32 %v673_v19, %v501_v15  ;;  %v675_v24 = vpop.f32.mrb[6].mxu0  ;;  %720 = vst [vmem:[#allocation4 + $0x10] sm:$0xff] %v713_v20  ;;  %v6044_v33 = vpop.f32.mrb[7].mxu1 }
 0x1c9   :  { %718 = vst [vmem:[#allocation4] sm:$0xff] %v672_v18  ;;  %v676_v30 = vpop.f32.mrb[7].mxu0 }
 0x1ca   :  { %719 = vst [vmem:[#allocation4 + $0x8] sm:$0xff] %v674_v22 }
 0x1d1   :  { %v1266_v18 = vld [vmem:[#allocation4 + $0x7] ss:$8 sm:$0x7] }
 0x1d2   :  { %v1275_v36 = vrot.slane %v1266_v18, 1 }
 0x1e5   :  { %v973_v46 = vpop.f32.mrb[8].mxu1 }
 0x1e6   :  { %v932_v45 = vpop.f32.mrb[8].mxu0  ;;  %v6063_v50 = vpop.f32.mrb[9].mxu1  ;;  %v974_v8 = vadd.f32 %v973_v46, %v894_v4 }
 0x1e7   :  { %v933_v47 = vadd.f32 %v932_v45, %v886_v40  ;;  %v934_v49 = vpop.f32.mrb[9].mxu0  ;;  %v976_v53 = vpop.f32.mrb[10].mxu1 }
 0x1e8   :  { %v935_v51 = vadd.f32 %v934_v49, %v890_v42  ;;  %v936_v52 = vpop.f32.mrb[10].mxu0  ;;  %v6064_v58 = vpop.f32.mrb[11].mxu1  ;;  %v6520_v53 = vld [vmem:[#allocation19 + $0x8] ss:$12 sps:$4 sm:$0xff]  }
 0x1e9   :  { %v980_v54 = vadd.f32 %v979_v48, %v933_v47  ;;  %v937_v55 = vpop.f32.mrb[11].mxu0  ;;  %v6521_v58 = vld [vmem:[#allocation19 + $0x20] ss:$12 sps:$4 sm:$0xff]  }
 0x1ea   :  { %v990_v62 = vadd.f32 %v988_v60, %v935_v51  ;;  %v1180_v60 = vrot.slane %v1039_v6, %v7588_v57 }
 0x1eb   :  { %v5451_v61 = vmul.f32 -1.442695, %v980_v54 }
 0x1ec   :  { %v5452_v63 = vmul.f32 -1.442695, %v990_v62  ;;  %v6522_v62 = vld [vmem:[#allocation19 + $0x38] ss:$12 sps:$4 sm:$0xff]  }
 0x1ed   :  { %6768 = vpow2.f32 %v5451_v61 }
 0x1ee   :  { %6770 = vpow2.f32 %v5452_v63  ;;  %v6523_v63 = vld [vmem:[#allocation19 + $0x50] ss:$12 sps:$4 sm:$0xff]  }
 0x1f7   :  { %v6769_v0 = vpop.eup %6768 }
 0x1f8   :  { %v984_v1 = vadd.f32 1.0, %v6769_v0  ;;  %v6771_v5 = vpop.eup %6770 }
 0x1f9   :  { %v994_v7 = vadd.f32 1.0, %v6771_v5 }
 0x1fa   :  { %6772 = vrcp.f32 %v984_v1 }
 0x1fb   :  { %6774 = vrcp.f32 %v994_v7 }
 0x204   :  { %v6773_v10 = vpop.eup %6772 }
 0x205   :  { %v997_v12 = vmul.f32 %v6773_v10, %v974_v8  ;;  %v1259_v15 = vpop.f32.mrb[12].mxu1  ;;  %v6775_v45 = vpop.eup %6774  ;;  %v7652_v8 = vld [vmem:[#allocation13 + $0x18] ss:$12 sps:$4 sm:$0xff]   ;;  %v7656_v10 = vld [vmem:[#allocation13 + $0x34] ss:$12 sps:$4 sm:$0xff]  }
 0x206   :  { %v1218_v14 = vpop.f32.mrb[12].mxu0  ;;  %v6083_v20 = vpop.f32.mrb[13].mxu1  ;;  %v1002_v47 = vsub.f32 1.0, %v6775_v45  ;;  %v1004_v50 = vmul.f32 0.0, %v6775_v45 }
 0x207   :  { %v1000_v16 = vadd.f32 %v998_v13, %v997_v12  ;;  %v1219_v17 = vadd.f32 %v1218_v14, %v1172_v9  ;;  %v1220_v19 = vpop.f32.mrb[13].mxu0  ;;  %v1262_v24 = vpop.f32.mrb[14].mxu1  ;;  %v6535_v9 = vld [vmem:[#allocation13 + $0x20] ss:$12 sps:$4 sm:$0xff]   ;;  %v6539_v12 = vld [vmem:[#allocation13 + $0x38] ss:$12 sps:$4 sm:$0xff]  }
 0x208   :  { %v1221_v21 = vadd.f32 %v1220_v19, %v1176_v11  ;;  %v1222_v22 = vpop.f32.mrb[14].mxu0  ;;  %v6084_v33 = vpop.f32.mrb[15].mxu1  ;;  %v7659_v11 = vld [vmem:[#allocation13 + $0x30] ss:$12 sps:$4 sm:$0xff]   ;;  %v7663_v13 = vld [vmem:[#allocation13 + $0x4c] ss:$12 sps:$4 sm:$0xff]  }
 0x209   :  { %6776 = vtanh.f32 %v1000_v16  ;;  %v1267_v27 = vadd.f32 %v1266_v18, %v1219_v17  ;;  %v1223_v30 = vpop.f32.mrb[15].mxu0  ;;  %v7666_v14 = vld [vmem:[#allocation13 + $0x48] ss:$12 sps:$4 sm:$0xff]   ;;  %v7670_v16 = vld [vmem:[#allocation13 + $0x64] ss:$12 sps:$4 sm:$0xff]  }
 0x20a   :  { %v1277_v42 = vadd.f32 %v1275_v36, %v1221_v21  ;;  %v7673_v17 = vld [vmem:[#allocation13 + $0x60] ss:$12 sps:$4 sm:$0xff]   ;;  %v7677_v19 = vld [vmem:[#allocation13 + $0x7c] ss:$12 sps:$4 sm:$0xff]   ;;  %v7680_v20 = vld [vmem:[#allocation13 + $0x78] ss:$12 sps:$4 sm:$0xff]  }
 0x20b   :  { %v5477_v40 = vmul.f32 -1.442695, %v1267_v27  ;;  %v6551_v21 = vld [vmem:[#allocation13 + $0x80] ss:$12 sps:$4 sm:$0xff]   ;;  %v7687_v24 = vld [vmem:[#allocation13 + $0x90] ss:$12 sps:$4 sm:$0xff]  }
 0x20c   :  { %v5478_v46 = vmul.f32 -1.442695, %v1277_v42  ;;  %v7684_v22 = vld [vmem:[#allocation13 + $0x94] ss:$12 sps:$4 sm:$0xff]   ;;  %v6555_v27 = vld [vmem:[#allocation13 + $0x98] ss:$12 sps:$4 sm:$0xff]  }
 0x20d   :  { %6778 = vpow2.f32 %v5477_v40  ;;  %v7691_v30 = vld [vmem:[#allocation13 + $0xac] ss:$12 sps:$4 sm:$0xff]   ;;  %v7694_v33 = vld [vmem:[#allocation13 + $0xa8] ss:$12 sps:$4 sm:$0xff]   ;;  %v6559_v36 = vld [vmem:[#allocation13 + $0xb0] ss:$12 sps:$4 sm:$0xff]  }
 0x20e   :  { %6780 = vpow2.f32 %v5478_v46  ;;  %v7698_v40 = vld [vmem:[#allocation19 + $0x4] ss:$12 sps:$4 sm:$0xff]   ;;  %v1327_v42 = vld [vmem:[#allocation16] sm:$0x7] }
 0x20f   :  { %v1460_v45 = vrot.slane %v1327_v42, %v7586_v56  ;;  %v1464_v46 = vrot.slane %v1327_v42, %v7590_v59 }
 0x213   :  { %v6777_v48 = vpop.eup %6776 }
 0x214   :  { %v1003_v49 = vmul.f32 %v6777_v48, %v1002_v47 }
 0x216   :  { %v7603_v51 = vadd.f32 %v1004_v50, %v1003_v49  ;;  %v1554_v50 = vld [vmem:[#allocation3 + $0x1] ss:$8 sm:$0x7] }
 0x217   :  { %v6779_v52 = vpop.eup %6778 }
 0x218   :  { %v1271_v54 = vadd.f32 1.0, %v6779_v52  ;;  %1006 = vst [vmem:[#allocation23] sm:$0x1] %v7603_v51  ;;  %v1294_v55 = vpack.c.bf16 %v7603_v51, %v7603_v51  ;;  %v6781_v61 = vpop.eup %6780 }
 0x21a   :  { %6782 = vrcp.f32 %v1271_v54  ;;  %1505 = vmatmul.mubr.bf16.vlgmr.msra.gmra.mrb[16].mxu0 %v1294_v55  ;;  %6102 = vmatmul.mubr.bf16.vlgmr.msra.gmra.mrb[16].mxu1 %v1294_v55 }
 0x21b   :  { %1761 = vmatpush1.bf16.msra.mxu0 %v7495_v23  ;;  %6106 = vmatpush3.bf16.msra.mxu1 %v6520_v53  ;;  %v1281_v23 = vadd.f32 1.0, %v6781_v61 }
 0x21c   :  { %1762 = vmatprep.subr.bf16.mxu0 %v7497_v25  ;;  %6107 = vmatprep.subr.bf16.mxu1 %v7210_v2  ;;  %v1260_v25 = vadd.f32 %v1259_v15, %v1180_v60  ;;  %v6543_v15 = vld [vmem:[#allocation13 + $0x50] ss:$12 sps:$4 sm:$0xff]  }
 0x21d   :  { %1792 = vmatprep.mubr.bf16.mxu0 %v7211_v3  ;;  %6121 = vmatprep.mubr.msk.bf16.mxu1 %vm7212_vm0, %v7210_v2  ;;  %6784 = vrcp.f32 %v1281_v23  ;;  %v1563_v23 = vrot.slane %v1554_v50, 1 }
 0x21f   :  { %1763 = vmatpush1.bf16.msra.mxu0 %v7502_v26  ;;  %6108 = vmatpush3.bf16.msra.mxu1 %v6521_v58  ;;  %v1285_v26 = vrot.slane %v1266_v18, 2  ;;  %v6547_v18 = vld [vmem:[#allocation13 + $0x68] ss:$12 sps:$4 sm:$0xff]  }
 0x220   :  { %1764 = vmatprep.subr.bf16.mxu0 %v7505_v28  ;;  %6109 = vmatprep.subr.bf16.mxu1 %v7210_v2  ;;  %v6524_v28 = vld [vmem:[#allocation19 + $0x68] ss:$12 sps:$4 sm:$0xff]  }
 0x223   :  { %1765 = vmatpush1.bf16.msra.mxu0 %v7511_v29  ;;  %6110 = vmatpush3.bf16.msra.mxu1 %v6522_v62  ;;  %v6525_v29 = vld [vmem:[#allocation19 + $0x80] ss:$12 sps:$4 sm:$0xff]  }
 0x224   :  { %v6783_v0 = vpop.eup %6782  ;;  %1766 = vmatprep.subr.bf16.mxu0 %v7516_v31  ;;  %6111 = vmatprep.subr.bf16.mxu1 %v7210_v2 }
 0x225   :  { %v1284_v1 = vmul.f32 %v6783_v0, %v1260_v25 }
 0x227   :  { %v1287_v4 = vadd.f32 %v1285_v26, %v1284_v1  ;;  %1767 = vmatpush1.bf16.msra.mxu0 %v7521_v32  ;;  %6112 = vmatpush3.bf16.msra.mxu1 %v6523_v63  ;;  %v6785_v31 = vpop.eup %6784  ;;  %v6526_v32 = vld [vmem:[#allocation19 + $0x98] ss:$12 sps:$4 sm:$0xff]  }
 0x228   :  { %1768 = vmatprep.subr.bf16.mxu0 %v7523_v34  ;;  %6113 = vmatprep.subr.bf16.mxu1 %v7210_v2  ;;  %v1289_v34 = vsub.f32 1.0, %v6785_v31  ;;  %v1291_v6 = vmul.f32 0.0, %v6785_v31 }
 0x229   :  { %6786 = vtanh.f32 %v1287_v4 }
 0x22b   :  { %1769 = vmatpush1.bf16.msra.mxu0 %v7528_v35  ;;  %6114 = vmatpush3.bf16.msra.mxu1 %v6524_v28  ;;  %v6527_v35 = vld [vmem:[#allocation19 + $0xb0] ss:$12 sps:$4 sm:$0xff]   ;;  %v1468_v28 = vrot.slane %v1327_v42, %v7588_v57 }
 0x22c   :  { %1770 = vmatprep.subr.bf16.mxu0 %v7530_v37  ;;  %6115 = vmatprep.subr.bf16.mxu1 %v7210_v2 }
 0x22f   :  { %1771 = vmatpush1.bf16.msra.mxu0 %v7535_v38  ;;  %6116 = vmatpush3.bf16.msra.mxu1 %v6525_v29  ;;  %v7705_v29 = vld [vmem:[#allocation22] sm:$0x7] }
 0x230   :  { %1772 = vmatprep.subr.bf16.mxu0 %v7537_v39  ;;  %6117 = vmatprep.subr.bf16.mxu1 %v7210_v2  ;;  %v7643_v39 = vld [vmem:[#allocation13 + $0x4] ss:$12 sps:$4 sm:$0xff]  }
 0x233   :  { %v6787_v5 = vpop.eup %6786  ;;  %1773 = vmatpush1.bf16.msra.mxu0 %v7542_v41  ;;  %6118 = vmatpush3.bf16.msra.mxu1 %v6526_v32  ;;  %v7645_v41 = vld [vmem:[#allocation13] ss:$12 sps:$4 sm:$0xff]  }
 0x234   :  { %1774 = vmatprep.subr.bf16.mxu0 %v7544_v43  ;;  %6119 = vmatprep.subr.bf16.mxu1 %v7210_v2  ;;  %v1290_v37 = vmul.f32 %v6787_v5, %v1289_v34  ;;  %v6531_v43 = vld [vmem:[#allocation13 + $0x8] ss:$12 sps:$4 sm:$0xff]   ;;  %v1748_v34 = vrot.slane %v7705_v29, %v7586_v56 }
 0x236   :  { %v7633_v7 = vadd.f32 %v1291_v6, %v1290_v37  ;;  %v1573_v6 = vrot.slane %v1554_v50, 2 }
 0x237   :  { %1775 = vmatpush1.bf16.msra.mxu0 %v7549_v44  ;;  %6120 = vmatpush3.bf16.msra.mxu1 %v6527_v35  ;;  %v7649_v44 = vld [vmem:[#allocation13 + $0x1c] ss:$12 sps:$4 sm:$0xff]   ;;  %v1752_v35 = vrot.slane %v7705_v29, %v7590_v59 }
 0x238   :  { %1293 = vst [vmem:[#allocation5 + $0x7] sm:$0x1] %v7633_v7  ;;  %v1582_v38 = vpack.c.bf16 %v7633_v7, %v7633_v7  ;;  %6125 = vmatprep.subr.bf16.mxu1 %v7210_v2  ;;  %2048 = vmatprep.subr.bf16.mxu0 %v7643_v39 }
 0x23a   :  { %1793 = vmatmul.mubr.bf16.vlgmr.msra.gmra.mrb[20].mxu0 %v1582_v38  ;;  %6122 = vmatmul.mubr.bf16.vlgmr.msra.gmra.mrb[20].mxu1 %v1582_v38 }
 0x23b   :  { %2080 = vmatprep.mubr.bf16.mxu0 %v7211_v3  ;;  %6141 = vmatprep.mubr.msk.bf16.mxu1 %vm7212_vm0, %v7210_v2 }
 0x23c   :  { %2049 = vmatpush1.bf16.msra.mxu0 %v7645_v41  ;;  %6126 = vmatpush3.bf16.msra.mxu1 %v6531_v43 }
 0x23d   :  { %6127 = vmatprep.subr.bf16.mxu1 %v7210_v2  ;;  %2050 = vmatprep.subr.bf16.mxu0 %v7649_v44 }
 0x240   :  { %2051 = vmatpush1.bf16.msra.mxu0 %v7652_v8  ;;  %6128 = vmatpush3.bf16.msra.mxu1 %v6535_v9 }
 0x241   :  { %6129 = vmatprep.subr.bf16.mxu1 %v7210_v2  ;;  %2052 = vmatprep.subr.bf16.mxu0 %v7656_v10 }
 0x244   :  { %2053 = vmatpush1.bf16.msra.mxu0 %v7659_v11  ;;  %6130 = vmatpush3.bf16.msra.mxu1 %v6539_v12 }
 0x245   :  { %6131 = vmatprep.subr.bf16.mxu1 %v7210_v2  ;;  %2054 = vmatprep.subr.bf16.mxu0 %v7663_v13 }
 0x248   :  { %2055 = vmatpush1.bf16.msra.mxu0 %v7666_v14  ;;  %6132 = vmatpush3.bf16.msra.mxu1 %v6543_v15  ;;  %v7711_v15 = vld [vmem:[#allocation4 + $0x6] ss:$8 sm:$0x7] }
 0x249   :  { %6133 = vmatprep.subr.bf16.mxu1 %v7210_v2  ;;  %2056 = vmatprep.subr.bf16.mxu0 %v7670_v16 }
 0x24c   :  { %2057 = vmatpush1.bf16.msra.mxu0 %v7673_v17  ;;  %6134 = vmatpush3.bf16.msra.mxu1 %v6547_v18 }
 0x24d   :  { %6135 = vmatprep.subr.bf16.mxu1 %v7210_v2  ;;  %2058 = vmatprep.subr.bf16.mxu0 %v7677_v19 }
 0x250   :  { %2059 = vmatpush1.bf16.msra.mxu0 %v7680_v20  ;;  %6136 = vmatpush3.bf16.msra.mxu1 %v6551_v21 }
 0x251   :  { %6137 = vmatprep.subr.bf16.mxu1 %v7210_v2  ;;  %2060 = vmatprep.subr.bf16.mxu0 %v7684_v22 }
 0x254   :  { %2061 = vmatpush1.bf16.msra.mxu0 %v7687_v24  ;;  %6138 = vmatpush3.bf16.msra.mxu1 %v6555_v27 }
 0x255   :  { %6139 = vmatprep.subr.bf16.mxu1 %v7210_v2  ;;  %2062 = vmatprep.subr.bf16.mxu0 %v7691_v30 }
 0x258   :  { %2063 = vmatpush1.bf16.msra.mxu0 %v7694_v33  ;;  %6140 = vmatpush3.bf16.msra.mxu1 %v6559_v36 }
 0x259   :  { %6145 = vmatprep.subr.bf16.mxu1 %v7210_v2  ;;  %2336 = vmatprep.subr.bf16.mxu0 %v7698_v40 }
 0x2ed   :  { %v1506_v47 = vpop.f32.mrb[16].mxu0  ;;  %v1547_v48 = vpop.f32.mrb[16].mxu1 }
 0x2ee   :  { %v1507_v49 = vadd.f32 %v1506_v47, %v1460_v45  ;;  %v1508_v52 = vpop.f32.mrb[17].mxu0  ;;  %v6103_v53 = vpop.f32.mrb[17].mxu1  ;;  %v1548_v32 = vadd.f32 %v1547_v48, %v1468_v28  ;;  %v1851_v48 = vrot.slane %v7711_v15, 1 }
 0x2ef   :  { %v1509_v54 = vadd.f32 %v1508_v52, %v1464_v46  ;;  %v1510_v55 = vpop.f32.mrb[18].mxu0  ;;  %v1550_v58 = vpop.f32.mrb[18].mxu1 }
 0x2f0   :  { %v1555_v60 = vadd.f32 %v1554_v50, %v1507_v49  ;;  %v1511_v61 = vpop.f32.mrb[19].mxu0  ;;  %v6104_v62 = vpop.f32.mrb[19].mxu1 }
 0x2f1   :  { %v1565_v63 = vadd.f32 %v1563_v23, %v1509_v54  ;;  %v7718_v23 = vld [vmem:[#allocation19] ss:$12 sps:$4 sm:$0xff]  }
 0x2f2   :  { %v5503_v25 = vmul.f32 -1.442695, %v1555_v60 }
 0x2f3   :  { %v5504_v0 = vmul.f32 -1.442695, %v1565_v63 }
 0x2f4   :  { %6788 = vpow2.f32 %v5503_v25  ;;  %v6563_v25 = vld [vmem:[#allocation19 + $0x8] ss:$12 sps:$4 sm:$0xff]  }
 0x2f5   :  { %6790 = vpow2.f32 %v5504_v0 }
 0x2fe   :  { %v6789_v1 = vpop.eup %6788 }
 0x2ff   :  { %v1559_v26 = vadd.f32 1.0, %v6789_v1  ;;  %v6791_v4 = vpop.eup %6790  ;;  %v7723_v1 = vld [vmem:[#allocation19 + $0x1c] ss:$12 sps:$4 sm:$0xff]  }
 0x300   :  { %v1569_v31 = vadd.f32 1.0, %v6791_v4  ;;  %v7730_v4 = vld [vmem:[#allocation19 + $0x34] ss:$12 sps:$4 sm:$0xff]  }
 0x301   :  { %6792 = vrcp.f32 %v1559_v26  ;;  %v6567_v26 = vld [vmem:[#allocation19 + $0x20] ss:$12 sps:$4 sm:$0xff]  }
 0x302   :  { %6794 = vrcp.f32 %v1569_v31  ;;  %v1756_v31 = vrot.slane %v7705_v29, %v7588_v57  ;;  %v6575_v29 = vld [vmem:[#allocation19 + $0x50] ss:$12 sps:$4 sm:$0xff]  }
 0x30b   :  { %v6793_v5 = vpop.eup %6792 }
 0x30c   :  { %v1572_v37 = vmul.f32 %v6793_v5, %v1548_v32  ;;  %v6795_v52 = vpop.eup %6794  ;;  %v7738_v32 = vld [vmem:[#allocation19 + $0x30] ss:$12 sps:$4 sm:$0xff]   ;;  %v7742_v5 = vld [vmem:[#allocation19 + $0x4c] ss:$12 sps:$4 sm:$0xff]  }
 0x30d   :  { %v1794_v38 = vpop.f32.mrb[20].mxu0  ;;  %v1835_v43 = vpop.f32.mrb[20].mxu1  ;;  %v1577_v54 = vsub.f32 1.0, %v6795_v52  ;;  %v1579_v60 = vmul.f32 %v6795_v52, %v7603_v51  ;;  %v7726_v51 = vld [vmem:[#allocation19 + $0x18] ss:$12 sps:$4 sm:$0xff]  }
 0x30e   :  { %v1575_v9 = vadd.f32 %v1573_v6, %v1572_v37  ;;  %v1795_v12 = vadd.f32 %v1794_v38, %v1748_v34  ;;  %v1796_v18 = vpop.f32.mrb[21].mxu0  ;;  %v6123_v21 = vpop.f32.mrb[21].mxu1  ;;  %v6571_v34 = vld [vmem:[#allocation19 + $0x38] ss:$12 sps:$4 sm:$0xff]   ;;  %v1836_v37 = vadd.f32 %v1835_v43, %v1756_v31  ;;  %v7745_v6 = vld [vmem:[#allocation19 + $0x48] ss:$12 sps:$4 sm:$0xff]  }
 0x30f   :  { %v1797_v27 = vadd.f32 %v1796_v18, %v1752_v35  ;;  %v1798_v36 = vpop.f32.mrb[22].mxu0  ;;  %v1838_v42 = vpop.f32.mrb[22].mxu1  ;;  %v1861_v18 = vrot.slane %v7711_v15, 2  ;;  %v7753_v43 = vld [vmem:[#allocation19 + $0x60] ss:$12 sps:$4 sm:$0xff]  }
 0x310   :  { %6796 = vtanh.f32 %v1575_v9  ;;  %v1843_v45 = vadd.f32 %v7711_v15, %v1795_v12  ;;  %v1799_v46 = vpop.f32.mrb[23].mxu0  ;;  %v6124_v47 = vpop.f32.mrb[23].mxu1  ;;  %v7749_v9 = vld [vmem:[#allocation19 + $0x64] ss:$12 sps:$4 sm:$0xff]   ;;  %v7757_v36 = vld [vmem:[#allocation19 + $0x7c] ss:$12 sps:$4 sm:$0xff]  }
 0x311   :  { %v1853_v50 = vadd.f32 %v1851_v48, %v1797_v27  ;;  %v6579_v27 = vld [vmem:[#allocation19 + $0x68] ss:$12 sps:$4 sm:$0xff]   ;;  %v7760_v42 = vld [vmem:[#allocation19 + $0x78] ss:$12 sps:$4 sm:$0xff]   ;;  %v6583_v15 = vld [vmem:[#allocation19 + $0x80] ss:$12 sps:$4 sm:$0xff]  }
 0x312   :  { %v5529_v49 = vmul.f32 -1.442695, %v1843_v45  ;;  %v7764_v45 = vld [vmem:[#allocation19 + $0x94] ss:$12 sps:$4 sm:$0xff]   ;;  %v7767_v47 = vld [vmem:[#allocation19 + $0x90] ss:$12 sps:$4 sm:$0xff]  }
 0x313   :  { %v5530_v53 = vmul.f32 -1.442695, %v1853_v50  ;;  %v6587_v48 = vld [vmem:[#allocation19 + $0x98] ss:$12 sps:$4 sm:$0xff]  }
 0x314   :  { %6798 = vpow2.f32 %v5529_v49  ;;  %v7771_v49 = vld [vmem:[#allocation19 + $0xac] ss:$12 sps:$4 sm:$0xff]  }
 0x315   :  { %6800 = vpow2.f32 %v5530_v53  ;;  %v7774_v53 = vld [vmem:[#allocation19 + $0xa8] ss:$12 sps:$4 sm:$0xff]  }
 0x31a   :  { %v6797_v55 = vpop.eup %6796 }
 0x31b   :  { %v1578_v58 = vmul.f32 %v6797_v55, %v1577_v54  ;;  %v6591_v54 = vld [vmem:[#allocation19 + $0xb0] ss:$12 sps:$4 sm:$0xff]  }
 0x31d   :  { %v7716_v61 = vadd.f32 %v1579_v60, %v1578_v58 }
 0x31e   :  { %v6799_v62 = vpop.eup %6798 }
 0x31f   :  { %v1847_v63 = vadd.f32 1.0, %v6799_v62  ;;  %1581 = vst [vmem:[#allocation23 + $0x1] sm:$0x1] %v7716_v61  ;;  %v1870_v0 = vpack.c.bf16 %v7716_v61, %v7716_v61  ;;  %v6801_v28 = vpop.eup %6800 }
 0x320   :  { %v1857_v35 = vadd.f32 1.0, %v6801_v28 }
 0x321   :  { %6802 = vrcp.f32 %v1847_v63  ;;  %2081 = vmatmul.mubr.bf16.vlgmr.msra.gmra.mrb[24].mxu0 %v1870_v0  ;;  %6142 = vmatmul.mubr.bf16.vlgmr.msra.gmra.mrb[24].mxu1 %v1870_v0 }
 0x322   :  { %2337 = vmatpush1.bf16.msra.mxu0 %v7718_v23  ;;  %6146 = vmatpush3.bf16.msra.mxu1 %v6563_v25  ;;  %6804 = vrcp.f32 %v1857_v35 }
 0x323   :  { %2338 = vmatprep.subr.bf16.mxu0 %v7723_v1  ;;  %6147 = vmatprep.subr.bf16.mxu1 %v7210_v2 }
 0x324   :  { %2368 = vmatprep.mubr.bf16.mxu0 %v7211_v3  ;;  %6161 = vmatprep.mubr.msk.bf16.mxu1 %vm7212_vm0, %v7210_v2 }
 0x326   :  { %2339 = vmatpush1.bf16.msra.mxu0 %v7726_v51  ;;  %6148 = vmatpush3.bf16.msra.mxu1 %v6567_v26 }
 0x327   :  { %2340 = vmatprep.subr.bf16.mxu0 %v7730_v4  ;;  %6149 = vmatprep.subr.bf16.mxu1 %v7210_v2 }
 0x32a   :  { %2341 = vmatpush1.bf16.msra.mxu0 %v7738_v32  ;;  %6150 = vmatpush3.bf16.msra.mxu1 %v6571_v34 }
 0x32b   :  { %v6803_v38 = vpop.eup %6802  ;;  %2342 = vmatprep.subr.bf16.mxu0 %v7742_v5  ;;  %6151 = vmatprep.subr.bf16.mxu1 %v7210_v2 }
 0x32c   :  { %v1860_v12 = vmul.f32 %v6803_v38, %v1836_v37  ;;  %v6805_v46 = vpop.eup %6804 }
 0x32d   :  { %v1865_v50 = vsub.f32 1.0, %v6805_v46  ;;  %v1867_v58 = vmul.f32 %v6805_v46, %v7633_v7  ;;  %v6592_v7 = vld [vmem:[#allocation13 + $0x8] ss:$12 sps:$4 sm:$0xff]  }
 0x32e   :  { %v1863_v21 = vadd.f32 %v1861_v18, %v1860_v12  ;;  %2343 = vmatpush1.bf16.msra.mxu0 %v7745_v6  ;;  %6152 = vmatpush3.bf16.msra.mxu1 %v6575_v29 }
 0x32f   :  { %2344 = vmatprep.subr.bf16.mxu0 %v7749_v9  ;;  %6153 = vmatprep.subr.bf16.mxu1 %v7210_v2 }
 0x330   :  { %6806 = vtanh.f32 %v1863_v21  ;;  %v2191_v21 = vld [vmem:[#allocation22] sm:$0x7] }
 0x331   :  { %v2324_v46 = vrot.slane %v2191_v21, %v7586_v56 }
 0x332   :  { %2345 = vmatpush1.bf16.msra.mxu0 %v7753_v43  ;;  %6154 = vmatpush3.bf16.msra.mxu1 %v6579_v27 }
 0x333   :  { %2346 = vmatprep.subr.bf16.mxu0 %v7757_v36  ;;  %6155 = vmatprep.subr.bf16.mxu1 %v7210_v2 }
 0x336   :  { %2347 = vmatpush1.bf16.msra.mxu0 %v7760_v42  ;;  %6156 = vmatpush3.bf16.msra.mxu1 %v6583_v15 }
 0x337   :  { %2348 = vmatprep.subr.bf16.mxu0 %v7764_v45  ;;  %6157 = vmatprep.subr.bf16.mxu1 %v7210_v2 }
 0x33a   :  { %v6807_v52 = vpop.eup %6806  ;;  %2349 = vmatpush1.bf16.msra.mxu0 %v7767_v47  ;;  %6158 = vmatpush3.bf16.msra.mxu1 %v6587_v48 }
 0x33b   :  { %2350 = vmatprep.subr.bf16.mxu0 %v7771_v49  ;;  %6159 = vmatprep.subr.bf16.mxu1 %v7210_v2  ;;  %v1866_v55 = vmul.f32 %v6807_v52, %v1865_v50  ;;  %v2328_v50 = vrot.slane %v2191_v21, %v7590_v59 }
 0x33d   :  { %v7779_v60 = vadd.f32 %v1867_v58, %v1866_v55 }
 0x33e   :  { %2351 = vmatpush1.bf16.msra.mxu0 %v7774_v53  ;;  %6160 = vmatpush3.bf16.msra.mxu1 %v6591_v54 }
 0x33f   :  { %1869 = vst [vmem:[#allocation5 + $0x6] sm:$0x1] %v7779_v60  ;;  %v2158_v62 = vpack.c.bf16 %v7779_v60, %v7779_v60  ;;  %2624 = vmatprep.subr.bf16.mxu0 %v7643_v39  ;;  %6165 = vmatprep.subr.bf16.mxu1 %v7210_v2  ;;  %v6593_v39 = vld [vmem:[#allocation13 + $0x20] ss:$12 sps:$4 sm:$0xff]  }
 0x341   :  { %2369 = vmatmul.mubr.bf16.vlgmr.msra.gmra.mrb[28].mxu0 %v2158_v62  ;;  %6162 = vmatmul.mubr.bf16.vlgmr.msra.gmra.mrb[28].mxu1 %v2158_v62 }
 0x342   :  { %2625 = vmatpush1.bf16.msra.mxu0 %v7645_v41  ;;  %2656 = vmatprep.mubr.bf16.mxu0 %v7211_v3  ;;  %v6594_v41 = vld [vmem:[#allocation13 + $0x38] ss:$12 sps:$4 sm:$0xff]  }
 0x343   :  { %2626 = vmatprep.subr.bf16.mxu0 %v7649_v44  ;;  %6181 = vmatprep.mubr.msk.bf16.mxu1 %vm7212_vm0, %v7210_v2  ;;  %v6595_v44 = vld [vmem:[#allocation13 + $0x50] ss:$12 sps:$4 sm:$0xff]  }
 0x344   :  { %6166 = vmatpush3.bf16.msra.mxu1 %v6592_v7 }
 0x345   :  { %6167 = vmatprep.subr.bf16.mxu1 %v7210_v2 }
 0x346   :  { %2627 = vmatpush1.bf16.msra.mxu0 %v7652_v8  ;;  %v6596_v8 = vld [vmem:[#allocation13 + $0x68] ss:$12 sps:$4 sm:$0xff]  }
 0x347   :  { %2628 = vmatprep.subr.bf16.mxu0 %v7656_v10  ;;  %v6597_v10 = vld [vmem:[#allocation13 + $0x80] ss:$12 sps:$4 sm:$0xff]  }
 0x348   :  { %6168 = vmatpush3.bf16.msra.mxu1 %v6593_v39  ;;  %v2418_v39 = vld [vmem:[#allocation4 + $0x5] ss:$8 sm:$0x7] }
 0x349   :  { %6169 = vmatprep.subr.bf16.mxu1 %v7210_v2 }
 0x34a   :  { %2629 = vmatpush1.bf16.msra.mxu0 %v7659_v11  ;;  %v6598_v11 = vld [vmem:[#allocation13 + $0x98] ss:$12 sps:$4 sm:$0xff]  }
 0x34b   :  { %2630 = vmatprep.subr.bf16.mxu0 %v7663_v13  ;;  %v6599_v13 = vld [vmem:[#allocation13 + $0xb0] ss:$12 sps:$4 sm:$0xff]  }
 0x34c   :  { %6170 = vmatpush3.bf16.msra.mxu1 %v6594_v41 }
 0x34d   :  { %6171 = vmatprep.subr.bf16.mxu1 %v7210_v2 }
 0x34e   :  { %2631 = vmatpush1.bf16.msra.mxu0 %v7666_v14  ;;  %v1903_v14 = vld [vmem:[#allocation16] sm:$0x7] }
 0x34f   :  { %2632 = vmatprep.subr.bf16.mxu0 %v7670_v16  ;;  %v2036_v16 = vrot.slane %v1903_v14, %v7586_v56  ;;  %v2044_v18 = vrot.slane %v1903_v14, %v7588_v57 }
 0x350   :  { %6172 = vmatpush3.bf16.msra.mxu1 %v6595_v44 }
 0x351   :  { %6173 = vmatprep.subr.bf16.mxu1 %v7210_v2 }
 0x352   :  { %2633 = vmatpush1.bf16.msra.mxu0 %v7673_v17  ;;  %v2040_v17 = vrot.slane %v1903_v14, %v7590_v59 }
 0x353   :  { %2634 = vmatprep.subr.bf16.mxu0 %v7677_v19 }
 0x354   :  { %6174 = vmatpush3.bf16.msra.mxu1 %v6596_v8 }
 0x355   :  { %6175 = vmatprep.subr.bf16.mxu1 %v7210_v2 }
 0x356   :  { %2635 = vmatpush1.bf16.msra.mxu0 %v7680_v20 }
 0x357   :  { %2636 = vmatprep.subr.bf16.mxu0 %v7684_v22 }
 0x358   :  { %6176 = vmatpush3.bf16.msra.mxu1 %v6597_v10 }
 0x359   :  { %6177 = vmatprep.subr.bf16.mxu1 %v7210_v2 }
 0x35a   :  { %2637 = vmatpush1.bf16.msra.mxu0 %v7687_v24  ;;  %v2130_v24 = vld [vmem:[#allocation3 + $0x2] ss:$8 sm:$0x7] }
 0x35b   :  { %2638 = vmatprep.subr.bf16.mxu0 %v7691_v30  ;;  %v2139_v31 = vrot.slane %v2130_v24, 1  ;;  %v2149_v54 = vrot.slane %v2130_v24, 2 }
 0x35c   :  { %6178 = vmatpush3.bf16.msra.mxu1 %v6598_v11 }
 0x35d   :  { %6179 = vmatprep.subr.bf16.mxu1 %v7210_v2 }
 0x35e   :  { %2639 = vmatpush1.bf16.msra.mxu0 %v7694_v33 }
 0x35f   :  { %2912 = vmatprep.subr.bf16.mxu0 %v7698_v40 }
 0x360   :  { %6180 = vmatpush3.bf16.msra.mxu1 %v6599_v13 }
 0x361   :  { %6185 = vmatprep.subr.bf16.mxu1 %v7210_v2 }
 0x3f4   :  { %v2082_v19 = vpop.f32.mrb[24].mxu0  ;;  %v2123_v20 = vpop.f32.mrb[24].mxu1 }
 0x3f5   :  { %v2083_v22 = vadd.f32 %v2082_v19, %v2036_v16  ;;  %v2084_v30 = vpop.f32.mrb[25].mxu0  ;;  %v6143_v33 = vpop.f32.mrb[25].mxu1  ;;  %v2124_v15 = vadd.f32 %v2123_v20, %v2044_v18  ;;  %v2437_v18 = vrot.slane %v2418_v39, 2 }
 0x3f6   :  { %v2085_v40 = vadd.f32 %v2084_v30, %v2040_v17  ;;  %v2086_v25 = vpop.f32.mrb[26].mxu0  ;;  %v2126_v63 = vpop.f32.mrb[26].mxu1  ;;  %v2427_v17 = vrot.slane %v2418_v39, 1 }
 0x3f7   :  { %v2131_v0 = vadd.f32 %v2130_v24, %v2083_v22  ;;  %v2087_v26 = vpop.f32.mrb[27].mxu0  ;;  %v6144_v28 = vpop.f32.mrb[27].mxu1 }
 0x3f8   :  { %v2141_v35 = vadd.f32 %v2139_v31, %v2085_v40  ;;  %v6600_v26 = vld [vmem:[#allocation19 + $0x8] ss:$12 sps:$4 sm:$0xff]  }
 0x3f9   :  { %v5555_v34 = vmul.f32 -1.442695, %v2131_v0 }
 0x3fa   :  { %v5556_v37 = vmul.f32 -1.442695, %v2141_v35  ;;  %v2332_v35 = vrot.slane %v2191_v21, %v7588_v57 }
 0x3fb   :  { %6808 = vpow2.f32 %v5555_v34  ;;  %v6601_v34 = vld [vmem:[#allocation19 + $0x20] ss:$12 sps:$4 sm:$0xff]  }
 0x3fc   :  { %6810 = vpow2.f32 %v5556_v37  ;;  %v6602_v37 = vld [vmem:[#allocation19 + $0x38] ss:$12 sps:$4 sm:$0xff]  }
 0x405   :  { %v6809_v29 = vpop.eup %6808 }
 0x406   :  { %v2135_v38 = vadd.f32 1.0, %v6809_v29  ;;  %v6811_v12 = vpop.eup %6810  ;;  %v6603_v29 = vld [vmem:[#allocation19 + $0x50] ss:$12 sps:$4 sm:$0xff]  }
 0x407   :  { %v2145_v27 = vadd.f32 1.0, %v6811_v12 }
 0x408   :  { %6812 = vrcp.f32 %v2135_v38 }
 0x409   :  { %6814 = vrcp.f32 %v2145_v27 }
 0x412   :  { %v6813_v48 = vpop.eup %6812 }
 0x413   :  { %v2148_v52 = vmul.f32 %v6813_v48, %v2124_v15  ;;  %v6815_v22 = vpop.eup %6814  ;;  %v7870_v15 = vld [vmem:[#allocation13 + $0x18] ss:$12 sps:$4 sm:$0xff]   ;;  %v7874_v48 = vld [vmem:[#allocation13 + $0x34] ss:$12 sps:$4 sm:$0xff]  }
 0x414   :  { %v2370_v55 = vpop.f32.mrb[28].mxu0  ;;  %v2411_v58 = vpop.f32.mrb[28].mxu1  ;;  %v2153_v30 = vsub.f32 1.0, %v6815_v22  ;;  %v2155_v25 = vmul.f32 %v6815_v22, %v7716_v61 }
 0x415   :  { %v2151_v62 = vadd.f32 %v2149_v54, %v2148_v52  ;;  %v2371_v7 = vadd.f32 %v2370_v55, %v2324_v46  ;;  %v2372_v41 = vpop.f32.mrb[29].mxu0  ;;  %v6163_v44 = vpop.f32.mrb[29].mxu1  ;;  %v6615_v46 = vld [vmem:[#allocation13 + $0x20] ss:$12 sps:$4 sm:$0xff]   ;;  %v6619_v52 = vld [vmem:[#allocation13 + $0x38] ss:$12 sps:$4 sm:$0xff]  }
 0x416   :  { %v2373_v8 = vadd.f32 %v2372_v41, %v2328_v50  ;;  %v2374_v10 = vpop.f32.mrb[30].mxu0  ;;  %v2414_v11 = vpop.f32.mrb[30].mxu1  ;;  %v7877_v50 = vld [vmem:[#allocation13 + $0x30] ss:$12 sps:$4 sm:$0xff]   ;;  %v7881_v54 = vld [vmem:[#allocation13 + $0x4c] ss:$12 sps:$4 sm:$0xff]  }
 0x417   :  { %6816 = vtanh.f32 %v2151_v62  ;;  %v2419_v13 = vadd.f32 %v2418_v39, %v2371_v7  ;;  %v2375_v14 = vpop.f32.mrb[31].mxu0  ;;  %v6164_v16 = vpop.f32.mrb[31].mxu1  ;;  %v7884_v55 = vld [vmem:[#allocation13 + $0x48] ss:$12 sps:$4 sm:$0xff]   ;;  %v7888_v62 = vld [vmem:[#allocation13 + $0x64] ss:$12 sps:$4 sm:$0xff]  }
 0x418   :  { %v2429_v20 = vadd.f32 %v2427_v17, %v2373_v8  ;;  %v7891_v7 = vld [vmem:[#allocation13 + $0x60] ss:$12 sps:$4 sm:$0xff]   ;;  %v6627_v39 = vld [vmem:[#allocation13 + $0x68] ss:$12 sps:$4 sm:$0xff]   ;;  %v7898_v44 = vld [vmem:[#allocation13 + $0x78] ss:$12 sps:$4 sm:$0xff]  }
 0x419   :  { %v5581_v19 = vmul.f32 -1.442695, %v2419_v13  ;;  %v7895_v41 = vld [vmem:[#allocation13 + $0x7c] ss:$12 sps:$4 sm:$0xff]   ;;  %v6631_v8 = vld [vmem:[#allocation13 + $0x80] ss:$12 sps:$4 sm:$0xff]  }
 0x41a   :  { %v5582_v24 = vmul.f32 -1.442695, %v2429_v20  ;;  %v7902_v10 = vld [vmem:[#allocation13 + $0x94] ss:$12 sps:$4 sm:$0xff]   ;;  %v7905_v11 = vld [vmem:[#allocation13 + $0x90] ss:$12 sps:$4 sm:$0xff]  }
 0x41b   :  { %6818 = vpow2.f32 %v5581_v19  ;;  %v6635_v13 = vld [vmem:[#allocation13 + $0x98] ss:$12 sps:$4 sm:$0xff]   ;;  %v7912_v16 = vld [vmem:[#allocation13 + $0xa8] ss:$12 sps:$4 sm:$0xff]   ;;  %v6639_v17 = vld [vmem:[#allocation13 + $0xb0] ss:$12 sps:$4 sm:$0xff]  }
 0x41c   :  { %6820 = vpow2.f32 %v5582_v24  ;;  %v7909_v14 = vld [vmem:[#allocation13 + $0xac] ss:$12 sps:$4 sm:$0xff]   ;;  %v2479_v20 = vld [vmem:[#allocation16] sm:$0x7] }
 0x41d   :  { %v7916_v19 = vld [vmem:[#allocation19 + $0x4] ss:$12 sps:$4 sm:$0xff]   ;;  %v2612_v22 = vrot.slane %v2479_v20, %v7586_v56  ;;  %v2616_v24 = vrot.slane %v2479_v20, %v7590_v59 }
 0x421   :  { %v6817_v33 = vpop.eup %6816 }
 0x422   :  { %v2154_v40 = vmul.f32 %v6817_v33, %v2153_v30 }
 0x424   :  { %v7820_v63 = vadd.f32 %v2155_v25, %v2154_v40  ;;  %v2706_v25 = vld [vmem:[#allocation3 + $0x3] ss:$8 sm:$0x7] }
 0x425   :  { %v6819_v0 = vpop.eup %6818 }
 0x426   :  { %v2423_v28 = vadd.f32 1.0, %v6819_v0  ;;  %2157 = vst [vmem:[#allocation23 + $0x2] sm:$0x1] %v7820_v63  ;;  %v2446_v31 = vpack.c.bf16 %v7820_v63, %v7820_v63  ;;  %v6821_v61 = vpop.eup %6820 }
 0x428   :  { %6822 = vrcp.f32 %v2423_v28  ;;  %2657 = vmatmul.mubr.bf16.vlgmr.msra.gmra.mrb[32].mxu0 %v2446_v31  ;;  %6182 = vmatmul.mubr.bf16.vlgmr.msra.gmra.mrb[32].mxu1 %v2446_v31 }
 0x429   :  { %2913 = vmatpush1.bf16.msra.mxu0 %v7718_v23  ;;  %6186 = vmatpush3.bf16.msra.mxu1 %v6600_v26  ;;  %v2433_v23 = vadd.f32 1.0, %v6821_v61 }
 0x42a   :  { %2914 = vmatprep.subr.bf16.mxu0 %v7723_v1  ;;  %6187 = vmatprep.subr.bf16.mxu1 %v7210_v2  ;;  %v2412_v1 = vadd.f32 %v2411_v58, %v2332_v35  ;;  %v6623_v58 = vld [vmem:[#allocation13 + $0x50] ss:$12 sps:$4 sm:$0xff]  }
 0x42b   :  { %2944 = vmatprep.mubr.bf16.mxu0 %v7211_v3  ;;  %6201 = vmatprep.mubr.msk.bf16.mxu1 %vm7212_vm0, %v7210_v2  ;;  %6824 = vrcp.f32 %v2433_v23  ;;  %v2715_v23 = vrot.slane %v2706_v25, 1 }
 0x42d   :  { %2915 = vmatpush1.bf16.msra.mxu0 %v7726_v51  ;;  %6188 = vmatpush3.bf16.msra.mxu1 %v6601_v34 }
 0x42e   :  { %2916 = vmatprep.subr.bf16.mxu0 %v7730_v4  ;;  %6189 = vmatprep.subr.bf16.mxu1 %v7210_v2  ;;  %v6604_v4 = vld [vmem:[#allocation19 + $0x68] ss:$12 sps:$4 sm:$0xff]  }
 0x431   :  { %2917 = vmatpush1.bf16.msra.mxu0 %v7738_v32  ;;  %6190 = vmatpush3.bf16.msra.mxu1 %v6602_v37  ;;  %v6605_v32 = vld [vmem:[#allocation19 + $0x80] ss:$12 sps:$4 sm:$0xff]  }
 0x432   :  { %v6823_v38 = vpop.eup %6822  ;;  %2918 = vmatprep.subr.bf16.mxu0 %v7742_v5  ;;  %6191 = vmatprep.subr.bf16.mxu1 %v7210_v2 }
 0x433   :  { %v2436_v12 = vmul.f32 %v6823_v38, %v2412_v1 }
 0x435   :  { %v2439_v51 = vadd.f32 %v2437_v18, %v2436_v12  ;;  %2919 = vmatpush1.bf16.msra.mxu0 %v7745_v6  ;;  %6192 = vmatpush3.bf16.msra.mxu1 %v6603_v29  ;;  %v6825_v5 = vpop.eup %6824  ;;  %v6606_v6 = vld [vmem:[#allocation19 + $0x98] ss:$12 sps:$4 sm:$0xff]  }
 0x436   :  { %2920 = vmatprep.subr.bf16.mxu0 %v7749_v9  ;;  %6193 = vmatprep.subr.bf16.mxu1 %v7210_v2  ;;  %v2441_v9 = vsub.f32 1.0, %v6825_v5  ;;  %v2443_v27 = vmul.f32 %v6825_v5, %v7779_v60  ;;  %v7867_v60 = vld [vmem:[#allocation13 + $0x1c] ss:$12 sps:$4 sm:$0xff]  }
 0x437   :  { %6826 = vtanh.f32 %v2439_v51 }
 0x439   :  { %2921 = vmatpush1.bf16.msra.mxu0 %v7753_v43  ;;  %6194 = vmatpush3.bf16.msra.mxu1 %v6604_v4  ;;  %v6607_v43 = vld [vmem:[#allocation19 + $0xb0] ss:$12 sps:$4 sm:$0xff]   ;;  %v2620_v4 = vrot.slane %v2479_v20, %v7588_v57 }
 0x43a   :  { %2922 = vmatprep.subr.bf16.mxu0 %v7757_v36  ;;  %6195 = vmatprep.subr.bf16.mxu1 %v7210_v2 }
 0x43d   :  { %2923 = vmatpush1.bf16.msra.mxu0 %v7760_v42  ;;  %6196 = vmatpush3.bf16.msra.mxu1 %v6605_v32  ;;  %v7923_v32 = vld [vmem:[#allocation22] sm:$0x7] }
 0x43e   :  { %2924 = vmatprep.subr.bf16.mxu0 %v7764_v45  ;;  %6197 = vmatprep.subr.bf16.mxu1 %v7210_v2 }
 0x441   :  { %v6827_v21 = vpop.eup %6826  ;;  %2925 = vmatpush1.bf16.msra.mxu0 %v7767_v47  ;;  %6198 = vmatpush3.bf16.msra.mxu1 %v6606_v6  ;;  %v7861_v47 = vld [vmem:[#allocation13 + $0x4] ss:$12 sps:$4 sm:$0xff]  }
 0x442   :  { %2926 = vmatprep.subr.bf16.mxu0 %v7771_v49  ;;  %6199 = vmatprep.subr.bf16.mxu1 %v7210_v2  ;;  %v2442_v36 = vmul.f32 %v6827_v21, %v2441_v9  ;;  %v7863_v49 = vld [vmem:[#allocation13] ss:$12 sps:$4 sm:$0xff]   ;;  %v2900_v9 = vrot.slane %v7923_v32, %v7586_v56 }
 0x444   :  { %v7851_v42 = vadd.f32 %v2443_v27, %v2442_v36  ;;  %v2725_v27 = vrot.slane %v2706_v25, 2 }
 0x445   :  { %2927 = vmatpush1.bf16.msra.mxu0 %v7774_v53  ;;  %6200 = vmatpush3.bf16.msra.mxu1 %v6607_v43  ;;  %v6611_v53 = vld [vmem:[#allocation13 + $0x8] ss:$12 sps:$4 sm:$0xff]   ;;  %v2904_v43 = vrot.slane %v7923_v32, %v7590_v59 }
 0x446   :  { %2445 = vst [vmem:[#allocation5 + $0x5] sm:$0x1] %v7851_v42  ;;  %v2734_v45 = vpack.c.bf16 %v7851_v42, %v7851_v42  ;;  %6205 = vmatprep.subr.bf16.mxu1 %v7210_v2  ;;  %3200 = vmatprep.subr.bf16.mxu0 %v7861_v47 }
 0x448   :  { %2945 = vmatmul.mubr.bf16.vlgmr.msra.gmra.mrb[36].mxu0 %v2734_v45  ;;  %6202 = vmatmul.mubr.bf16.vlgmr.msra.gmra.mrb[36].mxu1 %v2734_v45 }
 0x449   :  { %3232 = vmatprep.mubr.bf16.mxu0 %v7211_v3  ;;  %6221 = vmatprep.mubr.msk.bf16.mxu1 %vm7212_vm0, %v7210_v2 }
 0x44a   :  { %3201 = vmatpush1.bf16.msra.mxu0 %v7863_v49  ;;  %6206 = vmatpush3.bf16.msra.mxu1 %v6611_v53 }
 0x44b   :  { %6207 = vmatprep.subr.bf16.mxu1 %v7210_v2  ;;  %3202 = vmatprep.subr.bf16.mxu0 %v7867_v60 }
 0x44e   :  { %3203 = vmatpush1.bf16.msra.mxu0 %v7870_v15  ;;  %6208 = vmatpush3.bf16.msra.mxu1 %v6615_v46 }
 0x44f   :  { %6209 = vmatprep.subr.bf16.mxu1 %v7210_v2  ;;  %3204 = vmatprep.subr.bf16.mxu0 %v7874_v48 }
 0x452   :  { %3205 = vmatpush1.bf16.msra.mxu0 %v7877_v50  ;;  %6210 = vmatpush3.bf16.msra.mxu1 %v6619_v52 }
 0x453   :  { %6211 = vmatprep.subr.bf16.mxu1 %v7210_v2  ;;  %3206 = vmatprep.subr.bf16.mxu0 %v7881_v54 }
 0x456   :  { %3207 = vmatpush1.bf16.msra.mxu0 %v7884_v55  ;;  %6212 = vmatpush3.bf16.msra.mxu1 %v6623_v58  ;;  %v7929_v58 = vld [vmem:[#allocation4 + $0x4] ss:$8 sm:$0x7] }
 0x457   :  { %6213 = vmatprep.subr.bf16.mxu1 %v7210_v2  ;;  %3208 = vmatprep.subr.bf16.mxu0 %v7888_v62 }
 0x45a   :  { %3209 = vmatpush1.bf16.msra.mxu0 %v7891_v7  ;;  %6214 = vmatpush3.bf16.msra.mxu1 %v6627_v39 }
 0x45b   :  { %6215 = vmatprep.subr.bf16.mxu1 %v7210_v2  ;;  %3210 = vmatprep.subr.bf16.mxu0 %v7895_v41 }
 0x45e   :  { %3211 = vmatpush1.bf16.msra.mxu0 %v7898_v44  ;;  %6216 = vmatpush3.bf16.msra.mxu1 %v6631_v8 }
 0x45f   :  { %6217 = vmatprep.subr.bf16.mxu1 %v7210_v2  ;;  %3212 = vmatprep.subr.bf16.mxu0 %v7902_v10 }
 0x462   :  { %3213 = vmatpush1.bf16.msra.mxu0 %v7905_v11  ;;  %6218 = vmatpush3.bf16.msra.mxu1 %v6635_v13 }
 0x463   :  { %6219 = vmatprep.subr.bf16.mxu1 %v7210_v2  ;;  %3214 = vmatprep.subr.bf16.mxu0 %v7909_v14 }
 0x466   :  { %3215 = vmatpush1.bf16.msra.mxu0 %v7912_v16  ;;  %6220 = vmatpush3.bf16.msra.mxu1 %v6639_v17 }
 0x467   :  { %6225 = vmatprep.subr.bf16.mxu1 %v7210_v2  ;;  %3488 = vmatprep.subr.bf16.mxu0 %v7916_v19 }
 0x4fb   :  { %v2658_v30 = vpop.f32.mrb[32].mxu0  ;;  %v2699_v33 = vpop.f32.mrb[32].mxu1 }
 0x4fc   :  { %v2659_v40 = vadd.f32 %v2658_v30, %v2612_v22  ;;  %v2660_v0 = vpop.f32.mrb[33].mxu0  ;;  %v6183_v26 = vpop.f32.mrb[33].mxu1  ;;  %v2700_v6 = vadd.f32 %v2699_v33, %v2620_v4  ;;  %v3003_v33 = vrot.slane %v7929_v58, 1 }
 0x4fd   :  { %v2661_v28 = vadd.f32 %v2660_v0, %v2616_v24  ;;  %v2662_v31 = vpop.f32.mrb[34].mxu0  ;;  %v2702_v34 = vpop.f32.mrb[34].mxu1 }
 0x4fe   :  { %v2707_v61 = vadd.f32 %v2706_v25, %v2659_v40  ;;  %v2663_v35 = vpop.f32.mrb[35].mxu0  ;;  %v6184_v37 = vpop.f32.mrb[35].mxu1 }
 0x4ff   :  { %v2717_v29 = vadd.f32 %v2715_v23, %v2661_v28  ;;  %v7936_v23 = vld [vmem:[#allocation19] ss:$12 sps:$4 sm:$0xff]  }
 0x500   :  { %v5607_v1 = vmul.f32 -1.442695, %v2707_v61 }
 0x501   :  { %v5608_v38 = vmul.f32 -1.442695, %v2717_v29 }
 0x502   :  { %6828 = vpow2.f32 %v5607_v1  ;;  %v6643_v1 = vld [vmem:[#allocation19 + $0x8] ss:$12 sps:$4 sm:$0xff]  }
 0x503   :  { %6830 = vpow2.f32 %v5608_v38 }
 0x50c   :  { %v6829_v12 = vpop.eup %6828 }
 0x50d   :  { %v2711_v18 = vadd.f32 1.0, %v6829_v12  ;;  %v6831_v51 = vpop.eup %6830  ;;  %v7941_v12 = vld [vmem:[#allocation19 + $0x1c] ss:$12 sps:$4 sm:$0xff]  }
 0x50e   :  { %v2721_v5 = vadd.f32 1.0, %v6831_v51  ;;  %v7948_v51 = vld [vmem:[#allocation19 + $0x34] ss:$12 sps:$4 sm:$0xff]  }
 0x50f   :  { %6832 = vrcp.f32 %v2711_v18  ;;  %v6647_v18 = vld [vmem:[#allocation19 + $0x20] ss:$12 sps:$4 sm:$0xff]  }
 0x510   :  { %6834 = vrcp.f32 %v2721_v5  ;;  %v2908_v5 = vrot.slane %v7923_v32, %v7588_v57  ;;  %v6655_v32 = vld [vmem:[#allocation19 + $0x50] ss:$12 sps:$4 sm:$0xff]  }
 0x519   :  { %v6833_v21 = vpop.eup %6832 }
 0x51a   :  { %v2724_v36 = vmul.f32 %v6833_v21, %v2700_v6  ;;  %v6835_v0 = vpop.eup %6834  ;;  %v7956_v6 = vld [vmem:[#allocation19 + $0x30] ss:$12 sps:$4 sm:$0xff]   ;;  %v7960_v21 = vld [vmem:[#allocation19 + $0x4c] ss:$12 sps:$4 sm:$0xff]  }
 0x51b   :  { %v2946_v45 = vpop.f32.mrb[36].mxu0  ;;  %v2987_v53 = vpop.f32.mrb[36].mxu1  ;;  %v2729_v28 = vsub.f32 1.0, %v6835_v0  ;;  %v2731_v61 = vmul.f32 %v6835_v0, %v7820_v63  ;;  %v7944_v63 = vld [vmem:[#allocation19 + $0x18] ss:$12 sps:$4 sm:$0xff]  }
 0x51c   :  { %v2727_v46 = vadd.f32 %v2725_v27, %v2724_v36  ;;  %v2947_v52 = vadd.f32 %v2946_v45, %v2900_v9  ;;  %v2948_v39 = vpop.f32.mrb[37].mxu0  ;;  %v6203_v8 = vpop.f32.mrb[37].mxu1  ;;  %v6651_v9 = vld [vmem:[#allocation19 + $0x38] ss:$12 sps:$4 sm:$0xff]   ;;  %v2988_v36 = vadd.f32 %v2987_v53, %v2908_v5  ;;  %v7963_v27 = vld [vmem:[#allocation19 + $0x48] ss:$12 sps:$4 sm:$0xff]  }
 0x51d   :  { %v2949_v13 = vadd.f32 %v2948_v39, %v2904_v43  ;;  %v2950_v17 = vpop.f32.mrb[38].mxu0  ;;  %v2990_v20 = vpop.f32.mrb[38].mxu1  ;;  %v3013_v39 = vrot.slane %v7929_v58, 2  ;;  %v7971_v53 = vld [vmem:[#allocation19 + $0x60] ss:$12 sps:$4 sm:$0xff]  }
 0x51e   :  { %6836 = vtanh.f32 %v2727_v46  ;;  %v2995_v22 = vadd.f32 %v7929_v58, %v2947_v52  ;;  %v2951_v24 = vpop.f32.mrb[39].mxu0  ;;  %v6204_v30 = vpop.f32.mrb[39].mxu1  ;;  %v7967_v46 = vld [vmem:[#allocation19 + $0x64] ss:$12 sps:$4 sm:$0xff]   ;;  %v7975_v17 = vld [vmem:[#allocation19 + $0x7c] ss:$12 sps:$4 sm:$0xff]  }
 0x51f   :  { %v3005_v25 = vadd.f32 %v3003_v33, %v2949_v13  ;;  %v6659_v13 = vld [vmem:[#allocation19 + $0x68] ss:$12 sps:$4 sm:$0xff]   ;;  %v7978_v20 = vld [vmem:[#allocation19 + $0x78] ss:$12 sps:$4 sm:$0xff]   ;;  %v6663_v58 = vld [vmem:[#allocation19 + $0x80] ss:$12 sps:$4 sm:$0xff]  }
 0x520   :  { %v5633_v40 = vmul.f32 -1.442695, %v2995_v22  ;;  %v7982_v22 = vld [vmem:[#allocation19 + $0x94] ss:$12 sps:$4 sm:$0xff]   ;;  %v7985_v30 = vld [vmem:[#allocation19 + $0x90] ss:$12 sps:$4 sm:$0xff]  }
 0x521   :  { %v5634_v26 = vmul.f32 -1.442695, %v3005_v25  ;;  %v6667_v33 = vld [vmem:[#allocation19 + $0x98] ss:$12 sps:$4 sm:$0xff]  }
 0x522   :  { %6838 = vpow2.f32 %v5633_v40  ;;  %v7989_v40 = vld [vmem:[#allocation19 + $0xac] ss:$12 sps:$4 sm:$0xff]  }
 0x523   :  { %6840 = vpow2.f32 %v5634_v26  ;;  %v7992_v26 = vld [vmem:[#allocation19 + $0xa8] ss:$12 sps:$4 sm:$0xff]  }
 0x528   :  { %v6837_v31 = vpop.eup %6836 }
 0x529   :  { %v2730_v34 = vmul.f32 %v6837_v31, %v2729_v28  ;;  %v6671_v28 = vld [vmem:[#allocation19 + $0xb0] ss:$12 sps:$4 sm:$0xff]  }
 0x52b   :  { %v7934_v35 = vadd.f32 %v2731_v61, %v2730_v34 }
 0x52c   :  { %v6839_v37 = vpop.eup %6838 }
 0x52d   :  { %v2999_v29 = vadd.f32 1.0, %v6839_v37  ;;  %2733 = vst [vmem:[#allocation23 + $0x3] sm:$0x1] %v7934_v35  ;;  %v3022_v38 = vpack.c.bf16 %v7934_v35, %v7934_v35  ;;  %v6841_v4 = vpop.eup %6840 }
 0x52e   :  { %v3009_v43 = vadd.f32 1.0, %v6841_v4 }
 0x52f   :  { %6842 = vrcp.f32 %v2999_v29  ;;  %3233 = vmatmul.mubr.bf16.vlgmr.msra.gmra.mrb[40].mxu0 %v3022_v38  ;;  %6222 = vmatmul.mubr.bf16.vlgmr.msra.gmra.mrb[40].mxu1 %v3022_v38 }
 0x530   :  { %3489 = vmatpush1.bf16.msra.mxu0 %v7936_v23  ;;  %6226 = vmatpush3.bf16.msra.mxu1 %v6643_v1  ;;  %6844 = vrcp.f32 %v3009_v43 }
 0x531   :  { %3490 = vmatprep.subr.bf16.mxu0 %v7941_v12  ;;  %6227 = vmatprep.subr.bf16.mxu1 %v7210_v2 }
 0x532   :  { %3520 = vmatprep.mubr.bf16.mxu0 %v7211_v3  ;;  %6241 = vmatprep.mubr.msk.bf16.mxu1 %vm7212_vm0, %v7210_v2 }
 0x534   :  { %3491 = vmatpush1.bf16.msra.mxu0 %v7944_v63  ;;  %6228 = vmatpush3.bf16.msra.mxu1 %v6647_v18 }
 0x535   :  { %3492 = vmatprep.subr.bf16.mxu0 %v7948_v51  ;;  %6229 = vmatprep.subr.bf16.mxu1 %v7210_v2 }
 0x538   :  { %3493 = vmatpush1.bf16.msra.mxu0 %v7956_v6  ;;  %6230 = vmatpush3.bf16.msra.mxu1 %v6651_v9 }
 0x539   :  { %v6843_v45 = vpop.eup %6842  ;;  %3494 = vmatprep.subr.bf16.mxu0 %v7960_v21  ;;  %6231 = vmatprep.subr.bf16.mxu1 %v7210_v2 }
 0x53a   :  { %v3012_v52 = vmul.f32 %v6843_v45, %v2988_v36  ;;  %v6845_v24 = vpop.eup %6844 }
 0x53b   :  { %v3017_v25 = vsub.f32 1.0, %v6845_v24  ;;  %v3019_v34 = vmul.f32 %v6845_v24, %v7851_v42  ;;  %v6672_v42 = vld [vmem:[#allocation13 + $0x8] ss:$12 sps:$4 sm:$0xff]  }
 0x53c   :  { %v3015_v8 = vadd.f32 %v3013_v39, %v3012_v52  ;;  %3495 = vmatpush1.bf16.msra.mxu0 %v7963_v27  ;;  %6232 = vmatpush3.bf16.msra.mxu1 %v6655_v32 }
 0x53d   :  { %3496 = vmatprep.subr.bf16.mxu0 %v7967_v46  ;;  %6233 = vmatprep.subr.bf16.mxu1 %v7210_v2 }
 0x53e   :  { %6846 = vtanh.f32 %v3015_v8  ;;  %v3343_v8 = vld [vmem:[#allocation22] sm:$0x7] }
 0x53f   :  { %v3476_v24 = vrot.slane %v3343_v8, %v7586_v56 }
 0x540   :  { %3497 = vmatpush1.bf16.msra.mxu0 %v7971_v53  ;;  %6234 = vmatpush3.bf16.msra.mxu1 %v6659_v13 }
 0x541   :  { %3498 = vmatprep.subr.bf16.mxu0 %v7975_v17  ;;  %6235 = vmatprep.subr.bf16.mxu1 %v7210_v2 }
 0x544   :  { %3499 = vmatpush1.bf16.msra.mxu0 %v7978_v20  ;;  %6236 = vmatpush3.bf16.msra.mxu1 %v6663_v58 }
 0x545   :  { %3500 = vmatprep.subr.bf16.mxu0 %v7982_v22  ;;  %6237 = vmatprep.subr.bf16.mxu1 %v7210_v2 }
 0x548   :  { %v6847_v0 = vpop.eup %6846  ;;  %3501 = vmatpush1.bf16.msra.mxu0 %v7985_v30  ;;  %6238 = vmatpush3.bf16.msra.mxu1 %v6667_v33 }
 0x549   :  { %3502 = vmatprep.subr.bf16.mxu0 %v7989_v40  ;;  %6239 = vmatprep.subr.bf16.mxu1 %v7210_v2  ;;  %v3018_v31 = vmul.f32 %v6847_v0, %v3017_v25  ;;  %v3480_v25 = vrot.slane %v3343_v8, %v7590_v59 }
 0x54b   :  { %v7997_v61 = vadd.f32 %v3019_v34, %v3018_v31 }
 0x54c   :  { %3503 = vmatpush1.bf16.msra.mxu0 %v7992_v26  ;;  %6240 = vmatpush3.bf16.msra.mxu1 %v6671_v28 }
 0x54d   :  { %3021 = vst [vmem:[#allocation5 + $0x4] sm:$0x1] %v7997_v61  ;;  %v3310_v37 = vpack.c.bf16 %v7997_v61, %v7997_v61  ;;  %3776 = vmatprep.subr.bf16.mxu0 %v7861_v47  ;;  %6245 = vmatprep.subr.bf16.mxu1 %v7210_v2  ;;  %v6673_v47 = vld [vmem:[#allocation13 + $0x20] ss:$12 sps:$4 sm:$0xff]  }
 0x54f   :  { %3521 = vmatmul.mubr.bf16.vlgmr.msra.gmra.mrb[44].mxu0 %v3310_v37  ;;  %6242 = vmatmul.mubr.bf16.vlgmr.msra.gmra.mrb[44].mxu1 %v3310_v37 }
 0x550   :  { %3777 = vmatpush1.bf16.msra.mxu0 %v7863_v49  ;;  %3808 = vmatprep.mubr.bf16.mxu0 %v7211_v3  ;;  %v6674_v49 = vld [vmem:[#allocation13 + $0x38] ss:$12 sps:$4 sm:$0xff]  }
 0x551   :  { %3778 = vmatprep.subr.bf16.mxu0 %v7867_v60  ;;  %6261 = vmatprep.mubr.msk.bf16.mxu1 %vm7212_vm0, %v7210_v2  ;;  %v6675_v60 = vld [vmem:[#allocation13 + $0x50] ss:$12 sps:$4 sm:$0xff]  }
 0x552   :  { %6246 = vmatpush3.bf16.msra.mxu1 %v6672_v42 }
 0x553   :  { %6247 = vmatprep.subr.bf16.mxu1 %v7210_v2 }
 0x554   :  { %3779 = vmatpush1.bf16.msra.mxu0 %v7870_v15  ;;  %v6676_v15 = vld [vmem:[#allocation13 + $0x68] ss:$12 sps:$4 sm:$0xff]  }
 0x555   :  { %3780 = vmatprep.subr.bf16.mxu0 %v7874_v48  ;;  %v6677_v48 = vld [vmem:[#allocation13 + $0x80] ss:$12 sps:$4 sm:$0xff]  }
 0x556   :  { %6248 = vmatpush3.bf16.msra.mxu1 %v6673_v47  ;;  %v3570_v47 = vld [vmem:[#allocation4 + $0x3] ss:$8 sm:$0x7] }
 0x557   :  { %6249 = vmatprep.subr.bf16.mxu1 %v7210_v2 }
 0x558   :  { %3781 = vmatpush1.bf16.msra.mxu0 %v7877_v50  ;;  %v6678_v50 = vld [vmem:[#allocation13 + $0x98] ss:$12 sps:$4 sm:$0xff]  }
 0x559   :  { %3782 = vmatprep.subr.bf16.mxu0 %v7881_v54  ;;  %v6679_v54 = vld [vmem:[#allocation13 + $0xb0] ss:$12 sps:$4 sm:$0xff]  }
 0x55a   :  { %6250 = vmatpush3.bf16.msra.mxu1 %v6674_v49 }
 0x55b   :  { %6251 = vmatprep.subr.bf16.mxu1 %v7210_v2 }
 0x55c   :  { %3783 = vmatpush1.bf16.msra.mxu0 %v7884_v55  ;;  %v3055_v55 = vld [vmem:[#allocation16] sm:$0x7] }
 0x55d   :  { %3784 = vmatprep.subr.bf16.mxu0 %v7888_v62  ;;  %v3188_v62 = vrot.slane %v3055_v55, %v7586_v56  ;;  %v3196_v39 = vrot.slane %v3055_v55, %v7588_v57 }
 0x55e   :  { %6252 = vmatpush3.bf16.msra.mxu1 %v6675_v60 }
 0x55f   :  { %6253 = vmatprep.subr.bf16.mxu1 %v7210_v2 }
 0x560   :  { %3785 = vmatpush1.bf16.msra.mxu0 %v7891_v7  ;;  %v3192_v7 = vrot.slane %v3055_v55, %v7590_v59 }
 0x561   :  { %3786 = vmatprep.subr.bf16.mxu0 %v7895_v41 }
 0x562   :  { %6254 = vmatpush3.bf16.msra.mxu1 %v6676_v15 }
 0x563   :  { %6255 = vmatprep.subr.bf16.mxu1 %v7210_v2 }
 0x564   :  { %3787 = vmatpush1.bf16.msra.mxu0 %v7898_v44 }
 0x565   :  { %3788 = vmatprep.subr.bf16.mxu0 %v7902_v10 }
 0x566   :  { %6256 = vmatpush3.bf16.msra.mxu1 %v6677_v48 }
 0x567   :  { %6257 = vmatprep.subr.bf16.mxu1 %v7210_v2 }
 0x568   :  { %3789 = vmatpush1.bf16.msra.mxu0 %v7905_v11  ;;  %v3282_v11 = vld [vmem:[#allocation3 + $0x4] ss:$8 sm:$0x7] }
 0x569   :  { %3790 = vmatprep.subr.bf16.mxu0 %v7909_v14  ;;  %v3291_v5 = vrot.slane %v3282_v11, 1  ;;  %v3301_v28 = vrot.slane %v3282_v11, 2 }
 0x56a   :  { %6258 = vmatpush3.bf16.msra.mxu1 %v6678_v50 }
 0x56b   :  { %6259 = vmatprep.subr.bf16.mxu1 %v7210_v2 }
 0x56c   :  { %3791 = vmatpush1.bf16.msra.mxu0 %v7912_v16 }
 0x56d   :  { %4064 = vmatprep.subr.bf16.mxu0 %v7916_v19 }
 0x56e   :  { %6260 = vmatpush3.bf16.msra.mxu1 %v6679_v54 }
 0x56f   :  { %6265 = vmatprep.subr.bf16.mxu1 %v7210_v2 }
 0x602   :  { %v3234_v41 = vpop.f32.mrb[40].mxu0  ;;  %v3275_v44 = vpop.f32.mrb[40].mxu1 }
 0x603   :  { %v3235_v10 = vadd.f32 %v3234_v41, %v3188_v62  ;;  %v3236_v14 = vpop.f32.mrb[41].mxu0  ;;  %v6223_v16 = vpop.f32.mrb[41].mxu1  ;;  %v3276_v58 = vadd.f32 %v3275_v44, %v3196_v39  ;;  %v3589_v39 = vrot.slane %v3570_v47, 2 }
 0x604   :  { %v3237_v19 = vadd.f32 %v3236_v14, %v3192_v7  ;;  %v3238_v1 = vpop.f32.mrb[42].mxu0  ;;  %v3278_v29 = vpop.f32.mrb[42].mxu1  ;;  %v3579_v7 = vrot.slane %v3570_v47, 1 }
 0x605   :  { %v3283_v38 = vadd.f32 %v3282_v11, %v3235_v10  ;;  %v3239_v18 = vpop.f32.mrb[43].mxu0  ;;  %v6224_v4 = vpop.f32.mrb[43].mxu1 }
 0x606   :  { %v3293_v43 = vadd.f32 %v3291_v5, %v3237_v19  ;;  %v6680_v18 = vld [vmem:[#allocation19 + $0x8] ss:$12 sps:$4 sm:$0xff]  }
 0x607   :  { %v5659_v9 = vmul.f32 -1.442695, %v3283_v38 }
 0x608   :  { %v5660_v36 = vmul.f32 -1.442695, %v3293_v43  ;;  %v3484_v43 = vrot.slane %v3343_v8, %v7588_v57 }
 0x609   :  { %6848 = vpow2.f32 %v5659_v9  ;;  %v6681_v9 = vld [vmem:[#allocation19 + $0x20] ss:$12 sps:$4 sm:$0xff]  }
 0x60a   :  { %6850 = vpow2.f32 %v5660_v36  ;;  %v6682_v36 = vld [vmem:[#allocation19 + $0x38] ss:$12 sps:$4 sm:$0xff]  }
 0x613   :  { %v6849_v32 = vpop.eup %6848 }
 0x614   :  { %v3287_v45 = vadd.f32 1.0, %v6849_v32  ;;  %v6851_v52 = vpop.eup %6850  ;;  %v6683_v32 = vld [vmem:[#allocation19 + $0x50] ss:$12 sps:$4 sm:$0xff]  }
 0x615   :  { %v3297_v13 = vadd.f32 1.0, %v6851_v52 }
 0x616   :  { %6852 = vrcp.f32 %v3287_v45 }
 0x617   :  { %6854 = vrcp.f32 %v3297_v13 }
 0x620   :  { %v6853_v33 = vpop.eup %6852 }
 0x621   :  { %v3300_v0 = vmul.f32 %v6853_v33, %v3276_v58  ;;  %v6855_v10 = vpop.eup %6854  ;;  %v8088_v58 = vld [vmem:[#allocation13 + $0x18] ss:$12 sps:$4 sm:$0xff]   ;;  %v8092_v33 = vld [vmem:[#allocation13 + $0x34] ss:$12 sps:$4 sm:$0xff]  }
 0x622   :  { %v3522_v31 = vpop.f32.mrb[44].mxu0  ;;  %v3563_v34 = vpop.f32.mrb[44].mxu1  ;;  %v3305_v14 = vsub.f32 1.0, %v6855_v10  ;;  %v3307_v1 = vmul.f32 %v6855_v10, %v7934_v35 }
 0x623   :  { %v3303_v37 = vadd.f32 %v3301_v28, %v3300_v0  ;;  %v3523_v42 = vadd.f32 %v3522_v31, %v3476_v24  ;;  %v3524_v49 = vpop.f32.mrb[45].mxu0  ;;  %v6243_v60 = vpop.f32.mrb[45].mxu1  ;;  %v6695_v24 = vld [vmem:[#allocation13 + $0x20] ss:$12 sps:$4 sm:$0xff]   ;;  %v6699_v0 = vld [vmem:[#allocation13 + $0x38] ss:$12 sps:$4 sm:$0xff]  }
 0x624   :  { %v3525_v15 = vadd.f32 %v3524_v49, %v3480_v25  ;;  %v3526_v48 = vpop.f32.mrb[46].mxu0  ;;  %v3566_v50 = vpop.f32.mrb[46].mxu1  ;;  %v8095_v25 = vld [vmem:[#allocation13 + $0x30] ss:$12 sps:$4 sm:$0xff]   ;;  %v8099_v28 = vld [vmem:[#allocation13 + $0x4c] ss:$12 sps:$4 sm:$0xff]  }
 0x625   :  { %6856 = vtanh.f32 %v3303_v37  ;;  %v3571_v54 = vadd.f32 %v3570_v47, %v3523_v42  ;;  %v3527_v55 = vpop.f32.mrb[47].mxu0  ;;  %v6244_v62 = vpop.f32.mrb[47].mxu1  ;;  %v8102_v31 = vld [vmem:[#allocation13 + $0x48] ss:$12 sps:$4 sm:$0xff]   ;;  %v8106_v37 = vld [vmem:[#allocation13 + $0x64] ss:$12 sps:$4 sm:$0xff]  }
 0x626   :  { %v3581_v44 = vadd.f32 %v3579_v7, %v3525_v15  ;;  %v8109_v42 = vld [vmem:[#allocation13 + $0x60] ss:$12 sps:$4 sm:$0xff]   ;;  %v6707_v47 = vld [vmem:[#allocation13 + $0x68] ss:$12 sps:$4 sm:$0xff]   ;;  %v8116_v60 = vld [vmem:[#allocation13 + $0x78] ss:$12 sps:$4 sm:$0xff]  }
 0x627   :  { %v5685_v41 = vmul.f32 -1.442695, %v3571_v54  ;;  %v8113_v49 = vld [vmem:[#allocation13 + $0x7c] ss:$12 sps:$4 sm:$0xff]   ;;  %v6711_v15 = vld [vmem:[#allocation13 + $0x80] ss:$12 sps:$4 sm:$0xff]  }
 0x628   :  { %v5686_v11 = vmul.f32 -1.442695, %v3581_v44  ;;  %v8120_v48 = vld [vmem:[#allocation13 + $0x94] ss:$12 sps:$4 sm:$0xff]   ;;  %v8123_v50 = vld [vmem:[#allocation13 + $0x90] ss:$12 sps:$4 sm:$0xff]  }
 0x629   :  { %6858 = vpow2.f32 %v5685_v41  ;;  %v6715_v54 = vld [vmem:[#allocation13 + $0x98] ss:$12 sps:$4 sm:$0xff]   ;;  %v8130_v62 = vld [vmem:[#allocation13 + $0xa8] ss:$12 sps:$4 sm:$0xff]   ;;  %v6719_v7 = vld [vmem:[#allocation13 + $0xb0] ss:$12 sps:$4 sm:$0xff]  }
 0x62a   :  { %6860 = vpow2.f32 %v5686_v11  ;;  %v8127_v55 = vld [vmem:[#allocation13 + $0xac] ss:$12 sps:$4 sm:$0xff]   ;;  %v3631_v44 = vld [vmem:[#allocation16] sm:$0x7] }
 0x62b   :  { %v8134_v41 = vld [vmem:[#allocation19 + $0x4] ss:$12 sps:$4 sm:$0xff]   ;;  %v3764_v10 = vrot.slane %v3631_v44, %v7586_v56  ;;  %v3768_v11 = vrot.slane %v3631_v44, %v7590_v59 }
 0x62f   :  { %v6857_v16 = vpop.eup %6856 }
 0x630   :  { %v3306_v19 = vmul.f32 %v6857_v16, %v3305_v14 }
 0x632   :  { %v8038_v29 = vadd.f32 %v3307_v1, %v3306_v19  ;;  %v3858_v1 = vld [vmem:[#allocation3 + $0x5] ss:$8 sm:$0x7] }
 0x633   :  { %v6859_v38 = vpop.eup %6858 }
 0x634   :  { %v3575_v4 = vadd.f32 1.0, %v6859_v38  ;;  %3309 = vst [vmem:[#allocation23 + $0x4] sm:$0x1] %v8038_v29  ;;  %v3598_v5 = vpack.c.bf16 %v8038_v29, %v8038_v29  ;;  %v6861_v35 = vpop.eup %6860 }
 0x636   :  { %6862 = vrcp.f32 %v3575_v4  ;;  %3809 = vmatmul.mubr.bf16.vlgmr.msra.gmra.mrb[48].mxu0 %v3598_v5  ;;  %6262 = vmatmul.mubr.bf16.vlgmr.msra.gmra.mrb[48].mxu1 %v3598_v5 }
 0x637   :  { %4065 = vmatpush1.bf16.msra.mxu0 %v7936_v23  ;;  %6266 = vmatpush3.bf16.msra.mxu1 %v6680_v18  ;;  %v3585_v23 = vadd.f32 1.0, %v6861_v35 }
 0x638   :  { %4066 = vmatprep.subr.bf16.mxu0 %v7941_v12  ;;  %6267 = vmatprep.subr.bf16.mxu1 %v7210_v2  ;;  %v3564_v12 = vadd.f32 %v3563_v34, %v3484_v43  ;;  %v6703_v34 = vld [vmem:[#allocation13 + $0x50] ss:$12 sps:$4 sm:$0xff]  }
 0x639   :  { %4096 = vmatprep.mubr.bf16.mxu0 %v7211_v3  ;;  %6281 = vmatprep.mubr.msk.bf16.mxu1 %vm7212_vm0, %v7210_v2  ;;  %6864 = vrcp.f32 %v3585_v23  ;;  %v3867_v23 = vrot.slane %v3858_v1, 1 }
 0x63b   :  { %4067 = vmatpush1.bf16.msra.mxu0 %v7944_v63  ;;  %6268 = vmatpush3.bf16.msra.mxu1 %v6681_v9 }
 0x63c   :  { %4068 = vmatprep.subr.bf16.mxu0 %v7948_v51  ;;  %6269 = vmatprep.subr.bf16.mxu1 %v7210_v2  ;;  %v6684_v51 = vld [vmem:[#allocation19 + $0x68] ss:$12 sps:$4 sm:$0xff]  }
 0x63f   :  { %4069 = vmatpush1.bf16.msra.mxu0 %v7956_v6  ;;  %6270 = vmatpush3.bf16.msra.mxu1 %v6682_v36  ;;  %v6685_v6 = vld [vmem:[#allocation19 + $0x80] ss:$12 sps:$4 sm:$0xff]  }
 0x640   :  { %v6863_v45 = vpop.eup %6862  ;;  %4070 = vmatprep.subr.bf16.mxu0 %v7960_v21  ;;  %6271 = vmatprep.subr.bf16.mxu1 %v7210_v2 }
 0x641   :  { %v3588_v52 = vmul.f32 %v6863_v45, %v3564_v12 }
 0x643   :  { %v3591_v63 = vadd.f32 %v3589_v39, %v3588_v52  ;;  %4071 = vmatpush1.bf16.msra.mxu0 %v7963_v27  ;;  %6272 = vmatpush3.bf16.msra.mxu1 %v6683_v32  ;;  %v6865_v21 = vpop.eup %6864  ;;  %v6686_v27 = vld [vmem:[#allocation19 + $0x98] ss:$12 sps:$4 sm:$0xff]  }
 0x644   :  { %4072 = vmatprep.subr.bf16.mxu0 %v7967_v46  ;;  %6273 = vmatprep.subr.bf16.mxu1 %v7210_v2  ;;  %v3593_v46 = vsub.f32 1.0, %v6865_v21  ;;  %v3595_v13 = vmul.f32 %v6865_v21, %v7997_v61  ;;  %v8085_v61 = vld [vmem:[#allocation13 + $0x1c] ss:$12 sps:$4 sm:$0xff]  }
 0x645   :  { %6866 = vtanh.f32 %v3591_v63 }
 0x647   :  { %4073 = vmatpush1.bf16.msra.mxu0 %v7971_v53  ;;  %6274 = vmatpush3.bf16.msra.mxu1 %v6684_v51  ;;  %v6687_v53 = vld [vmem:[#allocation19 + $0xb0] ss:$12 sps:$4 sm:$0xff]   ;;  %v3772_v51 = vrot.slane %v3631_v44, %v7588_v57 }
 0x648   :  { %4074 = vmatprep.subr.bf16.mxu0 %v7975_v17  ;;  %6275 = vmatprep.subr.bf16.mxu1 %v7210_v2 }
 0x64b   :  { %4075 = vmatpush1.bf16.msra.mxu0 %v7978_v20  ;;  %6276 = vmatpush3.bf16.msra.mxu1 %v6685_v6  ;;  %v8141_v6 = vld [vmem:[#allocation22] sm:$0x7] }
 0x64c   :  { %4076 = vmatprep.subr.bf16.mxu0 %v7982_v22  ;;  %6277 = vmatprep.subr.bf16.mxu1 %v7210_v2 }
 0x64f   :  { %v6867_v8 = vpop.eup %6866  ;;  %4077 = vmatpush1.bf16.msra.mxu0 %v7985_v30  ;;  %6278 = vmatpush3.bf16.msra.mxu1 %v6686_v27  ;;  %v8079_v30 = vld [vmem:[#allocation13 + $0x4] ss:$12 sps:$4 sm:$0xff]  }
 0x650   :  { %4078 = vmatprep.subr.bf16.mxu0 %v7989_v40  ;;  %6279 = vmatprep.subr.bf16.mxu1 %v7210_v2  ;;  %v3594_v17 = vmul.f32 %v6867_v8, %v3593_v46  ;;  %v8081_v40 = vld [vmem:[#allocation13] ss:$12 sps:$4 sm:$0xff]   ;;  %v4052_v46 = vrot.slane %v8141_v6, %v7586_v56 }
 0x652   :  { %v8069_v20 = vadd.f32 %v3595_v13, %v3594_v17  ;;  %v3877_v13 = vrot.slane %v3858_v1, 2 }
 0x653   :  { %4079 = vmatpush1.bf16.msra.mxu0 %v7992_v26  ;;  %6280 = vmatpush3.bf16.msra.mxu1 %v6687_v53  ;;  %v6691_v26 = vld [vmem:[#allocation13 + $0x8] ss:$12 sps:$4 sm:$0xff]   ;;  %v4056_v53 = vrot.slane %v8141_v6, %v7590_v59 }
 0x654   :  { %3597 = vst [vmem:[#allocation5 + $0x3] sm:$0x1] %v8069_v20  ;;  %v3886_v22 = vpack.c.bf16 %v8069_v20, %v8069_v20  ;;  %6285 = vmatprep.subr.bf16.mxu1 %v7210_v2  ;;  %4352 = vmatprep.subr.bf16.mxu0 %v8079_v30 }
 0x656   :  { %4097 = vmatmul.mubr.bf16.vlgmr.msra.gmra.mrb[52].mxu0 %v3886_v22  ;;  %6282 = vmatmul.mubr.bf16.vlgmr.msra.gmra.mrb[52].mxu1 %v3886_v22 }
 0x657   :  { %4384 = vmatprep.mubr.bf16.mxu0 %v7211_v3  ;;  %6301 = vmatprep.mubr.msk.bf16.mxu1 %vm7212_vm0, %v7210_v2 }
 0x658   :  { %4353 = vmatpush1.bf16.msra.mxu0 %v8081_v40  ;;  %6286 = vmatpush3.bf16.msra.mxu1 %v6691_v26 }
 0x659   :  { %6287 = vmatprep.subr.bf16.mxu1 %v7210_v2  ;;  %4354 = vmatprep.subr.bf16.mxu0 %v8085_v61 }
 0x65c   :  { %4355 = vmatpush1.bf16.msra.mxu0 %v8088_v58  ;;  %6288 = vmatpush3.bf16.msra.mxu1 %v6695_v24 }
 0x65d   :  { %6289 = vmatprep.subr.bf16.mxu1 %v7210_v2  ;;  %4356 = vmatprep.subr.bf16.mxu0 %v8092_v33 }
 0x660   :  { %4357 = vmatpush1.bf16.msra.mxu0 %v8095_v25  ;;  %6290 = vmatpush3.bf16.msra.mxu1 %v6699_v0 }
 0x661   :  { %6291 = vmatprep.subr.bf16.mxu1 %v7210_v2  ;;  %4358 = vmatprep.subr.bf16.mxu0 %v8099_v28 }
 0x664   :  { %4359 = vmatpush1.bf16.msra.mxu0 %v8102_v31  ;;  %6292 = vmatpush3.bf16.msra.mxu1 %v6703_v34  ;;  %v8147_v34 = vld [vmem:[#allocation4 + $0x2] ss:$8 sm:$0x7] }
 0x665   :  { %6293 = vmatprep.subr.bf16.mxu1 %v7210_v2  ;;  %4360 = vmatprep.subr.bf16.mxu0 %v8106_v37 }
 0x668   :  { %4361 = vmatpush1.bf16.msra.mxu0 %v8109_v42  ;;  %6294 = vmatpush3.bf16.msra.mxu1 %v6707_v47 }
 0x669   :  { %6295 = vmatprep.subr.bf16.mxu1 %v7210_v2  ;;  %4362 = vmatprep.subr.bf16.mxu0 %v8113_v49 }
 0x66c   :  { %4363 = vmatpush1.bf16.msra.mxu0 %v8116_v60  ;;  %6296 = vmatpush3.bf16.msra.mxu1 %v6711_v15 }
 0x66d   :  { %6297 = vmatprep.subr.bf16.mxu1 %v7210_v2  ;;  %4364 = vmatprep.subr.bf16.mxu0 %v8120_v48 }
 0x670   :  { %4365 = vmatpush1.bf16.msra.mxu0 %v8123_v50  ;;  %6298 = vmatpush3.bf16.msra.mxu1 %v6715_v54 }
 0x671   :  { %6299 = vmatprep.subr.bf16.mxu1 %v7210_v2  ;;  %4366 = vmatprep.subr.bf16.mxu0 %v8127_v55 }
 0x674   :  { %4367 = vmatpush1.bf16.msra.mxu0 %v8130_v62  ;;  %6300 = vmatpush3.bf16.msra.mxu1 %v6719_v7 }
 0x675   :  { %6305 = vmatprep.subr.bf16.mxu1 %v7210_v2  ;;  %4640 = vmatprep.subr.bf16.mxu0 %v8134_v41 }
 0x709   :  { %v3810_v14 = vpop.f32.mrb[48].mxu0  ;;  %v3851_v16 = vpop.f32.mrb[48].mxu1 }
 0x70a   :  { %v3811_v19 = vadd.f32 %v3810_v14, %v3764_v10  ;;  %v3812_v38 = vpop.f32.mrb[49].mxu0  ;;  %v6263_v18 = vpop.f32.mrb[49].mxu1  ;;  %v3852_v27 = vadd.f32 %v3851_v16, %v3772_v51  ;;  %v4155_v16 = vrot.slane %v8147_v34, 1 }
 0x70b   :  { %v3813_v4 = vadd.f32 %v3812_v38, %v3768_v11  ;;  %v3814_v5 = vpop.f32.mrb[50].mxu0  ;;  %v3854_v9 = vpop.f32.mrb[50].mxu1 }
 0x70c   :  { %v3859_v35 = vadd.f32 %v3858_v1, %v3811_v19  ;;  %v3815_v43 = vpop.f32.mrb[51].mxu0  ;;  %v6264_v36 = vpop.f32.mrb[51].mxu1 }
 0x70d   :  { %v3869_v32 = vadd.f32 %v3867_v23, %v3813_v4  ;;  %v8154_v23 = vld [vmem:[#allocation19] ss:$12 sps:$4 sm:$0xff]  }
 0x70e   :  { %v5711_v12 = vmul.f32 -1.442695, %v3859_v35 }
 0x70f   :  { %v5712_v45 = vmul.f32 -1.442695, %v3869_v32 }
 0x710   :  { %6868 = vpow2.f32 %v5711_v12  ;;  %v6723_v12 = vld [vmem:[#allocation19 + $0x8] ss:$12 sps:$4 sm:$0xff]  }
 0x711   :  { %6870 = vpow2.f32 %v5712_v45 }
 0x71a   :  { %v6869_v52 = vpop.eup %6868 }
 0x71b   :  { %v3863_v39 = vadd.f32 1.0, %v6869_v52  ;;  %v6871_v63 = vpop.eup %6870  ;;  %v8159_v52 = vld [vmem:[#allocation19 + $0x1c] ss:$12 sps:$4 sm:$0xff]  }
 0x71c   :  { %v3873_v21 = vadd.f32 1.0, %v6871_v63  ;;  %v8166_v63 = vld [vmem:[#allocation19 + $0x34] ss:$12 sps:$4 sm:$0xff]  }
 0x71d   :  { %6872 = vrcp.f32 %v3863_v39  ;;  %v6727_v39 = vld [vmem:[#allocation19 + $0x20] ss:$12 sps:$4 sm:$0xff]  }
 0x71e   :  { %6874 = vrcp.f32 %v3873_v21  ;;  %v4060_v21 = vrot.slane %v8141_v6, %v7588_v57  ;;  %v6735_v6 = vld [vmem:[#allocation19 + $0x50] ss:$12 sps:$4 sm:$0xff]  }
 0x727   :  { %v6873_v8 = vpop.eup %6872 }
 0x728   :  { %v3876_v17 = vmul.f32 %v6873_v8, %v3852_v27  ;;  %v6875_v38 = vpop.eup %6874  ;;  %v8174_v27 = vld [vmem:[#allocation19 + $0x30] ss:$12 sps:$4 sm:$0xff]   ;;  %v8178_v8 = vld [vmem:[#allocation19 + $0x4c] ss:$12 sps:$4 sm:$0xff]  }
 0x729   :  { %v4098_v22 = vpop.f32.mrb[52].mxu0  ;;  %v4139_v26 = vpop.f32.mrb[52].mxu1  ;;  %v3881_v4 = vsub.f32 1.0, %v6875_v38  ;;  %v3883_v35 = vmul.f32 %v6875_v38, %v8038_v29  ;;  %v8162_v29 = vld [vmem:[#allocation19 + $0x18] ss:$12 sps:$4 sm:$0xff]  }
 0x72a   :  { %v3879_v24 = vadd.f32 %v3877_v13, %v3876_v17  ;;  %v4099_v0 = vadd.f32 %v4098_v22, %v4052_v46  ;;  %v4100_v47 = vpop.f32.mrb[53].mxu0  ;;  %v6283_v15 = vpop.f32.mrb[53].mxu1  ;;  %v6731_v46 = vld [vmem:[#allocation19 + $0x38] ss:$12 sps:$4 sm:$0xff]   ;;  %v4140_v17 = vadd.f32 %v4139_v26, %v4060_v21  ;;  %v8181_v13 = vld [vmem:[#allocation19 + $0x48] ss:$12 sps:$4 sm:$0xff]  }
 0x72b   :  { %v4101_v54 = vadd.f32 %v4100_v47, %v4056_v53  ;;  %v4102_v7 = vpop.f32.mrb[54].mxu0  ;;  %v4142_v44 = vpop.f32.mrb[54].mxu1  ;;  %v4165_v47 = vrot.slane %v8147_v34, 2  ;;  %v8189_v26 = vld [vmem:[#allocation19 + $0x60] ss:$12 sps:$4 sm:$0xff]  }
 0x72c   :  { %6876 = vtanh.f32 %v3879_v24  ;;  %v4147_v10 = vadd.f32 %v8147_v34, %v4099_v0  ;;  %v4103_v11 = vpop.f32.mrb[55].mxu0  ;;  %v6284_v14 = vpop.f32.mrb[55].mxu1  ;;  %v8185_v24 = vld [vmem:[#allocation19 + $0x64] ss:$12 sps:$4 sm:$0xff]   ;;  %v8193_v7 = vld [vmem:[#allocation19 + $0x7c] ss:$12 sps:$4 sm:$0xff]  }
 0x72d   :  { %v4157_v1 = vadd.f32 %v4155_v16, %v4101_v54  ;;  %v6739_v54 = vld [vmem:[#allocation19 + $0x68] ss:$12 sps:$4 sm:$0xff]   ;;  %v8196_v44 = vld [vmem:[#allocation19 + $0x78] ss:$12 sps:$4 sm:$0xff]   ;;  %v6743_v34 = vld [vmem:[#allocation19 + $0x80] ss:$12 sps:$4 sm:$0xff]  }
 0x72e   :  { %v5737_v19 = vmul.f32 -1.442695, %v4147_v10  ;;  %v8200_v10 = vld [vmem:[#allocation19 + $0x94] ss:$12 sps:$4 sm:$0xff]   ;;  %v8203_v14 = vld [vmem:[#allocation19 + $0x90] ss:$12 sps:$4 sm:$0xff]  }
 0x72f   :  { %v5738_v18 = vmul.f32 -1.442695, %v4157_v1  ;;  %v6747_v16 = vld [vmem:[#allocation19 + $0x98] ss:$12 sps:$4 sm:$0xff]  }
 0x730   :  { %6878 = vpow2.f32 %v5737_v19  ;;  %v8207_v19 = vld [vmem:[#allocation19 + $0xac] ss:$12 sps:$4 sm:$0xff]  }
 0x731   :  { %6880 = vpow2.f32 %v5738_v18  ;;  %v8210_v18 = vld [vmem:[#allocation19 + $0xa8] ss:$12 sps:$4 sm:$0xff]  }
 0x736   :  { %v6877_v5 = vpop.eup %6876 }
 0x737   :  { %v3882_v9 = vmul.f32 %v6877_v5, %v3881_v4  ;;  %v6751_v4 = vld [vmem:[#allocation19 + $0xb0] ss:$12 sps:$4 sm:$0xff]  }
 0x739   :  { %v8152_v43 = vadd.f32 %v3883_v35, %v3882_v9 }
 0x73a   :  { %v6879_v36 = vpop.eup %6878 }
 0x73b   :  { %v4151_v32 = vadd.f32 1.0, %v6879_v36  ;;  %3885 = vst [vmem:[#allocation23 + $0x5] sm:$0x1] %v8152_v43  ;;  %v4174_v45 = vpack.c.bf16 %v8152_v43, %v8152_v43  ;;  %v6881_v51 = vpop.eup %6880 }
 0x73c   :  { %v4161_v53 = vadd.f32 1.0, %v6881_v51 }
 0x73d   :  { %6882 = vrcp.f32 %v4151_v32  ;;  %4385 = vmatmul.mubr.bf16.vlgmr.msra.gmra.mrb[56].mxu0 %v4174_v45  ;;  %6302 = vmatmul.mubr.bf16.vlgmr.msra.gmra.mrb[56].mxu1 %v4174_v45 }
 0x73e   :  { %4641 = vmatpush1.bf16.msra.mxu0 %v8154_v23  ;;  %6306 = vmatpush3.bf16.msra.mxu1 %v6723_v12  ;;  %6884 = vrcp.f32 %v4161_v53 }
 0x73f   :  { %4642 = vmatprep.subr.bf16.mxu0 %v8159_v52  ;;  %6307 = vmatprep.subr.bf16.mxu1 %v7210_v2 }
 0x740   :  { %4672 = vmatprep.mubr.bf16.mxu0 %v7211_v3  ;;  %6321 = vmatprep.mubr.msk.bf16.mxu1 %vm7212_vm0, %v7210_v2 }
 0x742   :  { %4643 = vmatpush1.bf16.msra.mxu0 %v8162_v29  ;;  %6308 = vmatpush3.bf16.msra.mxu1 %v6727_v39 }
 0x743   :  { %4644 = vmatprep.subr.bf16.mxu0 %v8166_v63  ;;  %6309 = vmatprep.subr.bf16.mxu1 %v7210_v2 }
 0x746   :  { %4645 = vmatpush1.bf16.msra.mxu0 %v8174_v27  ;;  %6310 = vmatpush3.bf16.msra.mxu1 %v6731_v46 }
 0x747   :  { %v6883_v22 = vpop.eup %6882  ;;  %4646 = vmatprep.subr.bf16.mxu0 %v8178_v8  ;;  %6311 = vmatprep.subr.bf16.mxu1 %v7210_v2 }
 0x748   :  { %v4164_v0 = vmul.f32 %v6883_v22, %v4140_v17  ;;  %v6885_v11 = vpop.eup %6884 }
 0x749   :  { %v4169_v1 = vsub.f32 1.0, %v6885_v11  ;;  %v4171_v9 = vmul.f32 %v6885_v11, %v8069_v20  ;;  %v6752_v20 = vld [vmem:[#allocation13 + $0x8] ss:$12 sps:$4 sm:$0xff]  }
 0x74a   :  { %v4167_v15 = vadd.f32 %v4165_v47, %v4164_v0  ;;  %4647 = vmatpush1.bf16.msra.mxu0 %v8181_v13  ;;  %6312 = vmatpush3.bf16.msra.mxu1 %v6735_v6 }
 0x74b   :  { %4648 = vmatprep.subr.bf16.mxu0 %v8185_v24  ;;  %6313 = vmatprep.subr.bf16.mxu1 %v7210_v2 }
 0x74c   :  { %6886 = vtanh.f32 %v4167_v15  ;;  %v4495_v15 = vld [vmem:[#allocation22] sm:$0x7] }
 0x74d   :  { %v4628_v11 = vrot.slane %v4495_v15, %v7586_v56 }
 0x74e   :  { %4649 = vmatpush1.bf16.msra.mxu0 %v8189_v26  ;;  %6314 = vmatpush3.bf16.msra.mxu1 %v6739_v54 }
 0x74f   :  { %4650 = vmatprep.subr.bf16.mxu0 %v8193_v7  ;;  %6315 = vmatprep.subr.bf16.mxu1 %v7210_v2 }
 0x752   :  { %4651 = vmatpush1.bf16.msra.mxu0 %v8196_v44  ;;  %6316 = vmatpush3.bf16.msra.mxu1 %v6743_v34 }
 0x753   :  { %4652 = vmatprep.subr.bf16.mxu0 %v8200_v10  ;;  %6317 = vmatprep.subr.bf16.mxu1 %v7210_v2 }
 0x756   :  { %v6887_v38 = vpop.eup %6886  ;;  %4653 = vmatpush1.bf16.msra.mxu0 %v8203_v14  ;;  %6318 = vmatpush3.bf16.msra.mxu1 %v6747_v16 }
 0x757   :  { %4654 = vmatprep.subr.bf16.mxu0 %v8207_v19  ;;  %6319 = vmatprep.subr.bf16.mxu1 %v7210_v2  ;;  %v4170_v5 = vmul.f32 %v6887_v38, %v4169_v1  ;;  %v4632_v1 = vrot.slane %v4495_v15, %v7590_v59 }
 0x759   :  { %v8215_v35 = vadd.f32 %v4171_v9, %v4170_v5 }
 0x75a   :  { %4655 = vmatpush1.bf16.msra.mxu0 %v8210_v18  ;;  %6320 = vmatpush3.bf16.msra.mxu1 %v6751_v4 }
 0x75b   :  { %4173 = vst [vmem:[#allocation5 + $0x2] sm:$0x1] %v8215_v35  ;;  %v4462_v36 = vpack.c.bf16 %v8215_v35, %v8215_v35  ;;  %4928 = vmatprep.subr.bf16.mxu0 %v8079_v30  ;;  %6325 = vmatprep.subr.bf16.mxu1 %v7210_v2  ;;  %v6753_v30 = vld [vmem:[#allocation13 + $0x20] ss:$12 sps:$4 sm:$0xff]  }
 0x75d   :  { %4673 = vmatmul.mubr.bf16.vlgmr.msra.gmra.mrb[60].mxu0 %v4462_v36  ;;  %6322 = vmatmul.mubr.bf16.vlgmr.msra.gmra.mrb[60].mxu1 %v4462_v36 }
 0x75e   :  { %4929 = vmatpush1.bf16.msra.mxu0 %v8081_v40  ;;  %4960 = vmatprep.mubr.bf16.mxu0 %v7211_v3  ;;  %v6754_v40 = vld [vmem:[#allocation13 + $0x38] ss:$12 sps:$4 sm:$0xff]  }
 0x75f   :  { %4930 = vmatprep.subr.bf16.mxu0 %v8085_v61  ;;  %6341 = vmatprep.mubr.msk.bf16.mxu1 %vm7212_vm0, %v7210_v2  ;;  %v6755_v61 = vld [vmem:[#allocation13 + $0x50] ss:$12 sps:$4 sm:$0xff]  }
 0x760   :  { %6326 = vmatpush3.bf16.msra.mxu1 %v6752_v20 }
 0x761   :  { %6327 = vmatprep.subr.bf16.mxu1 %v7210_v2 }
 0x762   :  { %4931 = vmatpush1.bf16.msra.mxu0 %v8088_v58  ;;  %v6756_v58 = vld [vmem:[#allocation13 + $0x68] ss:$12 sps:$4 sm:$0xff]  }
 0x763   :  { %4932 = vmatprep.subr.bf16.mxu0 %v8092_v33  ;;  %v6757_v33 = vld [vmem:[#allocation13 + $0x80] ss:$12 sps:$4 sm:$0xff]  }
 0x764   :  { %6328 = vmatpush3.bf16.msra.mxu1 %v6753_v30  ;;  %v4722_v30 = vld [vmem:[#allocation4 + $0x1] ss:$8 sm:$0x7] }
 0x765   :  { %6329 = vmatprep.subr.bf16.mxu1 %v7210_v2 }
 0x766   :  { %4933 = vmatpush1.bf16.msra.mxu0 %v8095_v25  ;;  %v6758_v25 = vld [vmem:[#allocation13 + $0x98] ss:$12 sps:$4 sm:$0xff]  }
 0x767   :  { %4934 = vmatprep.subr.bf16.mxu0 %v8099_v28  ;;  %v6759_v28 = vld [vmem:[#allocation13 + $0xb0] ss:$12 sps:$4 sm:$0xff]  }
 0x768   :  { %6330 = vmatpush3.bf16.msra.mxu1 %v6754_v40 }
 0x769   :  { %6331 = vmatprep.subr.bf16.mxu1 %v7210_v2 }
 0x76a   :  { %4935 = vmatpush1.bf16.msra.mxu0 %v8102_v31  ;;  %v4207_v31 = vld [vmem:[#allocation16] sm:$0x7] }
 0x76b   :  { %4936 = vmatprep.subr.bf16.mxu0 %v8106_v37  ;;  %v4340_v37 = vrot.slane %v4207_v31, %v7586_v56  ;;  %v4348_v47 = vrot.slane %v4207_v31, %v7588_v57 }
 0x76c   :  { %6332 = vmatpush3.bf16.msra.mxu1 %v6755_v61 }
 0x76d   :  { %6333 = vmatprep.subr.bf16.mxu1 %v7210_v2 }
 0x76e   :  { %4937 = vmatpush1.bf16.msra.mxu0 %v8109_v42  ;;  %v4344_v42 = vrot.slane %v4207_v31, %v7590_v59 }
 0x76f   :  { %4938 = vmatprep.subr.bf16.mxu0 %v8113_v49 }
 0x770   :  { %6334 = vmatpush3.bf16.msra.mxu1 %v6756_v58 }
 0x771   :  { %6335 = vmatprep.subr.bf16.mxu1 %v7210_v2 }
 0x772   :  { %4939 = vmatpush1.bf16.msra.mxu0 %v8116_v60 }
 0x773   :  { %4940 = vmatprep.subr.bf16.mxu0 %v8120_v48 }
 0x774   :  { %6336 = vmatpush3.bf16.msra.mxu1 %v6757_v33 }
 0x775   :  { %6337 = vmatprep.subr.bf16.mxu1 %v7210_v2 }
 0x776   :  { %4941 = vmatpush1.bf16.msra.mxu0 %v8123_v50  ;;  %v4434_v50 = vld [vmem:[#allocation3 + $0x6] ss:$8 sm:$0x7] }
 0x777   :  { %4942 = vmatprep.subr.bf16.mxu0 %v8127_v55  ;;  %v4443_v21 = vrot.slane %v4434_v50, 1  ;;  %v4453_v4 = vrot.slane %v4434_v50, 2 }
 0x778   :  { %6338 = vmatpush3.bf16.msra.mxu1 %v6758_v25 }
 0x779   :  { %6339 = vmatprep.subr.bf16.mxu1 %v7210_v2 }
 0x77a   :  { %4943 = vmatpush1.bf16.msra.mxu0 %v8130_v62 }
 0x77b   :  { %5216 = vmatprep.subr.bf16.mxu0 %v8134_v41 }
 0x77c   :  { %6340 = vmatpush3.bf16.msra.mxu1 %v6759_v28 }
 0x77d   :  { %6345 = vmatprep.subr.bf16.mxu1 %v7210_v2 }
 0x810   :  { %v4386_v49 = vpop.f32.mrb[56].mxu0  ;;  %v4427_v60 = vpop.f32.mrb[56].mxu1 }
 0x811   :  { %v4387_v48 = vadd.f32 %v4386_v49, %v4340_v37  ;;  %v4388_v55 = vpop.f32.mrb[57].mxu0  ;;  %v6303_v62 = vpop.f32.mrb[57].mxu1  ;;  %v4428_v34 = vadd.f32 %v4427_v60, %v4348_v47 }
 0x812   :  { %v4389_v41 = vadd.f32 %v4388_v55, %v4344_v42  ;;  %v4390_v12 = vpop.f32.mrb[58].mxu0  ;;  %v4430_v32 = vpop.f32.mrb[58].mxu1  ;;  %v4731_v42 = vrot.slane %v4722_v30, 1 }
 0x813   :  { %v4435_v45 = vadd.f32 %v4434_v50, %v4387_v48  ;;  %v4391_v39 = vpop.f32.mrb[59].mxu0  ;;  %v6304_v51 = vpop.f32.mrb[59].mxu1 }
 0x814   :  { %v4445_v53 = vadd.f32 %v4443_v21, %v4389_v41  ;;  %v6760_v39 = vld [vmem:[#allocation19 + $0x8] ss:$12 sps:$4 sm:$0xff]  }
 0x815   :  { %v5763_v46 = vmul.f32 -1.442695, %v4435_v45 }
 0x816   :  { %v5764_v17 = vmul.f32 -1.442695, %v4445_v53  ;;  %v4636_v53 = vrot.slane %v4495_v15, %v7588_v57 }
 0x817   :  { %6888 = vpow2.f32 %v5763_v46  ;;  %v6761_v46 = vld [vmem:[#allocation19 + $0x20] ss:$12 sps:$4 sm:$0xff]  }
 0x818   :  { %6890 = vpow2.f32 %v5764_v17  ;;  %v6762_v17 = vld [vmem:[#allocation19 + $0x38] ss:$12 sps:$4 sm:$0xff]  }
 0x821   :  { %v6889_v6 = vpop.eup %6888 }
 0x822   :  { %v4439_v22 = vadd.f32 1.0, %v6889_v6  ;;  %v6891_v0 = vpop.eup %6890 }
 0x823   :  { %v4449_v54 = vadd.f32 1.0, %v6891_v0  ;;  %v4741_v0 = vrot.slane %v4722_v30, 2 }
 0x824   :  { %6892 = vrcp.f32 %v4439_v22 }
 0x825   :  { %6894 = vrcp.f32 %v4449_v54 }
 0x82e   :  { %v6893_v16 = vpop.eup %6892 }
 0x82f   :  { %v4452_v38 = vmul.f32 %v6893_v16, %v4428_v34  ;;  %v6895_v48 = vpop.eup %6894 }
 0x830   :  { %v4674_v5 = vpop.f32.mrb[60].mxu0  ;;  %v4715_v9 = vpop.f32.mrb[60].mxu1  ;;  %v4457_v55 = vsub.f32 1.0, %v6895_v48  ;;  %v4459_v12 = vmul.f32 %v6895_v48, %v8152_v43 }
 0x831   :  { %v4455_v36 = vadd.f32 %v4453_v4, %v4452_v38  ;;  %v4675_v20 = vadd.f32 %v4674_v5, %v4628_v11  ;;  %v4676_v40 = vpop.f32.mrb[61].mxu0  ;;  %v6323_v61 = vpop.f32.mrb[61].mxu1  ;;  %v5010_v11 = vld [vmem:[#allocation3 + $0x7] ss:$8 sm:$0x7] }
 0x832   :  { %v4677_v58 = vadd.f32 %v4676_v40, %v4632_v1  ;;  %v4678_v33 = vpop.f32.mrb[62].mxu0  ;;  %v4718_v25 = vpop.f32.mrb[62].mxu1 }
 0x833   :  { %6896 = vtanh.f32 %v4455_v36  ;;  %v4723_v28 = vadd.f32 %v4722_v30, %v4675_v20  ;;  %v4679_v31 = vpop.f32.mrb[63].mxu0  ;;  %v6324_v37 = vpop.f32.mrb[63].mxu1  ;;  %v5019_v20 = vrot.slane %v5010_v11, 1 }
 0x834   :  { %v4733_v60 = vadd.f32 %v4731_v42, %v4677_v58  ;;  %v5071_v31 = vld [vmem:[#allocation22] sm:$0x7] }
 0x835   :  { %v5789_v49 = vmul.f32 -1.442695, %v4723_v28  ;;  %v5208_v48 = vrot.slane %v5071_v31, %v7590_v59 }
 0x836   :  { %v5790_v50 = vmul.f32 -1.442695, %v4733_v60 }
 0x837   :  { %6898 = vpow2.f32 %v5789_v49  ;;  %v5204_v49 = vrot.slane %v5071_v31, %v7586_v56 }
 0x838   :  { %6900 = vpow2.f32 %v5790_v50 }
 0x83d   :  { %v6897_v62 = vpop.eup %6896 }
 0x83e   :  { %v4458_v41 = vmul.f32 %v6897_v62, %v4457_v55  ;;  %v5029_v55 = vrot.slane %v5010_v11, 2 }
 0x840   :  { %v8256_v32 = vadd.f32 %v4459_v12, %v4458_v41 }
 0x841   :  { %v6899_v45 = vpop.eup %6898 }
 0x842   :  { %v4727_v51 = vadd.f32 1.0, %v6899_v45  ;;  %4461 = vst [vmem:[#allocation23 + $0x6] sm:$0x1] %v8256_v32  ;;  %v4750_v21 = vpack.c.bf16 %v8256_v32, %v8256_v32  ;;  %v6901_v43 = vpop.eup %6900 }
 0x844   :  { %6902 = vrcp.f32 %v4727_v51  ;;  %4961 = vmatmul.mubr.bf16.vlgmr.msra.gmra.mrb[64].mxu0 %v4750_v21  ;;  %6342 = vmatmul.mubr.bf16.vlgmr.msra.gmra.mrb[64].mxu1 %v4750_v21 }
 0x845   :  { %5217 = vmatpush1.bf16.msra.mxu0 %v8154_v23  ;;  %6346 = vmatpush3.bf16.msra.mxu1 %v6760_v39  ;;  %v4737_v23 = vadd.f32 1.0, %v6901_v43  ;;  %v5297_v39 = vld [vmem:[#allocation4] ss:$8 sm:$0x7] }
 0x846   :  { %5218 = vmatprep.subr.bf16.mxu0 %v8159_v52  ;;  %6347 = vmatprep.subr.bf16.mxu1 %v7210_v2  ;;  %v4716_v52 = vadd.f32 %v4715_v9, %v4636_v53 }
 0x847   :  { %5248 = vmatprep.mubr.bf16.mxu0 %v7211_v3  ;;  %6361 = vmatprep.mubr.msk.bf16.mxu1 %vm7212_vm0, %v7210_v2  ;;  %v6763_v3 = vld [vmem:[#allocation19 + $0x50] ss:$12 sps:$4 sm:$0xff]   ;;  %6904 = vrcp.f32 %v4737_v23 }
 0x849   :  { %5219 = vmatpush1.bf16.msra.mxu0 %v8162_v29  ;;  %6348 = vmatpush3.bf16.msra.mxu1 %v6761_v46 }
 0x84a   :  { %5220 = vmatprep.subr.bf16.mxu0 %v8166_v63  ;;  %6349 = vmatprep.subr.bf16.mxu1 %v7210_v2  ;;  %v6764_v63 = vld [vmem:[#allocation19 + $0x68] ss:$12 sps:$4 sm:$0xff]  }
 0x84d   :  { %5221 = vmatpush1.bf16.msra.mxu0 %v8174_v27  ;;  %6350 = vmatpush3.bf16.msra.mxu1 %v6762_v17  ;;  %v6765_v27 = vld [vmem:[#allocation19 + $0x80] ss:$12 sps:$4 sm:$0xff]  }
 0x84e   :  { %v6903_v6 = vpop.eup %6902  ;;  %5222 = vmatprep.subr.bf16.mxu0 %v8178_v8  ;;  %6351 = vmatprep.subr.bf16.mxu1 %v7210_v2 }
 0x84f   :  { %v4740_v22 = vmul.f32 %v6903_v6, %v4716_v52  ;;  %v5306_v52 = vrot.slane %v5297_v39, 1 }
 0x851   :  { %v4743_v29 = vadd.f32 %v4741_v0, %v4740_v22  ;;  %5223 = vmatpush1.bf16.msra.mxu0 %v8181_v13  ;;  %6352 = vmatpush3.bf16.msra.mxu1 %v6763_v3  ;;  %v6905_v8 = vpop.eup %6904  ;;  %v6766_v13 = vld [vmem:[#allocation19 + $0x98] ss:$12 sps:$4 sm:$0xff]  }
 0x852   :  { %5224 = vmatprep.subr.bf16.mxu0 %v8185_v24  ;;  %6353 = vmatprep.subr.bf16.mxu1 %v7210_v2  ;;  %v4745_v24 = vsub.f32 1.0, %v6905_v8  ;;  %v4747_v15 = vmul.f32 %v6905_v8, %v8215_v35 }
 0x853   :  { %6906 = vtanh.f32 %v4743_v29 }
 0x855   :  { %5225 = vmatpush1.bf16.msra.mxu0 %v8189_v26  ;;  %6354 = vmatpush3.bf16.msra.mxu1 %v6764_v63  ;;  %v6767_v26 = vld [vmem:[#allocation19 + $0xb0] ss:$12 sps:$4 sm:$0xff]  }
 0x856   :  { %5226 = vmatprep.subr.bf16.mxu0 %v8193_v7  ;;  %6355 = vmatprep.subr.bf16.mxu1 %v7210_v2 }
 0x859   :  { %5227 = vmatpush1.bf16.msra.mxu0 %v8196_v44  ;;  %6356 = vmatpush3.bf16.msra.mxu1 %v6765_v27 }
 0x85a   :  { %5228 = vmatprep.subr.bf16.mxu0 %v8200_v10  ;;  %6357 = vmatprep.subr.bf16.mxu1 %v7210_v2 }
 0x85d   :  { %v6907_v47 = vpop.eup %6906  ;;  %5229 = vmatpush1.bf16.msra.mxu0 %v8203_v14  ;;  %6358 = vmatpush3.bf16.msra.mxu1 %v6766_v13  ;;  %v4783_v14 = vld [vmem:[#allocation16] sm:$0x7] }
 0x85e   :  { %5230 = vmatprep.subr.bf16.mxu0 %v8207_v19  ;;  %6359 = vmatprep.subr.bf16.mxu1 %v7210_v2  ;;  %v4746_v7 = vmul.f32 %v6907_v47, %v4745_v24  ;;  %v4916_v19 = vrot.slane %v4783_v14, %v7586_v56  ;;  %v4920_v2 = vrot.slane %v4783_v14, %v7590_v59 }
 0x85f   :  { %v4924_v28 = vrot.slane %v4783_v14, %v7588_v57 }
 0x860   :  { %v8287_v44 = vadd.f32 %v4747_v15, %v4746_v7 }
 0x861   :  { %5231 = vmatpush1.bf16.msra.mxu0 %v8210_v18  ;;  %6360 = vmatpush3.bf16.msra.mxu1 %v6767_v26 }
 0x862   :  { %4749 = vst [vmem:[#allocation5 + $0x1] sm:$0x1] %v8287_v44  ;;  %v5038_v10 = vpack.c.bf16 %v8287_v44, %v8287_v44 }
 0x864   :  { %5249 = vmatmul.mubr.bf16.vlgmr.msra.gmra.mrb[68].mxu0 %v5038_v10  ;;  %6362 = vmatmul.mubr.bf16.vlgmr.msra.gmra.mrb[68].mxu1 %v5038_v10 }
 0x917   :  { %v4962_v54 = vpop.f32.mrb[64].mxu0  ;;  %v5003_v34 = vpop.f32.mrb[64].mxu1 }
 0x918   :  { %v4963_v35 = vadd.f32 %v4962_v54, %v4916_v19  ;;  %v4964_v16 = vpop.f32.mrb[65].mxu0  ;;  %v6343_v1 = vpop.f32.mrb[65].mxu1  ;;  %v5004_v42 = vadd.f32 %v5003_v34, %v4924_v28 }
 0x919   :  { %v4965_v18 = vadd.f32 %v4964_v16, %v4920_v2  ;;  %v4966_v38 = vpop.f32.mrb[66].mxu0  ;;  %v5006_v4 = vpop.f32.mrb[66].mxu1 }
 0x91a   :  { %v5011_v5 = vadd.f32 %v5010_v11, %v4963_v35  ;;  %v4967_v9 = vpop.f32.mrb[67].mxu0  ;;  %v6344_v36 = vpop.f32.mrb[67].mxu1 }
 0x91b   :  { %v5021_v40 = vadd.f32 %v5019_v20, %v4965_v18 }
 0x91c   :  { %v5815_v30 = vmul.f32 -1.442695, %v5011_v5 }
 0x91d   :  { %v5816_v61 = vmul.f32 -1.442695, %v5021_v40 }
 0x91e   :  { %6908 = vpow2.f32 %v5815_v30 }
 0x91f   :  { %6910 = vpow2.f32 %v5816_v61 }
 0x928   :  { %v6909_v58 = vpop.eup %6908 }
 0x929   :  { %v5015_v33 = vadd.f32 1.0, %v6909_v58  ;;  %v6911_v25 = vpop.eup %6910 }
 0x92a   :  { %v5025_v37 = vadd.f32 1.0, %v6911_v25 }
 0x92b   :  { %6912 = vrcp.f32 %v5015_v33 }
 0x92c   :  { %6914 = vrcp.f32 %v5025_v37 }
 0x935   :  { %v6913_v60 = vpop.eup %6912 }
 0x936   :  { %v5028_v50 = vmul.f32 %v6913_v60, %v5004_v42  ;;  %v6915_v6 = vpop.eup %6914 }
 0x937   :  { %v5250_v62 = vpop.f32.mrb[68].mxu0  ;;  %v5291_v41 = vpop.f32.mrb[68].mxu1  ;;  %v5033_v0 = vsub.f32 1.0, %v6915_v6  ;;  %v5035_v27 = vmul.f32 %v6915_v6, %v8256_v32 }
 0x938   :  { %v5031_v12 = vadd.f32 %v5029_v55, %v5028_v50  ;;  %v5251_v45 = vadd.f32 %v5250_v62, %v5204_v49  ;;  %v5252_v51 = vpop.f32.mrb[69].mxu0  ;;  %v6363_v21 = vpop.f32.mrb[69].mxu1 }
 0x939   :  { %v5253_v46 = vadd.f32 %v5252_v51, %v5208_v48  ;;  %v5254_v43 = vpop.f32.mrb[70].mxu0  ;;  %v5294_v53 = vpop.f32.mrb[70].mxu1 }
 0x93a   :  { %6916 = vtanh.f32 %v5031_v12  ;;  %v5298_v17 = vadd.f32 %v5297_v39, %v5251_v45  ;;  %v5255_v23 = vpop.f32.mrb[71].mxu0  ;;  %v6364_v56 = vpop.f32.mrb[71].mxu1 }
 0x93b   :  { %v5308_v59 = vadd.f32 %v5306_v52, %v5253_v46 }
 0x93c   :  { %v5841_v3 = vmul.f32 -1.442695, %v5298_v17 }
 0x93d   :  { %v5842_v22 = vmul.f32 -1.442695, %v5308_v59 }
 0x93e   :  { %6918 = vpow2.f32 %v5841_v3 }
 0x93f   :  { %6920 = vpow2.f32 %v5842_v22 }
 0x944   :  { %v6917_v29 = vpop.eup %6916 }
 0x945   :  { %v5034_v63 = vmul.f32 %v6917_v29, %v5033_v0 }
 0x947   :  { %v5036_v8 = vadd.f32 %v5035_v27, %v5034_v63 }
 0x948   :  { %v6919_v13 = vpop.eup %6918 }
 0x949   :  { %5037 = vst [vmem:[#allocation23 + $0x7] sm:$0x1] %v5036_v8  ;;  %5325 = vst [vmem:[#allocation24] sm:$0x1] %v5036_v8  ;;  %v5302_v24 = vadd.f32 1.0, %v6919_v13 }
 0x94a   :  { %7147 = shalt.err (!%p7144_p9)
}
 0x94b   :  { %s7148_s15 = scalar_lea.hbm %s8336_s11, 16 }
 0x94c   :  { %p7149_p10 = scmp.ne.s32.totalorder %s8336_s11, %s7148_s15  ;;  %p7152_p11 = scmp.lt.u32.totalorder %s7148_s15, %s8336_s11 }
 0x94e   :  { %p7154_p12 = pnand %p7152_p11, %p7149_p10 }
 0x950   :  { %7157 = shalt.err (!%p7154_p12)
}
 0x951   :  { %5349 = dma.vmem_to_hbm [thread:$0]  %s5347_s24, 16, %s8336_s11, [#allocation25]   ;;  %6922 = vrcp.f32 %v5302_v24  ;;  %v6921_v32 = vpop.eup %6920  ;;  %v5212_v47 = vrot.slane %v5071_v31, %v7588_v57  ;;  %v5316_v14 = vrot.slane %v5297_v39, 2  ;;  %v5326_v1 = vld [vmem:[#allocation23] sm:$0xff] }
 0x952   :  { %v5312_v26 = vadd.f32 1.0, %v6921_v32  ;;  %s7214_s11 = smov [#allocation23]  }
 0x953   :  { %v5292_v7 = vadd.f32 %v5291_v41, %v5212_v47  ;;  %s5336_s9 = sshll.u32 %s7214_s11, 4  ;;  %s5337_s9 = int_to_ptr.vmem [resolvable:$true] %s5336_s9 }
 0x954   :  { %6924 = vrcp.f32 %v5312_v26  ;;  %s7158_s28 = scalar_lea.vmem %s5337_s9, 128  ;;  %p7163_p0 = scmp.lt.s32.totalorder %s5337_s9, %s5337_s9 }
 0x955   :  { %p7159_p13 = scmp.ne.s32.totalorder %s5337_s9, %s7158_s28  ;;  %p7164_p1 = scmp.lt.s32.totalorder %s7158_s28, %s7158_s28 }
 0x957   :  { %p7165_p2 = por %p7164_p1, %p7163_p0 }
 0x959   :  { %p7166_p3 = pnand %p7165_p2, %p7159_p13 }
 0x95b   :  { %v6923_v15 = vpop.eup %6922 }
 0x95c   :  { %v5315_v10 = vmul.f32 %v6923_v15, %v5292_v7 }
 0x95e   :  { %v5318_v19 = vadd.f32 %v5316_v14, %v5315_v10  ;;  %v6925_v2 = vpop.eup %6924 }
 0x95f   :  { %v5320_v54 = vsub.f32 1.0, %v6925_v2  ;;  %v5322_v11 = vmul.f32 %v6925_v2, %v8287_v44 }
 0x960   :  { %6926 = vtanh.f32 %v5318_v19 }
 0x96a   :  { %v6927_v34 = vpop.eup %6926 }
 0x96b   :  { %v5321_v35 = vmul.f32 %v6927_v34, %v5320_v54 }
 0x96d   :  { %v5323_v16 = vadd.f32 %v5322_v11, %v5321_v35 }
 0x96f   :  { %5324 = vst [vmem:[#allocation5] sm:$0x1] %v5323_v16 }
 0x976   :  { %v5327_v57 = vld [vmem:[#allocation5] sm:$0xff] }
 0x977   :  { %v5328_v18 = vadd.f32 %v5327_v57, %v5326_v1 }
 0x979   :  { %5329 = vst [vmem:[#allocation23] sm:$0xff] %v5328_v18 }
 0x97a   :  { %7169 = shalt.err (!%p7166_p3)
}
 0x97b   :  { %s7170_s17 = scalar_lea.hbm %s8335_s10, 128 }
 0x97c   :  { %p7171_p4 = scmp.ne.s32.totalorder %s8335_s10, %s7170_s17  ;;  %p7174_p5 = scmp.lt.u32.totalorder %s7170_s17, %s8335_s10 }
 0x97e   :  { %p7176_p6 = pnand %p7174_p5, %p7171_p4 }
 0x980   :  { %7179 = shalt.err (!%p7176_p6)
}
 0x981   :  { %5339 = dma.vmem_to_hbm [thread:$0]  %s5337_s9, 128, %s8335_s10, [#allocation8]  }
 0x982   :  { %7192 = dma.done.wait [#allocation8], 128  }
 0x983   :  { %7193 = vsyncadd [#allocation8], 4294967168 }
 0x984   :  { %7194 = dma.done.wait [#allocation25], 16  }
 0x985   :  { %7195 = vsyncadd [#allocation25], 4294967280 }
 0x986   :  { %5356 = vsyncpa [#allocation7], 1 }
 0x987   :  { %5357 = vsyncpa [#allocation12], 1 }
 0x988   :  { %5358 = vsyncpa [#allocation15], 1 }
 0x989   :  { %5359 = vsyncpa [#allocation18], 1 }
 0x98a   :  { %5360 = vsyncpa [#allocation21], 1 }
 0x98b   :  { %5361 = vsyncpa [#allocation8], 1 }
 0x98c   :  { %5362 = vsyncpa [#allocation25], 1 }
 0x98d   :  { %5363 = vsyncpa [#allocation9], 1 }

// kernel: greedy_search_decode.3
= control target key start
LH: loop header
LB: loop body
LE: loop exit
PB: predicated region body
PF: predicated region fallthrough
CT: control target
= control target key end

     0   :  { %19 = vsyncpa [#allocation4], 0  ;;  %s10081_s0 = inlined_call_operand.hbm [shape: f32[64,128], index: 0, kind: input, shape index: {}]   ;;  %s10082_s1 = inlined_call_operand.hbm [shape: f32[1,128], index: 1, kind: input, shape index: {}]   ;;  %s10083_s2 = inlined_call_operand.hbm [shape: f32[8,128], index: 2, kind: input, shape index: {}]   ;;  %s10084_s3 = inlined_call_operand.hbm [shape: bf16[128,8], index: 3, kind: input, shape index: {}]   ;;  %s10085_s4 = inlined_call_operand.hbm [shape: bf16[128,384], index: 4, kind: input, shape index: {}]   ;;  %s10086_s5 = inlined_call_operand.hbm [shape: bf16[128,384], index: 5, kind: input, shape index: {}]   ;;  %s10087_s6 = inlined_call_operand.hbm [shape: f32[1,384], index: 6, kind: input, shape index: {}]   ;;  %s10088_s7 = inlined_call_operand.hbm [shape: f32[1,384], index: 7, kind: input, shape index: {}]   ;;  %s10089_s8 = inlined_call_operand.hbm [shape: bf16[256,128], index: 8, kind: input, shape index: {}]   ;;  %s10090_s9 = inlined_call_operand.hbm [shape: f32[1,128], index: 9, kind: input, shape index: {}]   ;;  %s10091_s10 = inlined_call_operand.hbm [shape: bf16[128,128], index: 10, kind: input, shape index: {}]   ;;  %s10092_s11 = inlined_call_operand.hbm [shape: f32[1,128], index: 11, kind: input, shape index: {}]   ;;  %s10093_s12 = inlined_call_operand.hbm [shape: s32[6], index: 12, kind: output, shape index: {0}]   ;;  %s10094_s13 = inlined_call_operand.hbm [shape: f32[6], index: 13, kind: output, shape index: {1}]  }
   0x1   :  { %20 = vsyncpa [#allocation7], 0 }
   0x2   :  { %21 = vsyncpa [#allocation10], 0 }
   0x3   :  { %22 = vsyncpa [#allocation13], 0 }
   0x4   :  { %23 = vsyncpa [#allocation16], 0 }
   0x5   :  { %24 = vsyncpa [#allocation19], 0 }
   0x6   :  { %25 = vsyncpa [#allocation22], 0 }
   0x7   :  { %26 = vsyncpa [#allocation5], 0 }
   0x8   :  { %27 = vsyncpa [#allocation25], 0  ;;  %s8984_s25 = smov [#allocation6]   ;;  %s8985_s27 = smov [#allocation9]  }
   0x9   :  { %s46_s26 = sshll.u32 %s8984_s25, 4  ;;  %s65_s28 = sshll.u32 %s8985_s27, 4  ;;  %s47_s26 = int_to_ptr.vmem [resolvable:$true] %s46_s26  ;;  %s9077_s28 = int_to_ptr.vmem [resolvable:$true] %s65_s28 }
   0xa   :  { %s8682_s14 = scalar_lea.hbm %s10082_s1, 16 }
   0xb   :  { %p8683_p0 = scmp.ne.s32.totalorder %s10082_s1, %s8682_s14  ;;  %p8686_p1 = scmp.lt.u32.totalorder %s8682_s14, %s10082_s1 }
   0xd   :  { %p8688_p2 = pnand %p8686_p1, %p8683_p0 }
   0xf   :  { %8691 = shalt.err (!%p8688_p2)
}
  0x10   :  { %s8692_s19 = scalar_lea.vmem %s47_s26, 16  ;;  %s8696_s20 = scalar_lea.vmem %s47_s26, 32 }
  0x11   :  { %p8693_p3 = scmp.ne.s32.totalorder %s47_s26, %s8692_s19  ;;  %p8697_p4 = scmp.lt.s32.totalorder %s47_s26, %s47_s26 }
  0x12   :  { %p8698_p5 = scmp.lt.s32.totalorder %s8696_s20, %s8692_s19 }
  0x14   :  { %p8699_p6 = por %p8698_p5, %p8697_p4 }
  0x16   :  { %p8700_p7 = pnand %p8699_p6, %p8693_p3 }
  0x18   :  { %8703 = shalt.err (!%p8700_p7)
}
  0x19   :  { %49 = dma.hbm_to_vmem [thread:$0]  %s10082_s1, 16, %s47_s26, [#allocation7]  }
  0x1a   :  { %s8704_s25 = scalar_lea.hbm %s10084_s3, 1024 }
  0x1b   :  { %p8705_p8 = scmp.ne.s32.totalorder %s10084_s3, %s8704_s25  ;;  %p8708_p9 = scmp.lt.u32.totalorder %s8704_s25, %s10084_s3 }
  0x1d   :  { %p8710_p10 = pnand %p8708_p9, %p8705_p8 }
  0x1f   :  { %8713 = shalt.err (!%p8710_p10)
}
  0x20   :  { %s8714_s15 = scalar_lea.vmem %s9077_s28, 1024  ;;  %p8719_p12 = scmp.lt.s32.totalorder %s9077_s28, %s9077_s28 }
  0x21   :  { %p8715_p11 = scmp.ne.s32.totalorder %s9077_s28, %s8714_s15  ;;  %p8720_p13 = scmp.lt.s32.totalorder %s8714_s15, %s8714_s15 }
  0x23   :  { %p8721_p0 = por %p8720_p13, %p8719_p12 }
  0x25   :  { %p8722_p1 = pnand %p8721_p0, %p8715_p11 }
  0x27   :  { %8725 = shalt.err (!%p8722_p1)
}
  0x28   :  { %s8986_s1 = smov 64   ;;  %s8987_s26 = smov 4  }
  0x29   :  { %71 = dma.hbm_to_vmem [thread:$0]  %s10084_s3, 1024, %s9077_s28, [#allocation10], %s8986_s1, %s8986_s1, %s8987_s26  }
  0x2a   :  { %s8988_s18 = smov [#allocation12]   ;;  %s8989_s20 = smov [#allocation15]  }
  0x2b   :  { %s89_s19 = sshll.u32 %s8988_s18, 4  ;;  %s112_s21 = sshll.u32 %s8989_s20, 4  ;;  %s90_s19 = int_to_ptr.vmem [resolvable:$true] %s89_s19  ;;  %s9111_s21 = int_to_ptr.vmem [resolvable:$true] %s112_s21 }
  0x2c   :  { %s8726_s24 = scalar_lea.hbm %s10086_s5, 3072 }
  0x2d   :  { %p8727_p2 = scmp.ne.s32.totalorder %s10086_s5, %s8726_s24  ;;  %p8730_p3 = scmp.lt.u32.totalorder %s8726_s24, %s10086_s5 }
  0x2f   :  { %p8732_p4 = pnand %p8730_p3, %p8727_p2 }
  0x31   :  { %8735 = shalt.err (!%p8732_p4)
}
  0x32   :  { %s8736_s3 = scalar_lea.vmem %s90_s19, 3072  ;;  %p8741_p6 = scmp.lt.s32.totalorder %s90_s19, %s90_s19 }
  0x33   :  { %p8737_p5 = scmp.ne.s32.totalorder %s90_s19, %s8736_s3  ;;  %p8742_p7 = scmp.lt.s32.totalorder %s8736_s3, %s8736_s3 }
  0x35   :  { %p8743_p8 = por %p8742_p7, %p8741_p6 }
  0x37   :  { %p8744_p9 = pnand %p8743_p8, %p8737_p5 }
  0x39   :  { %8747 = shalt.err (!%p8744_p9)
}
  0x3a   :  { %s8990_s28 = smov 192   ;;  %s8991_s14 = smov 12  }
  0x3b   :  { %95 = dma.hbm_to_vmem [thread:$0]  %s10086_s5, 3072, %s90_s19, [#allocation13], %s8990_s28, %s8990_s28, %s8991_s14  }
  0x3c   :  { %s8748_s20 = scalar_lea.hbm %s10088_s7, 48 }
  0x3d   :  { %p8749_p10 = scmp.ne.s32.totalorder %s10088_s7, %s8748_s20  ;;  %p8752_p11 = scmp.lt.u32.totalorder %s8748_s20, %s10088_s7 }
  0x3f   :  { %p8754_p12 = pnand %p8752_p11, %p8749_p10 }
  0x41   :  { %8757 = shalt.err (!%p8754_p12)
}
  0x42   :  { %s8758_s27 = scalar_lea.vmem %s9111_s21, 48  ;;  %s8762_s5 = scalar_lea.vmem %s9111_s21, 64 }
  0x43   :  { %p8759_p13 = scmp.ne.s32.totalorder %s9111_s21, %s8758_s27  ;;  %p8763_p0 = scmp.lt.s32.totalorder %s9111_s21, %s9111_s21 }
  0x44   :  { %p8764_p1 = scmp.lt.s32.totalorder %s8762_s5, %s8758_s27 }
  0x46   :  { %p8765_p2 = por %p8764_p1, %p8763_p0 }
  0x48   :  { %p8766_p3 = pnand %p8765_p2, %p8759_p13 }
  0x4a   :  { %8769 = shalt.err (!%p8766_p3)
}
  0x4b   :  { %115 = dma.hbm_to_vmem [thread:$0]  %s10088_s7, 48, %s9111_s21, [#allocation16]  }
  0x4c   :  { %s8992_s30 = smov [#allocation18]   ;;  %s8993_s15 = smov [#allocation3]  }
  0x4d   :  { %s134_s3 = sshll.u32 %s8992_s30, 4  ;;  %s33_s16 = sshll.u32 %s8993_s15, 4  ;;  %s135_s3 = int_to_ptr.vmem [resolvable:$true] %s134_s3  ;;  %s9146_s16 = int_to_ptr.vmem [resolvable:$true] %s33_s16 }
  0x4e   :  { %s8770_s20 = scalar_lea.hbm %s10090_s9, 16 }
  0x4f   :  { %p8771_p4 = scmp.ne.s32.totalorder %s10090_s9, %s8770_s20  ;;  %p8774_p5 = scmp.lt.u32.totalorder %s8770_s20, %s10090_s9 }
  0x51   :  { %p8776_p6 = pnand %p8774_p5, %p8771_p4 }
  0x53   :  { %8779 = shalt.err (!%p8776_p6)
}
  0x54   :  { %s8780_s7 = scalar_lea.vmem %s135_s3, 16  ;;  %s8784_s21 = scalar_lea.vmem %s135_s3, 32 }
  0x55   :  { %p8781_p7 = scmp.ne.s32.totalorder %s135_s3, %s8780_s7  ;;  %p8785_p8 = scmp.lt.s32.totalorder %s135_s3, %s135_s3 }
  0x56   :  { %p8786_p9 = scmp.lt.s32.totalorder %s8784_s21, %s8780_s7 }
  0x58   :  { %p8787_p10 = por %p8786_p9, %p8785_p8 }
  0x5a   :  { %p8788_p11 = pnand %p8787_p10, %p8781_p7 }
  0x5c   :  { %8791 = shalt.err (!%p8788_p11)
}
  0x5d   :  { %137 = dma.hbm_to_vmem [thread:$0]  %s10090_s9, 16, %s135_s3, [#allocation19]  }
  0x5e   :  { %s8792_s30 = scalar_lea.hbm %s10081_s0, 1024 }
  0x5f   :  { %p8793_p12 = scmp.ne.s32.totalorder %s10081_s0, %s8792_s30  ;;  %p8796_p13 = scmp.lt.u32.totalorder %s8792_s30, %s10081_s0 }
  0x61   :  { %p8798_p0 = pnand %p8796_p13, %p8793_p12 }
  0x63   :  { %8801 = shalt.err (!%p8798_p0)
}
  0x64   :  { %s8802_s22 = scalar_lea.vmem %s9146_s16, 1024  ;;  %p8807_p2 = scmp.lt.s32.totalorder %s9146_s16, %s9146_s16 }
  0x65   :  { %p8803_p1 = scmp.ne.s32.totalorder %s9146_s16, %s8802_s22  ;;  %p8808_p3 = scmp.lt.s32.totalorder %s8802_s22, %s8802_s22 }
  0x67   :  { %p8809_p4 = por %p8808_p3, %p8807_p2 }
  0x69   :  { %p8810_p5 = pnand %p8809_p4, %p8803_p1 }
  0x6b   :  { %8813 = shalt.err (!%p8810_p5)
}
  0x6c   :  { %s8994_s9 = smov 128   ;;  %s8995_s3 = smov 8  }
  0x6d   :  { %39 = dma.hbm_to_vmem [thread:$0]  %s10081_s0, 1024, %s9146_s16, [#allocation4], %s8994_s9, %s8994_s9, %s8995_s3  }
  0x6e   :  { %s8996_s25 = smov [#allocation8]   ;;  %s8997_s21 = smov [#allocation11]  }
  0x6f   :  { %s56_s7 = sshll.u32 %s8996_s25, 4  ;;  %s77_s27 = sshll.u32 %s8997_s21, 4  ;;  %s57_s7 = int_to_ptr.vmem [resolvable:$true] %s56_s7  ;;  %s9177_s27 = int_to_ptr.vmem [resolvable:$true] %s77_s27 }
  0x70   :  { %s8814_s29 = scalar_lea.hbm %s10083_s2, 128 }
  0x71   :  { %p8815_p6 = scmp.ne.s32.totalorder %s10083_s2, %s8814_s29  ;;  %p8818_p7 = scmp.lt.u32.totalorder %s8814_s29, %s10083_s2 }
  0x73   :  { %p8820_p8 = pnand %p8818_p7, %p8815_p6 }
  0x75   :  { %8823 = shalt.err (!%p8820_p8)
}
  0x76   :  { %s8824_s0 = scalar_lea.vmem %s57_s7, 128  ;;  %p8829_p10 = scmp.lt.s32.totalorder %s57_s7, %s57_s7 }
  0x77   :  { %p8825_p9 = scmp.ne.s32.totalorder %s57_s7, %s8824_s0  ;;  %p8830_p11 = scmp.lt.s32.totalorder %s8824_s0, %s8824_s0 }
  0x79   :  { %p8831_p12 = por %p8830_p11, %p8829_p10 }
  0x7b   :  { %p8832_p13 = pnand %p8831_p12, %p8825_p9 }
  0x7d   :  { %8835 = shalt.err (!%p8832_p13)
}
  0x7e   :  { %59 = dma.hbm_to_vmem [thread:$0]  %s10083_s2, 128, %s57_s7, [#allocation7]  }
  0x7f   :  { %s8836_s3 = scalar_lea.hbm %s10085_s4, 3072 }
  0x80   :  { %p8837_p0 = scmp.ne.s32.totalorder %s10085_s4, %s8836_s3  ;;  %p8840_p1 = scmp.lt.u32.totalorder %s8836_s3, %s10085_s4 }
  0x82   :  { %p8842_p2 = pnand %p8840_p1, %p8837_p0 }
  0x84   :  { %8845 = shalt.err (!%p8842_p2)
}
  0x85   :  { %s8846_s5 = scalar_lea.vmem %s9177_s27, 3072  ;;  %p8851_p4 = scmp.lt.s32.totalorder %s9177_s27, %s9177_s27 }
  0x86   :  { %p8847_p3 = scmp.ne.s32.totalorder %s9177_s27, %s8846_s5  ;;  %p8852_p5 = scmp.lt.s32.totalorder %s8846_s5, %s8846_s5 }
  0x88   :  { %p8853_p6 = por %p8852_p5, %p8851_p4 }
  0x8a   :  { %p8854_p7 = pnand %p8853_p6, %p8847_p3 }
  0x8c   :  { %8857 = shalt.err (!%p8854_p7)
}
  0x8d   :  { %83 = dma.hbm_to_vmem [thread:$0]  %s10085_s4, 3072, %s9177_s27, [#allocation10], %s8990_s28, %s8990_s28, %s8991_s14  }
  0x8e   :  { %s8998_s19 = smov [#allocation14]   ;;  %s8999_s30 = smov [#allocation17]  }
  0x8f   :  { %s102_s29 = sshll.u32 %s8998_s19, 4  ;;  %s121_s15 = sshll.u32 %s8999_s30, 4  ;;  %s103_s29 = int_to_ptr.vmem [resolvable:$true] %s102_s29  ;;  %s9211_s15 = int_to_ptr.vmem [resolvable:$true] %s121_s15 }
  0x90   :  { %s8858_s0 = scalar_lea.hbm %s10087_s6, 48 }
  0x91   :  { %p8859_p8 = scmp.ne.s32.totalorder %s10087_s6, %s8858_s0  ;;  %p8862_p9 = scmp.lt.u32.totalorder %s8858_s0, %s10087_s6 }
  0x93   :  { %p8864_p10 = pnand %p8862_p9, %p8859_p8 }
  0x95   :  { %8867 = shalt.err (!%p8864_p10)
}
  0x96   :  { %s8868_s4 = scalar_lea.vmem %s103_s29, 48  ;;  %s8872_s28 = scalar_lea.vmem %s103_s29, 64 }
  0x97   :  { %p8869_p11 = scmp.ne.s32.totalorder %s103_s29, %s8868_s4  ;;  %p8873_p12 = scmp.lt.s32.totalorder %s103_s29, %s103_s29 }
  0x98   :  { %p8874_p13 = scmp.lt.s32.totalorder %s8872_s28, %s8868_s4 }
  0x9a   :  { %p8875_p0 = por %p8874_p13, %p8873_p12 }
  0x9c   :  { %p8876_p1 = pnand %p8875_p0, %p8869_p11 }
  0x9e   :  { %8879 = shalt.err (!%p8876_p1)
}
  0x9f   :  { %105 = dma.hbm_to_vmem [thread:$0]  %s10087_s6, 48, %s103_s29, [#allocation13]  }
  0xa0   :  { %s8880_s24 = scalar_lea.hbm %s10089_s8, 2048 }
  0xa1   :  { %p8881_p2 = scmp.ne.s32.totalorder %s10089_s8, %s8880_s24  ;;  %p8884_p3 = scmp.lt.u32.totalorder %s8880_s24, %s10089_s8 }
  0xa3   :  { %p8886_p4 = pnand %p8884_p3, %p8881_p2 }
  0xa5   :  { %8889 = shalt.err (!%p8886_p4)
}
  0xa6   :  { %s8890_s7 = scalar_lea.vmem %s9211_s15, 2048  ;;  %p8895_p6 = scmp.lt.s32.totalorder %s9211_s15, %s9211_s15 }
  0xa7   :  { %p8891_p5 = scmp.ne.s32.totalorder %s9211_s15, %s8890_s7  ;;  %p8896_p7 = scmp.lt.s32.totalorder %s8890_s7, %s8890_s7 }
  0xa9   :  { %p8897_p8 = por %p8896_p7, %p8895_p6 }
  0xab   :  { %p8898_p9 = pnand %p8897_p8, %p8891_p5 }
  0xad   :  { %8901 = shalt.err (!%p8898_p9)
}
  0xae   :  { %127 = dma.hbm_to_vmem [thread:$0]  %s10089_s8, 2048, %s9211_s15, [#allocation16], %s8986_s1, %s8986_s1, %s8987_s26  }
  0xaf   :  { %s9000_s29 = smov [#allocation20]   ;;  %s9001_s17 = smov [#allocation21]  }
  0xb0   :  { %s143_s30 = sshll.u32 %s9000_s29, 4  ;;  %s156_s18 = sshll.u32 %s9001_s17, 4  ;;  %s144_s30 = int_to_ptr.vmem [resolvable:$true] %s143_s30  ;;  %s157_s18 = int_to_ptr.vmem [resolvable:$true] %s156_s18 }
  0xb1   :  { %s8902_s20 = scalar_lea.hbm %s10091_s10, 1024 }
  0xb2   :  { %p8903_p10 = scmp.ne.s32.totalorder %s10091_s10, %s8902_s20  ;;  %p8906_p11 = scmp.lt.u32.totalorder %s8902_s20, %s10091_s10 }
  0xb4   :  { %p8908_p12 = pnand %p8906_p11, %p8903_p10 }
  0xb6   :  { %8911 = shalt.err (!%p8908_p12)
}
  0xb7   :  { %s8912_s8 = scalar_lea.vmem %s144_s30, 1024  ;;  %p8917_p0 = scmp.lt.s32.totalorder %s144_s30, %s144_s30 }
  0xb8   :  { %p8913_p13 = scmp.ne.s32.totalorder %s144_s30, %s8912_s8  ;;  %p8918_p1 = scmp.lt.s32.totalorder %s8912_s8, %s8912_s8 }
  0xba   :  { %p8919_p2 = por %p8918_p1, %p8917_p0 }
  0xbc   :  { %p8920_p3 = pnand %p8919_p2, %p8913_p13 }
  0xbe   :  { %8923 = shalt.err (!%p8920_p3)
}
  0xbf   :  { %149 = dma.hbm_to_vmem [thread:$0]  %s10091_s10, 1024, %s144_s30, [#allocation19], %s8986_s1, %s8986_s1, %s8987_s26  }
  0xc0   :  { %s8924_s23 = scalar_lea.hbm %s10092_s11, 16 }
  0xc1   :  { %p8925_p4 = scmp.ne.s32.totalorder %s10092_s11, %s8924_s23  ;;  %p8928_p5 = scmp.lt.u32.totalorder %s8924_s23, %s10092_s11 }
  0xc3   :  { %p8930_p6 = pnand %p8928_p5, %p8925_p4 }
  0xc5   :  { %8933 = shalt.err (!%p8930_p6)
}
  0xc6   :  { %s8934_s2 = scalar_lea.vmem %s157_s18, 16  ;;  %s8938_s7 = scalar_lea.vmem %s157_s18, 32 }
  0xc7   :  { %p8935_p7 = scmp.ne.s32.totalorder %s157_s18, %s8934_s2  ;;  %p8939_p8 = scmp.lt.s32.totalorder %s157_s18, %s157_s18 }
  0xc8   :  { %p8940_p9 = scmp.lt.s32.totalorder %s8938_s7, %s8934_s2 }
  0xca   :  { %p8941_p10 = por %p8940_p9, %p8939_p8 }
  0xcc   :  { %p8942_p11 = pnand %p8941_p10, %p8935_p7 }
  0xce   :  { %8945 = shalt.err (!%p8942_p11)
}
  0xcf   :  { %159 = dma.hbm_to_vmem [thread:$0]  %s10092_s11, 16, %s157_s18, [#allocation22]  }
  0xd0   :  { %8966 = dma.done.wait [#allocation4], 1024  }
  0xd1   :  { %8967 = vsyncadd [#allocation4], 4294966272 }
  0xd2   :  { %8968 = dma.done.wait [#allocation7], 144  }
  0xd3   :  { %8969 = vsyncadd [#allocation7], 4294967152 }
  0xd4   :  { %8970 = dma.done.wait [#allocation10], 4096  }
  0xd5   :  { %8971 = vsyncadd [#allocation10], 4294963200 }
  0xd6   :  { %8972 = dma.done.wait [#allocation13], 3120  }
  0xd7   :  { %8973 = vsyncadd [#allocation13], 4294964176 }
  0xd8   :  { %8974 = dma.done.wait [#allocation16], 2096  }
  0xd9   :  { %8975 = vsyncadd [#allocation16], 4294965200 }
  0xda   :  { %8976 = dma.done.wait [#allocation19], 1040  }
  0xdb   :  { %8977 = vsyncadd [#allocation19], 4294966256 }
  0xdc   :  { %8978 = dma.done.wait [#allocation22], 16  }
  0xdd   :  { %8979 = vsyncadd [#allocation22], 4294967280  ;;  %v10097_v0 = vmov 0.0   ;;  %v10095_v1 = vmov 0   ;;  %vm9004_vm0 = vmmov 0   ;;  %v8149_v54 = vld [vmem:[#allocation9] sm:$0xff]  }
  0xde   :  { %7480 = vmatprep.subr.bf16.mxu1 %v10097_v0  ;;  %411 = vmatprep.mubr.bf16.mxu0 %v10095_v1  ;;  %v8085_v2 = vld [vmem:[#allocation11 + $0x4] ss:$12 sps:$4 sm:$0xff]   ;;  %v8087_v3 = vld [vmem:[#allocation11] ss:$12 sps:$4 sm:$0xff]   ;;  %v8088_v4 = vld [vmem:[#allocation11 + $0x1c] ss:$12 sps:$4 sm:$0xff]  }
  0xdf   :  { %7496 = vmatprep.mubr.msk.bf16.mxu1 %vm9004_vm0, %v10097_v0  ;;  %379 = vmatprep.subr.bf16.mxu0 %v8085_v2  ;;  %v8090_v5 = vld [vmem:[#allocation11 + $0x18] ss:$12 sps:$4 sm:$0xff]   ;;  %v8091_v6 = vld [vmem:[#allocation11 + $0x34] ss:$12 sps:$4 sm:$0xff]   ;;  %v8093_v7 = vld [vmem:[#allocation11 + $0x30] ss:$12 sps:$4 sm:$0xff]  }
  0xe0   :  { %380 = vmatpush1.bf16.msra.mxu0 %v8087_v3  ;;  %v8094_v8 = vld [vmem:[#allocation11 + $0x4c] ss:$12 sps:$4 sm:$0xff]   ;;  %v8105_v9 = vld [vmem:[#allocation11 + $0x8] ss:$12 sps:$4 sm:$0xff]   ;;  %v8097_v11 = vld [vmem:[#allocation11 + $0x64] ss:$12 sps:$4 sm:$0xff]  }
  0xe1   :  { %381 = vmatprep.subr.bf16.mxu0 %v8088_v4  ;;  %v8096_v10 = vld [vmem:[#allocation11 + $0x48] ss:$12 sps:$4 sm:$0xff]   ;;  %7481 = vmatpush3.bf16.msra.mxu1 %v8105_v9  ;;  %v8109_v12 = vld [vmem:[#allocation11 + $0x20] ss:$12 sps:$4 sm:$0xff]   ;;  %v8111_v14 = vld [vmem:[#allocation11 + $0x38] ss:$12 sps:$4 sm:$0xff]   ;;  %v197_v4 = vlaneseq }
  0xe2   :  { %7482 = vmatprep.subr.bf16.mxu1 %v10097_v0  ;;  %v8099_v13 = vld [vmem:[#allocation11 + $0x60] ss:$12 sps:$4 sm:$0xff]   ;;  %v8100_v15 = vld [vmem:[#allocation11 + $0x7c] ss:$12 sps:$4 sm:$0xff]   ;;  %v8102_v16 = vld [vmem:[#allocation11 + $0x78] ss:$12 sps:$4 sm:$0xff]  }
  0xe3   :  { %v8115_v17 = vld [vmem:[#allocation11 + $0x50] ss:$12 sps:$4 sm:$0xff]   ;;  %v8103_v18 = vld [vmem:[#allocation11 + $0x94] ss:$12 sps:$4 sm:$0xff]   ;;  %v8107_v21 = vld [vmem:[#allocation11 + $0xac] ss:$12 sps:$4 sm:$0xff]  }
  0xe4   :  { %382 = vmatpush1.bf16.msra.mxu0 %v8090_v5  ;;  %v8106_v19 = vld [vmem:[#allocation11 + $0x90] ss:$12 sps:$4 sm:$0xff]   ;;  %v8119_v20 = vld [vmem:[#allocation11 + $0x68] ss:$12 sps:$4 sm:$0xff]   ;;  %v8123_v24 = vld [vmem:[#allocation11 + $0x80] ss:$12 sps:$4 sm:$0xff]  }
  0xe5   :  { %383 = vmatprep.subr.bf16.mxu0 %v8091_v6  ;;  %7483 = vmatpush3.bf16.msra.mxu1 %v8109_v12  ;;  %v8110_v22 = vld [vmem:[#allocation11 + $0xa8] ss:$12 sps:$4 sm:$0xff]   ;;  %v8114_v25 = vld [vmem:[#allocation12 + $0x4] ss:$12 sps:$4 sm:$0xff]   ;;  %v8112_v27 = vld [vmem:[#allocation12] ss:$12 sps:$4 sm:$0xff]  }
  0xe6   :  { %7484 = vmatprep.subr.bf16.mxu1 %v10097_v0  ;;  %v200_v23 = vld [vmem:[#allocation3 + $0x1] sm:$0x1]  ;;  %v8127_v28 = vld [vmem:[#allocation11 + $0x98] ss:$12 sps:$4 sm:$0xff]   ;;  %v8118_v29 = vld [vmem:[#allocation12 + $0x1c] ss:$12 sps:$4 sm:$0xff]  }
  0xe7   :  { %v201_v26 = vpack.c.bf16 %v200_v23, %v200_v23  ;;  %v8116_v30 = vld [vmem:[#allocation12 + $0x18] ss:$12 sps:$4 sm:$0xff]   ;;  %v8131_v31 = vld [vmem:[#allocation11 + $0xb0] ss:$12 sps:$4 sm:$0xff]   ;;  %v8122_v32 = vld [vmem:[#allocation12 + $0x34] ss:$12 sps:$4 sm:$0xff]  }
  0xe8   :  { %384 = vmatpush1.bf16.msra.mxu0 %v8093_v7  ;;  %v8120_v33 = vld [vmem:[#allocation12 + $0x30] ss:$12 sps:$4 sm:$0xff]   ;;  %v8126_v34 = vld [vmem:[#allocation12 + $0x4c] ss:$12 sps:$4 sm:$0xff]   ;;  %v8138_v35 = vld [vmem:[#allocation12 + $0x8] ss:$12 sps:$4 sm:$0xff]  }
  0xe9   :  { %385 = vmatprep.subr.bf16.mxu0 %v8094_v8  ;;  %7485 = vmatpush3.bf16.msra.mxu1 %v8111_v14  ;;  %v8124_v36 = vld [vmem:[#allocation12 + $0x48] ss:$12 sps:$4 sm:$0xff]   ;;  %v8142_v37 = vld [vmem:[#allocation12 + $0x20] ss:$12 sps:$4 sm:$0xff]   ;;  %v8130_v38 = vld [vmem:[#allocation12 + $0x64] ss:$12 sps:$4 sm:$0xff]  }
  0xea   :  { %7486 = vmatprep.subr.bf16.mxu1 %v10097_v0  ;;  %v8128_v39 = vld [vmem:[#allocation12 + $0x60] ss:$12 sps:$4 sm:$0xff]   ;;  %v8143_v40 = vld [vmem:[#allocation12 + $0x38] ss:$12 sps:$4 sm:$0xff]   ;;  %v8134_v41 = vld [vmem:[#allocation12 + $0x7c] ss:$12 sps:$4 sm:$0xff]  }
  0xeb   :  { %v8132_v42 = vld [vmem:[#allocation12 + $0x78] ss:$12 sps:$4 sm:$0xff]   ;;  %v8144_v43 = vld [vmem:[#allocation12 + $0x50] ss:$12 sps:$4 sm:$0xff]   ;;  %v8137_v44 = vld [vmem:[#allocation12 + $0x94] ss:$12 sps:$4 sm:$0xff]  }
  0xec   :  { %386 = vmatpush1.bf16.msra.mxu0 %v8096_v10  ;;  %v8135_v45 = vld [vmem:[#allocation12 + $0x90] ss:$12 sps:$4 sm:$0xff]   ;;  %v8145_v46 = vld [vmem:[#allocation12 + $0x68] ss:$12 sps:$4 sm:$0xff]   ;;  %v8141_v47 = vld [vmem:[#allocation12 + $0xac] ss:$12 sps:$4 sm:$0xff]  }
  0xed   :  { %387 = vmatprep.subr.bf16.mxu0 %v8097_v11  ;;  %7487 = vmatpush3.bf16.msra.mxu1 %v8115_v17  ;;  %v8139_v48 = vld [vmem:[#allocation12 + $0xa8] ss:$12 sps:$4 sm:$0xff]   ;;  %v8146_v50 = vld [vmem:[#allocation12 + $0x80] ss:$12 sps:$4 sm:$0xff]   ;;  %v8147_v51 = vld [vmem:[#allocation12 + $0x98] ss:$12 sps:$4 sm:$0xff]  }
  0xee   :  { %7488 = vmatprep.subr.bf16.mxu1 %v10097_v0  ;;  %v199_v49 = vld [vmem:[#allocation6] sm:$0x1]  ;;  %v8148_v53 = vld [vmem:[#allocation12 + $0xb0] ss:$12 sps:$4 sm:$0xff]   ;;  %v8150_v55 = vld [vmem:[#allocation9 + $0x8] sm:$0xff]   ;;  %v365_v5 = vshrl.u32 %v197_v4, 7 }
  0xef   :  { %v460_v52 = vpack.c.bf16 %v199_v49, %v199_v49  ;;  %v8151_v56 = vld [vmem:[#allocation9 + $0x10] sm:$0xff]   ;;  %v8152_v57 = vld [vmem:[#allocation9 + $0x18] sm:$0xff]   ;;  %v8153_v58 = vld [vmem:[#allocation9 + $0x20] sm:$0xff]   ;;  %vm9322_vm1 = vcmp.lt.s32.totalorder %v197_v4, 128  ;;  %vm845_vm2 = vcmask 57344   ;;  %vm858_vm3 = vcmask 64512  }
  0xf0   :  { %388 = vmatpush1.bf16.msra.mxu0 %v8099_v13  ;;  %v8154_v59 = vld [vmem:[#allocation9 + $0x28] sm:$0xff]   ;;  %v8155_v60 = vld [vmem:[#allocation9 + $0x30] sm:$0xff]   ;;  %v8156_v61 = vld [vmem:[#allocation9 + $0x38] sm:$0xff]   ;;  %v9309_v6 = vsub.s32 0, %v365_v5  ;;  %v9311_v9 = vsub.s32 1, %v365_v5  ;;  %vm1228_vm4 = vcmask 1040384  }
  0xf1   :  { %389 = vmatprep.subr.bf16.mxu0 %v8100_v15  ;;  %7489 = vmatpush3.bf16.msra.mxu1 %v8119_v20  ;;  %v493_v7 = vld [vmem:[#allocation15] sm:$0x7]  ;;  %v234_v8 = vld [vmem:[#allocation14] sm:$0x7]  ;;  %s8946_s3 = scalar_lea.hbm %s10093_s12, 16 }
  0xf2   :  { %7490 = vmatprep.subr.bf16.mxu1 %v10097_v0  ;;  %v367_v10 = vrot.slane %v234_v8, %v9309_v6  ;;  %v626_v11 = vrot.slane %v493_v7, %v9309_v6  ;;  %v371_v12 = vrot.slane %v234_v8, %v9311_v9  ;;  %v630_v13 = vrot.slane %v493_v7, %v9311_v9  ;;  %p8947_p12 = scmp.ne.s32.totalorder %s10093_s12, %s8946_s3  ;;  %p8950_p13 = scmp.lt.u32.totalorder %s8946_s3, %s10093_s12 }
  0xf4   :  { %390 = vmatpush1.bf16.msra.mxu0 %v8102_v16  ;;  %v7990_v14 = vadd.f32 %v626_v11, %v367_v10  ;;  %v7992_v16 = vadd.f32 %v630_v13, %v371_v12  ;;  %v8163_v10 = vld [vmem:[#allocation17 + $0x58] sm:$0xff]   ;;  %v8165_v12 = vld [vmem:[#allocation17 + $0x60] sm:$0xff]   ;;  %p8952_p0 = pnand %p8950_p13, %p8947_p12 }
  0xf5   :  { %391 = vmatprep.subr.bf16.mxu0 %v8103_v18  ;;  %7491 = vmatpush3.bf16.msra.mxu1 %v8123_v24  ;;  %v8164_v11 = vld [vmem:[#allocation17 + $0x18] sm:$0xff]   ;;  %v8166_v13 = vld [vmem:[#allocation17 + $0x20] sm:$0xff]  }
  0xf6   :  { %7492 = vmatprep.subr.bf16.mxu1 %v10097_v0 }
  0xf8   :  { %392 = vmatpush1.bf16.msra.mxu0 %v8106_v19 }
  0xf9   :  { %393 = vmatprep.subr.bf16.mxu0 %v8107_v21  ;;  %7493 = vmatpush3.bf16.msra.mxu1 %v8127_v28 }
  0xfa   :  { %7494 = vmatprep.subr.bf16.mxu1 %v10097_v0 }
  0xfc   :  { %394 = vmatpush1.bf16.msra.mxu0 %v8110_v22 }
  0xfd   :  { %638 = vmatprep.subr.bf16.mxu0 %v8114_v25  ;;  %7495 = vmatpush3.bf16.msra.mxu1 %v8131_v31 }
  0xfe   :  { %7500 = vmatprep.subr.bf16.mxu1 %v10097_v0 }
  0xff   :  { %412 = vmatmul.mubr.bf16.vlgmr.msra.gmra.mrb[0].mxu0 %v201_v26 }
 0x100   :  { %639 = vmatpush1.bf16.msra.mxu0 %v8112_v27  ;;  %670 = vmatprep.mubr.bf16.mxu0 %v10095_v1 }
 0x101   :  { %640 = vmatprep.subr.bf16.mxu0 %v8118_v29  ;;  %7497 = vmatmul.mubr.bf16.vlgmr.msra.gmra.mrb[0].mxu1 %v201_v26 }
 0x102   :  { %7501 = vmatpush3.bf16.msra.mxu1 %v8138_v35  ;;  %7516 = vmatprep.mubr.msk.bf16.mxu1 %vm9004_vm0, %v10097_v0 }
 0x103   :  { %7502 = vmatprep.subr.bf16.mxu1 %v10097_v0 }
 0x104   :  { %641 = vmatpush1.bf16.msra.mxu0 %v8116_v30  ;;  %v9317_v30 = vsub.s32 2, %v365_v5  ;;  %v8160_v5 = vld [vmem:[#allocation17 + $0x8] sm:$0xff]  }
 0x105   :  { %642 = vmatprep.subr.bf16.mxu0 %v8122_v32 }
 0x106   :  { %7503 = vmatpush3.bf16.msra.mxu1 %v8142_v37  ;;  %v634_v31 = vrot.slane %v493_v7, %v9317_v30  ;;  %v8161_v7 = vld [vmem:[#allocation17 + $0x50] sm:$0xff]  }
 0x107   :  { %7504 = vmatprep.subr.bf16.mxu1 %v10097_v0 }
 0x108   :  { %643 = vmatpush1.bf16.msra.mxu0 %v8120_v33  ;;  %v375_v33 = vrot.slane %v234_v8, %v9317_v30  ;;  %v8162_v8 = vld [vmem:[#allocation17 + $0x10] sm:$0xff]  }
 0x109   :  { %644 = vmatprep.subr.bf16.mxu0 %v8126_v34 }
 0x10a   :  { %7505 = vmatpush3.bf16.msra.mxu1 %v8143_v40 }
 0x10b   :  { %7506 = vmatprep.subr.bf16.mxu1 %v10097_v0 }
 0x10c   :  { %645 = vmatpush1.bf16.msra.mxu0 %v8124_v36 }
 0x10d   :  { %646 = vmatprep.subr.bf16.mxu0 %v8130_v38 }
 0x10e   :  { %7507 = vmatpush3.bf16.msra.mxu1 %v8144_v43 }
 0x10f   :  { %7508 = vmatprep.subr.bf16.mxu1 %v10097_v0 }
 0x110   :  { %647 = vmatpush1.bf16.msra.mxu0 %v8128_v39 }
 0x111   :  { %648 = vmatprep.subr.bf16.mxu0 %v8134_v41 }
 0x112   :  { %7509 = vmatpush3.bf16.msra.mxu1 %v8145_v46  ;;  %v8514_v46 = vld [vmem:[#allocation20 + $0x28] sm:$0xff]  }
 0x113   :  { %7510 = vmatprep.subr.bf16.mxu1 %v10097_v0 }
 0x114   :  { %649 = vmatpush1.bf16.msra.mxu0 %v8132_v42 }
 0x115   :  { %650 = vmatprep.subr.bf16.mxu0 %v8137_v44  ;;  %v8649_v44 = vld [vmem:[#allocation6] sm:$0x1] }
 0x116   :  { %7511 = vmatpush3.bf16.msra.mxu1 %v8146_v50 }
 0x117   :  { %7512 = vmatprep.subr.bf16.mxu1 %v10097_v0 }
 0x118   :  { %651 = vmatpush1.bf16.msra.mxu0 %v8135_v45 }
 0x119   :  { %652 = vmatprep.subr.bf16.mxu0 %v8141_v47 }
 0x11a   :  { %7513 = vmatpush3.bf16.msra.mxu1 %v8147_v51 }
 0x11b   :  { %7514 = vmatprep.subr.bf16.mxu1 %v10097_v0 }
 0x11c   :  { %653 = vmatpush1.bf16.msra.mxu0 %v8139_v48 }
 0x11d   :  { %7520 = vmatprep.subr.bf16.mxu0 %v10097_v0 }
 0x11e   :  { %7515 = vmatpush3.bf16.msra.mxu1 %v8148_v53 }
 0x11f   :  { %671 = vmatmul.mubr.bf16.vlgmr.msra.gmra.mrb[0].mxu0 %v460_v52  ;;  %7540 = vmatprep.subr.mxu1 %v10097_v0 }
 0x120   :  { %7536 = vmatprep.mubr.msk.bf16.mxu0 %vm9004_vm0, %v10097_v0  ;;  %7521 = vmatpush3.bf16.msra.mxu0 %v8149_v54 }
 0x121   :  { %7517 = vmatmul.mubr.bf16.vlgmr.msra.gmra.mrb[4].mxu1 %v460_v52  ;;  %7522 = vmatprep.subr.bf16.mxu0 %v10097_v0 }
 0x122   :  { %7542 = vmatprep.mubr.msk.f32.mxu1 %vm9004_vm0, %v10097_v0 }
 0x124   :  { %7523 = vmatpush3.bf16.msra.mxu0 %v8150_v55 }
 0x125   :  { %7524 = vmatprep.subr.bf16.mxu0 %v10097_v0 }
 0x128   :  { %7525 = vmatpush3.bf16.msra.mxu0 %v8151_v56 }
 0x129   :  { %7526 = vmatprep.subr.bf16.mxu0 %v10097_v0 }
 0x12c   :  { %7527 = vmatpush3.bf16.msra.mxu0 %v8152_v57 }
 0x12d   :  { %7528 = vmatprep.subr.bf16.mxu0 %v10097_v0 }
 0x130   :  { %7529 = vmatpush3.bf16.msra.mxu0 %v8153_v58 }
 0x131   :  { %7530 = vmatprep.subr.bf16.mxu0 %v10097_v0 }
 0x134   :  { %7531 = vmatpush3.bf16.msra.mxu0 %v8154_v59  ;;  %v9340_v59 = vld [vmem:[#allocation8] sm:$0xff] }
 0x135   :  { %7532 = vmatprep.subr.bf16.mxu0 %v10097_v0  ;;  %7541 = vmatpush3.msra.mxu1 %v9340_v59 }
 0x138   :  { %7533 = vmatpush3.bf16.msra.mxu0 %v8155_v60  ;;  %v8157_v60 = vld [vmem:[#allocation17 + $0x40] sm:$0xff]  }
 0x139   :  { %7534 = vmatprep.subr.bf16.mxu0 %v10097_v0  ;;  %7149 = vmatprep.subr.bf16.mxu1 %v8157_v60 }
 0x13c   :  { %7535 = vmatpush3.bf16.msra.mxu0 %v8156_v61 }
 0x13d   :  { %7545 = vmatprep.subr.bf16.mxu0 %v10097_v0 }
 0x1d4   :  { %v454_v62 = vpop.f32.mrb[0].mxu1 }
 0x1d5   :  { %v7498_v63 = vpop.f32.mrb[1].mxu1  ;;  %v455_v37 = vadd.f32 %v454_v62, %v375_v33  ;;  %v8652_v33 = vld [vmem:[#allocation11 + $0x1c] ss:$12 sps:$4 sm:$0xff]  }
 0x1d6   :  { %v457_v2 = vpop.f32.mrb[2].mxu1  ;;  %v8158_v63 = vld [vmem:[#allocation17] sm:$0xff]  }
 0x1d7   :  { %v7499_v3 = vpop.f32.mrb[3].mxu1 }
 0x1d8   :  { %v8159_v3 = vld [vmem:[#allocation17 + $0x48] sm:$0xff]  }
 0x1f2   :  { %v672_v15 = vpop.f32.mrb[0].mxu0 }
 0x1f3   :  { %v7991_v17 = vadd.f32 %v7990_v14, %v672_v15  ;;  %v674_v18 = vpop.f32.mrb[1].mxu0  ;;  %v8167_v14 = vld [vmem:[#allocation17 + $0x68] sm:$0xff]  }
 0x1f4   :  { %v676_v19 = vpop.f32.mrb[2].mxu0  ;;  %v7993_v22 = vadd.f32 %v7992_v16, %v674_v18  ;;  %v713_v24 = vpop.f32.mrb[4].mxu1  ;;  %v8168_v15 = vld [vmem:[#allocation17 + $0x28] sm:$0xff]   ;;  %v8169_v16 = vld [vmem:[#allocation17 + $0x70] sm:$0xff]   ;;  %v8171_v18 = vld [vmem:[#allocation17 + $0x78] sm:$0xff]  }
 0x1f5   :  { %v6670_v20 = vmul.f32 -1.442695, %v7991_v17  ;;  %v677_v21 = vpop.f32.mrb[3].mxu0  ;;  %v7518_v25 = vpop.f32.mrb[5].mxu1  ;;  %v714_v35 = vadd.f32 %v713_v24, %v634_v31  ;;  %v8170_v17 = vld [vmem:[#allocation17 + $0x30] sm:$0xff]   ;;  %v8172_v19 = vld [vmem:[#allocation17 + $0x38] sm:$0xff]  }
 0x1f6   :  { %v6671_v23 = vmul.f32 -1.442695, %v7993_v22  ;;  %v716_v26 = vpop.f32.mrb[6].mxu1  ;;  %v8173_v21 = vld [vmem:[#allocation20] sm:$0xff]   ;;  %v8174_v22 = vld [vmem:[#allocation20 + $0x8] sm:$0xff]  }
 0x1f7   :  { %8517 = vpow2.f32 %v6670_v20  ;;  %v7519_v27 = vpop.f32.mrb[7].mxu1  ;;  %v8650_v20 = vld [vmem:[#allocation11 + $0x4] ss:$12 sps:$4 sm:$0xff]  }
 0x1f8   :  { %8519 = vpow2.f32 %v6671_v23  ;;  %v8175_v23 = vld [vmem:[#allocation20 + $0x10] sm:$0xff]  }
 0x201   :  { %v8518_v28 = vpop.eup %8517 }
 0x202   :  { %v723_v29 = vadd.f32 1.0, %v8518_v28  ;;  %v8520_v32 = vpop.eup %8519 }
 0x203   :  { %v730_v34 = vadd.f32 1.0, %v8520_v32  ;;  %v8651_v32 = vld [vmem:[#allocation11] ss:$12 sps:$4 sm:$0xff]  }
 0x204   :  { %8521 = vrcp.f32 %v723_v29 }
 0x205   :  { %8523 = vrcp.f32 %v730_v34  ;;  %v8653_v34 = vld [vmem:[#allocation11 + $0x18] ss:$12 sps:$4 sm:$0xff]  }
 0x20e   :  { %v8522_v36 = vpop.eup %8521 }
 0x20f   :  { %v733_v38 = vmul.f32 %v8522_v36, %v714_v35  ;;  %v8524_v40 = vpop.eup %8523  ;;  %v8654_v35 = vld [vmem:[#allocation11 + $0x34] ss:$12 sps:$4 sm:$0xff]   ;;  %v8655_v36 = vld [vmem:[#allocation11 + $0x30] ss:$12 sps:$4 sm:$0xff]  }
 0x210   :  { %v736_v41 = vsub.f32 1.0, %v8524_v40  ;;  %v738_v45 = vmul.f32 %v8649_v44, %v8524_v40  ;;  %v8659_v40 = vld [vmem:[#allocation11 + $0x60] ss:$12 sps:$4 sm:$0xff]   ;;  %v8663_v44 = vld [vmem:[#allocation11 + $0x90] ss:$12 sps:$4 sm:$0xff]  }
 0x211   :  { %v734_v39 = vadd.f32 %v733_v38, %v455_v37  ;;  %v8656_v37 = vld [vmem:[#allocation11 + $0x4c] ss:$12 sps:$4 sm:$0xff]   ;;  %v8657_v38 = vld [vmem:[#allocation11 + $0x48] ss:$12 sps:$4 sm:$0xff]  }
 0x213   :  { %8525 = vtanh.f32 %v734_v39  ;;  %v8658_v39 = vld [vmem:[#allocation11 + $0x64] ss:$12 sps:$4 sm:$0xff]  }
 0x21d   :  { %v8526_v42 = vpop.eup %8525 }
 0x21e   :  { %v737_v43 = vmul.f32 %v8526_v42, %v736_v41  ;;  %v8660_v41 = vld [vmem:[#allocation11 + $0x7c] ss:$12 sps:$4 sm:$0xff]   ;;  %v8661_v42 = vld [vmem:[#allocation11 + $0x78] ss:$12 sps:$4 sm:$0xff]  }
 0x220   :  { %v9326_v47 = vadd.f32 %v738_v45, %v737_v43  ;;  %v8662_v43 = vld [vmem:[#allocation11 + $0x94] ss:$12 sps:$4 sm:$0xff]   ;;  %v8664_v45 = vld [vmem:[#allocation11 + $0xac] ss:$12 sps:$4 sm:$0xff]  }
 0x222   :  { %v9330_v48 = vpack.c.bf16 %v9326_v47, %v9326_v47  ;;  %936 = vst.msk [vmem:[#allocation2] sm:$0x1] %vm9322_vm1, %v9326_v47 }
 0x224   :  { %7537 = vmatmul.mubr.bf16.vlgmr.msra.gmra.mrb[4].mxu0 %v9330_v48 }
 0x225   :  { %7561 = vmatprep.mubr.msk.bf16.mxu0 %vm9004_vm0, %v10097_v0  ;;  %7546 = vmatpush3.bf16.msra.mxu0 %v8173_v21 }
 0x226   :  { %7547 = vmatprep.subr.bf16.mxu0 %v10097_v0 }
 0x229   :  { %7548 = vmatpush3.bf16.msra.mxu0 %v8174_v22 }
 0x22a   :  { %7549 = vmatprep.subr.bf16.mxu0 %v10097_v0 }
 0x22d   :  { %7550 = vmatpush3.bf16.msra.mxu0 %v8175_v23 }
 0x22e   :  { %7551 = vmatprep.subr.bf16.mxu0 %v10097_v0 }
 0x2f7   :  { %v839_v49 = vpop.f32.mrb[4].mxu0 }
 0x2f8   :  { %v7538_v50 = vpop.f32.mrb[5].mxu0  ;;  %v846_v51 = vsel %vm845_vm2, %v839_v49, -inf }
 0x2f9   :  { %847 = vmax.xlane.f32.xlu0 %v846_v51  ;;  %v842_v52 = vpop.f32.mrb[6].mxu0  ;;  %v8666_v50 = vld [vmem:[#allocation12 + $0x4] ss:$12 sps:$4 sm:$0xff]  }
 0x2fa   :  { %v7539_v53 = vpop.f32.mrb[7].mxu0  ;;  %v8176_v51 = vld [vmem:[#allocation20 + $0x18] sm:$0xff]   ;;  %v8177_v52 = vld [vmem:[#allocation20 + $0x20] sm:$0xff]  }
 0x2fb   :  { %7552 = vmatpush3.bf16.msra.mxu0 %v8176_v51  ;;  %v8178_v53 = vld [vmem:[#allocation20 + $0x28] sm:$0xff]  }
 0x2fc   :  { %7553 = vmatprep.subr.bf16.mxu0 %v10097_v0  ;;  %v8192_v51 = vld [vmem:[#allocation12 + $0x50] ss:$12 sps:$4 sm:$0xff]  }
 0x2ff   :  { %7554 = vmatpush3.bf16.msra.mxu0 %v8177_v52  ;;  %v8672_v52 = vld [vmem:[#allocation12 + $0x4c] ss:$12 sps:$4 sm:$0xff]  }
 0x300   :  { %7555 = vmatprep.subr.bf16.mxu0 %v10097_v0 }
 0x303   :  { %7556 = vmatpush3.bf16.msra.mxu0 %v8178_v53  ;;  %v8673_v53 = vld [vmem:[#allocation12 + $0x48] ss:$12 sps:$4 sm:$0xff]  }
 0x304   :  { %7557 = vmatprep.subr.bf16.mxu0 %v10097_v0 }
 0x386   :  { %v848_v54 = vpop.xlane.xlu0 %847 }
 0x387   :  { %v849_v55 = vsub.f32 %v839_v49, %v848_v54  ;;  %v8665_v49 = vld [vmem:[#allocation11 + $0xa8] ss:$12 sps:$4 sm:$0xff]   ;;  %v8179_v54 = vld [vmem:[#allocation20 + $0x30] sm:$0xff]  }
 0x388   :  { %7558 = vmatpush3.bf16.msra.mxu0 %v8179_v54  ;;  %v8193_v54 = vld [vmem:[#allocation12 + $0x68] ss:$12 sps:$4 sm:$0xff]  }
 0x389   :  { %v850_v56 = vmul.f32 1.442695, %v849_v55  ;;  %7559 = vmatprep.subr.bf16.mxu0 %v10097_v0  ;;  %v8180_v55 = vld [vmem:[#allocation20 + $0x38] sm:$0xff]  }
 0x38b   :  { %8527 = vpow2.f32 %v850_v56 }
 0x38c   :  { %7560 = vmatpush3.bf16.msra.mxu0 %v8180_v55  ;;  %v8674_v55 = vld [vmem:[#allocation12 + $0x64] ss:$12 sps:$4 sm:$0xff]  }
 0x38d   :  { %7565 = vmatprep.subr.bf16.mxu0 %v10097_v0 }
 0x395   :  { %v8528_v57 = vpop.eup %8527 }
 0x396   :  { %v852_v58 = vsel %vm845_vm2, %v8528_v57, 0.0 }
 0x397   :  { %853 = vadd.xlane.f32.xlu0 %v852_v58 }
 0x424   :  { %v854_v61 = vpop.xlane.xlu0 %853 }
 0x425   :  { %8529 = vrcp.f32 %v854_v61 }
 0x42f   :  { %v8530_v62 = vpop.eup %8529 }
 0x430   :  { %v856_v2 = vmul.f32 %v8530_v62, %v8528_v57  ;;  %v984_v57 = vld [vmem:[#allocation18] sm:$0x1] }
 0x432   :  { %7543 = vmatmul.mubr.msk.f32.vlgmr.msra.gmra.mrb[8].mxu1 %vm858_vm3, %v856_v2 }
 0x433   :  { %7150 = vmatpush3.bf16.msra.mxu1 %v8158_v63 }
 0x434   :  { %7151 = vmatprep.subr.bf16.mxu1 %v8159_v3 }
 0x437   :  { %7152 = vmatpush3.bf16.msra.mxu1 %v8160_v5  ;;  %v1139_v5 = vld [vmem:[#allocation21] sm:$0x1] }
 0x438   :  { %7153 = vmatprep.subr.bf16.mxu1 %v8161_v7 }
 0x43b   :  { %7154 = vmatpush3.bf16.msra.mxu1 %v8162_v8 }
 0x43c   :  { %7155 = vmatprep.subr.bf16.mxu1 %v8163_v10 }
 0x43f   :  { %7156 = vmatpush3.bf16.msra.mxu1 %v8164_v11 }
 0x440   :  { %7157 = vmatprep.subr.bf16.mxu1 %v8165_v12 }
 0x443   :  { %7158 = vmatpush3.bf16.msra.mxu1 %v8166_v13 }
 0x444   :  { %7159 = vmatprep.subr.bf16.mxu1 %v8167_v14  ;;  %v9364_v14 = vand.u32 127, %v197_v4  ;;  %v8181_v4 = vld [vmem:[#allocation11 + $0x8] ss:$12 sps:$4 sm:$0xff]  }
 0x447   :  { %7160 = vmatpush3.bf16.msra.mxu1 %v8168_v15 }
 0x448   :  { %7161 = vmatprep.subr.bf16.mxu1 %v8169_v16 }
 0x44b   :  { %7162 = vmatpush3.bf16.msra.mxu1 %v8170_v17 }
 0x44c   :  { %7163 = vmatprep.subr.bf16.mxu1 %v8171_v18 }
 0x44f   :  { %7164 = vmatpush3.bf16.msra.mxu1 %v8172_v19 }
 0x450   :  { %1450 = vmatprep.subr.bf16.mxu1 %v8650_v20 }
 0x505   :  { %v928_v24 = vpop.f32.mrb[8].mxu1 }
 0x506   :  { %937 = vst.msk [vmem:[#allocation2 + $0x1] sm:$0x1] %vm9322_vm1, %v928_v24  ;;  %v7544_v25 = vpop.f32.mrb[9].mxu1  ;;  %v8182_v24 = vld [vmem:[#allocation11 + $0x20] ss:$12 sps:$4 sm:$0xff]  }
 0x507   :  { %v8183_v25 = vld [vmem:[#allocation11 + $0x38] ss:$12 sps:$4 sm:$0xff]  }
 0x50d   :  { %v938_v26 = vld [vmem:[#allocation2] sm:$0x3] }
 0x50e   :  { %v947_v27 = vrot.slane %v938_v26, %v9311_v9  ;;  %v943_v28 = vrot.slane %v938_v26, %v9309_v6  ;;  %v8184_v26 = vld [vmem:[#allocation11 + $0x50] ss:$12 sps:$4 sm:$0xff]  }
 0x510   :  { %v951_v29 = vpack.c.bf16 %v947_v27, %v947_v27  ;;  %v950_v31 = vpack.c.bf16 %v943_v28, %v943_v28  ;;  %v8185_v27 = vld [vmem:[#allocation11 + $0x68] ss:$12 sps:$4 sm:$0xff]   ;;  %v8186_v28 = vld [vmem:[#allocation11 + $0x80] ss:$12 sps:$4 sm:$0xff]  }
 0x512   :  { %1113 = vmatprep.mubr.bf16.mxu1 %v951_v29  ;;  %v8187_v29 = vld [vmem:[#allocation11 + $0x98] ss:$12 sps:$4 sm:$0xff]  }
 0x513   :  { %1114 = vmatmul.mubr.bf16.vlgmr.msra.gmra.mrb[12].mxu1 %v950_v31  ;;  %v8188_v31 = vld [vmem:[#allocation11 + $0xb0] ss:$12 sps:$4 sm:$0xff]  }
 0x514   :  { %1451 = vmatpush1.bf16.msra.mxu1 %v8651_v32  ;;  %1482 = vmatprep.mubr.bf16.mxu1 %v10095_v1 }
 0x515   :  { %1452 = vmatprep.subr.bf16.mxu1 %v8652_v33 }
 0x518   :  { %1453 = vmatpush1.bf16.msra.mxu1 %v8653_v34 }
 0x519   :  { %1454 = vmatprep.subr.bf16.mxu1 %v8654_v35 }
 0x51c   :  { %1455 = vmatpush1.bf16.msra.mxu1 %v8655_v36 }
 0x51d   :  { %1456 = vmatprep.subr.bf16.mxu1 %v8656_v37 }
 0x520   :  { %1457 = vmatpush1.bf16.msra.mxu1 %v8657_v38 }
 0x521   :  { %1458 = vmatprep.subr.bf16.mxu1 %v8658_v39  ;;  %v8189_v39 = vld [vmem:[#allocation12 + $0x8] ss:$12 sps:$4 sm:$0xff]  }
 0x524   :  { %1459 = vmatpush1.bf16.msra.mxu1 %v8659_v40 }
 0x525   :  { %1460 = vmatprep.subr.bf16.mxu1 %v8660_v41  ;;  %v8667_v41 = vld [vmem:[#allocation12] ss:$12 sps:$4 sm:$0xff]  }
 0x528   :  { %1461 = vmatpush1.bf16.msra.mxu1 %v8661_v42  ;;  %v8190_v42 = vld [vmem:[#allocation12 + $0x20] ss:$12 sps:$4 sm:$0xff]  }
 0x529   :  { %1462 = vmatprep.subr.bf16.mxu1 %v8662_v43  ;;  %v8668_v43 = vld [vmem:[#allocation12 + $0x1c] ss:$12 sps:$4 sm:$0xff]  }
 0x52c   :  { %1463 = vmatpush1.bf16.msra.mxu1 %v8663_v44  ;;  %v8669_v44 = vld [vmem:[#allocation12 + $0x18] ss:$12 sps:$4 sm:$0xff]  }
 0x52d   :  { %1464 = vmatprep.subr.bf16.mxu1 %v8664_v45  ;;  %v8191_v45 = vld [vmem:[#allocation12 + $0x38] ss:$12 sps:$4 sm:$0xff]  }
 0x530   :  { %1465 = vmatpush1.bf16.msra.mxu1 %v8665_v49  ;;  %v8670_v49 = vld [vmem:[#allocation12 + $0x34] ss:$12 sps:$4 sm:$0xff]  }
 0x531   :  { %1708 = vmatprep.subr.bf16.mxu1 %v8666_v50  ;;  %v8671_v50 = vld [vmem:[#allocation12 + $0x30] ss:$12 sps:$4 sm:$0xff]  }
 0x5e6   :  { %v7165_v56 = vpop.f32.mrb[12].mxu1 }
 0x5e7   :  { %v7166_v58 = vpop.f32.mrb[13].mxu1 }
 0x5e8   :  { %v7167_v60 = vadd.f32 %v7166_v58, %v7165_v56  ;;  %v7168_v61 = vpop.f32.mrb[14].mxu1  ;;  %v8675_v56 = vld [vmem:[#allocation12 + $0x60] ss:$12 sps:$4 sm:$0xff]   ;;  %v8676_v58 = vld [vmem:[#allocation12 + $0x7c] ss:$12 sps:$4 sm:$0xff]  }
 0x5e9   :  { %v7169_v62 = vpop.f32.mrb[15].mxu1  ;;  %v8195_v61 = vld [vmem:[#allocation12 + $0x98] ss:$12 sps:$4 sm:$0xff]  }
 0x5ea   :  { %v1116_v63 = vadd.f32 %v7167_v60, %v984_v57  ;;  %v8194_v57 = vld [vmem:[#allocation12 + $0x80] ss:$12 sps:$4 sm:$0xff]   ;;  %v8677_v60 = vld [vmem:[#allocation12 + $0x78] ss:$12 sps:$4 sm:$0xff]  }
 0x5eb   :  { %v8678_v62 = vld [vmem:[#allocation12 + $0x94] ss:$12 sps:$4 sm:$0xff]  }
 0x5ec   :  { %8531 = vtanh.f32 %v1116_v63  ;;  %v8679_v63 = vld [vmem:[#allocation12 + $0x90] ss:$12 sps:$4 sm:$0xff]  }
 0x5f6   :  { %v8532_v2 = vpop.eup %8531 }
 0x5f7   :  { %v1122_v3 = vpack.c.bf16 %v8532_v2, %v8532_v2  ;;  %v8196_v2 = vld [vmem:[#allocation12 + $0xb0] ss:$12 sps:$4 sm:$0xff]  }
 0x5f9   :  { %7562 = vmatmul.mubr.bf16.vlgmr.msra.gmra.mrb[8].mxu0 %v1122_v3  ;;  %v8680_v3 = vld [vmem:[#allocation12 + $0xac] ss:$12 sps:$4 sm:$0xff]  }
 0x5fa   :  { %7581 = vmatprep.mubr.msk.bf16.mxu0 %vm9004_vm0, %v10097_v0  ;;  %7566 = vmatpush3.bf16.msra.mxu0 %v8181_v4 }
 0x5fb   :  { %7567 = vmatprep.subr.bf16.mxu0 %v10097_v0 }
 0x5fe   :  { %7568 = vmatpush3.bf16.msra.mxu0 %v8182_v24 }
 0x5ff   :  { %7569 = vmatprep.subr.bf16.mxu0 %v10097_v0 }
 0x602   :  { %7570 = vmatpush3.bf16.msra.mxu0 %v8183_v25 }
 0x603   :  { %7571 = vmatprep.subr.bf16.mxu0 %v10097_v0 }
 0x606   :  { %7572 = vmatpush3.bf16.msra.mxu0 %v8184_v26 }
 0x607   :  { %7573 = vmatprep.subr.bf16.mxu0 %v10097_v0 }
 0x60a   :  { %7574 = vmatpush3.bf16.msra.mxu0 %v8185_v27 }
 0x60b   :  { %7575 = vmatprep.subr.bf16.mxu0 %v10097_v0 }
 0x60e   :  { %7576 = vmatpush3.bf16.msra.mxu0 %v8186_v28 }
 0x60f   :  { %7577 = vmatprep.subr.bf16.mxu0 %v10097_v0 }
 0x612   :  { %7578 = vmatpush3.bf16.msra.mxu0 %v8187_v29 }
 0x613   :  { %7579 = vmatprep.subr.bf16.mxu0 %v10097_v0 }
 0x616   :  { %7580 = vmatpush3.bf16.msra.mxu0 %v8188_v31 }
 0x617   :  { %7585 = vmatprep.subr.bf16.mxu0 %v10097_v0 }
 0x6cc   :  { %v1222_v7 = vpop.f32.mrb[8].mxu0 }
 0x6cd   :  { %v9359_v8 = vadd.f32 %v1222_v7, %v1139_v5  ;;  %v7563_v10 = vpop.f32.mrb[9].mxu0  ;;  %v8681_v5 = vld [vmem:[#allocation12 + $0xa8] ss:$12 sps:$4 sm:$0xff]   ;;  %v8197_v7 = vld [vmem:[#allocation9] sm:$0xff]  }
 0x6ce   :  { %v1225_v11 = vpop.f32.mrb[10].mxu0  ;;  %v8198_v10 = vld [vmem:[#allocation9 + $0x8] sm:$0xff]  }
 0x6cf   :  { %v7564_v12 = vpop.f32.mrb[11].mxu0  ;;  %v1229_v13 = vsel %vm1228_vm4, %v9359_v8, -inf  ;;  %v8199_v11 = vld [vmem:[#allocation9 + $0x10] sm:$0xff]  }
 0x6d0   :  { %1230 = vmax.xlane.f32.xlu1 %v1229_v13  ;;  %v8202_v12 = vld [vmem:[#allocation9 + $0x28] sm:$0xff]   ;;  %v8203_v13 = vld [vmem:[#allocation9 + $0x30] sm:$0xff]  }
 0x75d   :  { %v9366_v15 = vpop.xlane.xlu1 %1230 }
 0x75e   :  { %vm1232_vm5 = vcmp.eq.f32.partialorder %v9359_v8, %v9366_v15  ;;  %vm1260_vm7 = vcmp.gt.f32.partialorder %v9366_v15, -inf }
 0x75f   :  { %v1233_v16 = vsel %vm1232_vm5, %v9364_v14, 128 }
 0x760   :  { %v1234_v17 = vsel %vm1228_vm4, %v1233_v16, 2147483647  ;;  %v8204_v16 = vld [vmem:[#allocation9 + $0x38] sm:$0xff]  }
 0x761   :  { %v1236_v18 = vshra.s32 %v1234_v17, 16  ;;  %v1235_v20 = vand.u32 65535, %v1234_v17 }
 0x763   :  { %v1238_v19 = vcvt.s32.f32 %v1236_v18  ;;  %v1237_v22 = vcvt.s32.f32 %v1235_v20 }
 0x765   :  { %1239 = vmin.xlane.f32.xlu1 %v1238_v19 }
 0x7f2   :  { %v1240_v21 = vpop.xlane.xlu1 %1239 }
 0x7f3   :  { %vm1241_vm6 = vcmp.eq.f32.partialorder %v1238_v19, %v1240_v21  ;;  %v1246_v32 = vcvt.f32.s32 %v1240_v21  ;;  %v1563_v21 = vld [vmem:[#allocation15] sm:$0x7] }
 0x7f4   :  { %v1242_v23 = vsel %vm1241_vm6, %v1237_v22, inf  ;;  %v1305_v22 = vld [vmem:[#allocation14] sm:$0x7]  ;;  %v1696_v4 = vrot.slane %v1563_v21, %v9309_v6  ;;  %v1700_v25 = vrot.slane %v1563_v21, %v9311_v9 }
 0x7f5   :  { %1243 = vmin.xlane.f32.xlu0 %v1242_v23  ;;  %v1247_v34 = vshll.u32 %v1246_v32, 16  ;;  %v1438_v23 = vrot.slane %v1305_v22, %v9309_v6  ;;  %v1442_v24 = vrot.slane %v1305_v22, %v9311_v9 }
 0x7f7   :  { %v7994_v26 = vadd.f32 %v1696_v4, %v1438_v23  ;;  %v7996_v29 = vadd.f32 %v1700_v25, %v1442_v24  ;;  %v8211_v23 = vld [vmem:[#allocation17 + $0x58] sm:$0xff]   ;;  %v8213_v24 = vld [vmem:[#allocation17 + $0x60] sm:$0xff]  }
 0x7f8   :  { %v8212_v4 = vld [vmem:[#allocation17 + $0x18] sm:$0xff]   ;;  %v8214_v25 = vld [vmem:[#allocation17 + $0x20] sm:$0xff]  }
 0x882   :  { %v1244_v33 = vpop.xlane.xlu0 %1243 }
 0x883   :  { %v1245_v35 = vcvt.f32.s32 %v1244_v33 }
 0x885   :  { %v1248_v36 = vadd.s32 %v1247_v34, %v1245_v35 }
 0x887   :  { %v1261_v37 = vsel %vm1260_vm7, %v1248_v36, 0 }
 0x888   :  { %8038 = vpush %v1261_v37 }
 0x8b9   :  { %s8039_s11 = spop %8038 }
 0x8ba   :  { %1264 = sst [smem:[#allocation23]] %s8039_s11  ;;  %s1270_s26 = scalar_lea.vmem [#allocation3], %s8039_s11 }
 0x8bb   :  { %v1271_v38 = vld [vmem:[%s1270_s26] sm:$0x1] }
 0x8bc   :  { %v1272_v40 = vpack.c.bf16 %v1271_v38, %v1271_v38 }
 0x8be   :  { %1483 = vmatmul.mubr.bf16.vlgmr.msra.gmra.mrb[16].mxu1 %v1272_v40  ;;  %7582 = vmatmul.mubr.bf16.vlgmr.msra.gmra.mrb[12].mxu0 %v1272_v40 }
 0x8bf   :  { %1709 = vmatpush1.bf16.msra.mxu1 %v8667_v41  ;;  %7586 = vmatpush3.bf16.msra.mxu0 %v8189_v39 }
 0x8c0   :  { %1710 = vmatprep.subr.bf16.mxu1 %v8668_v43  ;;  %7587 = vmatprep.subr.bf16.mxu0 %v10097_v0 }
 0x8c1   :  { %1740 = vmatprep.mubr.bf16.mxu1 %v10095_v1  ;;  %7601 = vmatprep.mubr.msk.bf16.mxu0 %vm9004_vm0, %v10097_v0 }
 0x8c3   :  { %1711 = vmatpush1.bf16.msra.mxu1 %v8669_v44  ;;  %7588 = vmatpush3.bf16.msra.mxu0 %v8190_v42  ;;  %v1704_v44 = vrot.slane %v1563_v21, %v9317_v30  ;;  %v8209_v21 = vld [vmem:[#allocation17 + $0x50] sm:$0xff]  }
 0x8c4   :  { %1712 = vmatprep.subr.bf16.mxu1 %v8670_v49  ;;  %7589 = vmatprep.subr.bf16.mxu0 %v10097_v0 }
 0x8c7   :  { %1713 = vmatpush1.bf16.msra.mxu1 %v8671_v50  ;;  %7590 = vmatpush3.bf16.msra.mxu0 %v8191_v45  ;;  %v1446_v45 = vrot.slane %v1305_v22, %v9317_v30  ;;  %v8210_v22 = vld [vmem:[#allocation17 + $0x10] sm:$0xff]  }
 0x8c8   :  { %1714 = vmatprep.subr.bf16.mxu1 %v8672_v52  ;;  %7591 = vmatprep.subr.bf16.mxu0 %v10097_v0 }
 0x8cb   :  { %1715 = vmatpush1.bf16.msra.mxu1 %v8673_v53  ;;  %7592 = vmatpush3.bf16.msra.mxu0 %v8192_v51 }
 0x8cc   :  { %1716 = vmatprep.subr.bf16.mxu1 %v8674_v55  ;;  %7593 = vmatprep.subr.bf16.mxu0 %v10097_v0 }
 0x8cf   :  { %1717 = vmatpush1.bf16.msra.mxu1 %v8675_v56  ;;  %7594 = vmatpush3.bf16.msra.mxu0 %v8193_v54 }
 0x8d0   :  { %1718 = vmatprep.subr.bf16.mxu1 %v8676_v58  ;;  %7595 = vmatprep.subr.bf16.mxu0 %v10097_v0 }
 0x8d3   :  { %1719 = vmatpush1.bf16.msra.mxu1 %v8677_v60  ;;  %7596 = vmatpush3.bf16.msra.mxu0 %v8194_v57 }
 0x8d4   :  { %1720 = vmatprep.subr.bf16.mxu1 %v8678_v62  ;;  %7597 = vmatprep.subr.bf16.mxu0 %v10097_v0 }
 0x8d7   :  { %1721 = vmatpush1.bf16.msra.mxu1 %v8679_v63  ;;  %7598 = vmatpush3.bf16.msra.mxu0 %v8195_v61 }
 0x8d8   :  { %1722 = vmatprep.subr.bf16.mxu1 %v8680_v3  ;;  %7599 = vmatprep.subr.bf16.mxu0 %v10097_v0 }
 0x8db   :  { %1723 = vmatpush1.bf16.msra.mxu1 %v8681_v5  ;;  %7600 = vmatpush3.bf16.msra.mxu0 %v8196_v2 }
 0x8dc   :  { %7605 = vmatprep.subr.bf16.mxu1 %v10097_v0  ;;  %7625 = vmatprep.subr.mxu0 %v10097_v0 }
 0x8de   :  { %1741 = vmatmul.mubr.bf16.vlgmr.msra.gmra.mrb[16].mxu1 %v9330_v48  ;;  %7602 = vmatmul.mubr.bf16.vlgmr.msra.gmra.mrb[16].mxu0 %v9330_v48  ;;  %v8200_v48 = vld [vmem:[#allocation9 + $0x18] sm:$0xff]  }
 0x8df   :  { %7621 = vmatprep.mubr.msk.bf16.mxu1 %vm9004_vm0, %v10097_v0  ;;  %7626 = vmatpush3.msra.mxu0 %v9340_v59  ;;  %v8201_v59 = vld [vmem:[#allocation9 + $0x20] sm:$0xff]  }
 0x8e0   :  { %7627 = vmatprep.mubr.msk.f32.mxu0 %vm9004_vm0, %v10097_v0  ;;  %7606 = vmatpush3.bf16.msra.mxu1 %v8197_v7 }
 0x8e1   :  { %7607 = vmatprep.subr.bf16.mxu1 %v10097_v0 }
 0x8e4   :  { %7608 = vmatpush3.bf16.msra.mxu1 %v8198_v10 }
 0x8e5   :  { %7609 = vmatprep.subr.bf16.mxu1 %v10097_v0 }
 0x8e8   :  { %7610 = vmatpush3.bf16.msra.mxu1 %v8199_v11 }
 0x8e9   :  { %7611 = vmatprep.subr.bf16.mxu1 %v10097_v0 }
 0x8ec   :  { %7612 = vmatpush3.bf16.msra.mxu1 %v8200_v48 }
 0x8ed   :  { %7613 = vmatprep.subr.bf16.mxu1 %v10097_v0 }
 0x8f0   :  { %7614 = vmatpush3.bf16.msra.mxu1 %v8201_v59 }
 0x8f1   :  { %7615 = vmatprep.subr.bf16.mxu1 %v10097_v0 }
 0x8f4   :  { %7616 = vmatpush3.bf16.msra.mxu1 %v8202_v12  ;;  %v8205_v12 = vld [vmem:[#allocation17 + $0x40] sm:$0xff]  }
 0x8f5   :  { %7617 = vmatprep.subr.bf16.mxu1 %v10097_v0  ;;  %7209 = vmatprep.subr.bf16.mxu0 %v8205_v12 }
 0x8f8   :  { %7618 = vmatpush3.bf16.msra.mxu1 %v8203_v13 }
 0x8f9   :  { %7619 = vmatprep.subr.bf16.mxu1 %v10097_v0 }
 0x8fc   :  { %7620 = vmatpush3.bf16.msra.mxu1 %v8204_v16 }
 0x8fd   :  { %7630 = vmatprep.subr.bf16.mxu1 %v10097_v0 }
 0x991   :  { %v1525_v17 = vpop.f32.mrb[12].mxu0 }
 0x992   :  { %v7583_v18 = vpop.f32.mrb[13].mxu0  ;;  %v1526_v52 = vadd.f32 %v1525_v17, %v1446_v45  ;;  %v8206_v17 = vld [vmem:[#allocation17] sm:$0xff]   ;;  %v8226_v45 = vld [vmem:[#allocation20 + $0x28] sm:$0xff]  }
 0x993   :  { %v1528_v19 = vpop.f32.mrb[14].mxu0 }
 0x994   :  { %v7584_v20 = vpop.f32.mrb[15].mxu0  ;;  %v8207_v19 = vld [vmem:[#allocation17 + $0x48] sm:$0xff]  }
 0x995   :  { %v8208_v20 = vld [vmem:[#allocation17 + $0x8] sm:$0xff]  }
 0x9b1   :  { %v1742_v27 = vpop.f32.mrb[16].mxu1  ;;  %v1783_v28 = vpop.f32.mrb[16].mxu0 }
 0x9b2   :  { %v7995_v31 = vadd.f32 %v7994_v26, %v1742_v27  ;;  %v1744_v32 = vpop.f32.mrb[17].mxu1  ;;  %v7603_v33 = vpop.f32.mrb[17].mxu0  ;;  %v1784_v50 = vadd.f32 %v1783_v28, %v1704_v44  ;;  %v8215_v26 = vld [vmem:[#allocation17 + $0x68] sm:$0xff]   ;;  %v8217_v28 = vld [vmem:[#allocation17 + $0x70] sm:$0xff]  }
 0x9b3   :  { %v1746_v34 = vpop.f32.mrb[18].mxu1  ;;  %v1786_v35 = vpop.f32.mrb[18].mxu0  ;;  %v7997_v39 = vadd.f32 %v7996_v29, %v1744_v32  ;;  %v8216_v27 = vld [vmem:[#allocation17 + $0x28] sm:$0xff]   ;;  %v8218_v29 = vld [vmem:[#allocation17 + $0x30] sm:$0xff]   ;;  %v8220_v32 = vld [vmem:[#allocation17 + $0x38] sm:$0xff]  }
 0x9b4   :  { %v6753_v36 = vmul.f32 -1.442695, %v7995_v31  ;;  %v1747_v37 = vpop.f32.mrb[19].mxu1  ;;  %v7604_v38 = vpop.f32.mrb[19].mxu0  ;;  %v8219_v31 = vld [vmem:[#allocation17 + $0x78] sm:$0xff]   ;;  %v8221_v33 = vld [vmem:[#allocation20] sm:$0xff]  }
 0x9b5   :  { %v6754_v40 = vmul.f32 -1.442695, %v7997_v39  ;;  %v8222_v34 = vld [vmem:[#allocation20 + $0x8] sm:$0xff]   ;;  %v8223_v35 = vld [vmem:[#allocation20 + $0x10] sm:$0xff]   ;;  %v8225_v44 = vld [vmem:[#allocation20 + $0x20] sm:$0xff]  }
 0x9b6   :  { %8533 = vpow2.f32 %v6753_v36 }
 0x9b7   :  { %8535 = vpow2.f32 %v6754_v40 }
 0x9c0   :  { %v8534_v41 = vpop.eup %8533 }
 0x9c1   :  { %v1793_v42 = vadd.f32 1.0, %v8534_v41  ;;  %v8536_v43 = vpop.eup %8535 }
 0x9c2   :  { %v1800_v49 = vadd.f32 1.0, %v8536_v43  ;;  %v8224_v43 = vld [vmem:[#allocation20 + $0x18] sm:$0xff]  }
 0x9c3   :  { %8537 = vrcp.f32 %v1793_v42 }
 0x9c4   :  { %8539 = vrcp.f32 %v1800_v49  ;;  %v8227_v49 = vld [vmem:[#allocation20 + $0x30] sm:$0xff]  }
 0x9cd   :  { %v8538_v51 = vpop.eup %8537 }
 0x9ce   :  { %v1803_v53 = vmul.f32 %v8538_v51, %v1784_v50  ;;  %v8540_v55 = vpop.eup %8539  ;;  %v8228_v50 = vld [vmem:[#allocation20 + $0x38] sm:$0xff]  }
 0x9cf   :  { %v1806_v56 = vsub.f32 1.0, %v8540_v55  ;;  %v1808_v60 = vmul.f32 %v8540_v55, %v9326_v47 }
 0x9d0   :  { %v1804_v54 = vadd.f32 %v1803_v53, %v1526_v52  ;;  %v2048_v52 = vld [vmem:[#allocation18] sm:$0x1] }
 0x9d2   :  { %8541 = vtanh.f32 %v1804_v54 }
 0x9dc   :  { %v8542_v57 = vpop.eup %8541 }
 0x9dd   :  { %v1807_v58 = vmul.f32 %v8542_v57, %v1806_v56 }
 0x9df   :  { %v9415_v61 = vadd.f32 %v1808_v60, %v1807_v58 }
 0x9e1   :  { %v9419_v62 = vpack.c.bf16 %v9415_v61, %v9415_v61  ;;  %2000 = vst.msk [vmem:[#allocation2] sm:$0x1] %vm9322_vm1, %v9415_v61 }
 0x9e3   :  { %7622 = vmatmul.mubr.bf16.vlgmr.msra.gmra.mrb[20].mxu1 %v9419_v62 }
 0x9e4   :  { %7646 = vmatprep.mubr.msk.bf16.mxu1 %vm9004_vm0, %v10097_v0  ;;  %7631 = vmatpush3.bf16.msra.mxu1 %v8221_v33  ;;  %v8236_v33 = vld [vmem:[#allocation11 + $0x20] ss:$12 sps:$4 sm:$0xff]  }
 0x9e5   :  { %7632 = vmatprep.subr.bf16.mxu1 %v10097_v0 }
 0x9e8   :  { %7633 = vmatpush3.bf16.msra.mxu1 %v8222_v34  ;;  %v9470_v34 = vld [vmem:[#allocation11 + $0x18] ss:$12 sps:$4 sm:$0xff]  }
 0x9e9   :  { %7634 = vmatprep.subr.bf16.mxu1 %v10097_v0 }
 0x9ec   :  { %7635 = vmatpush3.bf16.msra.mxu1 %v8223_v35  ;;  %v9474_v35 = vld [vmem:[#allocation11 + $0x34] ss:$12 sps:$4 sm:$0xff]  }
 0x9ed   :  { %7636 = vmatprep.subr.bf16.mxu1 %v10097_v0 }
 0x9f0   :  { %7637 = vmatpush3.bf16.msra.mxu1 %v8224_v43  ;;  %v9491_v43 = vld [vmem:[#allocation11 + $0x60] ss:$12 sps:$4 sm:$0xff]  }
 0x9f1   :  { %7638 = vmatprep.subr.bf16.mxu1 %v10097_v0 }
 0x9f4   :  { %7639 = vmatpush3.bf16.msra.mxu1 %v8225_v44  ;;  %v9495_v44 = vld [vmem:[#allocation11 + $0x7c] ss:$12 sps:$4 sm:$0xff]  }
 0x9f5   :  { %7640 = vmatprep.subr.bf16.mxu1 %v10097_v0 }
 0x9f8   :  { %7641 = vmatpush3.bf16.msra.mxu1 %v8226_v45  ;;  %v8252_v45 = vld [vmem:[#allocation11 + $0x80] ss:$12 sps:$4 sm:$0xff]  }
 0x9f9   :  { %7642 = vmatprep.subr.bf16.mxu1 %v10097_v0 }
 0x9fc   :  { %7643 = vmatpush3.bf16.msra.mxu1 %v8227_v49  ;;  %v9498_v49 = vld [vmem:[#allocation11 + $0x78] ss:$12 sps:$4 sm:$0xff]  }
 0x9fd   :  { %7644 = vmatprep.subr.bf16.mxu1 %v10097_v0 }
 0xa00   :  { %7645 = vmatpush3.bf16.msra.mxu1 %v8228_v50  ;;  %v9502_v50 = vld [vmem:[#allocation11 + $0x94] ss:$12 sps:$4 sm:$0xff]  }
 0xa01   :  { %7650 = vmatprep.subr.bf16.mxu1 %v10097_v0 }
 0xab6   :  { %v1909_v63 = vpop.f32.mrb[20].mxu1 }
 0xab7   :  { %v7623_v2 = vpop.f32.mrb[21].mxu1  ;;  %v1915_v3 = vsel %vm845_vm2, %v1909_v63, -inf }
 0xab8   :  { %1916 = vmax.xlane.f32.xlu1 %v1915_v3  ;;  %v1912_v47 = vpop.f32.mrb[22].mxu1  ;;  %v2203_v3 = vld [vmem:[#allocation21] sm:$0x1] }
 0xab9   :  { %v7624_v5 = vpop.f32.mrb[23].mxu1 }
 0xb45   :  { %v1917_v7 = vpop.xlane.xlu1 %1916 }
 0xb46   :  { %v1918_v10 = vsub.f32 %v1909_v63, %v1917_v7  ;;  %v1253_v63 = vsub.f32 %v9359_v8, %v9366_v15 }
 0xb48   :  { %v1919_v11 = vmul.f32 1.442695, %v1918_v10  ;;  %v1254_v2 = vmul.f32 1.442695, %v1253_v63 }
 0xb4a   :  { %8543 = vpow2.f32 %v1919_v11 }
 0xb54   :  { %v8544_v48 = vpop.eup %8543 }
 0xb55   :  { %v1921_v59 = vsel %vm845_vm2, %v8544_v48, 0.0 }
 0xb56   :  { %1922 = vadd.xlane.f32.xlu0 %v1921_v59 }
 0xbe3   :  { %v1923_v13 = vpop.xlane.xlu0 %1922 }
 0xbe4   :  { %8545 = vrcp.f32 %v1923_v13  ;;  %v1249_v13 = vsub.f32 -inf, %v9366_v15 }
 0xbe6   :  { %v1250_v8 = vmul.f32 1.442695, %v1249_v13  ;;  %v9532_v13 = vld [vmem:[#allocation12 + $0x34] ss:$12 sps:$4 sm:$0xff]  }
 0xbee   :  { %v8546_v16 = vpop.eup %8545 }
 0xbef   :  { %v1925_v18 = vmul.f32 %v8546_v16, %v8544_v48 }
 0xbf1   :  { %7628 = vmatmul.mubr.msk.f32.vlgmr.msra.gmra.mrb[20].mxu0 %vm858_vm3, %v1925_v18 }
 0xbf2   :  { %7210 = vmatpush3.bf16.msra.mxu0 %v8206_v17 }
 0xbf3   :  { %7211 = vmatprep.subr.bf16.mxu0 %v8207_v19 }
 0xbf6   :  { %7212 = vmatpush3.bf16.msra.mxu0 %v8208_v20 }
 0xbf7   :  { %7213 = vmatprep.subr.bf16.mxu0 %v8209_v21 }
 0xbfa   :  { %7214 = vmatpush3.bf16.msra.mxu0 %v8210_v22 }
 0xbfb   :  { %7215 = vmatprep.subr.bf16.mxu0 %v8211_v23 }
 0xbfe   :  { %7216 = vmatpush3.bf16.msra.mxu0 %v8212_v4 }
 0xbff   :  { %7217 = vmatprep.subr.bf16.mxu0 %v8213_v24 }
 0xc02   :  { %7218 = vmatpush3.bf16.msra.mxu0 %v8214_v25 }
 0xc03   :  { %7219 = vmatprep.subr.bf16.mxu0 %v8215_v26 }
 0xc06   :  { %7220 = vmatpush3.bf16.msra.mxu0 %v8216_v27 }
 0xc07   :  { %7221 = vmatprep.subr.bf16.mxu0 %v8217_v28  ;;  %v9462_v28 = vld [vmem:[#allocation11] ss:$12 sps:$4 sm:$0xff]  }
 0xc0a   :  { %7222 = vmatpush3.bf16.msra.mxu0 %v8218_v29  ;;  %v9464_v29 = vld [vmem:[#allocation11 + $0x4] ss:$12 sps:$4 sm:$0xff]  }
 0xc0b   :  { %7223 = vmatprep.subr.bf16.mxu0 %v8219_v31  ;;  %v8232_v31 = vld [vmem:[#allocation11 + $0x8] ss:$12 sps:$4 sm:$0xff]  }
 0xc0e   :  { %7224 = vmatpush3.bf16.msra.mxu0 %v8220_v32  ;;  %v9466_v32 = vld [vmem:[#allocation11 + $0x1c] ss:$12 sps:$4 sm:$0xff]  }
 0xc0f   :  { %2513 = vmatprep.subr.bf16.mxu0 %v9464_v29 }
 0xcc4   :  { %v1996_v36 = vpop.f32.mrb[20].mxu0 }
 0xcc5   :  { %2001 = vst.msk [vmem:[#allocation2 + $0x1] sm:$0x1] %vm9322_vm1, %v1996_v36  ;;  %v7629_v37 = vpop.f32.mrb[21].mxu0  ;;  %v8240_v36 = vld [vmem:[#allocation11 + $0x38] ss:$12 sps:$4 sm:$0xff]  }
 0xcc6   :  { %v9477_v37 = vld [vmem:[#allocation11 + $0x30] ss:$12 sps:$4 sm:$0xff]  }
 0xccc   :  { %v2002_v38 = vld [vmem:[#allocation2] sm:$0x3] }
 0xccd   :  { %v2011_v39 = vrot.slane %v2002_v38, %v9311_v9  ;;  %v2007_v40 = vrot.slane %v2002_v38, %v9309_v6  ;;  %v9481_v38 = vld [vmem:[#allocation11 + $0x4c] ss:$12 sps:$4 sm:$0xff]  }
 0xccf   :  { %v2015_v41 = vpack.c.bf16 %v2011_v39, %v2011_v39  ;;  %v2014_v42 = vpack.c.bf16 %v2007_v40, %v2007_v40  ;;  %v8244_v39 = vld [vmem:[#allocation11 + $0x50] ss:$12 sps:$4 sm:$0xff]   ;;  %v9484_v40 = vld [vmem:[#allocation11 + $0x48] ss:$12 sps:$4 sm:$0xff]  }
 0xcd1   :  { %2177 = vmatprep.mubr.bf16.mxu0 %v2015_v41  ;;  %v9488_v41 = vld [vmem:[#allocation11 + $0x64] ss:$12 sps:$4 sm:$0xff]  }
 0xcd2   :  { %2178 = vmatmul.mubr.bf16.vlgmr.msra.gmra.mrb[24].mxu0 %v2014_v42  ;;  %v8248_v42 = vld [vmem:[#allocation11 + $0x68] ss:$12 sps:$4 sm:$0xff]  }
 0xcd3   :  { %2545 = vmatprep.mubr.bf16.mxu0 %v10095_v1  ;;  %2514 = vmatpush1.bf16.msra.mxu0 %v9462_v28 }
 0xcd4   :  { %2515 = vmatprep.subr.bf16.mxu0 %v9466_v32 }
 0xcd7   :  { %2516 = vmatpush1.bf16.msra.mxu0 %v9470_v34 }
 0xcd8   :  { %2517 = vmatprep.subr.bf16.mxu0 %v9474_v35 }
 0xcdb   :  { %2518 = vmatpush1.bf16.msra.mxu0 %v9477_v37 }
 0xcdc   :  { %2519 = vmatprep.subr.bf16.mxu0 %v9481_v38 }
 0xcdf   :  { %2520 = vmatpush1.bf16.msra.mxu0 %v9484_v40 }
 0xce0   :  { %2521 = vmatprep.subr.bf16.mxu0 %v9488_v41 }
 0xce3   :  { %2522 = vmatpush1.bf16.msra.mxu0 %v9491_v43 }
 0xce4   :  { %2523 = vmatprep.subr.bf16.mxu0 %v9495_v44 }
 0xce7   :  { %2524 = vmatpush1.bf16.msra.mxu0 %v9498_v49 }
 0xce8   :  { %2525 = vmatprep.subr.bf16.mxu0 %v9502_v50 }
 0xda5   :  { %v7225_v51 = vpop.f32.mrb[24].mxu0 }
 0xda6   :  { %v7226_v53 = vpop.f32.mrb[25].mxu0 }
 0xda7   :  { %v7227_v54 = vadd.f32 %v7226_v53, %v7225_v51  ;;  %v7228_v55 = vpop.f32.mrb[26].mxu0  ;;  %v8256_v51 = vld [vmem:[#allocation11 + $0x98] ss:$12 sps:$4 sm:$0xff]  }
 0xda8   :  { %v7229_v56 = vpop.f32.mrb[27].mxu0  ;;  %v9511_v53 = vld [vmem:[#allocation11 + $0xac] ss:$12 sps:$4 sm:$0xff]   ;;  %v8260_v55 = vld [vmem:[#allocation11 + $0xb0] ss:$12 sps:$4 sm:$0xff]  }
 0xda9   :  { %v2180_v57 = vadd.f32 %v7227_v54, %v2048_v52  ;;  %v9505_v52 = vld [vmem:[#allocation11 + $0x90] ss:$12 sps:$4 sm:$0xff]   ;;  %v9513_v54 = vld [vmem:[#allocation11 + $0xa8] ss:$12 sps:$4 sm:$0xff]  }
 0xdaa   :  { %2526 = vmatpush1.bf16.msra.mxu0 %v9505_v52  ;;  %v9517_v56 = vld [vmem:[#allocation12 + $0x4] ss:$12 sps:$4 sm:$0xff]  }
 0xdab   :  { %8547 = vtanh.f32 %v2180_v57  ;;  %2527 = vmatprep.subr.bf16.mxu0 %v9511_v53 }
 0xdac   :  { %8549 = vpow2.f32 %v1254_v2 }
 0xdad   :  { %8551 = vpow2.f32 %v1250_v8  ;;  %v9538_v8 = vld [vmem:[#allocation12 + $0x30] ss:$12 sps:$4 sm:$0xff]  }
 0xdae   :  { %2528 = vmatpush1.bf16.msra.mxu0 %v9513_v54 }
 0xdaf   :  { %2771 = vmatprep.subr.bf16.mxu0 %v9517_v56 }
 0xdb5   :  { %v8548_v58 = vpop.eup %8547 }
 0xdb6   :  { %v2186_v60 = vpack.c.bf16 %v8548_v58, %v8548_v58  ;;  %v8550_v59 = vpop.eup %8549 }
 0xdb7   :  { %v1256_v12 = vsel %vm1228_vm4, %v8550_v59, 0.0  ;;  %v8552_v16 = vpop.eup %8551  ;;  %v9528_v59 = vld [vmem:[#allocation12 + $0x18] ss:$12 sps:$4 sm:$0xff]  }
 0xdb8   :  { %7647 = vmatmul.mubr.bf16.vlgmr.msra.gmra.mrb[24].mxu1 %v2186_v60  ;;  %v1252_v19 = vmul.f32 0.0, %v8552_v16  ;;  %v8272_v16 = vld [vmem:[#allocation12 + $0x38] ss:$12 sps:$4 sm:$0xff]  }
 0xdb9   :  { %7666 = vmatprep.mubr.msk.bf16.mxu1 %vm9004_vm0, %v10097_v0  ;;  %7651 = vmatpush3.bf16.msra.mxu1 %v8232_v31  ;;  %v9570_v31 = vld [vmem:[#allocation12 + $0xac] ss:$12 sps:$4 sm:$0xff]  }
 0xdba   :  { %7652 = vmatprep.subr.bf16.mxu1 %v10097_v0 }
 0xdbd   :  { %7653 = vmatpush3.bf16.msra.mxu1 %v8236_v33  ;;  %v9573_v33 = vld [vmem:[#allocation12 + $0xa8] ss:$12 sps:$4 sm:$0xff]  }
 0xdbe   :  { %7654 = vmatprep.subr.bf16.mxu1 %v10097_v0 }
 0xdc1   :  { %7655 = vmatpush3.bf16.msra.mxu1 %v8240_v36  ;;  %v8292_v36 = vld [vmem:[#allocation12 + $0xb0] ss:$12 sps:$4 sm:$0xff]  }
 0xdc2   :  { %7656 = vmatprep.subr.bf16.mxu1 %v10097_v0 }
 0xdc5   :  { %7657 = vmatpush3.bf16.msra.mxu1 %v8244_v39  ;;  %v8293_v39 = vld [vmem:[#allocation9] sm:$0xff]  }
 0xdc6   :  { %7658 = vmatprep.subr.bf16.mxu1 %v10097_v0 }
 0xdc9   :  { %7659 = vmatpush3.bf16.msra.mxu1 %v8248_v42  ;;  %v8294_v42 = vld [vmem:[#allocation9 + $0x8] sm:$0xff]  }
 0xdca   :  { %7660 = vmatprep.subr.bf16.mxu1 %v10097_v0 }
 0xdcd   :  { %7661 = vmatpush3.bf16.msra.mxu1 %v8252_v45  ;;  %v8295_v45 = vld [vmem:[#allocation9 + $0x10] sm:$0xff]  }
 0xdce   :  { %7662 = vmatprep.subr.bf16.mxu1 %v10097_v0 }
 0xdd1   :  { %7663 = vmatpush3.bf16.msra.mxu1 %v8256_v51  ;;  %v8296_v51 = vld [vmem:[#allocation9 + $0x18] sm:$0xff]  }
 0xdd2   :  { %7664 = vmatprep.subr.bf16.mxu1 %v10097_v0 }
 0xdd5   :  { %7665 = vmatpush3.bf16.msra.mxu1 %v8260_v55  ;;  %v8298_v55 = vld [vmem:[#allocation9 + $0x28] sm:$0xff]  }
 0xdd6   :  { %7670 = vmatprep.subr.bf16.mxu1 %v10097_v0 }
 0xe8b   :  { %v2286_v47 = vpop.f32.mrb[24].mxu1 }
 0xe8c   :  { %v9447_v5 = vadd.f32 %v2286_v47, %v2203_v3  ;;  %v7648_v7 = vpop.f32.mrb[25].mxu1 }
 0xe8d   :  { %v2289_v10 = vpop.f32.mrb[26].mxu1  ;;  %v9523_v7 = vld [vmem:[#allocation12] ss:$12 sps:$4 sm:$0xff]  }
 0xe8e   :  { %v7649_v11 = vpop.f32.mrb[27].mxu1  ;;  %v2292_v48 = vsel %vm1228_vm4, %v9447_v5, -inf  ;;  %v8264_v10 = vld [vmem:[#allocation12 + $0x8] ss:$12 sps:$4 sm:$0xff]  }
 0xe8f   :  { %2293 = vmax.xlane.f32.xlu1 %v2292_v48  ;;  %v9525_v48 = vld [vmem:[#allocation12 + $0x1c] ss:$12 sps:$4 sm:$0xff]  }
 0xe93   :  { %1257 = vadd.xlane.f32.xlu1 %v1256_v12  ;;  %v8268_v12 = vld [vmem:[#allocation12 + $0x20] ss:$12 sps:$4 sm:$0xff]  }
 0xf1c   :  { %v9453_v17 = vpop.xlane.xlu1 %2293 }
 0xf1d   :  { %vm2295_vm8 = vcmp.eq.f32.partialorder %v9447_v5, %v9453_v17  ;;  %vm2323_vm10 = vcmp.gt.f32.partialorder %v9453_v17, -inf }
 0xf1e   :  { %v2296_v18 = vsel %vm2295_vm8, %v9364_v14, 128 }
 0xf1f   :  { %v2297_v20 = vsel %vm1228_vm4, %v2296_v18, 2147483647  ;;  %v9542_v18 = vld [vmem:[#allocation12 + $0x4c] ss:$12 sps:$4 sm:$0xff]  }
 0xf20   :  { %v1258_v21 = vpop.xlane.xlu1 %1257  ;;  %v2299_v22 = vshra.s32 %v2297_v20, 16  ;;  %v2298_v24 = vand.u32 65535, %v2297_v20  ;;  %v8276_v20 = vld [vmem:[#allocation12 + $0x50] ss:$12 sps:$4 sm:$0xff]  }
 0xf21   :  { %v1259_v23 = vadd.f32 %v1258_v21, %v1252_v19  ;;  %v9545_v19 = vld [vmem:[#allocation12 + $0x48] ss:$12 sps:$4 sm:$0xff]   ;;  %v9549_v21 = vld [vmem:[#allocation12 + $0x64] ss:$12 sps:$4 sm:$0xff]  }
 0xf22   :  { %v2301_v4 = vcvt.s32.f32 %v2299_v22  ;;  %v2300_v26 = vcvt.s32.f32 %v2298_v24  ;;  %v9552_v22 = vld [vmem:[#allocation12 + $0x60] ss:$12 sps:$4 sm:$0xff]  }
 0xf23   :  { %8553 = vrcp.f32 %v1259_v23  ;;  %v8280_v23 = vld [vmem:[#allocation12 + $0x68] ss:$12 sps:$4 sm:$0xff]   ;;  %v8284_v24 = vld [vmem:[#allocation12 + $0x80] ss:$12 sps:$4 sm:$0xff]  }
 0xf24   :  { %2302 = vmin.xlane.f32.xlu0 %v2301_v4 }
 0xf2d   :  { %v8554_v15 = vpop.eup %8553 }
 0xf2e   :  { %8040 = vpush %v8554_v15  ;;  %v9559_v15 = vld [vmem:[#allocation12 + $0x78] ss:$12 sps:$4 sm:$0xff]  }
 0xf5f   :  { %s8041_s6 = spop %8040 }
 0xf60   :  { %1269 = sst [smem:[#allocation24]] %s8041_s6 }
 0xfb1   :  { %v9459_v25 = vpop.xlane.xlu0 %2302 }
 0xfb2   :  { %vm2304_vm9 = vcmp.eq.f32.partialorder %v2301_v4, %v9459_v25  ;;  %v2309_v57 = vcvt.f32.s32 %v9459_v25  ;;  %v9556_v4 = vld [vmem:[#allocation12 + $0x7c] ss:$12 sps:$4 sm:$0xff]   ;;  %v9563_v25 = vld [vmem:[#allocation12 + $0x94] ss:$12 sps:$4 sm:$0xff]  }
 0xfb3   :  { %v2305_v27 = vsel %vm2304_vm9, %v2300_v26, inf  ;;  %v9566_v26 = vld [vmem:[#allocation12 + $0x90] ss:$12 sps:$4 sm:$0xff]  }
 0xfb4   :  { %2306 = vmin.xlane.f32.xlu0 %v2305_v27  ;;  %v2310_v60 = vshll.u32 %v2309_v57, 16  ;;  %v8288_v27 = vld [vmem:[#allocation12 + $0x98] ss:$12 sps:$4 sm:$0xff]   ;;  %v8299_v57 = vld [vmem:[#allocation9 + $0x30] sm:$0xff]  }
0x1041   :  { %v2307_v58 = vpop.xlane.xlu0 %2306 }
0x1042   :  { %v2308_v63 = vcvt.f32.s32 %v2307_v58  ;;  %v8300_v58 = vld [vmem:[#allocation9 + $0x38] sm:$0xff]  }
0x1044   :  { %v2311_v2 = vadd.s32 %v2310_v60, %v2308_v63 }
0x1046   :  { %v2324_v3 = vsel %vm2323_vm10, %v2311_v2, 0 }
0x1047   :  { %8042 = vpush %v2324_v3 }
0x1078   :  { %s8043_s19 = spop %8042 }
0x1079   :  { %2327 = sst [smem:[#allocation23 + $0x1]] %s8043_s19  ;;  %s2333_s29 = scalar_lea.vmem [#allocation3], %s8043_s19 }
0x107a   :  { %v2334_v47 = vld [vmem:[%s2333_s29] sm:$0x1] }
0x107b   :  { %v2335_v11 = vpack.c.bf16 %v2334_v47, %v2334_v47  ;;  %v2626_v47 = vld [vmem:[#allocation15] sm:$0x7] }
0x107d   :  { %2546 = vmatmul.mubr.bf16.vlgmr.msra.gmra.mrb[28].mxu0 %v2335_v11  ;;  %7667 = vmatmul.mubr.bf16.vlgmr.msra.gmra.mrb[28].mxu1 %v2335_v11 }
0x107e   :  { %2772 = vmatpush1.bf16.msra.mxu0 %v9523_v7  ;;  %7671 = vmatpush3.bf16.msra.mxu1 %v8264_v10  ;;  %v2368_v10 = vld [vmem:[#allocation14] sm:$0x7] }
0x107f   :  { %2773 = vmatprep.subr.bf16.mxu0 %v9525_v48  ;;  %7672 = vmatprep.subr.bf16.mxu1 %v10097_v0  ;;  %v2501_v11 = vrot.slane %v2368_v10, %v9309_v6 }
0x1080   :  { %2803 = vmatprep.mubr.bf16.mxu0 %v10095_v1  ;;  %7686 = vmatprep.mubr.msk.bf16.mxu1 %vm9004_vm0, %v10097_v0 }
0x1082   :  { %2774 = vmatpush1.bf16.msra.mxu0 %v9528_v59  ;;  %7673 = vmatpush3.bf16.msra.mxu1 %v8268_v12  ;;  %v2759_v12 = vrot.slane %v2626_v47, %v9309_v6 }
0x1083   :  { %2775 = vmatprep.subr.bf16.mxu0 %v9532_v13  ;;  %7674 = vmatprep.subr.bf16.mxu1 %v10097_v0 }
0x1086   :  { %2776 = vmatpush1.bf16.msra.mxu0 %v9538_v8  ;;  %7675 = vmatpush3.bf16.msra.mxu1 %v8272_v16  ;;  %v2505_v16 = vrot.slane %v2368_v10, %v9311_v9 }
0x1087   :  { %2777 = vmatprep.subr.bf16.mxu0 %v9542_v18  ;;  %7676 = vmatprep.subr.bf16.mxu1 %v10097_v0 }
0x108a   :  { %2778 = vmatpush1.bf16.msra.mxu0 %v9545_v19  ;;  %7677 = vmatpush3.bf16.msra.mxu1 %v8276_v20  ;;  %v2763_v20 = vrot.slane %v2626_v47, %v9311_v9 }
0x108b   :  { %2779 = vmatprep.subr.bf16.mxu0 %v9549_v21  ;;  %7678 = vmatprep.subr.bf16.mxu1 %v10097_v0 }
0x108e   :  { %2780 = vmatpush1.bf16.msra.mxu0 %v9552_v22  ;;  %7679 = vmatpush3.bf16.msra.mxu1 %v8280_v23  ;;  %v7998_v23 = vadd.f32 %v2759_v12, %v2501_v11  ;;  %v2767_v11 = vrot.slane %v2626_v47, %v9317_v30  ;;  %v2509_v12 = vrot.slane %v2368_v10, %v9317_v30 }
0x108f   :  { %2781 = vmatprep.subr.bf16.mxu0 %v9556_v4  ;;  %7680 = vmatprep.subr.bf16.mxu1 %v10097_v0 }
0x1092   :  { %2782 = vmatpush1.bf16.msra.mxu0 %v9559_v15  ;;  %7681 = vmatpush3.bf16.msra.mxu1 %v8284_v24 }
0x1093   :  { %2783 = vmatprep.subr.bf16.mxu0 %v9563_v25  ;;  %7682 = vmatprep.subr.bf16.mxu1 %v10097_v0 }
0x1096   :  { %2784 = vmatpush1.bf16.msra.mxu0 %v9566_v26  ;;  %7683 = vmatpush3.bf16.msra.mxu1 %v8288_v27 }
0x1097   :  { %2785 = vmatprep.subr.bf16.mxu0 %v9570_v31  ;;  %7684 = vmatprep.subr.bf16.mxu1 %v10097_v0 }
0x109a   :  { %2786 = vmatpush1.bf16.msra.mxu0 %v9573_v33  ;;  %7685 = vmatpush3.bf16.msra.mxu1 %v8292_v36  ;;  %v8000_v36 = vadd.f32 %v2763_v20, %v2505_v16 }
0x109b   :  { %7690 = vmatprep.subr.bf16.mxu0 %v10097_v0  ;;  %7710 = vmatprep.subr.mxu1 %v10097_v0 }
0x109d   :  { %2804 = vmatmul.mubr.bf16.vlgmr.msra.gmra.mrb[28].mxu0 %v9419_v62  ;;  %7687 = vmatmul.mubr.bf16.vlgmr.msra.gmra.mrb[32].mxu1 %v9419_v62  ;;  %v8297_v62 = vld [vmem:[#allocation9 + $0x20] sm:$0xff]  }
0x109e   :  { %7706 = vmatprep.mubr.msk.bf16.mxu0 %vm9004_vm0, %v10097_v0  ;;  %7712 = vmatprep.mubr.msk.f32.mxu1 %vm9004_vm0, %v10097_v0 }
0x109f   :  { %7691 = vmatpush3.bf16.msra.mxu0 %v8293_v39 }
0x10a0   :  { %7692 = vmatprep.subr.bf16.mxu0 %v10097_v0 }
0x10a3   :  { %7693 = vmatpush3.bf16.msra.mxu0 %v8294_v42 }
0x10a4   :  { %7694 = vmatprep.subr.bf16.mxu0 %v10097_v0 }
0x10a7   :  { %7695 = vmatpush3.bf16.msra.mxu0 %v8295_v45 }
0x10a8   :  { %7696 = vmatprep.subr.bf16.mxu0 %v10097_v0 }
0x10ab   :  { %7697 = vmatpush3.bf16.msra.mxu0 %v8296_v51 }
0x10ac   :  { %7698 = vmatprep.subr.bf16.mxu0 %v10097_v0 }
0x10af   :  { %7699 = vmatpush3.bf16.msra.mxu0 %v8297_v62 }
0x10b0   :  { %7700 = vmatprep.subr.bf16.mxu0 %v10097_v0 }
0x10b3   :  { %7701 = vmatpush3.bf16.msra.mxu0 %v8298_v55 }
0x10b4   :  { %7702 = vmatprep.subr.bf16.mxu0 %v10097_v0 }
0x10b7   :  { %7703 = vmatpush3.bf16.msra.mxu0 %v8299_v57 }
0x10b8   :  { %7704 = vmatprep.subr.bf16.mxu0 %v10097_v0 }
0x10bb   :  { %7705 = vmatpush3.bf16.msra.mxu0 %v8300_v58 }
0x10bc   :  { %7715 = vmatprep.subr.bf16.mxu0 %v10097_v0 }
0x1150   :  { %v2588_v60 = vpop.f32.mrb[28].mxu1 }
0x1151   :  { %v7668_v63 = vpop.f32.mrb[29].mxu1 }
0x1152   :  { %v2591_v2 = vpop.f32.mrb[30].mxu1 }
0x1153   :  { %v7669_v3 = vpop.f32.mrb[31].mxu1 }
0x1170   :  { %v2805_v24 = vpop.f32.mrb[28].mxu0  ;;  %v2846_v27 = vpop.f32.mrb[32].mxu1 }
0x1171   :  { %v7999_v39 = vadd.f32 %v7998_v23, %v2805_v24  ;;  %v2807_v42 = vpop.f32.mrb[29].mxu0  ;;  %v7688_v45 = vpop.f32.mrb[33].mxu1  ;;  %v2847_v20 = vadd.f32 %v2846_v27, %v2767_v11  ;;  %v2589_v24 = vadd.f32 %v2588_v60, %v2509_v12  ;;  %v9615_v12 = vld [vmem:[#allocation8] sm:$0xff] }
0x1172   :  { %v2809_v51 = vpop.f32.mrb[30].mxu0  ;;  %v2849_v62 = vpop.f32.mrb[34].mxu1  ;;  %v8001_v63 = vadd.f32 %v8000_v36, %v2807_v42  ;;  %7711 = vmatpush3.msra.mxu1 %v9615_v12 }
0x1173   :  { %v6836_v55 = vmul.f32 -1.442695, %v7999_v39  ;;  %v2810_v57 = vpop.f32.mrb[31].mxu0  ;;  %v7689_v58 = vpop.f32.mrb[35].mxu1 }
0x1174   :  { %v6837_v2 = vmul.f32 -1.442695, %v8001_v63 }
0x1175   :  { %8555 = vpow2.f32 %v6836_v55 }
0x1176   :  { %8557 = vpow2.f32 %v6837_v2 }
0x117f   :  { %v8556_v3 = vpop.eup %8555 }
0x1180   :  { %v2856_v1 = vadd.f32 1.0, %v8556_v3  ;;  %v8558_v0 = vpop.eup %8557 }
0x1181   :  { %v2863_v16 = vadd.f32 1.0, %v8558_v0  ;;  %v10103_v0 = vmov 0.0  }
0x1182   :  { %8559 = vrcp.f32 %v2856_v1 }
0x1183   :  { %8561 = vrcp.f32 %v2863_v16  ;;  %v8301_v16 = vld [vmem:[#allocation17 + $0x40] sm:$0xff]  }
0x1184   :  { %7269 = vmatprep.subr.bf16.mxu1 %v8301_v16  ;;  %v8319_v16 = vld [vmem:[#allocation20 + $0x10] sm:$0xff]  }
0x118c   :  { %v8560_v23 = vpop.eup %8559 }
0x118d   :  { %v2866_v45 = vmul.f32 %v8560_v23, %v2847_v20  ;;  %v8562_v36 = vpop.eup %8561 }
0x118e   :  { %v2869_v42 = vsub.f32 1.0, %v8562_v36  ;;  %v2871_v55 = vmul.f32 %v8562_v36, %v9415_v61  ;;  %v8304_v36 = vld [vmem:[#allocation17 + $0x8] sm:$0xff]  }
0x118f   :  { %v2867_v39 = vadd.f32 %v2866_v45, %v2589_v24  ;;  %v8302_v24 = vld [vmem:[#allocation17] sm:$0xff]  }
0x1191   :  { %8563 = vtanh.f32 %v2867_v39  ;;  %v8303_v39 = vld [vmem:[#allocation17 + $0x48] sm:$0xff]  }
0x119b   :  { %v8564_v51 = vpop.eup %8563 }
0x119c   :  { %v2870_v62 = vmul.f32 %v8564_v51, %v2869_v42  ;;  %v8305_v42 = vld [vmem:[#allocation17 + $0x50] sm:$0xff]  }
0x119d   :  { %v8306_v51 = vld [vmem:[#allocation17 + $0x10] sm:$0xff]  }
0x119e   :  { %v9601_v1 = vadd.f32 %v2871_v55, %v2870_v62  ;;  %v8307_v62 = vld [vmem:[#allocation17 + $0x58] sm:$0xff]  }
0x119f   :  { %v8308_v55 = vld [vmem:[#allocation17 + $0x18] sm:$0xff]  }
0x11a0   :  { %v9605_v47 = vpack.c.bf16 %v9601_v1, %v9601_v1  ;;  %3063 = vst.msk [vmem:[#allocation2] sm:$0x1] %vm9322_vm1, %v9601_v1 }
0x11a2   :  { %7707 = vmatmul.mubr.bf16.vlgmr.msra.gmra.mrb[32].mxu0 %v9605_v47 }
0x11a3   :  { %7731 = vmatprep.mubr.msk.bf16.mxu0 %vm9004_vm0, %v10103_v0 }
0x1275   :  { %v2972_v60 = vpop.f32.mrb[32].mxu0 }
0x1276   :  { %v7708_v10 = vpop.f32.mrb[33].mxu0  ;;  %v2978_v27 = vsel %vm845_vm2, %v2972_v60, -inf }
0x1277   :  { %2979 = vmax.xlane.f32.xlu1 %v2978_v27  ;;  %v2975_v61 = vpop.f32.mrb[34].mxu0  ;;  %v8310_v10 = vld [vmem:[#allocation17 + $0x20] sm:$0xff]   ;;  %v8311_v27 = vld [vmem:[#allocation17 + $0x68] sm:$0xff]  }
0x1278   :  { %v7709_v57 = vpop.f32.mrb[35].mxu0  ;;  %v8312_v61 = vld [vmem:[#allocation17 + $0x28] sm:$0xff]  }
0x1279   :  { %v8313_v57 = vld [vmem:[#allocation17 + $0x70] sm:$0xff]  }
0x1304   :  { %v2980_v58 = vpop.xlane.xlu1 %2979 }
0x1305   :  { %v2981_v63 = vsub.f32 %v2972_v60, %v2980_v58  ;;  %v8309_v60 = vld [vmem:[#allocation17 + $0x60] sm:$0xff]   ;;  %v8314_v58 = vld [vmem:[#allocation17 + $0x30] sm:$0xff]  }
0x1307   :  { %v2982_v2 = vmul.f32 1.442695, %v2981_v63  ;;  %v8315_v63 = vld [vmem:[#allocation17 + $0x78] sm:$0xff]  }
0x1309   :  { %8565 = vpow2.f32 %v2982_v2  ;;  %v8316_v2 = vld [vmem:[#allocation17 + $0x38] sm:$0xff]  }
0x1313   :  { %v8566_v3 = vpop.eup %8565 }
0x1314   :  { %v2984_v11 = vsel %vm845_vm2, %v8566_v3, 0.0 }
0x1315   :  { %2985 = vadd.xlane.f32.xlu0 %v2984_v11  ;;  %v8318_v11 = vld [vmem:[#allocation20 + $0x8] sm:$0xff]  }
0x13a2   :  { %v2986_v20 = vpop.xlane.xlu0 %2985 }
0x13a3   :  { %8567 = vrcp.f32 %v2986_v20 }
0x13ad   :  { %v8568_v23 = vpop.eup %8567 }
0x13ae   :  { %v2988_v45 = vmul.f32 %v8568_v23, %v8566_v3  ;;  %v8317_v3 = vld [vmem:[#allocation20] sm:$0xff]  }
0x13af   :  { %7716 = vmatpush3.bf16.msra.mxu0 %v8317_v3 }
0x13b0   :  { %7713 = vmatmul.mubr.msk.f32.vlgmr.msra.gmra.mrb[10].mxu1 %vm858_vm3, %v2988_v45  ;;  %7717 = vmatprep.subr.bf16.mxu0 %v10103_v0 }
0x13b1   :  { %7270 = vmatpush3.bf16.msra.mxu1 %v8302_v24 }
0x13b2   :  { %7271 = vmatprep.subr.bf16.mxu1 %v8303_v39 }
0x13b3   :  { %7718 = vmatpush3.bf16.msra.mxu0 %v8318_v11 }
0x13b4   :  { %7719 = vmatprep.subr.bf16.mxu0 %v10103_v0 }
0x13b5   :  { %7272 = vmatpush3.bf16.msra.mxu1 %v8304_v36 }
0x13b6   :  { %7273 = vmatprep.subr.bf16.mxu1 %v8305_v42  ;;  %v10104_v42 = vmov 0  }
0x13b7   :  { %7720 = vmatpush3.bf16.msra.mxu0 %v8319_v16 }
0x13b8   :  { %7721 = vmatprep.subr.bf16.mxu0 %v10103_v0 }
0x13b9   :  { %7274 = vmatpush3.bf16.msra.mxu1 %v8306_v51  ;;  %v3266_v51 = vld [vmem:[#allocation21] sm:$0x1] }
0x13ba   :  { %7275 = vmatprep.subr.bf16.mxu1 %v8307_v62 }
0x13bd   :  { %7276 = vmatpush3.bf16.msra.mxu1 %v8308_v55 }
0x13be   :  { %7277 = vmatprep.subr.bf16.mxu1 %v8309_v60 }
0x13c1   :  { %7278 = vmatpush3.bf16.msra.mxu1 %v8310_v10 }
0x13c2   :  { %7279 = vmatprep.subr.bf16.mxu1 %v8311_v27 }
0x13c5   :  { %7280 = vmatpush3.bf16.msra.mxu1 %v8312_v61 }
0x13c6   :  { %7281 = vmatprep.subr.bf16.mxu1 %v8313_v57 }
0x13c9   :  { %7282 = vmatpush3.bf16.msra.mxu1 %v8314_v58 }
0x13ca   :  { %7283 = vmatprep.subr.bf16.mxu1 %v8315_v63  ;;  %v2312_v63 = vsub.f32 -inf, %v9453_v17 }
0x13cd   :  { %7284 = vmatpush3.bf16.msra.mxu1 %v8316_v2 }
0x13ce   :  { %3576 = vmatprep.subr.bf16.mxu1 %v9464_v29 }
0x1483   :  { %v3059_v20 = vpop.f32.mrb[10].mxu1 }
0x1484   :  { %3064 = vst.msk [vmem:[#allocation2 + $0x1] sm:$0x1] %vm9322_vm1, %v3059_v20  ;;  %v7714_v23 = vpop.f32.mrb[11].mxu1 }
0x148b   :  { %v3065_v24 = vld [vmem:[#allocation2] sm:$0x3] }
0x148c   :  { %v3074_v29 = vrot.slane %v3065_v24, %v9311_v9  ;;  %v3070_v45 = vrot.slane %v3065_v24, %v9309_v6 }
0x148e   :  { %v3078_v39 = vpack.c.bf16 %v3074_v29, %v3074_v29  ;;  %v3077_v36 = vpack.c.bf16 %v3070_v45, %v3070_v45 }
0x1490   :  { %3240 = vmatprep.mubr.bf16.mxu1 %v3078_v39 }
0x1491   :  { %3241 = vmatmul.mubr.bf16.vlgmr.msra.gmra.mrb[36].mxu1 %v3077_v36 }
0x1492   :  { %3577 = vmatpush1.bf16.msra.mxu1 %v9462_v28  ;;  %3608 = vmatprep.mubr.bf16.mxu1 %v10104_v42  ;;  %v8320_v28 = vld [vmem:[#allocation20 + $0x18] sm:$0xff]  }
0x1493   :  { %3578 = vmatprep.subr.bf16.mxu1 %v9466_v32  ;;  %7722 = vmatpush3.bf16.msra.mxu0 %v8320_v28  ;;  %v8321_v32 = vld [vmem:[#allocation20 + $0x20] sm:$0xff]  }
0x1494   :  { %7723 = vmatprep.subr.bf16.mxu0 %v10103_v0 }
0x1496   :  { %3579 = vmatpush1.bf16.msra.mxu1 %v9470_v34  ;;  %v8322_v34 = vld [vmem:[#allocation20 + $0x28] sm:$0xff]  }
0x1497   :  { %3580 = vmatprep.subr.bf16.mxu1 %v9474_v35  ;;  %7724 = vmatpush3.bf16.msra.mxu0 %v8321_v32  ;;  %v8323_v35 = vld [vmem:[#allocation20 + $0x30] sm:$0xff]  }
0x1498   :  { %7725 = vmatprep.subr.bf16.mxu0 %v10103_v0 }
0x149a   :  { %3581 = vmatpush1.bf16.msra.mxu1 %v9477_v37  ;;  %v8324_v37 = vld [vmem:[#allocation20 + $0x38] sm:$0xff]  }
0x149b   :  { %3582 = vmatprep.subr.bf16.mxu1 %v9481_v38  ;;  %7726 = vmatpush3.bf16.msra.mxu0 %v8322_v34  ;;  %v8325_v34 = vld [vmem:[#allocation11 + $0x8] ss:$12 sps:$4 sm:$0xff]  }
0x149c   :  { %7727 = vmatprep.subr.bf16.mxu0 %v10103_v0 }
0x149e   :  { %3583 = vmatpush1.bf16.msra.mxu1 %v9484_v40  ;;  %v3111_v40 = vld [vmem:[#allocation18] sm:$0x1] }
0x149f   :  { %3584 = vmatprep.subr.bf16.mxu1 %v9488_v41  ;;  %7728 = vmatpush3.bf16.msra.mxu0 %v8323_v35  ;;  %v8326_v35 = vld [vmem:[#allocation11 + $0x20] ss:$12 sps:$4 sm:$0xff]  }
0x14a0   :  { %7729 = vmatprep.subr.bf16.mxu0 %v10103_v0 }
0x14a2   :  { %3585 = vmatpush1.bf16.msra.mxu1 %v9491_v43 }
0x14a3   :  { %3586 = vmatprep.subr.bf16.mxu1 %v9495_v44  ;;  %7730 = vmatpush3.bf16.msra.mxu0 %v8324_v37  ;;  %v8327_v37 = vld [vmem:[#allocation11 + $0x38] ss:$12 sps:$4 sm:$0xff]  }
0x14a4   :  { %7735 = vmatprep.subr.bf16.mxu0 %v10103_v0 }
0x14a6   :  { %3587 = vmatpush1.bf16.msra.mxu1 %v9498_v49 }
0x14a7   :  { %3588 = vmatprep.subr.bf16.mxu1 %v9502_v50 }
0x14aa   :  { %3589 = vmatpush1.bf16.msra.mxu1 %v9505_v52 }
0x14ab   :  { %3590 = vmatprep.subr.bf16.mxu1 %v9511_v53 }
0x14ae   :  { %3591 = vmatpush1.bf16.msra.mxu1 %v9513_v54  ;;  %v2316_v54 = vsub.f32 %v9447_v5, %v9453_v17  ;;  %v2313_v5 = vmul.f32 1.442695, %v2312_v63 }
0x14af   :  { %3834 = vmatprep.subr.bf16.mxu1 %v9517_v56 }
0x14b0   :  { %v2317_v56 = vmul.f32 1.442695, %v2316_v54 }
0x1564   :  { %v7285_v38 = vpop.f32.mrb[36].mxu1 }
0x1565   :  { %v7286_v41 = vpop.f32.mrb[37].mxu1 }
0x1566   :  { %v7287_v43 = vadd.f32 %v7286_v41, %v7285_v38  ;;  %v7288_v44 = vpop.f32.mrb[38].mxu1  ;;  %v8328_v38 = vld [vmem:[#allocation11 + $0x50] ss:$12 sps:$4 sm:$0xff]   ;;  %v8330_v41 = vld [vmem:[#allocation11 + $0x80] ss:$12 sps:$4 sm:$0xff]  }
0x1567   :  { %v7289_v49 = vpop.f32.mrb[39].mxu1  ;;  %v8332_v44 = vld [vmem:[#allocation11 + $0xb0] ss:$12 sps:$4 sm:$0xff]  }
0x1568   :  { %v3243_v50 = vadd.f32 %v7287_v43, %v3111_v40  ;;  %v8329_v40 = vld [vmem:[#allocation11 + $0x68] ss:$12 sps:$4 sm:$0xff]   ;;  %v8331_v43 = vld [vmem:[#allocation11 + $0x98] ss:$12 sps:$4 sm:$0xff]  }
0x156a   :  { %8569 = vtanh.f32 %v3243_v50 }
0x156b   :  { %8571 = vpow2.f32 %v2317_v56 }
0x156c   :  { %8573 = vpow2.f32 %v2313_v5 }
0x1574   :  { %v8570_v52 = vpop.eup %8569 }
0x1575   :  { %v3249_v53 = vpack.c.bf16 %v8570_v52, %v8570_v52  ;;  %v8572_v57 = vpop.eup %8571 }
0x1576   :  { %v2319_v58 = vsel %vm1228_vm4, %v8572_v57, 0.0  ;;  %v8574_v2 = vpop.eup %8573  ;;  %v3431_v57 = vld [vmem:[#allocation14] sm:$0x7] }
0x1577   :  { %7732 = vmatmul.mubr.bf16.vlgmr.msra.gmra.mrb[36].mxu0 %v3249_v53  ;;  %v2315_v16 = vmul.f32 0.0, %v8574_v2  ;;  %v3568_v5 = vrot.slane %v3431_v57, %v9311_v9 }
0x1578   :  { %7751 = vmatprep.mubr.msk.bf16.mxu0 %vm9004_vm0, %v10103_v0  ;;  %7736 = vmatpush3.bf16.msra.mxu0 %v8325_v34 }
0x1579   :  { %7737 = vmatprep.subr.bf16.mxu0 %v10103_v0 }
0x157c   :  { %7738 = vmatpush3.bf16.msra.mxu0 %v8326_v35 }
0x157d   :  { %7739 = vmatprep.subr.bf16.mxu0 %v10103_v0 }
0x1580   :  { %7740 = vmatpush3.bf16.msra.mxu0 %v8327_v37 }
0x1581   :  { %7741 = vmatprep.subr.bf16.mxu0 %v10103_v0 }
0x1584   :  { %7742 = vmatpush3.bf16.msra.mxu0 %v8328_v38 }
0x1585   :  { %7743 = vmatprep.subr.bf16.mxu0 %v10103_v0 }
0x1588   :  { %7744 = vmatpush3.bf16.msra.mxu0 %v8329_v40 }
0x1589   :  { %7745 = vmatprep.subr.bf16.mxu0 %v10103_v0 }
0x158c   :  { %7746 = vmatpush3.bf16.msra.mxu0 %v8330_v41 }
0x158d   :  { %7747 = vmatprep.subr.bf16.mxu0 %v10103_v0 }
0x1590   :  { %7748 = vmatpush3.bf16.msra.mxu0 %v8331_v43  ;;  %v3572_v43 = vrot.slane %v3431_v57, %v9317_v30 }
0x1591   :  { %7749 = vmatprep.subr.bf16.mxu0 %v10103_v0 }
0x1594   :  { %7750 = vmatpush3.bf16.msra.mxu0 %v8332_v44 }
0x1595   :  { %7755 = vmatprep.subr.bf16.mxu0 %v10103_v0 }
0x164a   :  { %v3349_v62 = vpop.f32.mrb[36].mxu0 }
0x164b   :  { %v9653_v55 = vadd.f32 %v3349_v62, %v3266_v51  ;;  %v7733_v60 = vpop.f32.mrb[37].mxu0  ;;  %v8333_v62 = vld [vmem:[#allocation12 + $0x8] ss:$12 sps:$4 sm:$0xff]  }
0x164c   :  { %v3352_v10 = vpop.f32.mrb[38].mxu0 }
0x164d   :  { %v7734_v27 = vpop.f32.mrb[39].mxu0  ;;  %v3355_v61 = vsel %vm1228_vm4, %v9653_v55, -inf  ;;  %v8334_v10 = vld [vmem:[#allocation12 + $0x20] ss:$12 sps:$4 sm:$0xff]  }
0x164e   :  { %3356 = vmax.xlane.f32.xlu1 %v3355_v61  ;;  %v8335_v27 = vld [vmem:[#allocation12 + $0x38] ss:$12 sps:$4 sm:$0xff]  }
0x164f   :  { %v3689_v61 = vld [vmem:[#allocation15] sm:$0x7] }
0x1650   :  { %v3822_v63 = vrot.slane %v3689_v61, %v9309_v6  ;;  %v3826_v2 = vrot.slane %v3689_v61, %v9311_v9  ;;  %v3830_v41 = vrot.slane %v3689_v61, %v9317_v30  ;;  %v8353_v61 = vld [vmem:[#allocation17 + $0x50] sm:$0xff]  }
0x1652   :  { %2320 = vadd.xlane.f32.xlu1 %v2319_v58  ;;  %v3564_v58 = vrot.slane %v3431_v57, %v9309_v6  ;;  %v8354_v57 = vld [vmem:[#allocation17 + $0x10] sm:$0xff]  }
0x16db   :  { %v9659_v3 = vpop.xlane.xlu1 %3356 }
0x16dc   :  { %vm3358_vm11 = vcmp.eq.f32.partialorder %v9653_v55, %v9659_v3  ;;  %vm3386_vm13 = vcmp.gt.f32.partialorder %v9659_v3, -inf }
0x16dd   :  { %v3359_v11 = vsel %vm3358_vm11, %v9364_v14, 128 }
0x16de   :  { %v3360_v20 = vsel %vm1228_vm4, %v3359_v11, 2147483647  ;;  %v8002_v11 = vadd.f32 %v3822_v63, %v3564_v58  ;;  %v8355_v58 = vld [vmem:[#allocation17 + $0x58] sm:$0xff]  }
0x16df   :  { %v2321_v23 = vpop.xlane.xlu1 %2320  ;;  %v3362_v24 = vshra.s32 %v3360_v20, 16  ;;  %v3361_v39 = vand.u32 65535, %v3360_v20  ;;  %v8356_v63 = vld [vmem:[#allocation17 + $0x18] sm:$0xff]  }
0x16e0   :  { %v2322_v29 = vadd.f32 %v2321_v23, %v2315_v16  ;;  %v8004_v23 = vadd.f32 %v3826_v2, %v3568_v5  ;;  %v8357_v5 = vld [vmem:[#allocation17 + $0x60] sm:$0xff]  }
0x16e1   :  { %v3364_v45 = vcvt.s32.f32 %v3362_v24  ;;  %v3363_v28 = vcvt.s32.f32 %v3361_v39  ;;  %v8358_v2 = vld [vmem:[#allocation17 + $0x20] sm:$0xff]  }
0x16e2   :  { %8575 = vrcp.f32 %v2322_v29 }
0x16e3   :  { %3365 = vmin.xlane.f32.xlu0 %v3364_v45 }
0x16ec   :  { %v8576_v17 = vpop.eup %8575 }
0x16ed   :  { %8044 = vpush %v8576_v17 }
0x171e   :  { %s8045_s30 = spop %8044 }
0x171f   :  { %2332 = sst [smem:[#allocation24 + $0x1]] %s8045_s30 }
0x1770   :  { %v3366_v36 = vpop.xlane.xlu0 %3365 }
0x1771   :  { %vm3367_vm12 = vcmp.eq.f32.partialorder %v3364_v45, %v3366_v36  ;;  %v3372_v49 = vcvt.f32.s32 %v3366_v36 }
0x1772   :  { %v3368_v32 = vsel %vm3367_vm12, %v3363_v28, inf }
0x1773   :  { %3369 = vmin.xlane.f32.xlu0 %v3368_v32  ;;  %v3373_v52 = vshll.u32 %v3372_v49, 16 }
0x1800   :  { %v3370_v50 = vpop.xlane.xlu0 %3369 }
0x1801   :  { %v3371_v53 = vcvt.f32.s32 %v3370_v50 }
0x1803   :  { %v3374_v54 = vadd.s32 %v3373_v52, %v3371_v53 }
0x1805   :  { %v3387_v56 = vsel %vm3386_vm13, %v3374_v54, 0 }
0x1806   :  { %8046 = vpush %v3387_v56 }
0x1837   :  { %s8047_s17 = spop %8046 }
0x1838   :  { %3390 = sst [smem:[#allocation23 + $0x2]] %s8047_s17  ;;  %s3396_s18 = scalar_lea.vmem [#allocation3], %s8047_s17 }
0x1839   :  { %v3397_v51 = vld [vmem:[%s3396_s18] sm:$0x1] }
0x183a   :  { %v3398_v60 = vpack.c.bf16 %v3397_v51, %v3397_v51 }
0x183c   :  { %3609 = vmatmul.mubr.bf16.vlgmr.msra.gmra.mrb[40].mxu1 %v3398_v60  ;;  %7752 = vmatmul.mubr.bf16.vlgmr.msra.gmra.mrb[40].mxu0 %v3398_v60 }
0x183d   :  { %3835 = vmatpush1.bf16.msra.mxu1 %v9523_v7  ;;  %7756 = vmatpush3.bf16.msra.mxu0 %v8333_v62  ;;  %v8336_v7 = vld [vmem:[#allocation12 + $0x50] ss:$12 sps:$4 sm:$0xff]  }
0x183e   :  { %3836 = vmatprep.subr.bf16.mxu1 %v9525_v48  ;;  %7757 = vmatprep.subr.bf16.mxu0 %v10103_v0  ;;  %v8337_v48 = vld [vmem:[#allocation12 + $0x68] ss:$12 sps:$4 sm:$0xff]  }
0x183f   :  { %3866 = vmatprep.mubr.bf16.mxu1 %v10104_v42  ;;  %7771 = vmatprep.mubr.msk.bf16.mxu0 %vm9004_vm0, %v10103_v0 }
0x1841   :  { %3837 = vmatpush1.bf16.msra.mxu1 %v9528_v59  ;;  %7758 = vmatpush3.bf16.msra.mxu0 %v8334_v10  ;;  %v8338_v59 = vld [vmem:[#allocation12 + $0x80] ss:$12 sps:$4 sm:$0xff]  }
0x1842   :  { %3838 = vmatprep.subr.bf16.mxu1 %v9532_v13  ;;  %7759 = vmatprep.subr.bf16.mxu0 %v10103_v0  ;;  %v8339_v13 = vld [vmem:[#allocation12 + $0x98] ss:$12 sps:$4 sm:$0xff]  }
0x1845   :  { %3839 = vmatpush1.bf16.msra.mxu1 %v9538_v8  ;;  %7760 = vmatpush3.bf16.msra.mxu0 %v8335_v27  ;;  %v8340_v8 = vld [vmem:[#allocation12 + $0xb0] ss:$12 sps:$4 sm:$0xff]  }
0x1846   :  { %3840 = vmatprep.subr.bf16.mxu1 %v9542_v18  ;;  %7761 = vmatprep.subr.bf16.mxu0 %v10103_v0  ;;  %v8341_v18 = vld [vmem:[#allocation9] sm:$0xff]  }
0x1849   :  { %3841 = vmatpush1.bf16.msra.mxu1 %v9545_v19  ;;  %7762 = vmatpush3.bf16.msra.mxu0 %v8336_v7  ;;  %v8342_v19 = vld [vmem:[#allocation9 + $0x8] sm:$0xff]  }
0x184a   :  { %3842 = vmatprep.subr.bf16.mxu1 %v9549_v21  ;;  %7763 = vmatprep.subr.bf16.mxu0 %v10103_v0  ;;  %v8343_v21 = vld [vmem:[#allocation9 + $0x10] sm:$0xff]  }
0x184d   :  { %3843 = vmatpush1.bf16.msra.mxu1 %v9552_v22  ;;  %7764 = vmatpush3.bf16.msra.mxu0 %v8337_v48  ;;  %v8344_v22 = vld [vmem:[#allocation9 + $0x18] sm:$0xff]  }
0x184e   :  { %3844 = vmatprep.subr.bf16.mxu1 %v9556_v4  ;;  %7765 = vmatprep.subr.bf16.mxu0 %v10103_v0  ;;  %v8345_v4 = vld [vmem:[#allocation9 + $0x20] sm:$0xff]  }
0x1851   :  { %3845 = vmatpush1.bf16.msra.mxu1 %v9559_v15  ;;  %7766 = vmatpush3.bf16.msra.mxu0 %v8338_v59  ;;  %v8346_v15 = vld [vmem:[#allocation9 + $0x28] sm:$0xff]  }
0x1852   :  { %3846 = vmatprep.subr.bf16.mxu1 %v9563_v25  ;;  %7767 = vmatprep.subr.bf16.mxu0 %v10103_v0  ;;  %v8347_v25 = vld [vmem:[#allocation9 + $0x30] sm:$0xff]  }
0x1855   :  { %3847 = vmatpush1.bf16.msra.mxu1 %v9566_v26  ;;  %7768 = vmatpush3.bf16.msra.mxu0 %v8339_v13  ;;  %v8348_v26 = vld [vmem:[#allocation9 + $0x38] sm:$0xff]  }
0x1856   :  { %3848 = vmatprep.subr.bf16.mxu1 %v9570_v31  ;;  %7769 = vmatprep.subr.bf16.mxu0 %v10103_v0 }
0x1859   :  { %3849 = vmatpush1.bf16.msra.mxu1 %v9573_v33  ;;  %7770 = vmatpush3.bf16.msra.mxu0 %v8340_v8 }
0x185a   :  { %7775 = vmatprep.subr.bf16.mxu1 %v10103_v0  ;;  %7795 = vmatprep.subr.mxu0 %v10103_v0 }
0x185c   :  { %3867 = vmatmul.mubr.bf16.vlgmr.msra.gmra.mrb[40].mxu1 %v9605_v47  ;;  %7772 = vmatmul.mubr.bf16.vlgmr.msra.gmra.mrb[44].mxu0 %v9605_v47 }
0x185d   :  { %7791 = vmatprep.mubr.msk.bf16.mxu1 %vm9004_vm0, %v10103_v0  ;;  %7796 = vmatpush3.msra.mxu0 %v9615_v12 }
0x185e   :  { %7797 = vmatprep.mubr.msk.f32.mxu0 %vm9004_vm0, %v10103_v0  ;;  %7776 = vmatpush3.bf16.msra.mxu1 %v8341_v18 }
0x185f   :  { %7777 = vmatprep.subr.bf16.mxu1 %v10103_v0 }
0x1862   :  { %7778 = vmatpush3.bf16.msra.mxu1 %v8342_v19 }
0x1863   :  { %7779 = vmatprep.subr.bf16.mxu1 %v10103_v0 }
0x1866   :  { %7780 = vmatpush3.bf16.msra.mxu1 %v8343_v21 }
0x1867   :  { %7781 = vmatprep.subr.bf16.mxu1 %v10103_v0 }
0x186a   :  { %7782 = vmatpush3.bf16.msra.mxu1 %v8344_v22 }
0x186b   :  { %7783 = vmatprep.subr.bf16.mxu1 %v10103_v0 }
0x186e   :  { %7784 = vmatpush3.bf16.msra.mxu1 %v8345_v4 }
0x186f   :  { %7785 = vmatprep.subr.bf16.mxu1 %v10103_v0 }
0x1872   :  { %7786 = vmatpush3.bf16.msra.mxu1 %v8346_v15  ;;  %v8349_v15 = vld [vmem:[#allocation17 + $0x40] sm:$0xff]  }
0x1873   :  { %7787 = vmatprep.subr.bf16.mxu1 %v10103_v0  ;;  %7329 = vmatprep.subr.bf16.mxu0 %v8349_v15 }
0x1876   :  { %7788 = vmatpush3.bf16.msra.mxu1 %v8347_v25 }
0x1877   :  { %7789 = vmatprep.subr.bf16.mxu1 %v10103_v0 }
0x187a   :  { %7790 = vmatpush3.bf16.msra.mxu1 %v8348_v26 }
0x187b   :  { %7800 = vmatprep.subr.bf16.mxu1 %v10103_v0 }
0x190f   :  { %v3651_v31 = vpop.f32.mrb[40].mxu0 }
0x1910   :  { %v7753_v33 = vpop.f32.mrb[41].mxu0  ;;  %v3652_v52 = vadd.f32 %v3651_v31, %v3572_v43  ;;  %v8350_v31 = vld [vmem:[#allocation17] sm:$0xff]   ;;  %v8370_v43 = vld [vmem:[#allocation20 + $0x28] sm:$0xff]  }
0x1911   :  { %v3654_v47 = vpop.f32.mrb[42].mxu0 }
0x1912   :  { %v7754_v12 = vpop.f32.mrb[43].mxu0  ;;  %v8351_v47 = vld [vmem:[#allocation17 + $0x48] sm:$0xff]  }
0x1913   :  { %v8352_v12 = vld [vmem:[#allocation17 + $0x8] sm:$0xff]  }
0x192f   :  { %v3868_v16 = vpop.f32.mrb[40].mxu1  ;;  %v3909_v20 = vpop.f32.mrb[44].mxu0 }
0x1930   :  { %v8003_v24 = vadd.f32 %v8002_v11, %v3868_v16  ;;  %v3870_v29 = vpop.f32.mrb[41].mxu1  ;;  %v7773_v45 = vpop.f32.mrb[45].mxu0  ;;  %v3910_v49 = vadd.f32 %v3909_v20, %v3830_v41  ;;  %v8359_v11 = vld [vmem:[#allocation17 + $0x68] sm:$0xff]   ;;  %v8361_v20 = vld [vmem:[#allocation17 + $0x70] sm:$0xff]  }
0x1931   :  { %v3872_v17 = vpop.f32.mrb[42].mxu1  ;;  %v3912_v39 = vpop.f32.mrb[46].mxu0  ;;  %v8005_v34 = vadd.f32 %v8004_v23, %v3870_v29  ;;  %v8360_v16 = vld [vmem:[#allocation17 + $0x28] sm:$0xff]   ;;  %v8362_v23 = vld [vmem:[#allocation17 + $0x30] sm:$0xff]   ;;  %v8364_v29 = vld [vmem:[#allocation17 + $0x38] sm:$0xff]  }
0x1932   :  { %v6919_v36 = vmul.f32 -1.442695, %v8003_v24  ;;  %v3873_v28 = vpop.f32.mrb[43].mxu1  ;;  %v7774_v32 = vpop.f32.mrb[47].mxu0  ;;  %v8363_v24 = vld [vmem:[#allocation17 + $0x78] sm:$0xff]   ;;  %v8365_v45 = vld [vmem:[#allocation20] sm:$0xff]  }
0x1933   :  { %v6920_v35 = vmul.f32 -1.442695, %v8005_v34  ;;  %v8366_v17 = vld [vmem:[#allocation20 + $0x8] sm:$0xff]   ;;  %v8367_v39 = vld [vmem:[#allocation20 + $0x10] sm:$0xff]   ;;  %v8369_v41 = vld [vmem:[#allocation20 + $0x20] sm:$0xff]  }
0x1934   :  { %8577 = vpow2.f32 %v6919_v36 }
0x1935   :  { %8579 = vpow2.f32 %v6920_v35 }
0x193e   :  { %v8578_v37 = vpop.eup %8577 }
0x193f   :  { %v3919_v38 = vadd.f32 1.0, %v8578_v37  ;;  %v8580_v40 = vpop.eup %8579 }
0x1940   :  { %v3926_v44 = vadd.f32 1.0, %v8580_v40  ;;  %v8368_v40 = vld [vmem:[#allocation20 + $0x18] sm:$0xff]  }
0x1941   :  { %8581 = vrcp.f32 %v3919_v38 }
0x1942   :  { %8583 = vrcp.f32 %v3926_v44  ;;  %v8371_v44 = vld [vmem:[#allocation20 + $0x30] sm:$0xff]  }
0x194b   :  { %v8582_v50 = vpop.eup %8581 }
0x194c   :  { %v3929_v53 = vmul.f32 %v8582_v50, %v3910_v49  ;;  %v8584_v56 = vpop.eup %8583  ;;  %v8372_v49 = vld [vmem:[#allocation20 + $0x38] sm:$0xff]  }
0x194d   :  { %v3932_v51 = vsub.f32 1.0, %v8584_v56  ;;  %v3934_v10 = vmul.f32 %v8584_v56, %v9601_v1 }
0x194e   :  { %v3930_v54 = vadd.f32 %v3929_v53, %v3652_v52  ;;  %v4174_v52 = vld [vmem:[#allocation18] sm:$0x1] }
0x1950   :  { %8585 = vtanh.f32 %v3930_v54 }
0x195a   :  { %v8586_v62 = vpop.eup %8585 }
0x195b   :  { %v3933_v60 = vmul.f32 %v8586_v62, %v3932_v51 }
0x195d   :  { %v9723_v27 = vadd.f32 %v3934_v10, %v3933_v60 }
0x195f   :  { %v9727_v7 = vpack.c.bf16 %v9723_v27, %v9723_v27  ;;  %4126 = vst.msk [vmem:[#allocation2] sm:$0x1] %vm9322_vm1, %v9723_v27 }
0x1961   :  { %7792 = vmatmul.mubr.bf16.vlgmr.msra.gmra.mrb[44].mxu1 %v9727_v7 }
0x1962   :  { %7816 = vmatprep.mubr.msk.bf16.mxu1 %vm9004_vm0, %v10103_v0  ;;  %7801 = vmatpush3.bf16.msra.mxu1 %v8365_v45  ;;  %v8380_v45 = vld [vmem:[#allocation11 + $0x20] ss:$12 sps:$4 sm:$0xff]  }
0x1963   :  { %7802 = vmatprep.subr.bf16.mxu1 %v10103_v0 }
0x1966   :  { %7803 = vmatpush3.bf16.msra.mxu1 %v8366_v17  ;;  %v9778_v17 = vld [vmem:[#allocation11 + $0x18] ss:$12 sps:$4 sm:$0xff]  }
0x1967   :  { %7804 = vmatprep.subr.bf16.mxu1 %v10103_v0 }
0x196a   :  { %7805 = vmatpush3.bf16.msra.mxu1 %v8367_v39  ;;  %v9782_v39 = vld [vmem:[#allocation11 + $0x34] ss:$12 sps:$4 sm:$0xff]  }
0x196b   :  { %7806 = vmatprep.subr.bf16.mxu1 %v10103_v0 }
0x196e   :  { %7807 = vmatpush3.bf16.msra.mxu1 %v8368_v40  ;;  %v9799_v40 = vld [vmem:[#allocation11 + $0x60] ss:$12 sps:$4 sm:$0xff]  }
0x196f   :  { %7808 = vmatprep.subr.bf16.mxu1 %v10103_v0 }
0x1972   :  { %7809 = vmatpush3.bf16.msra.mxu1 %v8369_v41  ;;  %v9803_v41 = vld [vmem:[#allocation11 + $0x7c] ss:$12 sps:$4 sm:$0xff]  }
0x1973   :  { %7810 = vmatprep.subr.bf16.mxu1 %v10103_v0 }
0x1976   :  { %7811 = vmatpush3.bf16.msra.mxu1 %v8370_v43  ;;  %v8396_v43 = vld [vmem:[#allocation11 + $0x80] ss:$12 sps:$4 sm:$0xff]  }
0x1977   :  { %7812 = vmatprep.subr.bf16.mxu1 %v10103_v0 }
0x197a   :  { %7813 = vmatpush3.bf16.msra.mxu1 %v8371_v44  ;;  %v9806_v44 = vld [vmem:[#allocation11 + $0x78] ss:$12 sps:$4 sm:$0xff]  }
0x197b   :  { %7814 = vmatprep.subr.bf16.mxu1 %v10103_v0 }
0x197e   :  { %7815 = vmatpush3.bf16.msra.mxu1 %v8372_v49  ;;  %v9810_v49 = vld [vmem:[#allocation11 + $0x94] ss:$12 sps:$4 sm:$0xff]  }
0x197f   :  { %7820 = vmatprep.subr.bf16.mxu1 %v10103_v0 }
0x1a34   :  { %v4035_v48 = vpop.f32.mrb[44].mxu1 }
0x1a35   :  { %v7793_v59 = vpop.f32.mrb[45].mxu1  ;;  %v4041_v13 = vsel %vm845_vm2, %v4035_v48, -inf }
0x1a36   :  { %4042 = vmax.xlane.f32.xlu1 %v4041_v13  ;;  %v4038_v1 = vpop.f32.mrb[46].mxu1  ;;  %v4329_v13 = vld [vmem:[#allocation21] sm:$0x1] }
0x1a37   :  { %v7794_v8 = vpop.f32.mrb[47].mxu1 }
0x1ac3   :  { %v4043_v18 = vpop.xlane.xlu1 %4042 }
0x1ac4   :  { %v4044_v19 = vsub.f32 %v4035_v48, %v4043_v18  ;;  %v3379_v48 = vsub.f32 %v9653_v55, %v9659_v3 }
0x1ac6   :  { %v4045_v21 = vmul.f32 1.442695, %v4044_v19  ;;  %v3380_v59 = vmul.f32 1.442695, %v3379_v48 }
0x1ac8   :  { %8587 = vpow2.f32 %v4045_v21 }
0x1ad2   :  { %v8588_v22 = vpop.eup %8587 }
0x1ad3   :  { %v4047_v4 = vsel %vm845_vm2, %v8588_v22, 0.0 }
0x1ad4   :  { %4048 = vadd.xlane.f32.xlu0 %v4047_v4 }
0x1b61   :  { %v4049_v25 = vpop.xlane.xlu0 %4048 }
0x1b62   :  { %8589 = vrcp.f32 %v4049_v25  ;;  %v3375_v25 = vsub.f32 -inf, %v9659_v3 }
0x1b64   :  { %v3376_v55 = vmul.f32 1.442695, %v3375_v25  ;;  %v9840_v25 = vld [vmem:[#allocation12 + $0x34] ss:$12 sps:$4 sm:$0xff]  }
0x1b6c   :  { %v8590_v26 = vpop.eup %8589 }
0x1b6d   :  { %v4051_v33 = vmul.f32 %v8590_v26, %v8588_v22 }
0x1b6f   :  { %7798 = vmatmul.mubr.msk.f32.vlgmr.msra.gmra.mrb[22].mxu0 %vm858_vm3, %v4051_v33 }
0x1b70   :  { %7330 = vmatpush3.bf16.msra.mxu0 %v8350_v31 }
0x1b71   :  { %7331 = vmatprep.subr.bf16.mxu0 %v8351_v47 }
0x1b74   :  { %7332 = vmatpush3.bf16.msra.mxu0 %v8352_v12 }
0x1b75   :  { %7333 = vmatprep.subr.bf16.mxu0 %v8353_v61 }
0x1b78   :  { %7334 = vmatpush3.bf16.msra.mxu0 %v8354_v57 }
0x1b79   :  { %7335 = vmatprep.subr.bf16.mxu0 %v8355_v58 }
0x1b7c   :  { %7336 = vmatpush3.bf16.msra.mxu0 %v8356_v63 }
0x1b7d   :  { %7337 = vmatprep.subr.bf16.mxu0 %v8357_v5 }
0x1b80   :  { %7338 = vmatpush3.bf16.msra.mxu0 %v8358_v2 }
0x1b81   :  { %7339 = vmatprep.subr.bf16.mxu0 %v8359_v11 }
0x1b84   :  { %7340 = vmatpush3.bf16.msra.mxu0 %v8360_v16 }
0x1b85   :  { %7341 = vmatprep.subr.bf16.mxu0 %v8361_v20  ;;  %v9770_v20 = vld [vmem:[#allocation11] ss:$12 sps:$4 sm:$0xff]  }
0x1b88   :  { %7342 = vmatpush3.bf16.msra.mxu0 %v8362_v23  ;;  %v9772_v23 = vld [vmem:[#allocation11 + $0x4] ss:$12 sps:$4 sm:$0xff]  }
0x1b89   :  { %7343 = vmatprep.subr.bf16.mxu0 %v8363_v24  ;;  %v8376_v24 = vld [vmem:[#allocation11 + $0x8] ss:$12 sps:$4 sm:$0xff]  }
0x1b8c   :  { %7344 = vmatpush3.bf16.msra.mxu0 %v8364_v29  ;;  %v9774_v29 = vld [vmem:[#allocation11 + $0x1c] ss:$12 sps:$4 sm:$0xff]  }
0x1b8d   :  { %4639 = vmatprep.subr.bf16.mxu0 %v9772_v23 }
0x1c42   :  { %v4122_v36 = vpop.f32.mrb[22].mxu0 }
0x1c43   :  { %4127 = vst.msk [vmem:[#allocation2 + $0x1] sm:$0x1] %vm9322_vm1, %v4122_v36  ;;  %v7799_v28 = vpop.f32.mrb[23].mxu0  ;;  %v8384_v36 = vld [vmem:[#allocation11 + $0x38] ss:$12 sps:$4 sm:$0xff]  }
0x1c44   :  { %v9785_v28 = vld [vmem:[#allocation11 + $0x30] ss:$12 sps:$4 sm:$0xff]  }
0x1c4a   :  { %v4128_v32 = vld [vmem:[#allocation2] sm:$0x3] }
0x1c4b   :  { %v4137_v34 = vrot.slane %v4128_v32, %v9311_v9  ;;  %v4133_v35 = vrot.slane %v4128_v32, %v9309_v6  ;;  %v9789_v32 = vld [vmem:[#allocation11 + $0x4c] ss:$12 sps:$4 sm:$0xff]  }
0x1c4d   :  { %v4141_v37 = vpack.c.bf16 %v4137_v34, %v4137_v34  ;;  %v4140_v38 = vpack.c.bf16 %v4133_v35, %v4133_v35  ;;  %v8388_v34 = vld [vmem:[#allocation11 + $0x50] ss:$12 sps:$4 sm:$0xff]   ;;  %v9792_v35 = vld [vmem:[#allocation11 + $0x48] ss:$12 sps:$4 sm:$0xff]  }
0x1c4f   :  { %4303 = vmatprep.mubr.bf16.mxu0 %v4141_v37  ;;  %v9796_v37 = vld [vmem:[#allocation11 + $0x64] ss:$12 sps:$4 sm:$0xff]  }
0x1c50   :  { %4304 = vmatmul.mubr.bf16.vlgmr.msra.gmra.mrb[48].mxu0 %v4140_v38  ;;  %v8392_v38 = vld [vmem:[#allocation11 + $0x68] ss:$12 sps:$4 sm:$0xff]  }
0x1c51   :  { %4671 = vmatprep.mubr.bf16.mxu0 %v10104_v42  ;;  %4640 = vmatpush1.bf16.msra.mxu0 %v9770_v20 }
0x1c52   :  { %4641 = vmatprep.subr.bf16.mxu0 %v9774_v29 }
0x1c55   :  { %4642 = vmatpush1.bf16.msra.mxu0 %v9778_v17 }
0x1c56   :  { %4643 = vmatprep.subr.bf16.mxu0 %v9782_v39 }
0x1c59   :  { %4644 = vmatpush1.bf16.msra.mxu0 %v9785_v28 }
0x1c5a   :  { %4645 = vmatprep.subr.bf16.mxu0 %v9789_v32 }
0x1c5d   :  { %4646 = vmatpush1.bf16.msra.mxu0 %v9792_v35 }
0x1c5e   :  { %4647 = vmatprep.subr.bf16.mxu0 %v9796_v37 }
0x1c61   :  { %4648 = vmatpush1.bf16.msra.mxu0 %v9799_v40 }
0x1c62   :  { %4649 = vmatprep.subr.bf16.mxu0 %v9803_v41 }
0x1c65   :  { %4650 = vmatpush1.bf16.msra.mxu0 %v9806_v44 }
0x1c66   :  { %4651 = vmatprep.subr.bf16.mxu0 %v9810_v49 }
0x1d23   :  { %v7345_v50 = vpop.f32.mrb[48].mxu0 }
0x1d24   :  { %v7346_v53 = vpop.f32.mrb[49].mxu0 }
0x1d25   :  { %v7347_v54 = vadd.f32 %v7346_v53, %v7345_v50  ;;  %v7348_v56 = vpop.f32.mrb[50].mxu0  ;;  %v8400_v50 = vld [vmem:[#allocation11 + $0x98] ss:$12 sps:$4 sm:$0xff]  }
0x1d26   :  { %v7349_v51 = vpop.f32.mrb[51].mxu0  ;;  %v9819_v53 = vld [vmem:[#allocation11 + $0xac] ss:$12 sps:$4 sm:$0xff]   ;;  %v8404_v56 = vld [vmem:[#allocation11 + $0xb0] ss:$12 sps:$4 sm:$0xff]  }
0x1d27   :  { %v4306_v62 = vadd.f32 %v7347_v54, %v4174_v52  ;;  %v9813_v52 = vld [vmem:[#allocation11 + $0x90] ss:$12 sps:$4 sm:$0xff]   ;;  %v9821_v54 = vld [vmem:[#allocation11 + $0xa8] ss:$12 sps:$4 sm:$0xff]  }
0x1d28   :  { %4652 = vmatpush1.bf16.msra.mxu0 %v9813_v52  ;;  %v9825_v51 = vld [vmem:[#allocation12 + $0x4] ss:$12 sps:$4 sm:$0xff]  }
0x1d29   :  { %8591 = vtanh.f32 %v4306_v62  ;;  %4653 = vmatprep.subr.bf16.mxu0 %v9819_v53 }
0x1d2a   :  { %8593 = vpow2.f32 %v3380_v59 }
0x1d2b   :  { %8595 = vpow2.f32 %v3376_v55  ;;  %v9846_v55 = vld [vmem:[#allocation12 + $0x30] ss:$12 sps:$4 sm:$0xff]  }
0x1d2c   :  { %4654 = vmatpush1.bf16.msra.mxu0 %v9821_v54 }
0x1d2d   :  { %4897 = vmatprep.subr.bf16.mxu0 %v9825_v51 }
0x1d33   :  { %v8592_v60 = vpop.eup %8591 }
0x1d34   :  { %v4312_v10 = vpack.c.bf16 %v8592_v60, %v8592_v60  ;;  %v8594_v4 = vpop.eup %8593 }
0x1d35   :  { %v3382_v15 = vsel %vm1228_vm4, %v8594_v4, 0.0  ;;  %v8596_v26 = vpop.eup %8595  ;;  %v9836_v4 = vld [vmem:[#allocation12 + $0x18] ss:$12 sps:$4 sm:$0xff]  }
0x1d36   :  { %7817 = vmatmul.mubr.bf16.vlgmr.msra.gmra.mrb[48].mxu1 %v4312_v10  ;;  %v3378_v47 = vmul.f32 0.0, %v8596_v26  ;;  %v8416_v26 = vld [vmem:[#allocation12 + $0x38] ss:$12 sps:$4 sm:$0xff]  }
0x1d37   :  { %7836 = vmatprep.mubr.msk.bf16.mxu1 %vm9004_vm0, %v10103_v0  ;;  %7821 = vmatpush3.bf16.msra.mxu1 %v8376_v24  ;;  %v9878_v24 = vld [vmem:[#allocation12 + $0xac] ss:$12 sps:$4 sm:$0xff]  }
0x1d38   :  { %7822 = vmatprep.subr.bf16.mxu1 %v10103_v0  ;;  %10105 = vst [vmem:[#allocation35_spill] sm:$0xff] %v9878_v24 }
0x1d3b   :  { %7823 = vmatpush3.bf16.msra.mxu1 %v8380_v45  ;;  %v9881_v45 = vld [vmem:[#allocation12 + $0xa8] ss:$12 sps:$4 sm:$0xff]  }
0x1d3c   :  { %7824 = vmatprep.subr.bf16.mxu1 %v10103_v0  ;;  %10106 = vst [vmem:[#allocation36_spill] sm:$0xff] %v9881_v45 }
0x1d3f   :  { %7825 = vmatpush3.bf16.msra.mxu1 %v8384_v36  ;;  %v8436_v36 = vld [vmem:[#allocation12 + $0xb0] ss:$12 sps:$4 sm:$0xff]  }
0x1d40   :  { %7826 = vmatprep.subr.bf16.mxu1 %v10103_v0 }
0x1d43   :  { %7827 = vmatpush3.bf16.msra.mxu1 %v8388_v34  ;;  %v8437_v34 = vld [vmem:[#allocation9] sm:$0xff]  }
0x1d44   :  { %7828 = vmatprep.subr.bf16.mxu1 %v10103_v0 }
0x1d47   :  { %7829 = vmatpush3.bf16.msra.mxu1 %v8392_v38  ;;  %v8438_v38 = vld [vmem:[#allocation9 + $0x8] sm:$0xff]  }
0x1d48   :  { %7830 = vmatprep.subr.bf16.mxu1 %v10103_v0 }
0x1d4b   :  { %7831 = vmatpush3.bf16.msra.mxu1 %v8396_v43  ;;  %v8439_v43 = vld [vmem:[#allocation9 + $0x10] sm:$0xff]  }
0x1d4c   :  { %7832 = vmatprep.subr.bf16.mxu1 %v10103_v0 }
0x1d4f   :  { %7833 = vmatpush3.bf16.msra.mxu1 %v8400_v50  ;;  %v8440_v50 = vld [vmem:[#allocation9 + $0x18] sm:$0xff]  }
0x1d50   :  { %7834 = vmatprep.subr.bf16.mxu1 %v10103_v0 }
0x1d53   :  { %7835 = vmatpush3.bf16.msra.mxu1 %v8404_v56  ;;  %v8442_v56 = vld [vmem:[#allocation9 + $0x28] sm:$0xff]  }
0x1d54   :  { %7840 = vmatprep.subr.bf16.mxu1 %v10103_v0 }
0x1e09   :  { %v4412_v1 = vpop.f32.mrb[48].mxu1 }
0x1e0a   :  { %v9755_v8 = vadd.f32 %v4412_v1, %v4329_v13  ;;  %v7818_v18 = vpop.f32.mrb[49].mxu1 }
0x1e0b   :  { %v4415_v19 = vpop.f32.mrb[50].mxu1  ;;  %v9831_v18 = vld [vmem:[#allocation12] ss:$12 sps:$4 sm:$0xff]  }
0x1e0c   :  { %v7819_v21 = vpop.f32.mrb[51].mxu1  ;;  %v4418_v22 = vsel %vm1228_vm4, %v9755_v8, -inf  ;;  %v8408_v19 = vld [vmem:[#allocation12 + $0x8] ss:$12 sps:$4 sm:$0xff]  }
0x1e0d   :  { %4419 = vmax.xlane.f32.xlu1 %v4418_v22  ;;  %v9833_v22 = vld [vmem:[#allocation12 + $0x1c] ss:$12 sps:$4 sm:$0xff]  }
0x1e11   :  { %3383 = vadd.xlane.f32.xlu1 %v3382_v15  ;;  %v8412_v15 = vld [vmem:[#allocation12 + $0x20] ss:$12 sps:$4 sm:$0xff]  }
0x1e9a   :  { %v9761_v31 = vpop.xlane.xlu1 %4419 }
0x1e9b   :  { %vm4421_vm14 = vcmp.eq.f32.partialorder %v9755_v8, %v9761_v31  ;;  %vm4449_vm5 = vcmp.gt.f32.partialorder %v9761_v31, -inf }
0x1e9c   :  { %v4422_v33 = vsel %vm4421_vm14, %v9364_v14, 128 }
0x1e9d   :  { %v4423_v12 = vsel %vm1228_vm4, %v4422_v33, 2147483647  ;;  %v9850_v33 = vld [vmem:[#allocation12 + $0x4c] ss:$12 sps:$4 sm:$0xff]  }
0x1e9e   :  { %v3384_v61 = vpop.xlane.xlu1 %3383  ;;  %v4425_v57 = vshra.s32 %v4423_v12, 16  ;;  %v4424_v5 = vand.u32 65535, %v4423_v12  ;;  %v8420_v12 = vld [vmem:[#allocation12 + $0x50] ss:$12 sps:$4 sm:$0xff]  }
0x1e9f   :  { %v3385_v58 = vadd.f32 %v3384_v61, %v3378_v47  ;;  %v9853_v47 = vld [vmem:[#allocation12 + $0x48] ss:$12 sps:$4 sm:$0xff]   ;;  %v9857_v61 = vld [vmem:[#allocation12 + $0x64] ss:$12 sps:$4 sm:$0xff]  }
0x1ea0   :  { %v4427_v63 = vcvt.s32.f32 %v4425_v57  ;;  %v4426_v11 = vcvt.s32.f32 %v4424_v5  ;;  %v9860_v57 = vld [vmem:[#allocation12 + $0x60] ss:$12 sps:$4 sm:$0xff]  }
0x1ea1   :  { %8597 = vrcp.f32 %v3385_v58  ;;  %v8424_v58 = vld [vmem:[#allocation12 + $0x68] ss:$12 sps:$4 sm:$0xff]   ;;  %v8428_v5 = vld [vmem:[#allocation12 + $0x80] ss:$12 sps:$4 sm:$0xff]  }
0x1ea2   :  { %4428 = vmin.xlane.f32.xlu0 %v4427_v63 }
0x1eab   :  { %v8598_v3 = vpop.eup %8597 }
0x1eac   :  { %8048 = vpush %v8598_v3  ;;  %v9867_v3 = vld [vmem:[#allocation12 + $0x78] ss:$12 sps:$4 sm:$0xff]  }
0x1edd   :  { %s8049_s0 = spop %8048 }
0x1ede   :  { %3395 = sst [smem:[#allocation24 + $0x2]] %s8049_s0 }
0x1f2f   :  { %v9767_v2 = vpop.xlane.xlu0 %4428 }
0x1f30   :  { %vm4430_vm15 = vcmp.eq.f32.partialorder %v4427_v63, %v9767_v2  ;;  %v4435_v62 = vcvt.f32.s32 %v9767_v2  ;;  %v9864_v63 = vld [vmem:[#allocation12 + $0x7c] ss:$12 sps:$4 sm:$0xff]   ;;  %v9871_v2 = vld [vmem:[#allocation12 + $0x94] ss:$12 sps:$4 sm:$0xff]  }
0x1f31   :  { %v4431_v16 = vsel %vm4430_vm15, %v4426_v11, inf  ;;  %v9874_v11 = vld [vmem:[#allocation12 + $0x90] ss:$12 sps:$4 sm:$0xff]  }
0x1f32   :  { %4432 = vmin.xlane.f32.xlu0 %v4431_v16  ;;  %v4436_v10 = vshll.u32 %v4435_v62, 16  ;;  %v8432_v16 = vld [vmem:[#allocation12 + $0x98] ss:$12 sps:$4 sm:$0xff]   ;;  %v8443_v62 = vld [vmem:[#allocation9 + $0x30] sm:$0xff]  }
0x1fbf   :  { %v4433_v60 = vpop.xlane.xlu0 %4432 }
0x1fc0   :  { %v4434_v48 = vcvt.f32.s32 %v4433_v60  ;;  %v8444_v60 = vld [vmem:[#allocation9 + $0x38] sm:$0xff]  }
0x1fc2   :  { %v4437_v59 = vadd.s32 %v4436_v10, %v4434_v48 }
0x1fc4   :  { %v4450_v13 = vsel %vm4449_vm5, %v4437_v59, 0 }
0x1fc5   :  { %8050 = vpush %v4450_v13 }
0x1ff6   :  { %s8051_s16 = spop %8050 }
0x1ff7   :  { %4453 = sst [smem:[#allocation23 + $0x3]] %s8051_s16  ;;  %s4459_s20 = scalar_lea.vmem [#allocation3], %s8051_s16 }
0x1ff8   :  { %v4460_v1 = vld [vmem:[%s4459_s20] sm:$0x1] }
0x1ff9   :  { %v4461_v21 = vpack.c.bf16 %v4460_v1, %v4460_v1  ;;  %v4752_v1 = vld [vmem:[#allocation15] sm:$0x7] }
0x1ffb   :  { %4672 = vmatmul.mubr.bf16.vlgmr.msra.gmra.mrb[52].mxu0 %v4461_v21  ;;  %7837 = vmatmul.mubr.bf16.vlgmr.msra.gmra.mrb[52].mxu1 %v4461_v21 }
0x1ffc   :  { %4898 = vmatpush1.bf16.msra.mxu0 %v9831_v18  ;;  %7841 = vmatpush3.bf16.msra.mxu1 %v8408_v19  ;;  %v4494_v19 = vld [vmem:[#allocation14] sm:$0x7] }
0x1ffd   :  { %4899 = vmatprep.subr.bf16.mxu0 %v9833_v22  ;;  %7842 = vmatprep.subr.bf16.mxu1 %v10103_v0  ;;  %v4627_v21 = vrot.slane %v4494_v19, %v9309_v6 }
0x1ffe   :  { %4929 = vmatprep.mubr.bf16.mxu0 %v10104_v42  ;;  %7856 = vmatprep.mubr.msk.bf16.mxu1 %vm9004_vm0, %v10103_v0 }
0x2000   :  { %4900 = vmatpush1.bf16.msra.mxu0 %v9836_v4  ;;  %7843 = vmatpush3.bf16.msra.mxu1 %v8412_v15  ;;  %v4885_v15 = vrot.slane %v4752_v1, %v9309_v6 }
0x2001   :  { %4901 = vmatprep.subr.bf16.mxu0 %v9840_v25  ;;  %7844 = vmatprep.subr.bf16.mxu1 %v10103_v0 }
0x2004   :  { %4902 = vmatpush1.bf16.msra.mxu0 %v9846_v55  ;;  %7845 = vmatpush3.bf16.msra.mxu1 %v8416_v26  ;;  %v4631_v26 = vrot.slane %v4494_v19, %v9311_v9 }
0x2005   :  { %4903 = vmatprep.subr.bf16.mxu0 %v9850_v33  ;;  %7846 = vmatprep.subr.bf16.mxu1 %v10103_v0 }
0x2008   :  { %4904 = vmatpush1.bf16.msra.mxu0 %v9853_v47  ;;  %7847 = vmatpush3.bf16.msra.mxu1 %v8420_v12  ;;  %v4889_v12 = vrot.slane %v4752_v1, %v9311_v9 }
0x2009   :  { %4905 = vmatprep.subr.bf16.mxu0 %v9857_v61  ;;  %7848 = vmatprep.subr.bf16.mxu1 %v10103_v0 }
0x200c   :  { %4906 = vmatpush1.bf16.msra.mxu0 %v9860_v57  ;;  %7849 = vmatpush3.bf16.msra.mxu1 %v8424_v58  ;;  %v8006_v58 = vadd.f32 %v4885_v15, %v4627_v21  ;;  %v4893_v21 = vrot.slane %v4752_v1, %v9317_v30  ;;  %v4635_v15 = vrot.slane %v4494_v19, %v9317_v30 }
0x200d   :  { %4907 = vmatprep.subr.bf16.mxu0 %v9864_v63  ;;  %7850 = vmatprep.subr.bf16.mxu1 %v10103_v0 }
0x2010   :  { %4908 = vmatpush1.bf16.msra.mxu0 %v9867_v3  ;;  %7851 = vmatpush3.bf16.msra.mxu1 %v8428_v5 }
0x2011   :  { %4909 = vmatprep.subr.bf16.mxu0 %v9871_v2  ;;  %7852 = vmatprep.subr.bf16.mxu1 %v10103_v0 }
0x2014   :  { %4910 = vmatpush1.bf16.msra.mxu0 %v9874_v11  ;;  %7853 = vmatpush3.bf16.msra.mxu1 %v8432_v16 }
0x2015   :  { %4911 = vmatprep.subr.bf16.mxu0 %v9878_v24  ;;  %7854 = vmatprep.subr.bf16.mxu1 %v10103_v0 }
0x2018   :  { %4912 = vmatpush1.bf16.msra.mxu0 %v9881_v45  ;;  %7855 = vmatpush3.bf16.msra.mxu1 %v8436_v36  ;;  %v8008_v36 = vadd.f32 %v4889_v12, %v4631_v26 }
0x2019   :  { %7860 = vmatprep.subr.bf16.mxu0 %v10103_v0  ;;  %7880 = vmatprep.subr.mxu1 %v10103_v0 }
0x201b   :  { %4930 = vmatmul.mubr.bf16.vlgmr.msra.gmra.mrb[52].mxu0 %v9727_v7  ;;  %7857 = vmatmul.mubr.bf16.vlgmr.msra.gmra.mrb[56].mxu1 %v9727_v7  ;;  %v8441_v7 = vld [vmem:[#allocation9 + $0x20] sm:$0xff]  }
0x201c   :  { %7876 = vmatprep.mubr.msk.bf16.mxu0 %vm9004_vm0, %v10103_v0  ;;  %7882 = vmatprep.mubr.msk.f32.mxu1 %vm9004_vm0, %v10103_v0 }
0x201d   :  { %7861 = vmatpush3.bf16.msra.mxu0 %v8437_v34 }
0x201e   :  { %7862 = vmatprep.subr.bf16.mxu0 %v10103_v0 }
0x2021   :  { %7863 = vmatpush3.bf16.msra.mxu0 %v8438_v38 }
0x2022   :  { %7864 = vmatprep.subr.bf16.mxu0 %v10103_v0 }
0x2025   :  { %7865 = vmatpush3.bf16.msra.mxu0 %v8439_v43 }
0x2026   :  { %7866 = vmatprep.subr.bf16.mxu0 %v10103_v0 }
0x2029   :  { %7867 = vmatpush3.bf16.msra.mxu0 %v8440_v50 }
0x202a   :  { %7868 = vmatprep.subr.bf16.mxu0 %v10103_v0 }
0x202d   :  { %7869 = vmatpush3.bf16.msra.mxu0 %v8441_v7 }
0x202e   :  { %7870 = vmatprep.subr.bf16.mxu0 %v10103_v0 }
0x2031   :  { %7871 = vmatpush3.bf16.msra.mxu0 %v8442_v56 }
0x2032   :  { %7872 = vmatprep.subr.bf16.mxu0 %v10103_v0 }
0x2035   :  { %7873 = vmatpush3.bf16.msra.mxu0 %v8443_v62 }
0x2036   :  { %7874 = vmatprep.subr.bf16.mxu0 %v10103_v0 }
0x2039   :  { %7875 = vmatpush3.bf16.msra.mxu0 %v8444_v60 }
0x203a   :  { %7885 = vmatprep.subr.bf16.mxu0 %v10103_v0 }
0x20ce   :  { %v4714_v10 = vpop.f32.mrb[52].mxu1 }
0x20cf   :  { %v7838_v48 = vpop.f32.mrb[53].mxu1 }
0x20d0   :  { %v4717_v59 = vpop.f32.mrb[54].mxu1 }
0x20d1   :  { %v7839_v13 = vpop.f32.mrb[55].mxu1 }
0x20ee   :  { %v4931_v5 = vpop.f32.mrb[52].mxu0  ;;  %v4972_v16 = vpop.f32.mrb[56].mxu1 }
0x20ef   :  { %v8007_v34 = vadd.f32 %v8006_v58, %v4931_v5  ;;  %v4933_v38 = vpop.f32.mrb[53].mxu0  ;;  %v7858_v43 = vpop.f32.mrb[57].mxu1  ;;  %v4973_v12 = vadd.f32 %v4972_v16, %v4893_v21  ;;  %v4715_v5 = vadd.f32 %v4714_v10, %v4635_v15  ;;  %v9923_v21 = vld [vmem:[#allocation8] sm:$0xff]  ;;  %v8445_v15 = vld [vmem:[#allocation17 + $0x40] sm:$0xff]  }
0x20f0   :  { %v4935_v50 = vpop.f32.mrb[54].mxu0  ;;  %v4975_v7 = vpop.f32.mrb[58].mxu1  ;;  %v8009_v48 = vadd.f32 %v8008_v36, %v4933_v38  ;;  %7881 = vmatpush3.msra.mxu1 %v9923_v21 }
0x20f1   :  { %v7002_v56 = vmul.f32 -1.442695, %v8007_v34  ;;  %v4936_v62 = vpop.f32.mrb[55].mxu0  ;;  %v7859_v60 = vpop.f32.mrb[59].mxu1  ;;  %7389 = vmatprep.subr.bf16.mxu1 %v8445_v15 }
0x20f2   :  { %v7003_v59 = vmul.f32 -1.442695, %v8009_v48 }
0x20f3   :  { %8599 = vpow2.f32 %v7002_v56 }
0x20f4   :  { %8601 = vpow2.f32 %v7003_v59 }
0x20fd   :  { %v8600_v13 = vpop.eup %8599 }
0x20fe   :  { %v4982_v45 = vadd.f32 1.0, %v8600_v13  ;;  %v8602_v24 = vpop.eup %8601 }
0x20ff   :  { %v4989_v26 = vadd.f32 1.0, %v8602_v24 }
0x2100   :  { %8603 = vrcp.f32 %v4982_v45 }
0x2101   :  { %8605 = vrcp.f32 %v4989_v26 }
0x210a   :  { %v8604_v58 = vpop.eup %8603 }
0x210b   :  { %v4992_v43 = vmul.f32 %v8604_v58, %v4973_v12  ;;  %v8606_v36 = vpop.eup %8605  ;;  %v8446_v58 = vld [vmem:[#allocation17] sm:$0xff]  }
0x210c   :  { %v4995_v38 = vsub.f32 1.0, %v8606_v36  ;;  %v4997_v56 = vmul.f32 %v8606_v36, %v9723_v27  ;;  %v8449_v36 = vld [vmem:[#allocation17 + $0x50] sm:$0xff]  }
0x210d   :  { %v4993_v34 = vadd.f32 %v4992_v43, %v4715_v5  ;;  %v8447_v43 = vld [vmem:[#allocation17 + $0x48] sm:$0xff]  }
0x210f   :  { %8607 = vtanh.f32 %v4993_v34  ;;  %v8448_v34 = vld [vmem:[#allocation17 + $0x8] sm:$0xff]  }
0x2119   :  { %v8608_v50 = vpop.eup %8607 }
0x211a   :  { %v4996_v7 = vmul.f32 %v8608_v50, %v4995_v38  ;;  %v8450_v38 = vld [vmem:[#allocation17 + $0x10] sm:$0xff]   ;;  %v8451_v50 = vld [vmem:[#allocation17 + $0x58] sm:$0xff]  }
0x211c   :  { %v9909_v45 = vadd.f32 %v4997_v56, %v4996_v7  ;;  %v8452_v7 = vld [vmem:[#allocation17 + $0x18] sm:$0xff]   ;;  %v8453_v56 = vld [vmem:[#allocation17 + $0x60] sm:$0xff]  }
0x211e   :  { %v9913_v1 = vpack.c.bf16 %v9909_v45, %v9909_v45  ;;  %5189 = vst.msk [vmem:[#allocation2] sm:$0x1] %vm9322_vm1, %v9909_v45 }
0x2120   :  { %7877 = vmatmul.mubr.bf16.vlgmr.msra.gmra.mrb[56].mxu0 %v9913_v1 }
0x2121   :  { %7901 = vmatprep.mubr.msk.bf16.mxu0 %vm9004_vm0, %v10103_v0 }
0x21f3   :  { %v5098_v24 = vpop.f32.mrb[56].mxu0 }
0x21f4   :  { %v7878_v10 = vpop.f32.mrb[57].mxu0  ;;  %v5104_v19 = vsel %vm845_vm2, %v5098_v24, -inf }
0x21f5   :  { %5105 = vmax.xlane.f32.xlu1 %v5104_v19  ;;  %v5101_v27 = vpop.f32.mrb[58].mxu0  ;;  %v8455_v10 = vld [vmem:[#allocation17 + $0x68] sm:$0xff]  }
0x21f6   :  { %v7879_v16 = vpop.f32.mrb[59].mxu0  ;;  %v8456_v19 = vld [vmem:[#allocation17 + $0x28] sm:$0xff]   ;;  %v8457_v27 = vld [vmem:[#allocation17 + $0x70] sm:$0xff]  }
0x21f7   :  { %v8458_v16 = vld [vmem:[#allocation17 + $0x30] sm:$0xff]  }
0x2282   :  { %v5106_v62 = vpop.xlane.xlu1 %5105 }
0x2283   :  { %v5107_v60 = vsub.f32 %v5098_v24, %v5106_v62  ;;  %v8454_v24 = vld [vmem:[#allocation17 + $0x20] sm:$0xff]   ;;  %v8459_v62 = vld [vmem:[#allocation17 + $0x78] sm:$0xff]  }
0x2285   :  { %v5108_v48 = vmul.f32 1.442695, %v5107_v60  ;;  %v8460_v60 = vld [vmem:[#allocation17 + $0x38] sm:$0xff]  }
0x2287   :  { %8609 = vpow2.f32 %v5108_v48  ;;  %v8461_v48 = vld [vmem:[#allocation20] sm:$0xff]  }
0x2288   :  { %7886 = vmatpush3.bf16.msra.mxu0 %v8461_v48 }
0x2289   :  { %7887 = vmatprep.subr.bf16.mxu0 %v10103_v0 }
0x2291   :  { %v8610_v59 = vpop.eup %8609 }
0x2292   :  { %v5110_v13 = vsel %vm845_vm2, %v8610_v59, 0.0 }
0x2293   :  { %5111 = vadd.xlane.f32.xlu0 %v5110_v13  ;;  %v8463_v13 = vld [vmem:[#allocation20 + $0x10] sm:$0xff]  }
0x2320   :  { %v5112_v26 = vpop.xlane.xlu0 %5111 }
0x2321   :  { %8611 = vrcp.f32 %v5112_v26 }
0x232b   :  { %v8612_v12 = vpop.eup %8611 }
0x232c   :  { %v5114_v5 = vmul.f32 %v8612_v12, %v8610_v59  ;;  %v8462_v59 = vld [vmem:[#allocation20 + $0x8] sm:$0xff]  }
0x232d   :  { %7888 = vmatpush3.bf16.msra.mxu0 %v8462_v59 }
0x232e   :  { %7883 = vmatmul.mubr.msk.f32.vlgmr.msra.gmra.mrb[60].mxu1 %vm858_vm3, %v5114_v5  ;;  %7889 = vmatprep.subr.bf16.mxu0 %v10103_v0 }
0x232f   :  { %7390 = vmatpush3.bf16.msra.mxu1 %v8446_v58 }
0x2330   :  { %7391 = vmatprep.subr.bf16.mxu1 %v8447_v43 }
0x2331   :  { %7890 = vmatpush3.bf16.msra.mxu0 %v8463_v13 }
0x2332   :  { %7891 = vmatprep.subr.bf16.mxu0 %v10103_v0 }
0x2333   :  { %7392 = vmatpush3.bf16.msra.mxu1 %v8448_v34  ;;  %v5392_v34 = vld [vmem:[#allocation21] sm:$0x1] }
0x2334   :  { %7393 = vmatprep.subr.bf16.mxu1 %v8449_v36 }
0x2337   :  { %7394 = vmatpush3.bf16.msra.mxu1 %v8450_v38 }
0x2338   :  { %7395 = vmatprep.subr.bf16.mxu1 %v8451_v50 }
0x233b   :  { %7396 = vmatpush3.bf16.msra.mxu1 %v8452_v7 }
0x233c   :  { %7397 = vmatprep.subr.bf16.mxu1 %v8453_v56 }
0x233f   :  { %7398 = vmatpush3.bf16.msra.mxu1 %v8454_v24 }
0x2340   :  { %7399 = vmatprep.subr.bf16.mxu1 %v8455_v10 }
0x2343   :  { %7400 = vmatpush3.bf16.msra.mxu1 %v8456_v19 }
0x2344   :  { %7401 = vmatprep.subr.bf16.mxu1 %v8457_v27  ;;  %v4438_v27 = vsub.f32 -inf, %v9761_v31 }
0x2347   :  { %7402 = vmatpush3.bf16.msra.mxu1 %v8458_v16 }
0x2348   :  { %7403 = vmatprep.subr.bf16.mxu1 %v8459_v62 }
0x234b   :  { %7404 = vmatpush3.bf16.msra.mxu1 %v8460_v60 }
0x234c   :  { %5702 = vmatprep.subr.bf16.mxu1 %v9772_v23 }
0x2401   :  { %v5185_v15 = vpop.f32.mrb[60].mxu1 }
0x2402   :  { %5190 = vst.msk [vmem:[#allocation2 + $0x1] sm:$0x1] %vm9322_vm1, %v5185_v15  ;;  %v7884_v26 = vpop.f32.mrb[61].mxu1 }
0x2409   :  { %v5191_v12 = vld [vmem:[#allocation2] sm:$0x3] }
0x240a   :  { %v5200_v23 = vrot.slane %v5191_v12, %v9311_v9  ;;  %v5196_v58 = vrot.slane %v5191_v12, %v9309_v6 }
0x240c   :  { %v5204_v5 = vpack.c.bf16 %v5200_v23, %v5200_v23  ;;  %v5203_v43 = vpack.c.bf16 %v5196_v58, %v5196_v58 }
0x240e   :  { %5366 = vmatprep.mubr.bf16.mxu1 %v5204_v5 }
0x240f   :  { %5367 = vmatmul.mubr.bf16.vlgmr.msra.gmra.mrb[64].mxu1 %v5203_v43 }
0x2410   :  { %5703 = vmatpush1.bf16.msra.mxu1 %v9770_v20  ;;  %5734 = vmatprep.mubr.bf16.mxu1 %v10104_v42  ;;  %v8464_v20 = vld [vmem:[#allocation20 + $0x18] sm:$0xff]  }
0x2411   :  { %5704 = vmatprep.subr.bf16.mxu1 %v9774_v29  ;;  %7892 = vmatpush3.bf16.msra.mxu0 %v8464_v20  ;;  %v8465_v29 = vld [vmem:[#allocation20 + $0x20] sm:$0xff]  }
0x2412   :  { %7893 = vmatprep.subr.bf16.mxu0 %v10103_v0  ;;  %v8469_v20 = vld [vmem:[#allocation11 + $0x8] ss:$12 sps:$4 sm:$0xff]  }
0x2414   :  { %5705 = vmatpush1.bf16.msra.mxu1 %v9778_v17  ;;  %v8466_v17 = vld [vmem:[#allocation20 + $0x28] sm:$0xff]  }
0x2415   :  { %5706 = vmatprep.subr.bf16.mxu1 %v9782_v39  ;;  %7894 = vmatpush3.bf16.msra.mxu0 %v8465_v29  ;;  %v8467_v39 = vld [vmem:[#allocation20 + $0x30] sm:$0xff]  }
0x2416   :  { %7895 = vmatprep.subr.bf16.mxu0 %v10103_v0  ;;  %v8470_v29 = vld [vmem:[#allocation11 + $0x20] ss:$12 sps:$4 sm:$0xff]  }
0x2418   :  { %5707 = vmatpush1.bf16.msra.mxu1 %v9785_v28  ;;  %v8468_v28 = vld [vmem:[#allocation20 + $0x38] sm:$0xff]  }
0x2419   :  { %5708 = vmatprep.subr.bf16.mxu1 %v9789_v32  ;;  %7896 = vmatpush3.bf16.msra.mxu0 %v8466_v17  ;;  %v8471_v17 = vld [vmem:[#allocation11 + $0x38] ss:$12 sps:$4 sm:$0xff]  }
0x241a   :  { %7897 = vmatprep.subr.bf16.mxu0 %v10103_v0 }
0x241c   :  { %5709 = vmatpush1.bf16.msra.mxu1 %v9792_v35  ;;  %v5237_v35 = vld [vmem:[#allocation18] sm:$0x1] }
0x241d   :  { %5710 = vmatprep.subr.bf16.mxu1 %v9796_v37  ;;  %7898 = vmatpush3.bf16.msra.mxu0 %v8467_v39  ;;  %v8472_v39 = vld [vmem:[#allocation11 + $0x50] ss:$12 sps:$4 sm:$0xff]  }
0x241e   :  { %7899 = vmatprep.subr.bf16.mxu0 %v10103_v0 }
0x2420   :  { %5711 = vmatpush1.bf16.msra.mxu1 %v9799_v40 }
0x2421   :  { %5712 = vmatprep.subr.bf16.mxu1 %v9803_v41  ;;  %7900 = vmatpush3.bf16.msra.mxu0 %v8468_v28  ;;  %v8473_v28 = vld [vmem:[#allocation11 + $0x68] ss:$12 sps:$4 sm:$0xff]  }
0x2422   :  { %7905 = vmatprep.subr.bf16.mxu0 %v10103_v0 }
0x2424   :  { %5713 = vmatpush1.bf16.msra.mxu1 %v9806_v44 }
0x2425   :  { %5714 = vmatprep.subr.bf16.mxu1 %v9810_v49 }
0x2428   :  { %5715 = vmatpush1.bf16.msra.mxu1 %v9813_v52 }
0x2429   :  { %5716 = vmatprep.subr.bf16.mxu1 %v9819_v53 }
0x242c   :  { %5717 = vmatpush1.bf16.msra.mxu1 %v9821_v54  ;;  %v4442_v54 = vsub.f32 %v9755_v8, %v9761_v31  ;;  %v4439_v8 = vmul.f32 1.442695, %v4438_v27 }
0x242d   :  { %5960 = vmatprep.subr.bf16.mxu1 %v9825_v51 }
0x242e   :  { %v4443_v51 = vmul.f32 1.442695, %v4442_v54 }
0x24e2   :  { %v7405_v32 = vpop.f32.mrb[64].mxu1 }
0x24e3   :  { %v7406_v37 = vpop.f32.mrb[65].mxu1 }
0x24e4   :  { %v7407_v40 = vadd.f32 %v7406_v37, %v7405_v32  ;;  %v7408_v41 = vpop.f32.mrb[66].mxu1  ;;  %v8474_v32 = vld [vmem:[#allocation11 + $0x80] ss:$12 sps:$4 sm:$0xff]   ;;  %v8476_v37 = vld [vmem:[#allocation11 + $0xb0] ss:$12 sps:$4 sm:$0xff]  }
0x24e5   :  { %v7409_v44 = vpop.f32.mrb[67].mxu1 }
0x24e6   :  { %v5369_v49 = vadd.f32 %v7407_v40, %v5237_v35  ;;  %v8475_v35 = vld [vmem:[#allocation11 + $0x98] ss:$12 sps:$4 sm:$0xff]  }
0x24e8   :  { %8613 = vtanh.f32 %v5369_v49 }
0x24e9   :  { %8615 = vpow2.f32 %v4443_v51  ;;  %v8477_v51 = vld [vmem:[#allocation12 + $0x8] ss:$12 sps:$4 sm:$0xff]  }
0x24ea   :  { %8617 = vpow2.f32 %v4439_v8 }
0x24f2   :  { %v8614_v52 = vpop.eup %8613 }
0x24f3   :  { %v5375_v53 = vpack.c.bf16 %v8614_v52, %v8614_v52  ;;  %v8616_v10 = vpop.eup %8615 }
0x24f4   :  { %v4445_v19 = vsel %vm1228_vm4, %v8616_v10, 0.0  ;;  %v8618_v16 = vpop.eup %8617  ;;  %v5815_v10 = vld [vmem:[#allocation15] sm:$0x7] }
0x24f5   :  { %7902 = vmatmul.mubr.bf16.vlgmr.msra.gmra.mrb[60].mxu0 %v5375_v53  ;;  %v4441_v48 = vmul.f32 0.0, %v8618_v16  ;;  %v5948_v8 = vrot.slane %v5815_v10, %v9309_v6 }
0x24f6   :  { %7921 = vmatprep.mubr.msk.bf16.mxu0 %vm9004_vm0, %v10103_v0  ;;  %7906 = vmatpush3.bf16.msra.mxu0 %v8469_v20 }
0x24f7   :  { %7907 = vmatprep.subr.bf16.mxu0 %v10103_v0 }
0x24fa   :  { %7908 = vmatpush3.bf16.msra.mxu0 %v8470_v29 }
0x24fb   :  { %7909 = vmatprep.subr.bf16.mxu0 %v10103_v0 }
0x24fe   :  { %7910 = vmatpush3.bf16.msra.mxu0 %v8471_v17 }
0x24ff   :  { %7911 = vmatprep.subr.bf16.mxu0 %v10103_v0 }
0x2502   :  { %7912 = vmatpush3.bf16.msra.mxu0 %v8472_v39 }
0x2503   :  { %7913 = vmatprep.subr.bf16.mxu0 %v10103_v0 }
0x2506   :  { %7914 = vmatpush3.bf16.msra.mxu0 %v8473_v28 }
0x2507   :  { %7915 = vmatprep.subr.bf16.mxu0 %v10103_v0 }
0x250a   :  { %7916 = vmatpush3.bf16.msra.mxu0 %v8474_v32 }
0x250b   :  { %7917 = vmatprep.subr.bf16.mxu0 %v10103_v0 }
0x250e   :  { %7918 = vmatpush3.bf16.msra.mxu0 %v8475_v35  ;;  %v5956_v35 = vrot.slane %v5815_v10, %v9317_v30 }
0x250f   :  { %7919 = vmatprep.subr.bf16.mxu0 %v10103_v0 }
0x2512   :  { %7920 = vmatpush3.bf16.msra.mxu0 %v8476_v37 }
0x2513   :  { %7925 = vmatprep.subr.bf16.mxu0 %v10103_v0 }
0x25c8   :  { %v5475_v36 = vpop.f32.mrb[60].mxu0 }
0x25c9   :  { %v9961_v38 = vadd.f32 %v5475_v36, %v5392_v34  ;;  %v7903_v50 = vpop.f32.mrb[61].mxu0  ;;  %v8478_v36 = vld [vmem:[#allocation12 + $0x20] ss:$12 sps:$4 sm:$0xff]  }
0x25ca   :  { %v5478_v7 = vpop.f32.mrb[62].mxu0  ;;  %v8479_v50 = vld [vmem:[#allocation12 + $0x38] ss:$12 sps:$4 sm:$0xff]  }
0x25cb   :  { %v7904_v56 = vpop.f32.mrb[63].mxu0  ;;  %v5481_v24 = vsel %vm1228_vm4, %v9961_v38, -inf }
0x25cc   :  { %5482 = vmax.xlane.f32.xlu1 %v5481_v24 }
0x25d0   :  { %4446 = vadd.xlane.f32.xlu1 %v4445_v19  ;;  %v5557_v19 = vld [vmem:[#allocation14] sm:$0x7] }
0x25d1   :  { %v5690_v27 = vrot.slane %v5557_v19, %v9309_v6  ;;  %v5694_v16 = vrot.slane %v5557_v19, %v9311_v9  ;;  %v5698_v37 = vrot.slane %v5557_v19, %v9317_v30  ;;  %v8500_v19 = vld [vmem:[#allocation17 + $0x18] sm:$0xff]  }
0x2659   :  { %v9967_v62 = vpop.xlane.xlu1 %5482 }
0x265a   :  { %vm5484_vm6 = vcmp.eq.f32.partialorder %v9961_v38, %v9967_v62  ;;  %vm5512_vm8 = vcmp.gt.f32.partialorder %v9967_v62, -inf }
0x265b   :  { %v5485_v60 = vsel %vm5484_vm6, %v9364_v14, 128 }
0x265c   :  { %v5486_v59 = vsel %vm1228_vm4, %v5485_v60, 2147483647  ;;  %v5952_v60 = vrot.slane %v5815_v10, %v9311_v9  ;;  %v8499_v10 = vld [vmem:[#allocation17 + $0x58] sm:$0xff]  }
0x265d   :  { %v4447_v13 = vpop.xlane.xlu1 %4446  ;;  %v5488_v15 = vshra.s32 %v5486_v59, 16  ;;  %v5487_v23 = vand.u32 65535, %v5486_v59 }
0x265e   :  { %v4448_v26 = vadd.f32 %v4447_v13, %v4441_v48  ;;  %v8010_v48 = vadd.f32 %v5948_v8, %v5690_v27  ;;  %v8501_v27 = vld [vmem:[#allocation17 + $0x60] sm:$0xff]  }
0x265f   :  { %v5490_v12 = vcvt.s32.f32 %v5488_v15  ;;  %v5489_v5 = vcvt.s32.f32 %v5487_v23  ;;  %v8012_v15 = vadd.f32 %v5952_v60, %v5694_v16  ;;  %v8502_v8 = vld [vmem:[#allocation17 + $0x20] sm:$0xff]   ;;  %v8503_v16 = vld [vmem:[#allocation17 + $0x68] sm:$0xff]  }
0x2660   :  { %8619 = vrcp.f32 %v4448_v26  ;;  %v8504_v60 = vld [vmem:[#allocation17 + $0x28] sm:$0xff]  }
0x2661   :  { %5491 = vmin.xlane.f32.xlu0 %v5490_v12 }
0x266a   :  { %v8620_v31 = vpop.eup %8619 }
0x266b   :  { %8052 = vpush %v8620_v31 }
0x269c   :  { %s8053_s22 = spop %8052 }
0x269d   :  { %4458 = sst [smem:[#allocation24 + $0x3]] %s8053_s22 }
0x26ee   :  { %v5492_v58 = vpop.xlane.xlu0 %5491 }
0x26ef   :  { %vm5493_vm7 = vcmp.eq.f32.partialorder %v5490_v12, %v5492_v58  ;;  %v5498_v40 = vcvt.f32.s32 %v5492_v58 }
0x26f0   :  { %v5494_v43 = vsel %vm5493_vm7, %v5489_v5, inf }
0x26f1   :  { %5495 = vmin.xlane.f32.xlu0 %v5494_v43  ;;  %v5499_v44 = vshll.u32 %v5498_v40, 16 }
0x277e   :  { %v5496_v41 = vpop.xlane.xlu0 %5495 }
0x277f   :  { %v5497_v49 = vcvt.f32.s32 %v5496_v41 }
0x2781   :  { %v5500_v52 = vadd.s32 %v5499_v44, %v5497_v49 }
0x2783   :  { %v5513_v53 = vsel %vm5512_vm8, %v5500_v52, 0 }
0x2784   :  { %8054 = vpush %v5513_v53 }
0x27b5   :  { %s8055_s9 = spop %8054 }
0x27b6   :  { %5516 = sst [smem:[#allocation23 + $0x4]] %s8055_s9  ;;  %s5522_s4 = scalar_lea.vmem [#allocation3], %s8055_s9 }
0x27b7   :  { %v5523_v54 = vld [vmem:[%s5522_s4] sm:$0x1] }
0x27b8   :  { %v5524_v34 = vpack.c.bf16 %v5523_v54, %v5523_v54 }
0x27ba   :  { %5735 = vmatmul.mubr.bf16.vlgmr.msra.gmra.mrb[68].mxu1 %v5524_v34  ;;  %7922 = vmatmul.mubr.bf16.vlgmr.msra.gmra.mrb[64].mxu0 %v5524_v34 }
0x27bb   :  { %5961 = vmatpush1.bf16.msra.mxu1 %v9831_v18  ;;  %7926 = vmatpush3.bf16.msra.mxu0 %v8477_v51  ;;  %v8480_v18 = vld [vmem:[#allocation12 + $0x50] ss:$12 sps:$4 sm:$0xff]  }
0x27bc   :  { %5962 = vmatprep.subr.bf16.mxu1 %v9833_v22  ;;  %7927 = vmatprep.subr.bf16.mxu0 %v10103_v0  ;;  %v8482_v22 = vld [vmem:[#allocation12 + $0x80] ss:$12 sps:$4 sm:$0xff]  }
0x27bd   :  { %5992 = vmatprep.mubr.bf16.mxu1 %v10104_v42  ;;  %7941 = vmatprep.mubr.msk.bf16.mxu0 %vm9004_vm0, %v10103_v0  ;;  %v8481_v42 = vld [vmem:[#allocation12 + $0x68] ss:$12 sps:$4 sm:$0xff]  }
0x27bf   :  { %5963 = vmatpush1.bf16.msra.mxu1 %v9836_v4  ;;  %7928 = vmatpush3.bf16.msra.mxu0 %v8478_v36  ;;  %v8483_v4 = vld [vmem:[#allocation12 + $0x98] ss:$12 sps:$4 sm:$0xff]  }
0x27c0   :  { %5964 = vmatprep.subr.bf16.mxu1 %v9840_v25  ;;  %7929 = vmatprep.subr.bf16.mxu0 %v10103_v0  ;;  %v8484_v25 = vld [vmem:[#allocation12 + $0xb0] ss:$12 sps:$4 sm:$0xff]  }
0x27c3   :  { %5965 = vmatpush1.bf16.msra.mxu1 %v9846_v55  ;;  %7930 = vmatpush3.bf16.msra.mxu0 %v8479_v50  ;;  %v10107_v55 = vld [vmem:[#allocation35_spill] sm:$0xff] }
0x27c4   :  { %5966 = vmatprep.subr.bf16.mxu1 %v9850_v33  ;;  %7931 = vmatprep.subr.bf16.mxu0 %v10103_v0  ;;  %v10108_v33 = vld [vmem:[#allocation36_spill] sm:$0xff] }
0x27c7   :  { %5967 = vmatpush1.bf16.msra.mxu1 %v9853_v47  ;;  %7932 = vmatpush3.bf16.msra.mxu0 %v8480_v18  ;;  %v8485_v47 = vld [vmem:[#allocation9] sm:$0xff]  }
0x27c8   :  { %5968 = vmatprep.subr.bf16.mxu1 %v9857_v61  ;;  %7933 = vmatprep.subr.bf16.mxu0 %v10103_v0  ;;  %v8486_v61 = vld [vmem:[#allocation9 + $0x8] sm:$0xff]  }
0x27cb   :  { %5969 = vmatpush1.bf16.msra.mxu1 %v9860_v57  ;;  %7934 = vmatpush3.bf16.msra.mxu0 %v8481_v42  ;;  %v8487_v57 = vld [vmem:[#allocation9 + $0x10] sm:$0xff]  }
0x27cc   :  { %5970 = vmatprep.subr.bf16.mxu1 %v9864_v63  ;;  %7935 = vmatprep.subr.bf16.mxu0 %v10103_v0  ;;  %v8488_v63 = vld [vmem:[#allocation9 + $0x18] sm:$0xff]  }
0x27cf   :  { %5971 = vmatpush1.bf16.msra.mxu1 %v9867_v3  ;;  %7936 = vmatpush3.bf16.msra.mxu0 %v8482_v22  ;;  %v8489_v3 = vld [vmem:[#allocation9 + $0x20] sm:$0xff]  }
0x27d0   :  { %5972 = vmatprep.subr.bf16.mxu1 %v9871_v2  ;;  %7937 = vmatprep.subr.bf16.mxu0 %v10103_v0  ;;  %v8490_v2 = vld [vmem:[#allocation9 + $0x28] sm:$0xff]  }
0x27d3   :  { %5973 = vmatpush1.bf16.msra.mxu1 %v9874_v11  ;;  %7938 = vmatpush3.bf16.msra.mxu0 %v8483_v4  ;;  %v8491_v11 = vld [vmem:[#allocation9 + $0x30] sm:$0xff]  }
0x27d4   :  { %5974 = vmatprep.subr.bf16.mxu1 %v10107_v55  ;;  %7939 = vmatprep.subr.bf16.mxu0 %v10103_v0 }
0x27d7   :  { %5975 = vmatpush1.bf16.msra.mxu1 %v10108_v33  ;;  %7940 = vmatpush3.bf16.msra.mxu0 %v8484_v25 }
0x27d8   :  { %7945 = vmatprep.subr.bf16.mxu1 %v10103_v0  ;;  %7965 = vmatprep.subr.mxu0 %v10103_v0 }
0x27da   :  { %5993 = vmatmul.mubr.bf16.vlgmr.msra.gmra.mrb[68].mxu1 %v9913_v1  ;;  %7942 = vmatmul.mubr.bf16.vlgmr.msra.gmra.mrb[68].mxu0 %v9913_v1  ;;  %v8492_v1 = vld [vmem:[#allocation9 + $0x38] sm:$0xff]  }
0x27db   :  { %7961 = vmatprep.mubr.msk.bf16.mxu1 %vm9004_vm0, %v10103_v0  ;;  %7966 = vmatpush3.msra.mxu0 %v9923_v21 }
0x27dc   :  { %7967 = vmatprep.mubr.msk.f32.mxu0 %vm9004_vm0, %v10103_v0  ;;  %7946 = vmatpush3.bf16.msra.mxu1 %v8485_v47 }
0x27dd   :  { %7947 = vmatprep.subr.bf16.mxu1 %v10103_v0 }
0x27e0   :  { %7948 = vmatpush3.bf16.msra.mxu1 %v8486_v61 }
0x27e1   :  { %7949 = vmatprep.subr.bf16.mxu1 %v10103_v0 }
0x27e4   :  { %7950 = vmatpush3.bf16.msra.mxu1 %v8487_v57 }
0x27e5   :  { %7951 = vmatprep.subr.bf16.mxu1 %v10103_v0 }
0x27e8   :  { %7952 = vmatpush3.bf16.msra.mxu1 %v8488_v63  ;;  %v8493_v63 = vld [vmem:[#allocation17 + $0x40] sm:$0xff]  }
0x27e9   :  { %7953 = vmatprep.subr.bf16.mxu1 %v10103_v0  ;;  %7449 = vmatprep.subr.bf16.mxu0 %v8493_v63 }
0x27ec   :  { %7954 = vmatpush3.bf16.msra.mxu1 %v8489_v3 }
0x27ed   :  { %7955 = vmatprep.subr.bf16.mxu1 %v10103_v0 }
0x27f0   :  { %7956 = vmatpush3.bf16.msra.mxu1 %v8490_v2 }
0x27f1   :  { %7957 = vmatprep.subr.bf16.mxu1 %v10103_v0 }
0x27f4   :  { %7958 = vmatpush3.bf16.msra.mxu1 %v8491_v11  ;;  %v8494_v11 = vld [vmem:[#allocation17] sm:$0xff]  }
0x27f5   :  { %7959 = vmatprep.subr.bf16.mxu1 %v10103_v0 }
0x27f8   :  { %7960 = vmatpush3.bf16.msra.mxu1 %v8492_v1 }
0x27f9   :  { %7970 = vmatprep.subr.bf16.mxu1 %v10103_v0 }
0x288d   :  { %v5777_v21 = vpop.f32.mrb[64].mxu0 }
0x288e   :  { %v7923_v7 = vpop.f32.mrb[65].mxu0  ;;  %v5778_v49 = vadd.f32 %v5777_v21, %v5698_v37  ;;  %v8495_v21 = vld [vmem:[#allocation17 + $0x48] sm:$0xff]  }
0x288f   :  { %v5780_v56 = vpop.f32.mrb[66].mxu0  ;;  %v8496_v7 = vld [vmem:[#allocation17 + $0x8] sm:$0xff]  }
0x2890   :  { %v7924_v24 = vpop.f32.mrb[67].mxu0  ;;  %v8497_v56 = vld [vmem:[#allocation17 + $0x50] sm:$0xff]  }
0x2891   :  { %v8498_v24 = vld [vmem:[#allocation17 + $0x10] sm:$0xff]  }
0x28ad   :  { %v5994_v59 = vpop.f32.mrb[68].mxu1  ;;  %v6035_v13 = vpop.f32.mrb[68].mxu0 }
0x28ae   :  { %v8011_v26 = vadd.f32 %v8010_v48, %v5994_v59  ;;  %v5996_v12 = vpop.f32.mrb[69].mxu1  ;;  %v7943_v31 = vpop.f32.mrb[69].mxu0  ;;  %v6036_v41 = vadd.f32 %v6035_v13, %v5956_v35  ;;  %v8505_v48 = vld [vmem:[#allocation17 + $0x70] sm:$0xff]   ;;  %v8507_v13 = vld [vmem:[#allocation17 + $0x78] sm:$0xff]   ;;  %v6300_v35 = vld [vmem:[#allocation18] sm:$0x1] }
0x28af   :  { %v5998_v23 = vpop.f32.mrb[70].mxu1  ;;  %v6038_v58 = vpop.f32.mrb[70].mxu0  ;;  %v8013_v29 = vadd.f32 %v8012_v15, %v5996_v12  ;;  %v8506_v59 = vld [vmem:[#allocation17 + $0x30] sm:$0xff]   ;;  %v8508_v15 = vld [vmem:[#allocation17 + $0x38] sm:$0xff]  }
0x28b0   :  { %v7085_v5 = vmul.f32 -1.442695, %v8011_v26  ;;  %v5999_v43 = vpop.f32.mrb[71].mxu1  ;;  %v7944_v20 = vpop.f32.mrb[71].mxu0  ;;  %v8509_v26 = vld [vmem:[#allocation20] sm:$0xff]   ;;  %v8510_v12 = vld [vmem:[#allocation20 + $0x8] sm:$0xff]  }
0x28b1   :  { %v7086_v17 = vmul.f32 -1.442695, %v8013_v29  ;;  %v8511_v31 = vld [vmem:[#allocation20 + $0x10] sm:$0xff]  }
0x28b2   :  { %8621 = vpow2.f32 %v7085_v5 }
0x28b3   :  { %8623 = vpow2.f32 %v7086_v17 }
0x28bc   :  { %v8622_v39 = vpop.eup %8621 }
0x28bd   :  { %v6045_v28 = vadd.f32 1.0, %v8622_v39  ;;  %v8624_v32 = vpop.eup %8623  ;;  %v8512_v39 = vld [vmem:[#allocation20 + $0x18] sm:$0xff]  }
0x28be   :  { %v6052_v40 = vadd.f32 1.0, %v8624_v32  ;;  %v8515_v32 = vld [vmem:[#allocation20 + $0x30] sm:$0xff]  }
0x28bf   :  { %8625 = vrcp.f32 %v6045_v28  ;;  %v8513_v28 = vld [vmem:[#allocation20 + $0x20] sm:$0xff]  }
0x28c0   :  { %8627 = vrcp.f32 %v6052_v40 }
0x28c9   :  { %v8626_v44 = vpop.eup %8625 }
0x28ca   :  { %v6055_v52 = vmul.f32 %v8626_v44, %v6036_v41  ;;  %v8628_v54 = vpop.eup %8627 }
0x28cb   :  { %v6058_v51 = vsub.f32 1.0, %v8628_v54  ;;  %v6060_v50 = vmul.f32 %v8628_v54, %v9909_v45  ;;  %v5505_v54 = vsub.f32 %v9961_v38, %v9967_v62 }
0x28cc   :  { %v6056_v53 = vadd.f32 %v6055_v52, %v5778_v49 }
0x28ce   :  { %8629 = vtanh.f32 %v6056_v53 }
0x28d8   :  { %v8630_v34 = vpop.eup %8629 }
0x28d9   :  { %v6059_v36 = vmul.f32 %v8630_v34, %v6058_v51  ;;  %v5506_v51 = vmul.f32 1.442695, %v5505_v54  ;;  %v6455_v34 = vld [vmem:[#allocation21] sm:$0x1] }
0x28db   :  { %v6061_v18 = vadd.f32 %v6060_v50, %v6059_v36 }
0x28dd   :  { %v6062_v42 = vpack.c.bf16 %v6061_v18, %v6061_v18  ;;  %6252 = vst.msk [vmem:[#allocation2] sm:$0x1] %vm9322_vm1, %v6061_v18 }
0x28df   :  { %7962 = vmatmul.mubr.bf16.vlgmr.msra.gmra.mrb[72].mxu1 %v6062_v42 }
0x28e0   :  { %7986 = vmatprep.mubr.msk.bf16.mxu1 %vm9004_vm0, %v10103_v0  ;;  %7971 = vmatpush3.bf16.msra.mxu1 %v8509_v26 }
0x28e1   :  { %7972 = vmatprep.subr.bf16.mxu1 %v10103_v0 }
0x28e4   :  { %7973 = vmatpush3.bf16.msra.mxu1 %v8510_v12 }
0x28e5   :  { %7974 = vmatprep.subr.bf16.mxu1 %v10103_v0 }
0x28e8   :  { %7975 = vmatpush3.bf16.msra.mxu1 %v8511_v31 }
0x28e9   :  { %7976 = vmatprep.subr.bf16.mxu1 %v10103_v0 }
0x28ec   :  { %7977 = vmatpush3.bf16.msra.mxu1 %v8512_v39 }
0x28ed   :  { %7978 = vmatprep.subr.bf16.mxu1 %v10103_v0 }
0x28f0   :  { %7979 = vmatpush3.bf16.msra.mxu1 %v8513_v28 }
0x28f1   :  { %7980 = vmatprep.subr.bf16.mxu1 %v10103_v0 }
0x28f4   :  { %7981 = vmatpush3.bf16.msra.mxu1 %v8514_v46 }
0x28f5   :  { %7982 = vmatprep.subr.bf16.mxu1 %v10103_v0 }
0x28f8   :  { %7983 = vmatpush3.bf16.msra.mxu1 %v8515_v32 }
0x28f9   :  { %7984 = vmatprep.subr.bf16.mxu1 %v10103_v0 }
0x29b2   :  { %v6161_v30 = vpop.f32.mrb[72].mxu1 }
0x29b3   :  { %v7963_v22 = vpop.f32.mrb[73].mxu1  ;;  %v6167_v4 = vsel %vm845_vm2, %v6161_v30, -inf }
0x29b4   :  { %6168 = vmax.xlane.f32.xlu1 %v6167_v4  ;;  %v6164_v25 = vpop.f32.mrb[74].mxu1 }
0x29b5   :  { %v7964_v55 = vpop.f32.mrb[75].mxu1  ;;  %v5501_v25 = vsub.f32 -inf, %v9967_v62 }
0x29b7   :  { %v5502_v55 = vmul.f32 1.442695, %v5501_v25 }
0x2a41   :  { %v6169_v33 = vpop.xlane.xlu1 %6168 }
0x2a42   :  { %v6170_v47 = vsub.f32 %v6161_v30, %v6169_v33 }
0x2a44   :  { %v6171_v61 = vmul.f32 1.442695, %v6170_v47 }
0x2a46   :  { %8631 = vpow2.f32 %v6171_v61 }
0x2a50   :  { %v8632_v45 = vpop.eup %8631 }
0x2a51   :  { %v6173_v57 = vsel %vm845_vm2, %v8632_v45, 0.0 }
0x2a52   :  { %6174 = vadd.xlane.f32.xlu0 %v6173_v57 }
0x2adf   :  { %v6175_v3 = vpop.xlane.xlu0 %6174 }
0x2ae0   :  { %8633 = vrcp.f32 %v6175_v3 }
0x2aea   :  { %v8634_v2 = vpop.eup %8633 }
0x2aeb   :  { %v6177_v1 = vmul.f32 %v8634_v2, %v8632_v45 }
0x2aed   :  { %7968 = vmatmul.mubr.msk.f32.vlgmr.msra.gmra.mrb[72].mxu0 %vm858_vm3, %v6177_v1 }
0x2aee   :  { %7450 = vmatpush3.bf16.msra.mxu0 %v8494_v11 }
0x2aef   :  { %7451 = vmatprep.subr.bf16.mxu0 %v8495_v21 }
0x2af2   :  { %7452 = vmatpush3.bf16.msra.mxu0 %v8496_v7 }
0x2af3   :  { %7453 = vmatprep.subr.bf16.mxu0 %v8497_v56 }
0x2af6   :  { %7454 = vmatpush3.bf16.msra.mxu0 %v8498_v24 }
0x2af7   :  { %7455 = vmatprep.subr.bf16.mxu0 %v8499_v10 }
0x2afa   :  { %7456 = vmatpush3.bf16.msra.mxu0 %v8500_v19 }
0x2afb   :  { %7457 = vmatprep.subr.bf16.mxu0 %v8501_v27 }
0x2afe   :  { %7458 = vmatpush3.bf16.msra.mxu0 %v8502_v8 }
0x2aff   :  { %7459 = vmatprep.subr.bf16.mxu0 %v8503_v16 }
0x2b02   :  { %7460 = vmatpush3.bf16.msra.mxu0 %v8504_v60 }
0x2b03   :  { %7461 = vmatprep.subr.bf16.mxu0 %v8505_v48 }
0x2b06   :  { %7462 = vmatpush3.bf16.msra.mxu0 %v8506_v59 }
0x2b07   :  { %7463 = vmatprep.subr.bf16.mxu0 %v8507_v13 }
0x2b0a   :  { %7464 = vmatpush3.bf16.msra.mxu0 %v8508_v15 }
0x2bc0   :  { %v6248_v23 = vpop.f32.mrb[72].mxu0 }
0x2bc1   :  { %6253 = vst.msk [vmem:[#allocation2 + $0x1] sm:$0x1] %vm9322_vm1, %v6248_v23  ;;  %v7969_v58 = vpop.f32.mrb[73].mxu0 }
0x2bc8   :  { %v6254_v5 = vld [vmem:[#allocation2] sm:$0x3] }
0x2bc9   :  { %v6259_v43 = vrot.slane %v6254_v5, %v9309_v6  ;;  %v6263_v20 = vrot.slane %v6254_v5, %v9311_v9  ;;  %v8516_v6 = vld [vmem:[#allocation20 + $0x38] sm:$0xff]  }
0x2bca   :  { %7985 = vmatpush3.bf16.msra.mxu1 %v8516_v6 }
0x2bcb   :  { %v6266_v29 = vpack.c.bf16 %v6259_v43, %v6259_v43  ;;  %v6267_v17 = vpack.c.bf16 %v6263_v20, %v6263_v20 }
0x2bcd   :  { %6429 = vmatprep.mubr.bf16.mxu0 %v6267_v17 }
0x2bce   :  { %6430 = vmatmul.mubr.bf16.vlgmr.msra.gmra.mrb[76].mxu0 %v6266_v29 }
0x2ca1   :  { %v7465_v9 = vpop.f32.mrb[76].mxu0 }
0x2ca2   :  { %v7466_v37 = vpop.f32.mrb[77].mxu0 }
0x2ca3   :  { %v7467_v40 = vadd.f32 %v7466_v37, %v7465_v9  ;;  %v7468_v41 = vpop.f32.mrb[78].mxu0 }
0x2ca4   :  { %v7469_v44 = vpop.f32.mrb[79].mxu0 }
0x2ca5   :  { %v6432_v49 = vadd.f32 %v7467_v40, %v6300_v35 }
0x2ca7   :  { %8635 = vtanh.f32 %v6432_v49 }
0x2ca8   :  { %8637 = vpow2.f32 %v5506_v51 }
0x2ca9   :  { %8639 = vpow2.f32 %v5502_v55 }
0x2cb1   :  { %v8636_v52 = vpop.eup %8635 }
0x2cb2   :  { %v6438_v53 = vpack.c.bf16 %v8636_v52, %v8636_v52  ;;  %v8638_v22 = vpop.eup %8637 }
0x2cb3   :  { %v5508_v4 = vsel %vm1228_vm4, %v8638_v22, 0.0  ;;  %v8640_v38 = vpop.eup %8639 }
0x2cb4   :  { %7987 = vmatmul.mubr.bf16.vlgmr.msra.gmra.mrb[76].mxu1 %v6438_v53  ;;  %v5504_v57 = vmul.f32 0.0, %v8640_v38 }
0x2d87   :  { %v6538_v0 = vpop.f32.mrb[76].mxu1 }
0x2d88   :  { %v6539_v36 = vadd.f32 %v6538_v0, %v6455_v34  ;;  %v7988_v50 = vpop.f32.mrb[77].mxu1 }
0x2d89   :  { %v6541_v18 = vpop.f32.mrb[78].mxu1 }
0x2d8a   :  { %v7989_v42 = vpop.f32.mrb[79].mxu1  ;;  %v6544_v30 = vsel %vm1228_vm4, %v6539_v36, -inf }
0x2d8b   :  { %6545 = vmax.xlane.f32.xlu1 %v6544_v30 }
0x2d8f   :  { %5509 = vadd.xlane.f32.xlu1 %v5508_v4 }
0x2e18   :  { %v6546_v33 = vpop.xlane.xlu1 %6545 }
0x2e19   :  { %v6568_v47 = vsub.f32 %v6539_v36, %v6546_v33  ;;  %vm6547_vm0 = vcmp.eq.f32.partialorder %v6539_v36, %v6546_v33  ;;  %v6564_v19 = vsub.f32 -inf, %v6546_v33  ;;  %vm6575_vm2 = vcmp.gt.f32.partialorder %v6546_v33, -inf }
0x2e1a   :  { %v6548_v61 = vsel %vm6547_vm0, %v9364_v14, 128 }
0x2e1b   :  { %v6569_v45 = vmul.f32 1.442695, %v6568_v47  ;;  %v6549_v63 = vsel %vm1228_vm4, %v6548_v61, 2147483647  ;;  %v6565_v27 = vmul.f32 1.442695, %v6564_v19 }
0x2e1c   :  { %v5510_v3 = vpop.xlane.xlu1 %5509  ;;  %v6551_v2 = vshra.s32 %v6549_v63, 16  ;;  %v6550_v14 = vand.u32 65535, %v6549_v63 }
0x2e1d   :  { %8641 = vpow2.f32 %v6569_v45  ;;  %v5511_v11 = vadd.f32 %v5510_v3, %v5504_v57 }
0x2e1e   :  { %v6553_v1 = vcvt.s32.f32 %v6551_v2  ;;  %v6552_v24 = vcvt.s32.f32 %v6550_v14 }
0x2e1f   :  { %8643 = vrcp.f32 %v5511_v11 }
0x2e20   :  { %6554 = vmin.xlane.f32.xlu0 %v6553_v1  ;;  %8645 = vpow2.f32 %v6565_v27 }
0x2e27   :  { %v8642_v62 = vpop.eup %8641 }
0x2e28   :  { %v6571_v21 = vsel %vm1228_vm4, %v8642_v62, 0.0 }
0x2e29   :  { %v8644_v7 = vpop.eup %8643  ;;  %6572 = vadd.xlane.f32.xlu0 %v6571_v21 }
0x2e2a   :  { %8056 = vpush %v8644_v7  ;;  %v8646_v8 = vpop.eup %8645 }
0x2e2b   :  { %v6567_v60 = vmul.f32 0.0, %v8646_v8 }
0x2e5b   :  { %s8057_s28 = spop %8056 }
0x2e5c   :  { %5521 = sst [smem:[#allocation24 + $0x4]] %s8057_s28 }
0x2ead   :  { %v6555_v56 = vpop.xlane.xlu0 %6554 }
0x2eae   :  { %vm6556_vm1 = vcmp.eq.f32.partialorder %v6553_v1, %v6555_v56  ;;  %v6561_v59 = vcvt.f32.s32 %v6555_v56 }
0x2eaf   :  { %v6557_v10 = vsel %vm6556_vm1, %v6552_v24, inf }
0x2eb0   :  { %6558 = vmin.xlane.f32.xlu1 %v6557_v10  ;;  %v6562_v15 = vshll.u32 %v6561_v59, 16 }
0x2eb6   :  { %v6573_v16 = vpop.xlane.xlu0 %6572 }
0x2eb7   :  { %v6574_v48 = vadd.f32 %v6573_v16, %v6567_v60 }
0x2eb9   :  { %8647 = vrcp.f32 %v6574_v48 }
0x2ec3   :  { %v8648_v23 = vpop.eup %8647 }
0x2f3d   :  { %v6559_v13 = vpop.xlane.xlu1 %6558 }
0x2f3e   :  { %v6560_v26 = vcvt.f32.s32 %v6559_v13 }
0x2f40   :  { %v6563_v12 = vadd.s32 %v6562_v15, %v6560_v26 }
0x2f42   :  { %v6576_v31 = vsel %vm6575_vm2, %v6563_v12, 0 }
0x2f43   :  { %8058 = vpush %v6576_v31 }
0x2f44   :  { %8060 = vpush %v8648_v23 }
0x2f74   :  { %s8059_s8 = spop %8058 }
0x2f75   :  { %6579 = sst [smem:[#allocation23 + $0x5]] %s8059_s8  ;;  %s8061_s15 = spop %8060 }
0x2f76   :  { %6584 = sst [smem:[#allocation24 + $0x5]] %s8061_s15 }
0x2f77   :  { %8955 = shalt.err (!%p8952_p0)
}
0x2f78   :  { %s9005_s5 = smov [#allocation23]   ;;  %s8956_s11 = scalar_lea.hbm %s10094_s13, 16 }
0x2f79   :  { %6592 = dma.smem_to_hbm %s9005_s5, 16, %s10093_s12, [#allocation5]  }
0x2f7a   :  { %p8957_p1 = scmp.ne.s32.totalorder %s10094_s13, %s8956_s11  ;;  %p8960_p2 = scmp.lt.u32.totalorder %s8956_s11, %s10094_s13 }
0x2f7c   :  { %p8962_p3 = pnand %p8960_p2, %p8957_p1 }
0x2f7e   :  { %8965 = shalt.err (!%p8962_p3)
}
0x2f7f   :  { %s9006_s30 = smov [#allocation24]  }
0x2f80   :  { %6600 = dma.smem_to_hbm %s9006_s30, 16, %s10094_s13, [#allocation25]  }
0x2f81   :  { %8980 = dma.done.wait [#allocation5], 16  }
0x2f82   :  { %8981 = vsyncadd [#allocation5], 4294967280 }
0x2f83   :  { %8982 = dma.done.wait [#allocation25], 16  }
0x2f84   :  { %8983 = vsyncadd [#allocation25], 4294967280 }
0x2f85   :  { %6607 = sfence }
0x2f86   :  { %6608 = vsyncpa [#allocation4], 1 }
0x2f87   :  { %6609 = vsyncpa [#allocation7], 1 }
0x2f88   :  { %6610 = vsyncpa [#allocation10], 1 }
0x2f89   :  { %6611 = vsyncpa [#allocation13], 1 }
0x2f8a   :  { %6612 = vsyncpa [#allocation16], 1 }
0x2f8b   :  { %6613 = vsyncpa [#allocation19], 1 }
0x2f8c   :  { %6614 = vsyncpa [#allocation22], 1 }
0x2f8d   :  { %6615 = vsyncpa [#allocation5], 1 }
0x2f8e   :  { %6616 = vsyncpa [#allocation25], 1 }

</bundles_post_ra>
